<compile_context>
chip_gen: v6e
topology: v6e:2x2x1
jax: 0.10.0
libtpu: 0.0.40
codegen_flags: <defaults>
</compile_context>

<pallas_src>
import numpy as np
import jax
import jax.numpy as jnp
from jax import lax
from jax.experimental import pallas as pl
from jax.experimental.pallas import tpu as pltpu


def _silu(v):
    # SiLU via tanh-form sigmoid: sigmoid(v) = 0.5*(1 + tanh(v/2))  (EUP, no divide)
    return v * (0.5 * jnp.tanh(0.5 * v) + 0.5)


def _make_kernel(T, P, Cin, Cout, Temb, num_groups, eps, use_shortcut):
    TP = T * P
    inv_cnt1 = 1.0 / float((Cin // num_groups) * TP)
    inv_cnt2 = 1.0 / float((Cout // num_groups) * TP)

    def group_scale_shift(xf, oh_ref, oht_ref, gamma_ref, beta_ref, inv_cnt):
        # xf: (TP, C) f32.  Returns per-channel (1, C) scale/shift with the GroupNorm
        # affine folded in, so that  normalized = x * scale + shift.
        # NOTE: single-pass E[x^2]-mean^2 in f32; acceptable for zero-ish-mean
        # activations.  TODO(synk): switch to two-pass (centered) stats if inputs
        # carry large per-group offsets.
        s1 = jnp.sum(xf, axis=0, keepdims=True)                 # (1, C)
        s2 = jnp.sum(xf * xf, axis=0, keepdims=True)            # (1, C)
        gs1 = jnp.dot(s1, oh_ref[...], preferred_element_type=jnp.float32)   # (1, G)
        gs2 = jnp.dot(s2, oh_ref[...], preferred_element_type=jnp.float32)   # (1, G)
        gmean = gs1 * inv_cnt
        gvar = jnp.maximum(gs2 * inv_cnt - gmean * gmean, 0.0)  # clamp >= 0
        ginv = lax.rsqrt(gvar + eps)
        mean_c = jnp.dot(gmean, oht_ref[...], preferred_element_type=jnp.float32)  # (1, C)
        inv_c = jnp.dot(ginv, oht_ref[...], preferred_element_type=jnp.float32)    # (1, C)
        scale = gamma_ref[...] * inv_c
        shift = beta_ref[...] - mean_c * scale
        return scale, shift

    def fused_temporal_conv(ns_bf16, w_ref):
        # ns_bf16: (TP, C) bf16, w_ref: (C, 3*Cout) bf16 (taps packed along lanes).
        # ONE MXU matmul for all three temporal taps, then in-register frame shifts:
        #   h[t] = p_lo[t-1] + p_mid[t] + p_hi[t+1]      (zero-padded at t=0 / t=T-1)
        p = jnp.dot(ns_bf16, w_ref[...],
                    preferred_element_type=jnp.float32).reshape(T, P, 3 * Cout)
        mid = p[:, :, Cout:2 * Cout]
        if T == 1:
            return mid
        zerof = jnp.zeros((1, P, Cout), jnp.float32)
        lo = jnp.concatenate([zerof, p[:T - 1, :, 0:Cout]], axis=0)
        hi = jnp.concatenate([p[1:, :, 2 * Cout:3 * Cout], zerof], axis=0)
        return mid + lo + hi

    def kernel(x_ref, temb_ref,
               oh1_ref, oh1t_ref, g1_ref, be1_ref, w1_ref, b1_ref,
               wte_ref, bte_ref,
               oh2_ref, oh2t_ref, g2_ref, be2_ref, w2_ref, b2_ref,
               *rest):
        if use_shortcut:
            wsc_ref, bsc_ref, o_ref = rest
        else:
            (o_ref,) = rest

        # ---------- GroupNorm1 + SiLU (computed once) ----------------------------------
        xb = x_ref[0]                                   # (T, P, Cin) bf16
        xf = xb.astype(jnp.float32).reshape(TP, Cin)    # f32 working copy for stats/apply
        sc1, sh1 = group_scale_shift(xf, oh1_ref, oh1t_ref, g1_ref, be1_ref, inv_cnt1)
        ns1 = _silu(xf * sc1 + sh1).astype(jnp.bfloat16)          # (TP, Cin) bf16

        # ---------- conv1: fused 3-tap temporal conv (single MXU matmul) ---------------
        # time-embedding projection: SiLU -> Linear, added per frame (broadcast over P)
        te = _silu(temb_ref[0])                                   # (T, Temb) f32
        te = jnp.dot(te, wte_ref[...], preferred_element_type=jnp.float32) + bte_ref[...]
        h1 = fused_temporal_conv(ns1, w1_ref) + b1_ref[...] + te[:, None, :]  # (T,P,Cout)

        # ---------- GroupNorm2 + SiLU --------------------------------------------------
        h1f = h1.reshape(TP, Cout)
        sc2, sh2 = group_scale_shift(h1f, oh2_ref, oh2t_ref, g2_ref, be2_ref, inv_cnt2)
        ns2 = _silu(h1f * sc2 + sh2).astype(jnp.bfloat16)         # (TP, Cout) bf16

        # ---------- conv2 + shortcut + residual, accumulated straight into o_ref -------
        h2 = fused_temporal_conv(ns2, w2_ref) + b2_ref[...]
        if use_shortcut:
            xs = jnp.dot(xb.reshape(TP, Cin), wsc_ref[...],       # bf16 x fed directly
                         preferred_element_type=jnp.float32) + bsc_ref[...]
            xs = xs.reshape(T, P, Cout)
        else:
            xs = xf.reshape(T, P, Cin)                            # Cin == Cout
        o_ref[0] = xs + h2                                        # single full-block store

    return kernel


def _vmem_limit_bytes(T, P, Cin, Cout):
    """Rough working-set estimate (double-buffered blocks + large body temporaries),
    clamped to [32 MiB, 100 MiB].  v5e/v6e have 128 MiB physical VMEM so raising the
    limit is fine there; v7x (64 MiB) needs the P-tiled variant at production sizes."""
    TP = T * P
    x_blk = TP * Cin * 2                                   # bf16 input block
    out_blk = TP * Cout * 4                                # f32 output block
    slabs = TP * (Cin * 4 + Cin * 2                        # xf f32 + ns1 bf16
                  + 2 * (3 * Cout) * 4                     # fused conv results p, q
                  + 2 * Cout * 4 + Cout * 2)               # h1/xs f32 + ns2 bf16
    need = 2 * (x_blk + out_blk) + slabs + (2 << 20)
    return int(min(max(need, 32 * 1024 * 1024), 100 * 1024 * 1024))


def temporal_resnet_block_forward(x, temb, params, *, num_groups=32, eps=1e-6):
    """Pallas-backed TemporalResnetBlock.forward.

    x: (B, Cin, T, H, W) f32, temb: (B, T, Temb) f32.
    params (kernel-friendly layouts):
        gamma1/beta1 (Cin,), w_c1 (3, Cin, Cout), b_c1 (Cout,),
        w_te (Temb, Cout), b_te (Cout,),
        gamma2/beta2 (Cout,), w_c2 (3, Cout, Cout), b_c2 (Cout,),
        w_sc (Cin, Cout), b_sc (Cout,)   [used only when Cin != Cout]
    Returns (B, Cout, T, H, W) f32.
    """
    B, Cin, T, H, W = x.shape
    Cout = int(params["b_c1"].shape[0])
    Temb = int(temb.shape[-1])
    P = H * W
    G = num_groups
    use_shortcut = Cin != Cout

    # channels-last internal layout (lane dim = channels), DMA'd as bf16.
    xl = jnp.transpose(x, (0, 2, 3, 4, 1)).reshape(B, T, P, Cin).astype(jnp.bfloat16)
    temb = temb.astype(jnp.float32)

    def row(v):
        return v.reshape(1, -1).astype(jnp.float32)

    def onehots(C):
        # tiny (C, G) channel->group scatter matrices (replaces a dense (C, C) matmul)
        gid = np.arange(C) // (C // G)
        oh = (gid[:, None] == np.arange(G)[None, :]).astype(np.float32)
        return jnp.asarray(oh), jnp.asarray(oh.T)

    oh1, oh1t = onehots(Cin)
    oh2, oh2t = onehots(Cout)

    # fuse the 3 temporal taps along the lane (N) dim: (3, C, Co) -> (C, 3*Co)
    w1f = jnp.transpose(params["w_c1"], (1, 0, 2)).reshape(Cin, 3 * Cout).astype(jnp.bfloat16)
    w2f = jnp.transpose(params["w_c2"], (1, 0, 2)).reshape(Cout, 3 * Cout).astype(jnp.bfloat16)

    inputs = [
        xl, temb,
        oh1, oh1t, row(params["gamma1"]), row(params["beta1"]),
        w1f, row(params["b_c1"]),
        params["w_te"].astype(jnp.float32), row(params["b_te"]),
        oh2, oh2t, row(params["gamma2"]), row(params["beta2"]),
        w2f, row(params["b_c2"]),
    ]

    def full(shape):
        return pl.BlockSpec(shape, lambda b, _s=shape: (0,) * len(_s))

    in_specs = [
        pl.BlockSpec((1, T, P, Cin), lambda b: (b, 0, 0, 0)),
        pl.BlockSpec((1, T, Temb), lambda b: (b, 0, 0)),
        full((Cin, G)), full((G, Cin)), full((1, Cin)), full((1, Cin)),
        full((Cin, 3 * Cout)), full((1, Cout)),
        full((Temb, Cout)), full((1, Cout)),
        full((Cout, G)), full((G, Cout)), full((1, Cout)), full((1, Cout)),
        full((Cout, 3 * Cout)), full((1, Cout)),
    ]
    if use_shortcut:
        inputs += [params["w_sc"].astype(jnp.bfloat16), row(params["b_sc"])]
        in_specs += [full((Cin, Cout)), full((1, Cout))]

    kernel = _make_kernel(T, P, Cin, Cout, Temb, G, eps, use_shortcut)

    out = pl.pallas_call(
        kernel,
        out_shape=jax.ShapeDtypeStruct((B, T, P, Cout), jnp.float32),
        grid=(B,),
        in_specs=in_specs,
        out_specs=pl.BlockSpec((1, T, P, Cout), lambda b: (b, 0, 0, 0)),
        compiler_params=pltpu.CompilerParams(
            dimension_semantics=("parallel",),         # batch clips are independent
            vmem_limit_bytes=_vmem_limit_bytes(T, P, Cin, Cout),
        ),
    )(*inputs)

    # back to PyTorch NCTHW
    return jnp.transpose(out.reshape(B, T, H, W, Cout), (0, 4, 1, 2, 3))


def temporal_resnet_block_reference(x, temb, params, *, num_groups=32, eps=1e-6):
    """Pure-JAX f32 reference mirroring the PyTorch forward, for validation."""
    B, Cin, T, H, W = x.shape
    Cout = int(params["b_c1"].shape[0])
    G = num_groups

    def gn(y, gamma, beta):
        C = y.shape[1]
        yr = y.reshape(B, G, C // G, T, H, W)
        mean = yr.mean(axis=(2, 3, 4, 5), keepdims=True)
        var = jnp.mean((yr - mean) ** 2, axis=(2, 3, 4, 5), keepdims=True)
        yn = ((yr - mean) / jnp.sqrt(var + eps)).reshape(B, C, T, H, W)
        return yn * gamma[None, :, None, None, None] + beta[None, :, None, None, None]

    def silu(v):
        return v * jax.nn.sigmoid(v)

    def tconv(y, w, b):
        Co = w.shape[2]
        yp = jnp.pad(y, ((0, 0), (0, 0), (1, 1), (0, 0), (0, 0)))
        acc = jnp.zeros((B, Co, T, H, W), jnp.float32) + b[None, :, None, None, None]
        for k in range(3):
            acc = acc + jnp.einsum("bcthw,co->bothw", yp[:, :, k:k + T], w[k],
                                   precision=lax.Precision.HIGHEST)
        return acc

    x = x.astype(jnp.float32)
    h = silu(gn(x, params["gamma1"], params["beta1"]))
    h = tconv(h, params["w_c1"], params["b_c1"])
    te = jnp.einsum("btc,co->bto", silu(temb.astype(jnp.float32)), params["w_te"],
                    precision=lax.Precision.HIGHEST) + params["b_te"]
    h = h + jnp.transpose(te, (0, 2, 1))[:, :, :, None, None]
    h = silu(gn(h, params["gamma2"], params["beta2"]))
    h = tconv(h, params["w_c2"], params["b_c2"])
    if Cin != Cout:
        xs = jnp.einsum("bcthw,co->bothw", x, params["w_sc"],
                        precision=lax.Precision.HIGHEST) + params["b_sc"][None, :, None, None, None]
    else:
        xs = x
    return xs + h


if __name__ == "__main__":
    B, T, H, W = 2, 8, 8, 8
    Cin, Cout, Temb = 64, 32, 64   # Cin != Cout -> exercises the 1x1x1 shortcut conv

    key = jax.random.PRNGKey(0)
    ks = jax.random.split(key, 16)
    params = {
        "gamma1": 1.0 + 0.1 * jax.random.normal(ks[0], (Cin,), jnp.float32),
        "beta1": 0.1 * jax.random.normal(ks[1], (Cin,), jnp.float32),
        "w_c1": 0.1 * jax.random.normal(ks[2], (3, Cin, Cout), jnp.float32),   # Conv3d taps (k, Cin, Cout)
        "b_c1": 0.1 * jax.random.normal(ks[3], (Cout,), jnp.float32),
        "w_te": 0.1 * jax.random.normal(ks[4], (Temb, Cout), jnp.float32),     # time_emb_proj
        "b_te": 0.1 * jax.random.normal(ks[5], (Cout,), jnp.float32),
        "gamma2": 1.0 + 0.1 * jax.random.normal(ks[6], (Cout,), jnp.float32),
        "beta2": 0.1 * jax.random.normal(ks[7], (Cout,), jnp.float32),
        "w_c2": 0.1 * jax.random.normal(ks[8], (3, Cout, Cout), jnp.float32),
        "b_c2": 0.1 * jax.random.normal(ks[9], (Cout,), jnp.float32),
        "w_sc": 0.1 * jax.random.normal(ks[10], (Cin, Cout), jnp.float32),     # 1x1x1 shortcut conv
        "b_sc": 0.1 * jax.random.normal(ks[11], (Cout,), jnp.float32),
    }
    x = jax.random.normal(ks[12], (B, Cin, T, H, W), jnp.float32)
    temb = jax.random.normal(ks[13], (B, T, Temb), jnp.float32)

    out = temporal_resnet_block_forward(x, temb, params)
    out = jax.block_until_ready(out)

    ref = temporal_resnet_block_reference(x, temb, params)
    ref = jax.block_until_ready(ref)

    assert out.shape == (B, Cout, T, H, W), out.shape
    # bf16 input / bf16 MXU operands with f32 accumulation -> compare against the f32
    # reference at a bf16-appropriate tolerance.
    np.testing.assert_allclose(np.asarray(out), np.asarray(ref), rtol=3e-2, atol=3e-2)
    print("KERNEL_OK")
</pallas_src>

<mosaic_0001>
module attributes {stable_mosaic.version = 11 : i64} {
  func.func @kernel(%arg0: i32, %arg1: memref<1x8x64x64xbf16, #tpu.memory_space<vmem>>, %arg2: memref<1x8x64xf32, #tpu.memory_space<vmem>>, %arg3: memref<64x32xf32, #tpu.memory_space<vmem>>, %arg4: memref<32x64xf32, #tpu.memory_space<vmem>>, %arg5: memref<1x64xf32, #tpu.memory_space<vmem>>, %arg6: memref<1x64xf32, #tpu.memory_space<vmem>>, %arg7: memref<64x96xbf16, #tpu.memory_space<vmem>>, %arg8: memref<1x32xf32, #tpu.memory_space<vmem>>, %arg9: memref<64x32xf32, #tpu.memory_space<vmem>>, %arg10: memref<1x32xf32, #tpu.memory_space<vmem>>, %arg11: memref<32x32xf32, #tpu.memory_space<vmem>>, %arg12: memref<32x32xf32, #tpu.memory_space<vmem>>, %arg13: memref<1x32xf32, #tpu.memory_space<vmem>>, %arg14: memref<1x32xf32, #tpu.memory_space<vmem>>, %arg15: memref<32x96xbf16, #tpu.memory_space<vmem>>, %arg16: memref<1x32xf32, #tpu.memory_space<vmem>>, %arg17: memref<64x32xbf16, #tpu.memory_space<vmem>>, %arg18: memref<1x32xf32, #tpu.memory_space<vmem>>, %arg19: memref<1x8x64x32xf32, #tpu.memory_space<vmem>>) attributes {dimension_semantics = [#tpu.dimension_semantics<parallel>], iteration_bounds = array<i64: 2>, scalar_prefetch = 0 : i64, scratch_operands = 0 : i64, tpu.core_type = #tpu.core_type<tc>, window_params = [{transform_indices = @transform_0, window_bounds = array<i64: 1, 8, 64, 64>}, {transform_indices = @transform_1, window_bounds = array<i64: 1, 8, 64>}, {pipeline_mode = #tpu.pipeline_mode<synchronous>, transform_indices = @transform_2, window_bounds = array<i64: 64, 32>}, {pipeline_mode = #tpu.pipeline_mode<synchronous>, transform_indices = @transform_3, window_bounds = array<i64: 32, 64>}, {pipeline_mode = #tpu.pipeline_mode<synchronous>, transform_indices = @transform_4, window_bounds = array<i64: 1, 64>}, {pipeline_mode = #tpu.pipeline_mode<synchronous>, transform_indices = @transform_5, window_bounds = array<i64: 1, 64>}, {pipeline_mode = #tpu.pipeline_mode<synchronous>, transform_indices = @transform_6, window_bounds = array<i64: 64, 96>}, {pipeline_mode = #tpu.pipeline_mode<synchronous>, transform_indices = @transform_7, window_bounds = array<i64: 1, 32>}, {pipeline_mode = #tpu.pipeline_mode<synchronous>, transform_indices = @transform_8, window_bounds = array<i64: 64, 32>}, {pipeline_mode = #tpu.pipeline_mode<synchronous>, transform_indices = @transform_9, window_bounds = array<i64: 1, 32>}, {pipeline_mode = #tpu.pipeline_mode<synchronous>, transform_indices = @transform_10, window_bounds = array<i64: 32, 32>}, {pipeline_mode = #tpu.pipeline_mode<synchronous>, transform_indices = @transform_11, window_bounds = array<i64: 32, 32>}, {pipeline_mode = #tpu.pipeline_mode<synchronous>, transform_indices = @transform_12, window_bounds = array<i64: 1, 32>}, {pipeline_mode = #tpu.pipeline_mode<synchronous>, transform_indices = @transform_13, window_bounds = array<i64: 1, 32>}, {pipeline_mode = #tpu.pipeline_mode<synchronous>, transform_indices = @transform_14, window_bounds = array<i64: 32, 96>}, {pipeline_mode = #tpu.pipeline_mode<synchronous>, transform_indices = @transform_15, window_bounds = array<i64: 1, 32>}, {pipeline_mode = #tpu.pipeline_mode<synchronous>, transform_indices = @transform_16, window_bounds = array<i64: 64, 32>}, {pipeline_mode = #tpu.pipeline_mode<synchronous>, transform_indices = @transform_17, window_bounds = array<i64: 1, 32>}, {transform_indices = @transform_18, window_bounds = array<i64: 1, 8, 64, 32>}]} {
    %c0 = arith.constant 0 : index
    %c0_0 = arith.constant 0 : index
    %c0_1 = arith.constant 0 : index
    %c0_2 = arith.constant 0 : index
    %0 = vector.load %arg1[%c0, %c0_0, %c0_1, %c0_2] : memref<1x8x64x64xbf16, #tpu.memory_space<vmem>>, vector<1x8x64x64xbf16>
    %1 = vector.shape_cast %0 : vector<1x8x64x64xbf16> to vector<8x64x64xbf16>
    %2 = arith.extf %1 : vector<8x64x64xbf16> to vector<8x64x64xf32>
    %3 = vector.shape_cast %2 : vector<8x64x64xf32> to vector<512x64xf32>
    %cst = arith.constant dense<0.000000e+00> : vector<64xf32>
    %4 = vector.multi_reduction <add>, %3, %cst [0] : vector<512x64xf32> to vector<64xf32>
    %5 = vector.shape_cast %4 : vector<64xf32> to vector<1x64xf32>
    %6 = arith.mulf %3, %3 : vector<512x64xf32>
    %cst_3 = arith.constant dense<0.000000e+00> : vector<64xf32>
    %7 = vector.multi_reduction <add>, %6, %cst_3 [0] : vector<512x64xf32> to vector<64xf32>
    %8 = vector.shape_cast %7 : vector<64xf32> to vector<1x64xf32>
    %c0_4 = arith.constant 0 : index
    %c0_5 = arith.constant 0 : index
    %9 = vector.load %arg3[%c0_4, %c0_5] : memref<64x32xf32, #tpu.memory_space<vmem>>, vector<64x32xf32>
    %cst_6 = arith.constant dense<0.000000e+00> : vector<1x32xf32>
    %10 = tpu.matmul %5, %9, %cst_6 {dimension_numbers = #tpu.dot_dimension_numbers<[1], [0], [0], [1], [0, 0, 1, 1], [], []>} : vector<1x64xf32>, vector<64x32xf32>, vector<1x32xf32> -> vector<1x32xf32>
    %c0_7 = arith.constant 0 : index
    %c0_8 = arith.constant 0 : index
    %11 = vector.load %arg3[%c0_7, %c0_8] : memref<64x32xf32, #tpu.memory_space<vmem>>, vector<64x32xf32>
    %cst_9 = arith.constant dense<0.000000e+00> : vector<1x32xf32>
    %12 = tpu.matmul %8, %11, %cst_9 {dimension_numbers = #tpu.dot_dimension_numbers<[1], [0], [0], [1], [0, 0, 1, 1], [], []>} : vector<1x64xf32>, vector<64x32xf32>, vector<1x32xf32> -> vector<1x32xf32>
    %cst_10 = arith.constant 9.765625E-4 : f32
    %13 = vector.broadcast %cst_10 : f32 to vector<1x32xf32>
    %14 = arith.mulf %10, %13 : vector<1x32xf32>
    %cst_11 = arith.constant 9.765625E-4 : f32
    %15 = vector.broadcast %cst_11 : f32 to vector<1x32xf32>
    %16 = arith.mulf %12, %15 : vector<1x32xf32>
    %17 = arith.mulf %14, %14 : vector<1x32xf32>
    %18 = arith.subf %16, %17 : vector<1x32xf32>
    %cst_12 = arith.constant 0.000000e+00 : f32
    %19 = vector.broadcast %cst_12 : f32 to vector<1x32xf32>
    %20 = arith.maximumf %18, %19 : vector<1x32xf32>
    %cst_13 = arith.constant 9.99999997E-7 : f32
    %21 = vector.broadcast %cst_13 : f32 to vector<1x32xf32>
    %22 = arith.addf %20, %21 : vector<1x32xf32>
    %23 = math.rsqrt %22 : vector<1x32xf32>
    %c0_14 = arith.constant 0 : index
    %c0_15 = arith.constant 0 : index
    %24 = vector.load %arg4[%c0_14, %c0_15] : memref<32x64xf32, #tpu.memory_space<vmem>>, vector<32x64xf32>
    %cst_16 = arith.constant dense<0.000000e+00> : vector<1x64xf32>
    %25 = tpu.matmul %14, %24, %cst_16 {dimension_numbers = #tpu.dot_dimension_numbers<[1], [0], [0], [1], [0, 0, 1, 1], [], []>} : vector<1x32xf32>, vector<32x64xf32>, vector<1x64xf32> -> vector<1x64xf32>
    %c0_17 = arith.constant 0 : index
    %c0_18 = arith.constant 0 : index
    %26 = vector.load %arg4[%c0_17, %c0_18] : memref<32x64xf32, #tpu.memory_space<vmem>>, vector<32x64xf32>
    %cst_19 = arith.constant dense<0.000000e+00> : vector<1x64xf32>
    %27 = tpu.matmul %23, %26, %cst_19 {dimension_numbers = #tpu.dot_dimension_numbers<[1], [0], [0], [1], [0, 0, 1, 1], [], []>} : vector<1x32xf32>, vector<32x64xf32>, vector<1x64xf32> -> vector<1x64xf32>
    %c0_20 = arith.constant 0 : index
    %c0_21 = arith.constant 0 : index
    %28 = vector.load %arg5[%c0_20, %c0_21] : memref<1x64xf32, #tpu.memory_space<vmem>>, vector<1x64xf32>
    %29 = arith.mulf %28, %27 : vector<1x64xf32>
    %c0_22 = arith.constant 0 : index
    %c0_23 = arith.constant 0 : index
    %30 = vector.load %arg6[%c0_22, %c0_23] : memref<1x64xf32, #tpu.memory_space<vmem>>, vector<1x64xf32>
    %31 = arith.mulf %25, %29 : vector<1x64xf32>
    %32 = arith.subf %30, %31 : vector<1x64xf32>
    %33 = vector.broadcast %29 : vector<1x64xf32> to vector<512x64xf32>
    %34 = arith.mulf %3, %33 : vector<512x64xf32>
    %35 = vector.broadcast %32 : vector<1x64xf32> to vector<512x64xf32>
    %36 = arith.addf %34, %35 : vector<512x64xf32>
    %cst_24 = arith.constant 5.000000e-01 : f32
    %37 = vector.broadcast %cst_24 : f32 to vector<512x64xf32>
    %38 = arith.mulf %37, %36 : vector<512x64xf32>
    %39 = math.tanh %38 : vector<512x64xf32>
    %cst_25 = arith.constant 5.000000e-01 : f32
    %40 = vector.broadcast %cst_25 : f32 to vector<512x64xf32>
    %41 = arith.mulf %40, %39 : vector<512x64xf32>
    %cst_26 = arith.constant 5.000000e-01 : f32
    %42 = vector.broadcast %cst_26 : f32 to vector<512x64xf32>
    %43 = arith.addf %41, %42 : vector<512x64xf32>
    %44 = arith.mulf %36, %43 : vector<512x64xf32>
    %45 = arith.truncf %44 : vector<512x64xf32> to vector<512x64xbf16>
    %c0_27 = arith.constant 0 : index
    %c0_28 = arith.constant 0 : index
    %c0_29 = arith.constant 0 : index
    %46 = vector.load %arg2[%c0_27, %c0_28, %c0_29] : memref<1x8x64xf32, #tpu.memory_space<vmem>>, vector<1x8x64xf32>
    %47 = vector.shape_cast %46 : vector<1x8x64xf32> to vector<8x64xf32>
    %cst_30 = arith.constant 5.000000e-01 : f32
    %48 = vector.broadcast %cst_30 : f32 to vector<8x64xf32>
    %49 = arith.mulf %48, %47 : vector<8x64xf32>
    %50 = math.tanh %49 : vector<8x64xf32>
    %cst_31 = arith.constant 5.000000e-01 : f32
    %51 = vector.broadcast %cst_31 : f32 to vector<8x64xf32>
    %52 = arith.mulf %51, %50 : vector<8x64xf32>
    %cst_32 = arith.constant 5.000000e-01 : f32
    %53 = vector.broadcast %cst_32 : f32 to vector<8x64xf32>
    %54 = arith.addf %52, %53 : vector<8x64xf32>
    %55 = arith.mulf %47, %54 : vector<8x64xf32>
    %c0_33 = arith.constant 0 : index
    %c0_34 = arith.constant 0 : index
    %56 = vector.load %arg9[%c0_33, %c0_34] : memref<64x32xf32, #tpu.memory_space<vmem>>, vector<64x32xf32>
    %cst_35 = arith.constant dense<0.000000e+00> : vector<8x32xf32>
    %57 = tpu.matmul %55, %56, %cst_35 {dimension_numbers = #tpu.dot_dimension_numbers<[1], [0], [0], [1], [0, 0, 1, 1], [], []>} : vector<8x64xf32>, vector<64x32xf32>, vector<8x32xf32> -> vector<8x32xf32>
    %c0_36 = arith.constant 0 : index
    %c0_37 = arith.constant 0 : index
    %58 = vector.load %arg10[%c0_36, %c0_37] : memref<1x32xf32, #tpu.memory_space<vmem>>, vector<1x32xf32>
    %59 = vector.broadcast %58 : vector<1x32xf32> to vector<8x32xf32>
    %60 = arith.addf %57, %59 : vector<8x32xf32>
    %c0_38 = arith.constant 0 : index
    %c0_39 = arith.constant 0 : index
    %61 = vector.load %arg7[%c0_38, %c0_39] : memref<64x96xbf16, #tpu.memory_space<vmem>>, vector<64x96xbf16>
    %cst_40 = arith.constant dense<0.000000e+00> : vector<512x96xf32>
    %62 = tpu.matmul %45, %61, %cst_40 {dimension_numbers = #tpu.dot_dimension_numbers<[1], [0], [0], [1], [0, 0, 1, 1], [], []>} : vector<512x64xbf16>, vector<64x96xbf16>, vector<512x96xf32> -> vector<512x96xf32>
    %63 = vector.shape_cast %62 : vector<512x96xf32> to vector<8x64x96xf32>
    %64 = vector.extract_strided_slice %63 {offsets = [0, 0, 32], sizes = [8, 64, 32], strides = [1, 1, 1]} : vector<8x64x96xf32> to vector<8x64x32xf32>
    %cst_41 = arith.constant 0.000000e+00 : f32
    %65 = vector.broadcast %cst_41 : f32 to vector<1x64x32xf32>
    %66 = vector.extract_strided_slice %63 {offsets = [0, 0, 0], sizes = [7, 64, 32], strides = [1, 1, 1]} : vector<8x64x96xf32> to vector<7x64x32xf32>
    %67 = tpu.concatenate %65, %66 in 0 : vector<1x64x32xf32>, vector<7x64x32xf32> -> vector<8x64x32xf32>
    %68 = vector.extract_strided_slice %63 {offsets = [1, 0, 64], sizes = [7, 64, 32], strides = [1, 1, 1]} : vector<8x64x96xf32> to vector<7x64x32xf32>
    %69 = tpu.concatenate %68, %65 in 0 : vector<7x64x32xf32>, vector<1x64x32xf32> -> vector<8x64x32xf32>
    %70 = arith.addf %64, %67 : vector<8x64x32xf32>
    %71 = arith.addf %70, %69 : vector<8x64x32xf32>
    %c0_42 = arith.constant 0 : index
    %c0_43 = arith.constant 0 : index
    %72 = vector.load %arg8[%c0_42, %c0_43] : memref<1x32xf32, #tpu.memory_space<vmem>>, vector<1x32xf32>
    %73 = vector.shape_cast %72 : vector<1x32xf32> to vector<1x1x32xf32>
    %74 = vector.broadcast %73 : vector<1x1x32xf32> to vector<8x64x32xf32>
    %75 = arith.addf %71, %74 : vector<8x64x32xf32>
    %76 = vector.shape_cast %60 : vector<8x32xf32> to vector<8x1x32xf32>
    %77 = vector.broadcast %76 : vector<8x1x32xf32> to vector<8x64x32xf32>
    %78 = arith.addf %75, %77 : vector<8x64x32xf32>
    %79 = vector.shape_cast %78 : vector<8x64x32xf32> to vector<512x32xf32>
    %cst_44 = arith.constant dense<0.000000e+00> : vector<32xf32>
    %80 = vector.multi_reduction <add>, %79, %cst_44 [0] : vector<512x32xf32> to vector<32xf32>
    %81 = vector.shape_cast %80 : vector<32xf32> to vector<1x32xf32>
    %82 = arith.mulf %79, %79 : vector<512x32xf32>
    %cst_45 = arith.constant dense<0.000000e+00> : vector<32xf32>
    %83 = vector.multi_reduction <add>, %82, %cst_45 [0] : vector<512x32xf32> to vector<32xf32>
    %84 = vector.shape_cast %83 : vector<32xf32> to vector<1x32xf32>
    %c0_46 = arith.constant 0 : index
    %c0_47 = arith.constant 0 : index
    %85 = vector.load %arg11[%c0_46, %c0_47] : memref<32x32xf32, #tpu.memory_space<vmem>>, vector<32x32xf32>
    %cst_48 = arith.constant dense<0.000000e+00> : vector<1x32xf32>
    %86 = tpu.matmul %81, %85, %cst_48 {dimension_numbers = #tpu.dot_dimension_numbers<[1], [0], [0], [1], [0, 0, 1, 1], [], []>} : vector<1x32xf32>, vector<32x32xf32>, vector<1x32xf32> -> vector<1x32xf32>
    %c0_49 = arith.constant 0 : index
    %c0_50 = arith.constant 0 : index
    %87 = vector.load %arg11[%c0_49, %c0_50] : memref<32x32xf32, #tpu.memory_space<vmem>>, vector<32x32xf32>
    %cst_51 = arith.constant dense<0.000000e+00> : vector<1x32xf32>
    %88 = tpu.matmul %84, %87, %cst_51 {dimension_numbers = #tpu.dot_dimension_numbers<[1], [0], [0], [1], [0, 0, 1, 1], [], []>} : vector<1x32xf32>, vector<32x32xf32>, vector<1x32xf32> -> vector<1x32xf32>
    %cst_52 = arith.constant 0.001953125 : f32
    %89 = vector.broadcast %cst_52 : f32 to vector<1x32xf32>
    %90 = arith.mulf %86, %89 : vector<1x32xf32>
    %cst_53 = arith.constant 0.001953125 : f32
    %91 = vector.broadcast %cst_53 : f32 to vector<1x32xf32>
    %92 = arith.mulf %88, %91 : vector<1x32xf32>
    %93 = arith.mulf %90, %90 : vector<1x32xf32>
    %94 = arith.subf %92, %93 : vector<1x32xf32>
    %cst_54 = arith.constant 0.000000e+00 : f32
    %95 = vector.broadcast %cst_54 : f32 to vector<1x32xf32>
    %96 = arith.maximumf %94, %95 : vector<1x32xf32>
    %cst_55 = arith.constant 9.99999997E-7 : f32
    %97 = vector.broadcast %cst_55 : f32 to vector<1x32xf32>
    %98 = arith.addf %96, %97 : vector<1x32xf32>
    %99 = math.rsqrt %98 : vector<1x32xf32>
    %c0_56 = arith.constant 0 : index
    %c0_57 = arith.constant 0 : index
    %100 = vector.load %arg12[%c0_56, %c0_57] : memref<32x32xf32, #tpu.memory_space<vmem>>, vector<32x32xf32>
    %cst_58 = arith.constant dense<0.000000e+00> : vector<1x32xf32>
    %101 = tpu.matmul %90, %100, %cst_58 {dimension_numbers = #tpu.dot_dimension_numbers<[1], [0], [0], [1], [0, 0, 1, 1], [], []>} : vector<1x32xf32>, vector<32x32xf32>, vector<1x32xf32> -> vector<1x32xf32>
    %c0_59 = arith.constant 0 : index
    %c0_60 = arith.constant 0 : index
    %102 = vector.load %arg12[%c0_59, %c0_60] : memref<32x32xf32, #tpu.memory_space<vmem>>, vector<32x32xf32>
    %cst_61 = arith.constant dense<0.000000e+00> : vector<1x32xf32>
    %103 = tpu.matmul %99, %102, %cst_61 {dimension_numbers = #tpu.dot_dimension_numbers<[1], [0], [0], [1], [0, 0, 1, 1], [], []>} : vector<1x32xf32>, vector<32x32xf32>, vector<1x32xf32> -> vector<1x32xf32>
    %c0_62 = arith.constant 0 : index
    %c0_63 = arith.constant 0 : index
    %104 = vector.load %arg13[%c0_62, %c0_63] : memref<1x32xf32, #tpu.memory_space<vmem>>, vector<1x32xf32>
    %105 = arith.mulf %104, %103 : vector<1x32xf32>
    %c0_64 = arith.constant 0 : index
    %c0_65 = arith.constant 0 : index
    %106 = vector.load %arg14[%c0_64, %c0_65] : memref<1x32xf32, #tpu.memory_space<vmem>>, vector<1x32xf32>
    %107 = arith.mulf %101, %105 : vector<1x32xf32>
    %108 = arith.subf %106, %107 : vector<1x32xf32>
    %109 = vector.broadcast %105 : vector<1x32xf32> to vector<512x32xf32>
    %110 = arith.mulf %79, %109 : vector<512x32xf32>
    %111 = vector.broadcast %108 : vector<1x32xf32> to vector<512x32xf32>
    %112 = arith.addf %110, %111 : vector<512x32xf32>
    %cst_66 = arith.constant 5.000000e-01 : f32
    %113 = vector.broadcast %cst_66 : f32 to vector<512x32xf32>
    %114 = arith.mulf %113, %112 : vector<512x32xf32>
    %115 = math.tanh %114 : vector<512x32xf32>
    %cst_67 = arith.constant 5.000000e-01 : f32
    %116 = vector.broadcast %cst_67 : f32 to vector<512x32xf32>
    %117 = arith.mulf %116, %115 : vector<512x32xf32>
    %cst_68 = arith.constant 5.000000e-01 : f32
    %118 = vector.broadcast %cst_68 : f32 to vector<512x32xf32>
    %119 = arith.addf %117, %118 : vector<512x32xf32>
    %120 = arith.mulf %112, %119 : vector<512x32xf32>
    %121 = arith.truncf %120 : vector<512x32xf32> to vector<512x32xbf16>
    %c0_69 = arith.constant 0 : index
    %c0_70 = arith.constant 0 : index
    %122 = vector.load %arg15[%c0_69, %c0_70] : memref<32x96xbf16, #tpu.memory_space<vmem>>, vector<32x96xbf16>
    %cst_71 = arith.constant dense<0.000000e+00> : vector<512x96xf32>
    %123 = tpu.matmul %121, %122, %cst_71 {dimension_numbers = #tpu.dot_dimension_numbers<[1], [0], [0], [1], [0, 0, 1, 1], [], []>} : vector<512x32xbf16>, vector<32x96xbf16>, vector<512x96xf32> -> vector<512x96xf32>
    %124 = vector.shape_cast %123 : vector<512x96xf32> to vector<8x64x96xf32>
    %125 = vector.extract_strided_slice %124 {offsets = [0, 0, 32], sizes = [8, 64, 32], strides = [1, 1, 1]} : vector<8x64x96xf32> to vector<8x64x32xf32>
    %cst_72 = arith.constant 0.000000e+00 : f32
    %126 = vector.broadcast %cst_72 : f32 to vector<1x64x32xf32>
    %127 = vector.extract_strided_slice %124 {offsets = [0, 0, 0], sizes = [7, 64, 32], strides = [1, 1, 1]} : vector<8x64x96xf32> to vector<7x64x32xf32>
    %128 = tpu.concatenate %126, %127 in 0 : vector<1x64x32xf32>, vector<7x64x32xf32> -> vector<8x64x32xf32>
    %129 = vector.extract_strided_slice %124 {offsets = [1, 0, 64], sizes = [7, 64, 32], strides = [1, 1, 1]} : vector<8x64x96xf32> to vector<7x64x32xf32>
    %130 = tpu.concatenate %129, %126 in 0 : vector<7x64x32xf32>, vector<1x64x32xf32> -> vector<8x64x32xf32>
    %131 = arith.addf %125, %128 : vector<8x64x32xf32>
    %132 = arith.addf %131, %130 : vector<8x64x32xf32>
    %c0_73 = arith.constant 0 : index
    %c0_74 = arith.constant 0 : index
    %133 = vector.load %arg16[%c0_73, %c0_74] : memref<1x32xf32, #tpu.memory_space<vmem>>, vector<1x32xf32>
    %134 = vector.shape_cast %133 : vector<1x32xf32> to vector<1x1x32xf32>
    %135 = vector.broadcast %134 : vector<1x1x32xf32> to vector<8x64x32xf32>
    %136 = arith.addf %132, %135 : vector<8x64x32xf32>
    %137 = vector.shape_cast %1 : vector<8x64x64xbf16> to vector<512x64xbf16>
    %c0_75 = arith.constant 0 : index
    %c0_76 = arith.constant 0 : index
    %138 = vector.load %arg17[%c0_75, %c0_76] : memref<64x32xbf16, #tpu.memory_space<vmem>>, vector<64x32xbf16>
    %cst_77 = arith.constant dense<0.000000e+00> : vector<512x32xf32>
    %139 = tpu.matmul %137, %138, %cst_77 {dimension_numbers = #tpu.dot_dimension_numbers<[1], [0], [0], [1], [0, 0, 1, 1], [], []>} : vector<512x64xbf16>, vector<64x32xbf16>, vector<512x32xf32> -> vector<512x32xf32>
    %c0_78 = arith.constant 0 : index
    %c0_79 = arith.constant 0 : index
    %140 = vector.load %arg18[%c0_78, %c0_79] : memref<1x32xf32, #tpu.memory_space<vmem>>, vector<1x32xf32>
    %141 = vector.broadcast %140 : vector<1x32xf32> to vector<512x32xf32>
    %142 = arith.addf %139, %141 : vector<512x32xf32>
    %143 = vector.shape_cast %142 : vector<512x32xf32> to vector<8x64x32xf32>
    %144 = arith.addf %143, %136 : vector<8x64x32xf32>
    %c0_80 = arith.constant 0 : index
    %c0_81 = arith.constant 0 : index
    %c0_82 = arith.constant 0 : index
    %c0_83 = arith.constant 0 : index
    %145 = vector.load %arg19[%c0_80, %c0_81, %c0_82, %c0_83] : memref<1x8x64x32xf32, #tpu.memory_space<vmem>>, vector<1x8x64x32xf32>
    %146 = vector.shape_cast %145 : vector<1x8x64x32xf32> to vector<8x64x32xf32>
    %147 = vector.shape_cast %144 : vector<8x64x32xf32> to vector<1x8x64x32xf32>
    tpu.vector_store %arg19[%c0_80, %c0_81, %c0_82, %c0_83], %147 {strides = array<i32>} : memref<1x8x64x32xf32, #tpu.memory_space<vmem>>, vector<1x8x64x32xf32>,
    return
  }
  func.func @transform_0(%arg0: i32) -> (i32, i32, i32, i32) {
    %c0_i32 = arith.constant 0 : i32
    %c0_i32_0 = arith.constant 0 : i32
    %c0_i32_1 = arith.constant 0 : i32
    %c0_i32_2 = arith.constant 0 : i32
    return %arg0, %c0_i32, %c0_i32_0, %c0_i32_1 : i32, i32, i32, i32
  }
  func.func @transform_1(%arg0: i32) -> (i32, i32, i32) {
    %c0_i32 = arith.constant 0 : i32
    %c0_i32_0 = arith.constant 0 : i32
    %c0_i32_1 = arith.constant 0 : i32
    return %arg0, %c0_i32, %c0_i32_0 : i32, i32, i32
  }
  func.func @transform_2(%arg0: i32) -> (i32, i32) {
    %c0_i32 = arith.constant 0 : i32
    %c0_i32_0 = arith.constant 0 : i32
    %c0_i32_1 = arith.constant 0 : i32
    return %c0_i32, %c0_i32_0 : i32, i32
  }
  func.func @transform_3(%arg0: i32) -> (i32, i32) {
    %c0_i32 = arith.constant 0 : i32
    %c0_i32_0 = arith.constant 0 : i32
    %c0_i32_1 = arith.constant 0 : i32
    return %c0_i32, %c0_i32_0 : i32, i32
  }
  func.func @transform_4(%arg0: i32) -> (i32, i32) {
    %c0_i32 = arith.constant 0 : i32
    %c0_i32_0 = arith.constant 0 : i32
    %c0_i32_1 = arith.constant 0 : i32
    return %c0_i32, %c0_i32_0 : i32, i32
  }
  func.func @transform_5(%arg0: i32) -> (i32, i32) {
    %c0_i32 = arith.constant 0 : i32
    %c0_i32_0 = arith.constant 0 : i32
    %c0_i32_1 = arith.constant 0 : i32
    return %c0_i32, %c0_i32_0 : i32, i32
  }
  func.func @transform_6(%arg0: i32) -> (i32, i32) {
    %c0_i32 = arith.constant 0 : i32
    %c0_i32_0 = arith.constant 0 : i32
    %c0_i32_1 = arith.constant 0 : i32
    return %c0_i32, %c0_i32_0 : i32, i32
  }
  func.func @transform_7(%arg0: i32) -> (i32, i32) {
    %c0_i32 = arith.constant 0 : i32
    %c0_i32_0 = arith.constant 0 : i32
    %c0_i32_1 = arith.constant 0 : i32
    return %c0_i32, %c0_i32_0 : i32, i32
  }
  func.func @transform_8(%arg0: i32) -> (i32, i32) {
    %c0_i32 = arith.constant 0 : i32
    %c0_i32_0 = arith.constant 0 : i32
    %c0_i32_1 = arith.constant 0 : i32
    return %c0_i32, %c0_i32_0 : i32, i32
  }
  func.func @transform_9(%arg0: i32) -> (i32, i32) {
    %c0_i32 = arith.constant 0 : i32
    %c0_i32_0 = arith.constant 0 : i32
    %c0_i32_1 = arith.constant 0 : i32
    return %c0_i32, %c0_i32_0 : i32, i32
  }
  func.func @transform_10(%arg0: i32) -> (i32, i32) {
    %c0_i32 = arith.constant 0 : i32
    %c0_i32_0 = arith.constant 0 : i32
    %c0_i32_1 = arith.constant 0 : i32
    return %c0_i32, %c0_i32_0 : i32, i32
  }
  func.func @transform_11(%arg0: i32) -> (i32, i32) {
    %c0_i32 = arith.constant 0 : i32
    %c0_i32_0 = arith.constant 0 : i32
    %c0_i32_1 = arith.constant 0 : i32
    return %c0_i32, %c0_i32_0 : i32, i32
  }
  func.func @transform_12(%arg0: i32) -> (i32, i32) {
    %c0_i32 = arith.constant 0 : i32
    %c0_i32_0 = arith.constant 0 : i32
    %c0_i32_1 = arith.constant 0 : i32
    return %c0_i32, %c0_i32_0 : i32, i32
  }
  func.func @transform_13(%arg0: i32) -> (i32, i32) {
    %c0_i32 = arith.constant 0 : i32
    %c0_i32_0 = arith.constant 0 : i32
    %c0_i32_1 = arith.constant 0 : i32
    return %c0_i32, %c0_i32_0 : i32, i32
  }
  func.func @transform_14(%arg0: i32) -> (i32, i32) {
    %c0_i32 = arith.constant 0 : i32
    %c0_i32_0 = arith.constant 0 : i32
    %c0_i32_1 = arith.constant 0 : i32
    return %c0_i32, %c0_i32_0 : i32, i32
  }
  func.func @transform_15(%arg0: i32) -> (i32, i32) {
    %c0_i32 = arith.constant 0 : i32
    %c0_i32_0 = arith.constant 0 : i32
    %c0_i32_1 = arith.constant 0 : i32
    return %c0_i32, %c0_i32_0 : i32, i32
  }
  func.func @transform_16(%arg0: i32) -> (i32, i32) {
    %c0_i32 = arith.constant 0 : i32
    %c0_i32_0 = arith.constant 0 : i32
    %c0_i32_1 = arith.constant 0 : i32
    return %c0_i32, %c0_i32_0 : i32, i32
  }
  func.func @transform_17(%arg0: i32) -> (i32, i32) {
    %c0_i32 = arith.constant 0 : i32
    %c0_i32_0 = arith.constant 0 : i32
    %c0_i32_1 = arith.constant 0 : i32
    return %c0_i32, %c0_i32_0 : i32, i32
  }
  func.func @transform_18(%arg0: i32) -> (i32, i32, i32, i32) {
    %c0_i32 = arith.constant 0 : i32
    %c0_i32_0 = arith.constant 0 : i32
    %c0_i32_1 = arith.constant 0 : i32
    %c0_i32_2 = arith.constant 0 : i32
    return %arg0, %c0_i32, %c0_i32_0, %c0_i32_1 : i32, i32, i32, i32
  }
}

</mosaic_0001>

<bundles_post_ra>
// kernel: tpu_custom_call.1
= control target key start
LH: loop header
LB: loop body
LE: loop exit
PB: predicated region body
PF: predicated region fallthrough
CT: control target
= control target key end

     0   :  { %s12245_s0 = inlined_call_operand.hbm [shape: bf16[2,8,64,64], index: 0, kind: input, shape index: {}]   ;;  %s12246_s1 = inlined_call_operand.vmem [shape: f32[2,8,64], index: 1, kind: input, shape index: {}]   ;;  %s12247_s2 = inlined_call_operand.vmem [shape: f32[64,32], index: 2, kind: input, shape index: {}]   ;;  %s12248_s3 = inlined_call_operand.vmem [shape: f32[32,64], index: 3, kind: input, shape index: {}]   ;;  %s12249_s4 = inlined_call_operand.vmem [shape: f32[1,64], index: 4, kind: input, shape index: {}]   ;;  %s12250_s5 = inlined_call_operand.vmem [shape: f32[1,64], index: 5, kind: input, shape index: {}]   ;;  %s12251_s6 = inlined_call_operand.vmem [shape: bf16[64,96], index: 6, kind: input, shape index: {}]   ;;  %s12252_s7 = inlined_call_operand.vmem [shape: f32[1,32], index: 7, kind: input, shape index: {}]   ;;  %s12253_s8 = inlined_call_operand.vmem [shape: f32[64,32], index: 8, kind: input, shape index: {}]   ;;  %s12254_s9 = inlined_call_operand.vmem [shape: f32[1,32], index: 9, kind: input, shape index: {}]   ;;  %s12255_s10 = inlined_call_operand.vmem [shape: f32[32,32], index: 10, kind: input, shape index: {}]   ;;  %s12256_s11 = inlined_call_operand.vmem [shape: f32[32,32], index: 11, kind: input, shape index: {}]   ;;  %s12257_s12 = inlined_call_operand.vmem [shape: f32[1,32], index: 12, kind: input, shape index: {}]   ;;  %s12258_s13 = inlined_call_operand.vmem [shape: f32[1,32], index: 13, kind: input, shape index: {}]   ;;  %s12259_s14 = inlined_call_operand.vmem [shape: bf16[32,96], index: 14, kind: input, shape index: {}]   ;;  %s12260_s15 = inlined_call_operand.vmem [shape: f32[1,32], index: 15, kind: input, shape index: {}]   ;;  %s12261_s16 = inlined_call_operand.vmem [shape: bf16[64,32], index: 16, kind: input, shape index: {}]   ;;  %s12262_s17 = inlined_call_operand.vmem [shape: f32[1,32], index: 17, kind: input, shape index: {}]   ;;  %s12263_s18 = inlined_call_operand.vmem [shape: f32[2,8,64,32], index: 18, kind: output, shape index: {}]  }
   0x1   :  { %12454 = sst [smem:[#allocation87_spill]] %s12245_s0 }
   0x2   :  { %12455 = sst [smem:[#allocation88_spill]] %s12246_s1 }
   0x3   :  { %12456 = sst [smem:[#allocation89_spill]] %s12247_s2 }
   0x4   :  { %12457 = sst [smem:[#allocation90_spill]] %s12261_s16 }
   0x5   :  { %12458 = sst [smem:[#allocation91_spill]] %s12262_s17 }
   0x6   :  { %12459 = sst [smem:[#allocation92_spill]] %s12263_s18 }
   0x7   :  { %23 = vsyncpa [#allocation3], 0 }
   0x8   :  { %25 = vsyncpa [#allocation3 + $0x1], 0  ;;  %s7714_s27 = smov 0   ;;  %s7716_s28 = smov 0  }
   0x9   :  { %s7718_s29 = smov 0   ;;  %s7720_s30 = smov 0  }
   0xa LB: > { %12460 = sst [smem:[#allocation5_spill]] %s7605_s29  ;;  %s7733_s0 = sadd.s32 4294967295, %s7609_s30   ;;  %s7609_s30 = sphi %s7720_s30, %s12934_s30   ;;  %s7605_s29 = sphi %s7718_s29, %s12936_s29   ;;  %s7601_s28 = sphi %s7716_s28, %s12938_s28   ;;  %s7597_s27 = sphi %s7714_s27, %s12937_s27  }
   0xb   : > { %s7736_s19 = sadd.s32 1, %s7609_s30   ;;  %s38_s20 = sadd.s32 1, %s7605_s29 }
   0xc   : > { %12461 = sst [smem:[#allocation6_spill]] %s7736_s19  ;;  %s35_s1 = ssub.s32 %s7609_s30, %s7736_s19 }
   0xd   : > { %p36_p0 = scmp.eq.s32.totalorder %s35_s1, 0  ;;  %p45_p1 = scmp.ne.s32.totalorder %s7605_s29, %s7601_s28 }
   0xe   : > { %p46_p2 = scmp.eq.s32.totalorder %s7609_s30, 0  ;;  %p51_p3 = scmp.ne.s32.totalorder %s7601_s28, %s7597_s27 }
   0xf   : > { %s7746_s21 = scalar_select %p36_p0, %s7605_s29, %s38_s20  }
  0x10   : > { %p47_p4 = por %p46_p2, %p45_p1  ;;  %p52_p5 = scmp.eq.s32.totalorder %s7733_s0, 0 }
  0x11   : > { %12462 = sst [smem:[#allocation7_spill]] %s7746_s21  ;;  %p7137_p6 = scmp.lt.s32.totalorder %s7609_s30, 2 }
  0x12   : > { %p7750_p7 = por %p52_p5, %p51_p3  ;;  %s511_s2 = sand.u32 1, %s7605_s29  }
  0x13   : > { %s6462_s23 = sshll.u32 %s511_s2, 8  ;;  %s6623_s24 = sshll.u32 %s7609_s30, 12 }
  0x14   : > { %s12463_s22 = scalar_select %p7750_p7, 1, 0 }
  0x15   : > { %s12464_s19 = sld [smem:[#allocation87_spill]]  ;;  %s515_s27 = scalar_lea.vmem [#allocation2], %s6462_s23 }
  0x16   : > { %s522_s20 = sshll.u32 %s515_s27, 4  ;;  %p7763_p8 = pnand %p7137_p6, %p47_p4  ;;  %s7761_s20 = int_to_ptr.vmem [resolvable:$true] %s522_s20 }
  0x17   : > { %s7768_s29 = scalar_lea.sflag [#allocation3], %s511_s2 }
  0x18   : > { %p7549_p11 = pneg %p7763_p8 }
  0x1b   : > { %s7759_s1 = scalar_lea.hbm %s12464_s19, %s6623_s24  ;;  %s7552_s23 = scalar_lea.hbm %s12464_s19, 8192 }
  0x1c   : > { %s7547_s18 = scalar_lea.hbm %s7759_s1, 4096  ;;  %p7553_p0 = scmp.lt.s32.totalorder %s7759_s1, %s12464_s19 }
  0x1d   : > { %p7548_p10 = scmp.ne.s32.totalorder %s7759_s1, %s7547_s18  ;;  %p7554_p1 = scmp.lt.s32.totalorder %s7552_s23, %s7547_s18 }
  0x1f   : > { %p7550_p12 = pnand %p7549_p11, %p7548_p10  ;;  %p7555_p2 = por %p7554_p1, %p7553_p0 }
  0x21   : > { %p7551_p13 = pneg %p7550_p12 }
  0x23   : > { %p7556_p3 = pnand %p7555_p2, %p7551_p13 }
  0x25   : > { %7559 = shalt.err (!%p7556_p3)
}
  0x26   : > { %s7560_s2 = scalar_lea.vmem %s7761_s20, 4096  ;;  %s7611_s17 = smov [#allocation2]  }
  0x27   : > { %p7561_p4 = scmp.ne.s32.totalorder %s7761_s20, %s7560_s2  ;;  %s7565_s16 = sshll.u32 %s7611_s17, 4  ;;  %s7566_s16 = int_to_ptr.vmem [resolvable:$false] %s7565_s16 }
  0x28   : > { %s7567_s24 = scalar_lea.vmem %s7566_s16, 8192  ;;  %p7568_p10 = scmp.lt.s32.totalorder %s7761_s20, %s7566_s16 }
  0x29   : > { %p7563_p5 = pnand %p7561_p4, %p7549_p11  ;;  %p7569_p12 = scmp.lt.s32.totalorder %s7567_s24, %s7560_s2 }
  0x2b   : > { %p7564_p6 = pneg %p7563_p5  ;;  %p7570_p9 = por %p7569_p12, %p7568_p10 }
  0x2d   : > { %p7571_p7 = pnand %p7570_p9, %p7564_p6 }
  0x2f   : > { %7574 = shalt.err (!%p7571_p7)
}
  0x30   : > { %s7612_s18 = smov 64   ;;  %s7613_s25 = smov 4  }
  0x31   : > { %7136 = dma.hbm_to_vmem [thread:$0]  (!%p7763_p8), %s7759_s1, 4096, %s7761_s20, %s7768_s29, %s7612_s18, %s7612_s18, %s7613_s25  }
  0x32   : > { %p537_p11 = scmp.lt.s32.totalorder %s7609_s30, 3  ;;  %p12466_p13 = scmp.ge.s32.totalorder %s7609_s30, 1 }
  0x34   : > { %p538_p0 = pnand %p12466_p13, %p537_p11 }
  0x36   : > { %541 = sbr.rel (%p538_p0) target bundleno = 2715 (0xa9b), region = 92 }
  0x3b   : > { %s543_s16 = sand.u32 1, %s7601_s28   ;;  %p12467_p7 = scmp.ne.s32.totalorder %s12463_s22, 0 }
  0x3c   : > { %s6466_s17 = sshll.u32 %s543_s16, 8  ;;  %s544_s23 = scalar_lea.sflag [#allocation3], %s543_s16 }
  0x3d   : > { %s7793_s26 = scalar_lea.vmem [#allocation2], %s6466_s17 }
  0x3e   : > { %7592 = dma.done.wait (%p12467_p7), %s544_s23, 4096  }
  0x3f   : > { %7594 = vsyncadd (%p12467_p7), %s544_s23, 4294963200  ;;  %v12271_v0 = vmov 0.0   ;;  %vm7615_vm0 = vmmov 0   ;;  %s12468_s21 = sld [smem:[#allocation89_spill]]  ;;  %v614_v9 = vld [vmem:[%s7793_s26] sm:$0xff]   ;;  %v616_v10 = vld [vmem:[%s7793_s26 + $0x8] sm:$0xff]  }
  0x40   : > { %6788 = vmatprep.subr.mxu0 %v12271_v0  ;;  %6807 = vmatprep.subr.mxu1 %v12271_v0  ;;  %vm742_vm1 = vcmask 523264   ;;  %v618_v11 = vld [vmem:[%s7793_s26 + $0x10] sm:$0xff]   ;;  %v7846_v12 = vunpack.c.l.bf16 %v614_v9  ;;  %v7848_v13 = vunpack.c.h.bf16 %v614_v9  ;;  %v7850_v14 = vunpack.c.l.bf16 %v616_v10  ;;  %v620_v19 = vld [vmem:[%s7793_s26 + $0x18] sm:$0xff]   ;;  %v622_v27 = vld [vmem:[%s7793_s26 + $0x20] sm:$0xff]   ;;  %p604_p8 = scmp.lt.s32.totalorder %s7733_s0, 1  ;;  %s12501_s20 = sld [smem:[#allocation88_spill]] }
  0x41   : > { %6804 = vmatprep.mubr.msk.f32.mxu0 %vm7615_vm0, %v12271_v0  ;;  %6823 = vmatprep.mubr.msk.f32.mxu1 %vm7615_vm0, %v12271_v0  ;;  %v7854_v15 = vunpack.c.h.bf16 %v616_v10  ;;  %v7856_v16 = vunpack.c.l.bf16 %v618_v11  ;;  %v7865_v22 = vunpack.c.h.bf16 %v618_v11  ;;  %v7869_v25 = vunpack.c.l.bf16 %v620_v19  ;;  %v624_v34 = vld [vmem:[%s7793_s26 + $0x28] sm:$0xff]   ;;  %v626_v41 = vld [vmem:[%s7793_s26 + $0x30] sm:$0xff]   ;;  %v628_v48 = vld [vmem:[%s7793_s26 + $0x38] sm:$0xff]   ;;  %s7616_s27 = smov 32   ;;  %s7618_s16 = smov 96  }
  0x42   : > { %v743_v17 = vsel %vm742_vm1, %v7846_v12, 0.0  ;;  %v744_v18 = vsel %vm742_vm1, %v7848_v13, 0.0  ;;  %v746_v21 = vsel %vm742_vm1, %v7850_v14, 0.0  ;;  %v7874_v29 = vunpack.c.h.bf16 %v620_v19  ;;  %v630_v55 = vld [vmem:[%s7793_s26 + $0x40] sm:$0xff]   ;;  %v632_v62 = vld [vmem:[%s7793_s26 + $0x48] sm:$0xff]   ;;  %s12940_s0 = smov (!%p604_p8, %s7733_s0), 1 }
  0x43   : > { %v745_v20 = vadd.f32 %v744_v18, %v743_v17  ;;  %v748_v23 = vsel %vm742_vm1, %v7854_v15, 0.0  ;;  %v750_v26 = vsel %vm742_vm1, %v7856_v16, 0.0  ;;  %v752_v30 = vsel %vm742_vm1, %v7865_v22, 0.0  ;;  %v636_v18 = vld [vmem:[%s7793_s26 + $0x58] sm:$0xff]   ;;  %s6467_s29 = sshll.u32 %s12940_s0, 3  ;;  %s12787_s25 = sld [smem:[#allocation90_spill]] }
  0x44   : > { %v7878_v32 = vunpack.c.l.bf16 %v622_v27  ;;  %v754_v33 = vsel %vm742_vm1, %v7869_v25, 0.0  ;;  %v7883_v36 = vunpack.c.h.bf16 %v622_v27  ;;  %v756_v37 = vsel %vm742_vm1, %v7874_v29, 0.0  ;;  %s6624_s2 = sshll.u32 %s12940_s0, 9  ;;  %s12921_s18 = sld [smem:[#allocation92_spill]] }
  0x45   : > { %v1080_v1 = vld [vmem:[%s12468_s21 + $0x38] sm:$0xff]  ;;  %v1079_v2 = vld [vmem:[%s12468_s21 + $0x30] sm:$0xff]  ;;  %v1078_v3 = vld [vmem:[%s12468_s21 + $0x28] sm:$0xff]  ;;  %v747_v24 = vadd.f32 %v746_v21, %v745_v20  ;;  %v7887_v39 = vunpack.c.l.bf16 %v624_v34  ;;  %v7892_v43 = vunpack.c.h.bf16 %v624_v34  ;;  %v7896_v46 = vunpack.c.l.bf16 %v626_v41 }
  0x46   : > { %6789 = vmatpush3.msra.mxu0 %v1080_v1  ;;  %6808 = vmatpush3.msra.mxu1 %v1080_v1  ;;  %v1077_v4 = vld [vmem:[%s12468_s21 + $0x20] sm:$0xff]  ;;  %v1076_v5 = vld [vmem:[%s12468_s21 + $0x18] sm:$0xff]  ;;  %v1075_v6 = vld [vmem:[%s12468_s21 + $0x10] sm:$0xff]  ;;  %v758_v40 = vsel %vm742_vm1, %v7878_v32, 0.0  ;;  %v760_v44 = vsel %vm742_vm1, %v7883_v36, 0.0  ;;  %v7901_v50 = vunpack.c.h.bf16 %v626_v41  ;;  %v7905_v53 = vunpack.c.l.bf16 %v628_v48  ;;  %s607_s22 = scalar_lea.vmem %s12501_s20, %s6467_s29 }
  0x47   : > { %6790 = vmatprep.subr.mxu0 %v12271_v0  ;;  %6809 = vmatprep.subr.mxu1 %v12271_v0  ;;  %v1074_v7 = vld [vmem:[%s12468_s21 + $0x8] sm:$0xff]  ;;  %v1073_v8 = vld [vmem:[%s12468_s21] sm:$0xff]  ;;  %v749_v28 = vadd.f32 %v748_v23, %v747_v24  ;;  %v762_v47 = vsel %vm742_vm1, %v7887_v39, 0.0  ;;  %v764_v51 = vsel %vm742_vm1, %v7892_v43, 0.0  ;;  %v766_v54 = vsel %vm742_vm1, %v7896_v46, 0.0 }
  0x48   : > { %6791 = vmatpush3.msra.mxu0 %v1079_v2  ;;  %6810 = vmatpush3.msra.mxu1 %v1079_v2  ;;  %12469 = vst [vmem:[#allocation8_spill] sm:$0xff] %v7901_v50  ;;  %12470 = vst [vmem:[#allocation9_spill] sm:$0xff] %v7905_v53  ;;  %v7910_v57 = vunpack.c.h.bf16 %v628_v48  ;;  %v768_v58 = vsel %vm742_vm1, %v7901_v50, 0.0  ;;  %v7914_v60 = vunpack.c.l.bf16 %v630_v55  ;;  %v770_v61 = vsel %vm742_vm1, %v7905_v53, 0.0  ;;  %v638_v34 = vld [vmem:[%s7793_s26 + $0x60] sm:$0xff]  }
  0x49   : > { %6792 = vmatprep.subr.mxu0 %v12271_v0  ;;  %6811 = vmatprep.subr.mxu1 %v12271_v0  ;;  %v751_v31 = vadd.f32 %v750_v26, %v749_v28  ;;  %v7919_v1 = vunpack.c.h.bf16 %v630_v55  ;;  %v876_v20 = vmul.f32 %v7846_v12, %v7846_v12  ;;  %v877_v21 = vmul.f32 %v7848_v13, %v7848_v13 }
  0x4a   : > { %6793 = vmatpush3.msra.mxu0 %v1078_v3  ;;  %6812 = vmatpush3.msra.mxu1 %v1078_v3  ;;  %12471 = vst [vmem:[#allocation10_spill] sm:$0xff] %v7910_v57  ;;  %12472 = vst [vmem:[#allocation11_spill] sm:$0xff] %v7914_v60  ;;  %v772_v2 = vsel %vm742_vm1, %v7910_v57, 0.0  ;;  %v878_v23 = vmul.f32 %v7850_v14, %v7850_v14  ;;  %v879_v28 = vmul.f32 %v7854_v15, %v7854_v15  ;;  %vm1238_vm2 = vcmask 261120   ;;  %s11918_s17 = scalar_lea.vmem %s12921_s18, %s6624_s2 }
  0x4b   : > { %6794 = vmatprep.subr.mxu0 %v12271_v0  ;;  %6813 = vmatprep.subr.mxu1 %v12271_v0  ;;  %v753_v35 = vadd.f32 %v752_v30, %v751_v31  ;;  %12473 = vst [vmem:[#allocation12_spill] sm:$0xff] %v7919_v1  ;;  %v776_v9 = vsel %vm742_vm1, %v7919_v1, 0.0  ;;  %v7949_v30 = vunpack.c.l.bf16 %v636_v18  ;;  %v7959_v41 = vunpack.c.h.bf16 %v636_v18 }
  0x4c   : > { %6795 = vmatpush3.msra.mxu0 %v1077_v4  ;;  %6814 = vmatpush3.msra.mxu1 %v1077_v4  ;;  %v7923_v4 = vunpack.c.l.bf16 %v632_v62  ;;  %v945_v48 = vsel %vm742_vm1, %v879_v28, 0.0  ;;  %vm3171_vm3 = vcmask 523520  }
  0x4d   : > { %6796 = vmatprep.subr.mxu0 %v12271_v0  ;;  %6815 = vmatprep.subr.mxu1 %v12271_v0  ;;  %v755_v38 = vadd.f32 %v754_v33, %v753_v35  ;;  %v880_v33 = vmul.f32 %v7856_v16, %v7856_v16 }
  0x4e   : > { %6797 = vmatpush3.msra.mxu0 %v1076_v5  ;;  %6816 = vmatpush3.msra.mxu1 %v1076_v5  ;;  %12474 = vst [vmem:[#allocation13_spill] sm:$0xff] %v7923_v4  ;;  %v774_v5 = vsel %vm742_vm1, %v7914_v60, 0.0  ;;  %v778_v17 = vsel %vm742_vm1, %v7923_v4, 0.0 }
  0x4f   : > { %6798 = vmatprep.subr.mxu0 %v12271_v0  ;;  %6817 = vmatprep.subr.mxu1 %v12271_v0  ;;  %v757_v42 = vadd.f32 %v756_v37, %v755_v38  ;;  %v940_v37 = vsel %vm742_vm1, %v876_v20, 0.0  ;;  %v941_v38 = vsel %vm742_vm1, %v877_v21, 0.0 }
  0x50   : > { %6799 = vmatpush3.msra.mxu0 %v1075_v6  ;;  %6818 = vmatpush3.msra.mxu1 %v1075_v6  ;;  %v634_v6 = vld [vmem:[%s7793_s26 + $0x50] sm:$0xff]  }
  0x51   : > { %6800 = vmatprep.subr.mxu0 %v12271_v0  ;;  %6819 = vmatprep.subr.mxu1 %v12271_v0  ;;  %v759_v45 = vadd.f32 %v758_v40, %v757_v42  ;;  %v7932_v11 = vunpack.c.l.bf16 %v634_v6  ;;  %v7943_v24 = vunpack.c.h.bf16 %v634_v6  ;;  %v943_v40 = vsel %vm742_vm1, %v878_v23, 0.0 }
  0x52   : > { %6801 = vmatpush3.msra.mxu0 %v1074_v7  ;;  %6820 = vmatpush3.msra.mxu1 %v1074_v7 }
  0x53   : > { %6802 = vmatprep.subr.mxu0 %v12271_v0  ;;  %6821 = vmatprep.subr.mxu1 %v12271_v0  ;;  %v761_v49 = vadd.f32 %v760_v44, %v759_v45  ;;  %v782_v31 = vsel %vm742_vm1, %v7932_v11, 0.0  ;;  %v784_v42 = vsel %vm742_vm1, %v7943_v24, 0.0  ;;  %v942_v44 = vadd.f32 %v941_v38, %v940_v37 }
  0x54   : > { %6803 = vmatpush3.msra.mxu0 %v1073_v8  ;;  %6822 = vmatpush3.msra.mxu1 %v1073_v8  ;;  %v7928_v8 = vunpack.c.h.bf16 %v632_v62  ;;  %v886_v37 = vmul.f32 %v7887_v39, %v7887_v39 }
  0x55   : > { %6826 = vmatprep.subr.mxu0 %v12271_v0  ;;  %6837 = vmatprep.subr.mxu1 %v12271_v0  ;;  %v763_v52 = vadd.f32 %v762_v47, %v761_v49  ;;  %v881_v47 = vmul.f32 %v7865_v22, %v7865_v22  ;;  %v7966_v49 = vunpack.c.l.bf16 %v638_v34 }
  0x56   : > { %12475 = vst [vmem:[#allocation14_spill] sm:$0xff] %v7928_v8  ;;  %v780_v26 = vsel %vm742_vm1, %v7928_v8, 0.0 }
  0x57   : > { %v765_v56 = vadd.f32 %v764_v51, %v763_v52  ;;  %v786_v51 = vsel %vm742_vm1, %v7949_v30, 0.0  ;;  %v944_v52 = vadd.f32 %v943_v40, %v942_v44  ;;  %v790_v6 = vsel %vm742_vm1, %v7966_v49, 0.0 }
  0x59   : > { %v767_v59 = vadd.f32 %v766_v54, %v765_v56  ;;  %v640_v54 = vld [vmem:[%s7793_s26 + $0x68] sm:$0xff]   ;;  %v882_v56 = vmul.f32 %v7869_v25, %v7869_v25  ;;  %v946_v62 = vadd.f32 %v945_v48, %v944_v52 }
  0x5b   : > { %v769_v63 = vadd.f32 %v768_v58, %v767_v59  ;;  %v947_v58 = vsel %vm742_vm1, %v880_v33, 0.0  ;;  %v7974_v59 = vunpack.c.h.bf16 %v638_v34  ;;  %v951_v18 = vsel %vm742_vm1, %v882_v56, 0.0  ;;  %v644_v34 = vld [vmem:[%s7793_s26 + $0x78] sm:$0xff]  }
  0x5d   : > { %v771_v3 = vadd.f32 %v770_v61, %v769_v63  ;;  %v788_v61 = vsel %vm742_vm1, %v7959_v41, 0.0  ;;  %v792_v20 = vsel %vm742_vm1, %v7974_v59, 0.0 }
  0x5f   : > { %v773_v7 = vadd.f32 %v772_v2, %v771_v3  ;;  %v883_v2 = vmul.f32 %v7874_v29, %v7874_v29  ;;  %v949_v3 = vsel %vm742_vm1, %v881_v47, 0.0  ;;  %v887_v47 = vmul.f32 %v7892_v43, %v7892_v43 }
  0x61   : > { %v775_v10 = vadd.f32 %v774_v5, %v773_v7  ;;  %v7981_v5 = vunpack.c.l.bf16 %v640_v54  ;;  %v948_v7 = vadd.f32 %v947_v58, %v946_v62  ;;  %v888_v58 = vmul.f32 %v7896_v46, %v7896_v46 }
  0x62   : > { %v8019_v62 = vunpack.c.h.bf16 %v644_v34 }
  0x63   : > { %v777_v19 = vadd.f32 %v776_v9, %v775_v10  ;;  %v642_v9 = vld [vmem:[%s7793_s26 + $0x70] sm:$0xff]   ;;  %v950_v21 = vadd.f32 %v949_v3, %v948_v7  ;;  %v961_v7 = vsel %vm742_vm1, %v887_v47, 0.0  ;;  %v892_v47 = vmul.f32 %v7914_v60, %v7914_v60 }
  0x64   : > { %v7996_v28 = vunpack.c.l.bf16 %v642_v9  ;;  %v8004_v40 = vunpack.c.h.bf16 %v642_v9  ;;  %v907_v60 = vmul.f32 %v8019_v62, %v8019_v62 }
  0x65   : > { %v779_v27 = vadd.f32 %v778_v17, %v777_v19  ;;  %v884_v17 = vmul.f32 %v7878_v32, %v7878_v32  ;;  %v7989_v19 = vunpack.c.h.bf16 %v640_v54  ;;  %v952_v33 = vadd.f32 %v951_v18, %v950_v21  ;;  %v648_v18 = vld [vmem:[%s7793_s26 + $0x88] sm:$0xff]  }
  0x66   : > { %v798_v52 = vsel %vm742_vm1, %v7996_v28, 0.0  ;;  %v890_v21 = vmul.f32 %v7905_v53, %v7905_v53 }
  0x67   : > { %v781_v35 = vadd.f32 %v780_v26, %v779_v27  ;;  %v885_v26 = vmul.f32 %v7883_v36, %v7883_v36  ;;  %v953_v27 = vsel %vm742_vm1, %v883_v2, 0.0  ;;  %v955_v38 = vsel %vm742_vm1, %v884_v17, 0.0 }
  0x68   : > { %v954_v44 = vadd.f32 %v953_v27, %v952_v33  ;;  %v804_v27 = vsel %vm742_vm1, %v8019_v62, 0.0  ;;  %v903_v0 = vmul.f32 %v7989_v19, %v7989_v19 }
  0x69   : > { %v783_v45 = vadd.f32 %v782_v31, %v781_v35  ;;  %v794_v31 = vsel %vm742_vm1, %v7981_v5, 0.0  ;;  %v957_v48 = vsel %vm742_vm1, %v885_v26, 0.0 }
  0x6a   : > { %v956_v54 = vadd.f32 %v955_v38, %v954_v44  ;;  %v650_v44 = vld [vmem:[%s7793_s26 + $0x90] sm:$0xff]  }
  0x6b   : > { %v785_v55 = vadd.f32 %v784_v42, %v783_v45  ;;  %v796_v42 = vsel %vm742_vm1, %v7989_v19, 0.0 }
  0x6c   : > { %v958_v2 = vadd.f32 %v957_v48, %v956_v54  ;;  %v967_v48 = vsel %vm742_vm1, %v890_v21, 0.0 }
  0x6d   : > { %v787_v63 = vadd.f32 %v786_v51, %v785_v55  ;;  %v8011_v51 = vunpack.c.l.bf16 %v644_v34  ;;  %v646_v55 = vld [vmem:[%s7793_s26 + $0x80] sm:$0xff]   ;;  %v891_v34 = vmul.f32 %v7910_v57, %v7910_v57 }
  0x6e   : > { %v8026_v9 = vunpack.c.l.bf16 %v646_v55  ;;  %v8034_v26 = vunpack.c.h.bf16 %v646_v55 }
  0x6f   : > { %v789_v10 = vadd.f32 %v788_v61, %v787_v63  ;;  %v959_v61 = vsel %vm742_vm1, %v886_v37, 0.0  ;;  %v800_v63 = vsel %vm742_vm1, %v8004_v40, 0.0  ;;  %v8041_v37 = vunpack.c.l.bf16 %v648_v18 }
  0x70   : > { %12476 = vst [vmem:[#allocation15_spill] sm:$0xff] %v8026_v9  ;;  %v960_v17 = vadd.f32 %v959_v61, %v958_v2  ;;  %12477 = vst [vmem:[#allocation16_spill] sm:$0xff] %v8034_v26  ;;  %v806_v38 = vsel %vm742_vm1, %v8026_v9, 0.0  ;;  %v808_v54 = vsel %vm742_vm1, %v8034_v26, 0.0  ;;  %v969_v61 = vsel %vm742_vm1, %v891_v34, 0.0 }
  0x71   : > { %v791_v23 = vadd.f32 %v790_v6, %v789_v10  ;;  %v889_v6 = vmul.f32 %v7901_v50, %v7901_v50  ;;  %v802_v10 = vsel %vm742_vm1, %v8011_v51, 0.0  ;;  %12478 = vst [vmem:[#allocation17_spill] sm:$0xff] %v8041_v37  ;;  %v810_v2 = vsel %vm742_vm1, %v8041_v37, 0.0 }
  0x72   : > { %v909_v53 = vmul.f32 %v8034_v26, %v8034_v26  ;;  %v1001_v50 = vsel %vm742_vm1, %v907_v60, 0.0 }
  0x73   : > { %v793_v35 = vadd.f32 %v792_v20, %v791_v23  ;;  %v963_v23 = vsel %vm742_vm1, %v888_v58, 0.0  ;;  %v893_v58 = vmul.f32 %v7919_v1, %v7919_v1  ;;  %v993_v1 = vsel %vm742_vm1, %v903_v0, 0.0 }
  0x75   : > { %v795_v45 = vadd.f32 %v794_v31, %v793_v35  ;;  %v962_v31 = vadd.f32 %v961_v7, %v960_v17  ;;  %v965_v35 = vsel %vm742_vm1, %v889_v6, 0.0  ;;  %v652_v6 = vld [vmem:[%s7793_s26 + $0x98] sm:$0xff]   ;;  %v971_v17 = vsel %vm742_vm1, %v892_v47, 0.0 }
  0x76   : > { %v8079_v47 = vunpack.c.h.bf16 %v652_v6 }
  0x77   : > { %v797_v56 = vadd.f32 %v796_v42, %v795_v45  ;;  %v964_v42 = vadd.f32 %v963_v23, %v962_v31  ;;  %v973_v31 = vsel %vm742_vm1, %v893_v58, 0.0 }
  0x78   : > { %12483 = vst [vmem:[#allocation22_spill] sm:$0xff] %v8079_v47 }
  0x79   : > { %v799_v3 = vadd.f32 %v798_v52, %v797_v56  ;;  %v8049_v52 = vunpack.c.h.bf16 %v648_v18  ;;  %v966_v55 = vadd.f32 %v965_v35, %v964_v42  ;;  %v8064_v18 = vunpack.c.h.bf16 %v650_v44 }
  0x7b   : > { %v801_v20 = vadd.f32 %v800_v63, %v799_v3  ;;  %12479 = vst [vmem:[#allocation18_spill] sm:$0xff] %v8049_v52  ;;  %v8056_v63 = vunpack.c.l.bf16 %v650_v44  ;;  %v968_v3 = vadd.f32 %v967_v48, %v966_v55  ;;  %12481 = vst [vmem:[#allocation20_spill] sm:$0xff] %v8064_v18  ;;  %v896_v44 = vmul.f32 %v7932_v11, %v7932_v11 }
  0x7c   : > { %v816_v48 = vsel %vm742_vm1, %v8064_v18, 0.0  ;;  %v911_v26 = vmul.f32 %v8049_v52, %v8049_v52 }
  0x7d   : > { %v803_v33 = vadd.f32 %v802_v10, %v801_v20  ;;  %12480 = vst [vmem:[#allocation19_spill] sm:$0xff] %v8056_v63  ;;  %v894_v10 = vmul.f32 %v7923_v4, %v7923_v4  ;;  %v812_v20 = vsel %vm742_vm1, %v8049_v52, 0.0  ;;  %v970_v21 = vadd.f32 %v969_v61, %v968_v3 }
  0x7e   : > { %v814_v34 = vsel %vm742_vm1, %v8056_v63, 0.0  ;;  %v905_v4 = vmul.f32 %v8004_v40, %v8004_v40  ;;  %v913_v52 = vmul.f32 %v8064_v18, %v8064_v18  ;;  %v915_v18 = vmul.f32 %v8079_v47, %v8079_v47 }
  0x7f   : > { %v805_v45 = vadd.f32 %v804_v27, %v803_v33  ;;  %v895_v27 = vmul.f32 %v7928_v8, %v7928_v8  ;;  %v8071_v33 = vunpack.c.l.bf16 %v652_v6  ;;  %v972_v35 = vadd.f32 %v971_v17, %v970_v21 }
  0x80   : > { %v979_v17 = vsel %vm742_vm1, %v896_v44, 0.0  ;;  %v820_v21 = vsel %vm742_vm1, %v8079_v47, 0.0  ;;  %v658_v44 = vld [vmem:[%s7793_s26 + $0xb0] sm:$0xff]   ;;  %v997_v57 = vsel %vm742_vm1, %v905_v4, 0.0 }
  0x81   : > { %v807_v56 = vadd.f32 %v806_v38, %v805_v45  ;;  %12482 = vst [vmem:[#allocation21_spill] sm:$0xff] %v8071_v33  ;;  %v654_v38 = vld [vmem:[%s7793_s26 + $0xa0] sm:$0xff]   ;;  %v975_v45 = vsel %vm742_vm1, %v894_v10, 0.0  ;;  %v977_v58 = vsel %vm742_vm1, %v895_v27, 0.0  ;;  %v898_v10 = vmul.f32 %v7949_v30, %v7949_v30 }
  0x82   : > { %v8086_v61 = vunpack.c.l.bf16 %v654_v38 }
  0x83   : > { %v809_v7 = vadd.f32 %v808_v54, %v807_v56  ;;  %v974_v54 = vadd.f32 %v973_v31, %v972_v35  ;;  %v897_v56 = vmul.f32 %v7943_v24, %v7943_v24  ;;  %v899_v31 = vmul.f32 %v7959_v41, %v7959_v41 }
  0x84   : > { %12484 = vst [vmem:[#allocation23_spill] sm:$0xff] %v8086_v61 }
  0x85   : > { %v811_v23 = vadd.f32 %v810_v2, %v809_v7  ;;  %v818_v2 = vsel %vm742_vm1, %v8071_v33, 0.0  ;;  %v976_v3 = vadd.f32 %v975_v45, %v974_v54  ;;  %v656_v7 = vld [vmem:[%s7793_s26 + $0xa8] sm:$0xff]   ;;  %v983_v54 = vsel %vm742_vm1, %v898_v10, 0.0  ;;  %v660_v10 = vld [vmem:[%s7793_s26 + $0xb8] sm:$0xff]  }
  0x86   : > { %v8101_v35 = vunpack.c.l.bf16 %v656_v7 }
  0x87   : > { %v813_v42 = vadd.f32 %v812_v20, %v811_v23  ;;  %v8094_v20 = vunpack.c.h.bf16 %v654_v38  ;;  %v978_v23 = vadd.f32 %v977_v58, %v976_v3  ;;  %v901_v3 = vmul.f32 %v7974_v59, %v7974_v59 }
  0x88   : > { %12486 = vst [vmem:[#allocation25_spill] sm:$0xff] %v8101_v35 }
  0x89   : > { %v815_v55 = vadd.f32 %v814_v34, %v813_v42  ;;  %12485 = vst [vmem:[#allocation24_spill] sm:$0xff] %v8094_v20  ;;  %v981_v34 = vsel %vm742_vm1, %v897_v56, 0.0  ;;  %v822_v42 = vsel %vm742_vm1, %v8086_v61, 0.0  ;;  %v980_v45 = vadd.f32 %v979_v17, %v978_v23 }
  0x8a   : > { %v824_v58 = vsel %vm742_vm1, %v8094_v20, 0.0  ;;  %v8116_v17 = vunpack.c.l.bf16 %v658_v44  ;;  %v989_v8 = vsel %vm742_vm1, %v901_v3, 0.0  ;;  %v917_v47 = vmul.f32 %v8094_v20, %v8094_v20 }
  0x8b   : > { %v817_v6 = vadd.f32 %v816_v48, %v815_v55  ;;  %v900_v48 = vmul.f32 %v7966_v49, %v7966_v49  ;;  %v8109_v55 = vunpack.c.h.bf16 %v656_v7  ;;  %v982_v56 = vadd.f32 %v981_v34, %v980_v45 }
  0x8c   : > { %v1021_v20 = vsel %vm742_vm1, %v917_v47, 0.0 }
  0x8d   : > { %v819_v27 = vadd.f32 %v818_v2, %v817_v6  ;;  %v985_v6 = vsel %vm742_vm1, %v899_v31, 0.0  ;;  %v984_v23 = vadd.f32 %v983_v54, %v982_v56  ;;  %v987_v34 = vsel %vm742_vm1, %v900_v48, 0.0  ;;  %v662_v48 = vld [vmem:[%s7793_s26 + $0xc0] sm:$0xff]  }
  0x8e   : > { %v828_v45 = vsel %vm742_vm1, %v8109_v55, 0.0  ;;  %v8131_v54 = vunpack.c.l.bf16 %v660_v10 }
  0x8f   : > { %v821_v38 = vadd.f32 %v820_v21, %v819_v27  ;;  %v826_v21 = vsel %vm742_vm1, %v8101_v35, 0.0  ;;  %v902_v27 = vmul.f32 %v7981_v5, %v7981_v5  ;;  %v986_v31 = vadd.f32 %v985_v6, %v984_v23 }
  0x91   : > { %v823_v2 = vadd.f32 %v822_v42, %v821_v38  ;;  %v8124_v42 = vunpack.c.h.bf16 %v658_v44  ;;  %v988_v56 = vadd.f32 %v987_v34, %v986_v31  ;;  %v991_v6 = vsel %vm742_vm1, %v902_v27, 0.0  ;;  %v664_v27 = vld [vmem:[%s7793_s26 + $0xc8] sm:$0xff]  }
  0x92   : > { %v8146_v34 = vunpack.c.l.bf16 %v662_v48 }
  0x93   : > { %v825_v7 = vadd.f32 %v824_v58, %v823_v2  ;;  %12487 = vst [vmem:[#allocation26_spill] sm:$0xff] %v8124_v42  ;;  %v830_v58 = vsel %vm742_vm1, %v8116_v17, 0.0  ;;  %v904_v2 = vmul.f32 %v7996_v28, %v7996_v28  ;;  %v832_v23 = vsel %vm742_vm1, %v8124_v42, 0.0 }
  0x94   : > { %v990_v3 = vadd.f32 %v989_v8, %v988_v56  ;;  %v921_v47 = vmul.f32 %v8124_v42, %v8124_v42 }
  0x95   : > { %v827_v38 = vadd.f32 %v826_v21, %v825_v7  ;;  %v8139_v21 = vunpack.c.h.bf16 %v660_v10  ;;  %v995_v8 = vsel %vm742_vm1, %v904_v2, 0.0  ;;  %v666_v2 = vld [vmem:[%s7793_s26 + $0xd0] sm:$0xff]  }
  0x96   : > { %v992_v31 = vadd.f32 %v991_v6, %v990_v3  ;;  %v8161_v6 = vunpack.c.l.bf16 %v664_v27 }
  0x97   : > { %v829_v44 = vadd.f32 %v828_v45, %v827_v38  ;;  %v834_v45 = vsel %vm742_vm1, %v8131_v54, 0.0  ;;  %v906_v38 = vmul.f32 %v8011_v51, %v8011_v51  ;;  %v836_v56 = vsel %vm742_vm1, %v8139_v21, 0.0 }
  0x98   : > { %v994_v0 = vadd.f32 %v993_v1, %v992_v31 }
  0x99   : > { %v831_v7 = vadd.f32 %v830_v58, %v829_v44  ;;  %v8154_v58 = vunpack.c.h.bf16 %v662_v48  ;;  %v999_v1 = vsel %vm742_vm1, %v906_v38, 0.0  ;;  %v668_v38 = vld [vmem:[%s7793_s26 + $0xd8] sm:$0xff]  }
  0x9a   : > { %v996_v3 = vadd.f32 %v995_v8, %v994_v0  ;;  %v8176_v8 = vunpack.c.l.bf16 %v666_v2 }
  0x9b   : > { %v833_v10 = vadd.f32 %v832_v23, %v831_v7  ;;  %v838_v23 = vsel %vm742_vm1, %v8146_v34, 0.0  ;;  %v908_v7 = vmul.f32 %v8026_v9, %v8026_v9  ;;  %v840_v31 = vsel %vm742_vm1, %v8154_v58, 0.0 }
  0x9c   : > { %v998_v4 = vadd.f32 %v997_v57, %v996_v3  ;;  %12488 = vst [vmem:[#allocation27_spill] sm:$0xff] %v8176_v8  ;;  %v1005_v9 = vsel %vm742_vm1, %v909_v53, 0.0 }
  0x9d   : > { %v835_v44 = vadd.f32 %v834_v45, %v833_v10  ;;  %v8169_v45 = vunpack.c.h.bf16 %v664_v27  ;;  %v1003_v57 = vsel %vm742_vm1, %v908_v7, 0.0  ;;  %v670_v7 = vld [vmem:[%s7793_s26 + $0xe0] sm:$0xff]  }
  0x9e   : > { %v1000_v0 = vadd.f32 %v999_v1, %v998_v4  ;;  %v8191_v1 = vunpack.c.l.bf16 %v668_v38 }
  0x9f   : > { %v837_v48 = vadd.f32 %v836_v56, %v835_v44  ;;  %v842_v56 = vsel %vm742_vm1, %v8161_v6, 0.0  ;;  %v910_v44 = vmul.f32 %v8041_v37, %v8041_v37  ;;  %v844_v3 = vsel %vm742_vm1, %v8169_v45, 0.0 }
  0xa0   : > { %v1002_v60 = vadd.f32 %v1001_v50, %v1000_v0  ;;  %12490 = vst [vmem:[#allocation29_spill] sm:$0xff] %v8191_v1  ;;  %v1009_v37 = vsel %vm742_vm1, %v911_v26, 0.0 }
  0xa1   : > { %v839_v10 = vadd.f32 %v838_v23, %v837_v48  ;;  %v8184_v23 = vunpack.c.h.bf16 %v666_v2  ;;  %v1007_v50 = vsel %vm742_vm1, %v910_v44, 0.0  ;;  %v672_v44 = vld [vmem:[%s7793_s26 + $0xe8] sm:$0xff]  }
  0xa2   : > { %v1004_v4 = vadd.f32 %v1003_v57, %v1002_v60  ;;  %v8206_v57 = vunpack.c.l.bf16 %v670_v7 }
  0xa3   : > { %v841_v27 = vadd.f32 %v840_v31, %v839_v10  ;;  %12489 = vst [vmem:[#allocation28_spill] sm:$0xff] %v8184_v23  ;;  %v846_v31 = vsel %vm742_vm1, %v8176_v8, 0.0  ;;  %v912_v10 = vmul.f32 %v8056_v63, %v8056_v63  ;;  %v848_v0 = vsel %vm742_vm1, %v8184_v23, 0.0 }
  0xa4   : > { %v1006_v53 = vadd.f32 %v1005_v9, %v1004_v4  ;;  %12492 = vst [vmem:[#allocation31_spill] sm:$0xff] %v8206_v57  ;;  %v1013_v63 = vsel %vm742_vm1, %v913_v52, 0.0 }
  0xa5   : > { %v843_v48 = vadd.f32 %v842_v56, %v841_v27  ;;  %v8199_v56 = vunpack.c.h.bf16 %v668_v38  ;;  %v1011_v9 = vsel %vm742_vm1, %v912_v10, 0.0  ;;  %v674_v10 = vld [vmem:[%s7793_s26 + $0xf0] sm:$0xff]  }
  0xa6   : > { %v1008_v60 = vadd.f32 %v1007_v50, %v1006_v53  ;;  %v8221_v50 = vunpack.c.l.bf16 %v672_v44 }
  0xa7   : > { %v845_v2 = vadd.f32 %v844_v3, %v843_v48  ;;  %12491 = vst [vmem:[#allocation30_spill] sm:$0xff] %v8199_v56  ;;  %v850_v3 = vsel %vm742_vm1, %v8191_v1, 0.0  ;;  %v914_v48 = vmul.f32 %v8071_v33, %v8071_v33  ;;  %v852_v4 = vsel %vm742_vm1, %v8199_v56, 0.0 }
  0xa8   : > { %v1010_v26 = vadd.f32 %v1009_v37, %v1008_v60  ;;  %12494 = vst [vmem:[#allocation33_spill] sm:$0xff] %v8221_v50  ;;  %v1017_v33 = vsel %vm742_vm1, %v915_v18, 0.0 }
  0xa9   : > { %v847_v27 = vadd.f32 %v846_v31, %v845_v2  ;;  %v8214_v31 = vunpack.c.h.bf16 %v670_v7  ;;  %v1015_v37 = vsel %vm742_vm1, %v914_v48, 0.0 }
  0xaa   : > { %v1012_v53 = vadd.f32 %v1011_v9, %v1010_v26  ;;  %v8236_v9 = vunpack.c.l.bf16 %v674_v10 }
  0xab   : > { %v849_v38 = vadd.f32 %v848_v0, %v847_v27  ;;  %12493 = vst [vmem:[#allocation32_spill] sm:$0xff] %v8214_v31  ;;  %v854_v0 = vsel %vm742_vm1, %v8206_v57, 0.0  ;;  %v916_v27 = vmul.f32 %v8086_v61, %v8086_v61  ;;  %v856_v60 = vsel %vm742_vm1, %v8214_v31, 0.0 }
  0xac   : > { %v1014_v52 = vadd.f32 %v1013_v63, %v1012_v53  ;;  %12496 = vst [vmem:[#allocation35_spill] sm:$0xff] %v8236_v9  ;;  %v8244_v63 = vunpack.c.h.bf16 %v674_v10  ;;  %v920_v10 = vmul.f32 %v8116_v17, %v8116_v17 }
  0xad   : > { %v851_v2 = vadd.f32 %v850_v3, %v849_v38  ;;  %v8229_v3 = vunpack.c.h.bf16 %v672_v44  ;;  %v918_v44 = vmul.f32 %v8101_v35, %v8101_v35  ;;  %v1019_v61 = vsel %vm742_vm1, %v916_v27, 0.0 }
  0xae   : > { %v1016_v26 = vadd.f32 %v1015_v37, %v1014_v52  ;;  %12497 = vst [vmem:[#allocation36_spill] sm:$0xff] %v8244_v63 }
  0xaf   : > { %v853_v7 = vadd.f32 %v852_v4, %v851_v2  ;;  %12495 = vst [vmem:[#allocation34_spill] sm:$0xff] %v8229_v3  ;;  %v858_v4 = vsel %vm742_vm1, %v8221_v50, 0.0  ;;  %v676_v2 = vld [vmem:[%s7793_s26 + $0xf8] sm:$0xff]   ;;  %v1023_v27 = vsel %vm742_vm1, %v918_v44, 0.0  ;;  %v922_v44 = vmul.f32 %v8131_v54, %v8131_v54 }
  0xb0   : > { %v1018_v53 = vadd.f32 %v1017_v33, %v1016_v26  ;;  %v8251_v37 = vunpack.c.l.bf16 %v676_v2  ;;  %v8258_v35 = vunpack.c.h.bf16 %v676_v2  ;;  %v864_v33 = vsel %vm742_vm1, %v8244_v63, 0.0 }
  0xb1   : > { %v855_v38 = vadd.f32 %v854_v0, %v853_v7  ;;  %v860_v0 = vsel %vm742_vm1, %v8229_v3, 0.0  ;;  %v919_v7 = vmul.f32 %v8109_v55, %v8109_v55  ;;  %v1027_v2 = vsel %vm742_vm1, %v920_v10, 0.0 }
  0xb2   : > { %12498 = vst [vmem:[#allocation37_spill] sm:$0xff] %v8251_v37  ;;  %v1020_v52 = vadd.f32 %v1019_v61, %v1018_v53  ;;  %12499 = vst [vmem:[#allocation38_spill] sm:$0xff] %v8258_v35  ;;  %v866_v61 = vsel %vm742_vm1, %v8251_v37, 0.0  ;;  %v925_v10 = vmul.f32 %v8154_v58, %v8154_v58 }
  0xb3   : > { %v857_v48 = vadd.f32 %v856_v60, %v855_v38  ;;  %v862_v60 = vsel %vm742_vm1, %v8236_v9, 0.0 }
  0xb5   : > { %v859_v18 = vadd.f32 %v858_v4, %v857_v48  ;;  %v1022_v4 = vadd.f32 %v1021_v20, %v1020_v52  ;;  %v1025_v48 = vsel %vm742_vm1, %v919_v7, 0.0  ;;  %v923_v52 = vmul.f32 %v8139_v21, %v8139_v21 }
  0xb6   : > { %v1029_v7 = vsel %vm742_vm1, %v921_v47, 0.0 }
  0xb7   : > { %v861_v38 = vadd.f32 %v860_v0, %v859_v18  ;;  %v1024_v0 = vadd.f32 %v1023_v27, %v1022_v4  ;;  %v868_v18 = vsel %vm742_vm1, %v8258_v35, 0.0  ;;  %v924_v27 = vmul.f32 %v8146_v34, %v8146_v34 }
  0xb9   : > { %v863_v26 = vadd.f32 %v862_v60, %v861_v38  ;;  %v1026_v20 = vadd.f32 %v1025_v48, %v1024_v0  ;;  %v1033_v48 = vsel %vm742_vm1, %v923_v52, 0.0  ;;  %v1035_v47 = vsel %vm742_vm1, %v924_v27, 0.0 }
  0xbb   : > { %v865_v53 = vadd.f32 %v864_v33, %v863_v26  ;;  %v1028_v38 = vadd.f32 %v1027_v2, %v1026_v20  ;;  %v1031_v33 = vsel %vm742_vm1, %v922_v44, 0.0  ;;  %v927_v20 = vmul.f32 %v8169_v45, %v8169_v45 }
  0xbc   : > { %v1037_v44 = vsel %vm742_vm1, %v925_v10, 0.0 }
  0xbd   : > { %v867_v60 = vadd.f32 %v866_v61, %v865_v53  ;;  %v1030_v4 = vadd.f32 %v1029_v7, %v1028_v38  ;;  %v926_v53 = vmul.f32 %v8161_v6, %v8161_v6  ;;  %v928_v38 = vmul.f32 %v8176_v8, %v8176_v8 }
  0xbe   : > { %v1041_v27 = vsel %vm742_vm1, %v927_v20, 0.0 }
  0xbf   : > { %v869_v42 = vadd.f32 %v868_v18, %v867_v60  ;;  %v1032_v61 = vadd.f32 %v1031_v33, %v1030_v4  ;;  %v1039_v52 = vsel %vm742_vm1, %v926_v53, 0.0  ;;  %v929_v4 = vmul.f32 %v8184_v23, %v8184_v23 }
  0xc0   : > { %v1043_v10 = vsel %vm742_vm1, %v928_v38, 0.0  ;;  %v931_v53 = vmul.f32 %v8199_v56, %v8199_v56 }
  0xc1   : > { %v870_v26 = vrot.slane %v869_v42, 4  ;;  %v1034_v2 = vadd.f32 %v1033_v48, %v1032_v61  ;;  %v930_v61 = vmul.f32 %v8191_v1, %v8191_v1 }
  0xc3   : > { %v871_v0 = vadd.f32 %v870_v26, %v869_v42  ;;  %v1036_v60 = vadd.f32 %v1035_v47, %v1034_v2  ;;  %v1045_v2 = vsel %vm742_vm1, %v929_v4, 0.0  ;;  %v934_v4 = vmul.f32 %v8221_v50, %v8221_v50 }
  0xc5   : > { %v872_v18 = vrot.slane %v871_v0, 2  ;;  %v1038_v42 = vadd.f32 %v1037_v44, %v1036_v60  ;;  %v12500_v44 = vmov 0.0   ;;  %v932_v60 = vmul.f32 %v8206_v57, %v8206_v57 }
  0xc6   : > { %2450 = vrot.lane.b32.xlu0 %v12500_v44, %s7616_s27 }
  0xc7   : > { %v873_v7 = vadd.f32 %v872_v18, %v871_v0  ;;  %v1040_v26 = vadd.f32 %v1039_v52, %v1038_v42  ;;  %v1237_v0 = vld [vmem:[%s12248_s3 + $0x18] sm:$0xff]  ;;  %v1236_v18 = vld [vmem:[%s12248_s3 + $0x10] sm:$0xff]  ;;  %v933_v52 = vmul.f32 %v8214_v31, %v8214_v31  ;;  %v1049_v42 = vsel %vm742_vm1, %v931_v53, 0.0 }
  0xc8   : > { %v1055_v53 = vsel %vm742_vm1, %v934_v4, 0.0 }
  0xc9   : > { %v874_v33 = vrot.slane %v873_v7, 1  ;;  %v1042_v47 = vadd.f32 %v1041_v27, %v1040_v26  ;;  %v1051_v27 = vsel %vm742_vm1, %v932_v60, 0.0  ;;  %v938_v60 = vmul.f32 %v8251_v37, %v8251_v37 }
  0xcb   : > { %v875_v48 = vadd.f32 %v874_v33, %v873_v7  ;;  %v1044_v20 = vadd.f32 %v1043_v10, %v1042_v47  ;;  %v1047_v7 = vsel %vm742_vm1, %v930_v61, 0.0  ;;  %v1053_v61 = vsel %vm742_vm1, %v933_v52, 0.0 }
  0xcc   : > { %v936_v47 = vmul.f32 %v8236_v9, %v8236_v9  ;;  %v939_v52 = vmul.f32 %v8258_v35, %v8258_v35  ;;  %v1063_v4 = vsel %vm742_vm1, %v938_v60, 0.0 }
  0xcd   : > { %6805 = vmatmul.mubr.msk.f32.vlgmr.msra.gmra.mxu0 %vm742_vm1, %v875_v48  ;;  %v1046_v38 = vadd.f32 %v1045_v2, %v1044_v20  ;;  %v935_v48 = vmul.f32 %v8229_v3, %v8229_v3  ;;  %v937_v20 = vmul.f32 %v8244_v63, %v8244_v63 }
  0xce   : > { %6827 = vmatpush3.msra.mxu0 %v1237_v0  ;;  %6834 = vmatprep.mubr.msk.f32.mxu0 %vm7615_vm0, %v12500_v44 }
  0xcf   : > { %6828 = vmatprep.subr.mxu0 %v12500_v44  ;;  %v1048_v33 = vadd.f32 %v1047_v7, %v1046_v38  ;;  %v1057_v7 = vsel %vm742_vm1, %v935_v48, 0.0 }
  0xd0   : > { %6829 = vmatpush3.msra.mxu0 %v1236_v18 }
  0xd1   : > { %6830 = vmatprep.subr.mxu0 %v12500_v44  ;;  %v1050_v26 = vadd.f32 %v1049_v42, %v1048_v33  ;;  %v1059_v42 = vsel %vm742_vm1, %v936_v47, 0.0 }
  0xd3   : > { %v1052_v10 = vadd.f32 %v1051_v27, %v1050_v26  ;;  %v1061_v27 = vsel %vm742_vm1, %v937_v20, 0.0 }
  0xd5   : > { %v1054_v2 = vadd.f32 %v1053_v61, %v1052_v10  ;;  %v1065_v10 = vsel %vm742_vm1, %v939_v52, 0.0 }
  0xd7   : > { %v1056_v38 = vadd.f32 %v1055_v53, %v1054_v2 }
  0xd9   : > { %v1058_v33 = vadd.f32 %v1057_v7, %v1056_v38 }
  0xdb   : > { %v1060_v26 = vadd.f32 %v1059_v42, %v1058_v33 }
  0xdd   : > { %v1062_v61 = vadd.f32 %v1061_v27, %v1060_v26  ;;  %v1895_v27 = vld [vmem:[%s12253_s8 + $0x38] sm:$0xff]  ;;  %v1882_v26 = vld [vmem:[%s607_s22] sm:$0xff]  ;;  %s12917_s22 = sld [smem:[#allocation91_spill]] }
  0xdf   : > { %v1064_v63 = vadd.f32 %v1063_v4, %v1062_v61  ;;  %v1883_v4 = vmul.f32 0.5, %v1882_v26  ;;  %v1894_v61 = vld [vmem:[%s12253_s8 + $0x30] sm:$0xff] }
  0xe1   : > { %v1066_v48 = vadd.f32 %v1065_v10, %v1064_v63  ;;  %v1235_v63 = vld [vmem:[%s12248_s3 + $0x8] sm:$0xff] }
  0xe2   : > { %6831 = vmatpush3.msra.mxu0 %v1235_v63  ;;  %v1893_v10 = vld [vmem:[%s12253_s8 + $0x28] sm:$0xff] }
  0xe3   : > { %v1067_v53 = vrot.slane %v1066_v48, 4  ;;  %6832 = vmatprep.subr.mxu0 %v12500_v44 }
  0xe5   : > { %v1068_v2 = vadd.f32 %v1067_v53, %v1066_v48  ;;  %v1892_v48 = vld [vmem:[%s12253_s8 + $0x20] sm:$0xff]  ;;  %v1891_v53 = vld [vmem:[%s12253_s8 + $0x18] sm:$0xff] }
  0xe7   : > { %v1069_v9 = vrot.slane %v1068_v2, 2 }
  0xe9   : > { %v1070_v37 = vadd.f32 %v1069_v9, %v1068_v2 }
  0xeb   : > { %v1071_v3 = vrot.slane %v1070_v37, 1 }
  0xed   : > { %v1072_v47 = vadd.f32 %v1071_v3, %v1070_v37  ;;  %v1234_v3 = vld [vmem:[%s12248_s3] sm:$0xff] }
  0xee   : > { %6833 = vmatpush3.msra.mxu0 %v1234_v3 }
  0xef   : > { %6824 = vmatmul.mubr.msk.f32.vlgmr.msra.gmra.mxu1 %vm742_vm1, %v1072_v47  ;;  %6848 = vmatprep.subr.mxu0 %v12500_v44  ;;  %v1890_v47 = vld [vmem:[%s12253_s8 + $0x10] sm:$0xff] }
  0xf0   : > { %6838 = vmatpush3.msra.mxu1 %v1237_v0  ;;  %6845 = vmatprep.mubr.msk.f32.mxu1 %vm7615_vm0, %v12500_v44 }
  0xf1   : > { %6839 = vmatprep.subr.mxu1 %v12500_v44 }
  0xf2   : > { %6840 = vmatpush3.msra.mxu1 %v1236_v18 }
  0xf3   : > { %6841 = vmatprep.subr.mxu1 %v12500_v44 }
  0xf4   : > { %6842 = vmatpush3.msra.mxu1 %v1235_v63  ;;  %v1889_v63 = vld [vmem:[%s12253_s8 + $0x8] sm:$0xff] }
  0xf5   : > { %6843 = vmatprep.subr.mxu1 %v12500_v44 }
  0xf6   : > { %6844 = vmatpush3.msra.mxu1 %v1234_v3 }
 0x18d   : > { %v1150_v9 = vpop.f32.mrf.mxu0 }
 0x18e   : > { %v1227_v37 = vmul.f32 0.0009765625, %v1150_v9  ;;  %v7177_v9 = vld [vmem:[%s12251_s6 + $0x18] sm:$0xff]  }
 0x18f   : > { %v6806_v0 = vpop.f32.mrf.mxu0  ;;  %7123 = vmatprep.subr.bf16.mxu1 %v7177_v9 }
 0x190   : > { %6835 = vmatmul.mubr.msk.f32.vlgmr.msra.gmra.mxu0 %vm1238_vm2, %v1227_v37  ;;  %v1229_v18 = vmul.f32 %v1227_v37, %v1227_v37  ;;  %v7178_v37 = vld [vmem:[%s12251_s6 + $0x10] sm:$0xff]   ;;  %v1888_v0 = vld [vmem:[%s12253_s8] sm:$0xff] }
 0x191   : > { %6864 = vmatprep.mubr.msk.f32.mxu0 %vm7615_vm0, %v12500_v44  ;;  %6849 = vmatpush3.msra.mxu0 %v1895_v27  ;;  %v1385_v27 = vld [vmem:[%s12249_s4] sm:$0x1] }
 0x192   : > { %6850 = vmatprep.subr.mxu0 %v12500_v44 }
 0x193   : > { %6851 = vmatpush3.msra.mxu0 %v1894_v61 }
 0x194   : > { %6852 = vmatprep.subr.mxu0 %v12500_v44 }
 0x195   : > { %6853 = vmatpush3.msra.mxu0 %v1893_v10  ;;  %v1387_v10 = vld [vmem:[%s12250_s5] sm:$0x1] }
 0x196   : > { %6854 = vmatprep.subr.mxu0 %v12500_v44 }
 0x197   : > { %6855 = vmatpush3.msra.mxu0 %v1892_v48 }
 0x198   : > { %6856 = vmatprep.subr.mxu0 %v12500_v44 }
 0x199   : > { %6857 = vmatpush3.msra.mxu0 %v1891_v53 }
 0x19a   : > { %6858 = vmatprep.subr.mxu0 %v12500_v44 }
 0x19b   : > { %6859 = vmatpush3.msra.mxu0 %v1890_v47 }
 0x19c   : > { %6860 = vmatprep.subr.mxu0 %v12500_v44 }
 0x19d   : > { %6861 = vmatpush3.msra.mxu0 %v1889_v63 }
 0x19e   : > { %6862 = vmatprep.subr.mxu0 %v12500_v44 }
 0x19f   : > { %6863 = vmatpush3.msra.mxu0 %v1888_v0 }
 0x1a0   : > { %6867 = vmatprep.subr.bf16.mxu0 %v7177_v9 }
 0x1af   : > { %v1223_v20 = vpop.f32.mrf.mxu1 }
 0x1b0   : > { %v1228_v7 = vmul.f32 0.0009765625, %v1223_v20 }
 0x1b1   : > { %v6825_v38 = vpop.f32.mrf.mxu1 }
 0x1b2   : > { %v1230_v60 = vsub.f32 %v1228_v7, %v1229_v18  ;;  %v7179_v7 = vld [vmem:[%s12251_s6 + $0x8] sm:$0xff]   ;;  %v7180_v38 = vld [vmem:[%s12251_s6] sm:$0xff]  }
 0x1b4   : > { %v1231_v42 = vmax.f32 %v1230_v60, 0.0 }
 0x1b6   : > { %v1232_v33 = vadd.f32 1e-06, %v1231_v42 }
 0x1b8   : > { %7251 = vrsqrt.f32 %v1232_v33  ;;  %v1391_v33 = vlaneseq }
 0x1b9   : > { %7253 = vtanh.f32 %v1883_v4 }
 0x1c5   : > { %v7252_v52 = vpop.eup %7251 }
 0x1c6   : > { %6846 = vmatmul.mubr.msk.f32.vlgmr.msra.gmra.mxu1 %vm1238_vm2, %v7252_v52  ;;  %v7254_v2 = vpop.eup %7253  ;;  %v8407_v52 = vshrl.u32 %v1391_v33, 7 }
 0x1c7   : > { %v1885_v3 = vmul.f32 0.5, %v7254_v2  ;;  %7127 = vmatpush3.bf16.msra.mxu1 %v7177_v9 }
 0x1c8   : > { %7124 = vmatprep.subr.bf16.mxu1 %v7178_v37  ;;  %12502 = vst [vmem:[#allocation39_spill] sm:$0xff] %v8407_v52 }
 0x1c9   : > { %v1886_v18 = vadd.f32 0.5, %v1885_v3 }
 0x1cb   : > { %v1887_v20 = vmul.f32 %v1886_v18, %v1882_v26  ;;  %7128 = vmatpush3.bf16.msra.mxu1 %v7178_v37  ;;  %v8413_v26 = vsub.s32 0, %v8407_v52 }
 0x1cc   : > { %7125 = vmatprep.subr.bf16.mxu1 %v7179_v7 }
 0x1cd   : > { %6865 = vmatmul.mubr.msk.f32.vlgmr.msra.gmra.mxu0 %vm742_vm1, %v1887_v20  ;;  %12503 = vst [vmem:[#allocation40_spill] sm:$0xff] %v8413_v26 }
 0x1ce   : > { %6868 = vmatpush3.bf16.msra.mxu0 %v7177_v9 }
 0x1cf   : > { %6869 = vmatprep.subr.bf16.mxu0 %v7178_v37  ;;  %7129 = vmatpush3.bf16.msra.mxu1 %v7179_v7 }
 0x1d0   : > { %7126 = vmatprep.subr.bf16.mxu1 %v7180_v38 }
 0x1d2   : > { %6870 = vmatpush3.bf16.msra.mxu0 %v7178_v37 }
 0x1d3   : > { %6871 = vmatprep.subr.bf16.mxu0 %v7179_v7  ;;  %7130 = vmatpush3.bf16.msra.mxu1 %v7180_v38 }
 0x1d6   : > { %6872 = vmatpush3.bf16.msra.mxu0 %v7179_v7 }
 0x1d7   : > { %6873 = vmatprep.subr.bf16.mxu0 %v7180_v38 }
 0x1da   : > { %6874 = vmatpush3.bf16.msra.mxu0 %v7180_v38 }
 0x1db   : > { %6939 = vmatprep.subr.mxu0 %v12500_v44 }
 0x250   : > { %v1308_v60 = vpop.f32.mrf.mxu0 }
 0x252   : > { %v6836_v42 = vpop.f32.mrf.mxu0 }
 0x286   : > { %v1381_v4 = vpop.f32.mrf.mxu1 }
 0x287   : > { %v1386_v61 = vmul.f32 %v1385_v27, %v1381_v4 }
 0x288   : > { %v6847_v48 = vpop.f32.mrf.mxu1 }
 0x289   : > { %v1388_v53 = vmul.f32 %v1386_v61, %v1308_v60  ;;  %v8419_v2 = vrot.slane %v1386_v61, %v8413_v26 }
 0x28b   : > { %v1389_v47 = vsub.f32 %v1387_v10, %v1388_v53  ;;  %v1396_v63 = vmul.f32 %v8419_v2, %v7846_v12  ;;  %v1397_v3 = vmul.f32 %v8419_v2, %v7848_v13  ;;  %v1416_v9 = vmul.f32 %v8419_v2, %v7932_v11 }
 0x28c   : > { %v1417_v37 = vmul.f32 %v8419_v2, %v7943_v24  ;;  %v1398_v0 = vmul.f32 %v8419_v2, %v7850_v14  ;;  %v1399_v18 = vmul.f32 %v8419_v2, %v7854_v15  ;;  %v1418_v20 = vmul.f32 %v8419_v2, %v7949_v30 }
 0x28d   : > { %v8436_v12 = vrot.slane %v1389_v47, %v8413_v26  ;;  %v1419_v13 = vmul.f32 %v8419_v2, %v7959_v41  ;;  %v1400_v11 = vmul.f32 %v8419_v2, %v7856_v16  ;;  %v1401_v24 = vmul.f32 %v8419_v2, %v7865_v22 }
 0x28e   : > { %v1420_v14 = vmul.f32 %v8419_v2, %v7966_v49  ;;  %v1421_v15 = vmul.f32 %v8419_v2, %v7974_v59  ;;  %v1402_v30 = vmul.f32 %v8419_v2, %v7869_v25  ;;  %v1403_v7 = vmul.f32 %v8419_v2, %v7874_v29 }
 0x28f   : > { %v8453_v41 = vadd.f32 %v8436_v12, %v1396_v63  ;;  %v8456_v16 = vadd.f32 %v8436_v12, %v1397_v3  ;;  %v8459_v22 = vadd.f32 %v8436_v12, %v1416_v9  ;;  %v8462_v49 = vadd.f32 %v8436_v12, %v1417_v37 }
 0x290   : > { %v8465_v59 = vadd.f32 %v8436_v12, %v1398_v0  ;;  %v8468_v25 = vadd.f32 %v8436_v12, %v1399_v18  ;;  %v8471_v29 = vadd.f32 %v8436_v12, %v1418_v20  ;;  %v8474_v38 = vadd.f32 %v8436_v12, %v1419_v13 }
 0x291   : > { %v1530_v60 = vmul.f32 0.5, %v8453_v41  ;;  %v1531_v42 = vmul.f32 0.5, %v8456_v16  ;;  %v1550_v33 = vmul.f32 0.5, %v8459_v22  ;;  %v1551_v27 = vmul.f32 0.5, %v8462_v49 }
 0x292   : > { %v1532_v4 = vmul.f32 0.5, %v8465_v59  ;;  %v1533_v61 = vmul.f32 0.5, %v8468_v25  ;;  %v1552_v10 = vmul.f32 0.5, %v8471_v29  ;;  %v1553_v48 = vmul.f32 0.5, %v8474_v38 }
 0x293   : > { %7255 = vtanh.f32 %v1530_v60  ;;  %v8487_v53 = vadd.f32 %v8436_v12, %v1400_v11  ;;  %v8490_v47 = vadd.f32 %v8436_v12, %v1401_v24  ;;  %v8493_v63 = vadd.f32 %v8436_v12, %v1420_v14 }
 0x294   : > { %7257 = vtanh.f32 %v1531_v42  ;;  %v8496_v3 = vadd.f32 %v8436_v12, %v1421_v15  ;;  %v8499_v9 = vadd.f32 %v8436_v12, %v1402_v30  ;;  %v8502_v37 = vadd.f32 %v8436_v12, %v1403_v7  ;;  %v6512_v7 = vld [vmem:[%s12252_s7] ss:$0 sm:$0xff] }
 0x295   : > { %7259 = vtanh.f32 %v1550_v33  ;;  %v1534_v0 = vmul.f32 0.5, %v8487_v53  ;;  %v1535_v18 = vmul.f32 0.5, %v8490_v47  ;;  %v1554_v20 = vmul.f32 0.5, %v8493_v63  ;;  %2934 = vrot.lane.b32.xlu0 %v6512_v7, %s7616_s27 }
 0x296   : > { %7261 = vtanh.f32 %v1551_v27  ;;  %v1555_v13 = vmul.f32 0.5, %v8496_v3  ;;  %v1536_v11 = vmul.f32 0.5, %v8499_v9  ;;  %v1537_v24 = vmul.f32 0.5, %v8502_v37 }
 0x297   : > { %7263 = vtanh.f32 %v1532_v4  ;;  %v1422_v14 = vmul.f32 %v8419_v2, %v7981_v5  ;;  %v1423_v15 = vmul.f32 %v8419_v2, %v7989_v19  ;;  %v1404_v30 = vmul.f32 %v8419_v2, %v7878_v32 }
 0x298   : > { %7265 = vtanh.f32 %v1533_v61  ;;  %v1405_v60 = vmul.f32 %v8419_v2, %v7883_v36  ;;  %v1424_v42 = vmul.f32 %v8419_v2, %v7996_v28  ;;  %v1425_v5 = vmul.f32 %v8419_v2, %v8004_v40 }
 0x299   : > { %7267 = vtanh.f32 %v1552_v10  ;;  %v8527_v19 = vadd.f32 %v8436_v12, %v1422_v14  ;;  %v8530_v32 = vadd.f32 %v8436_v12, %v1423_v15  ;;  %v8533_v33 = vadd.f32 %v8436_v12, %v1404_v30 }
 0x29a   : > { %7269 = vtanh.f32 %v1553_v48  ;;  %v8536_v36 = vadd.f32 %v8436_v12, %v1405_v60  ;;  %v8539_v28 = vadd.f32 %v8436_v12, %v1424_v42  ;;  %v8542_v40 = vadd.f32 %v8436_v12, %v1425_v5  ;;  %v12504_v60 = vld [vmem:[#allocation8_spill] sm:$0xff] }
 0x29b   : > { %7271 = vtanh.f32 %v1534_v0  ;;  %v1556_v27 = vmul.f32 0.5, %v8527_v19  ;;  %v1557_v4 = vmul.f32 0.5, %v8530_v32  ;;  %v1538_v61 = vmul.f32 0.5, %v8533_v33 }
 0x29c   : > { %7273 = vtanh.f32 %v1535_v18  ;;  %v1539_v10 = vmul.f32 0.5, %v8536_v36  ;;  %v1558_v48 = vmul.f32 0.5, %v8539_v28  ;;  %v1559_v14 = vmul.f32 0.5, %v8542_v40 }
 0x29d   : > { %7275 = vtanh.f32 %v1554_v20  ;;  %v1406_v15 = vmul.f32 %v8419_v2, %v7887_v39  ;;  %v1407_v0 = vmul.f32 %v8419_v2, %v7892_v43  ;;  %v1426_v30 = vmul.f32 %v8419_v2, %v8011_v51 }
 0x29e   : > { %7277 = vtanh.f32 %v1555_v13  ;;  %v1427_v18 = vmul.f32 %v8419_v2, %v8019_v62  ;;  %v1408_v7 = vmul.f32 %v8419_v2, %v7896_v46  ;;  %v1409_v42 = vmul.f32 %v8419_v2, %v12504_v60 }
 0x29f   : > { %7279 = vtanh.f32 %v1536_v11  ;;  %v8563_v20 = vadd.f32 %v8436_v12, %v1406_v15  ;;  %v8566_v39 = vadd.f32 %v8436_v12, %v1407_v0  ;;  %v8569_v43 = vadd.f32 %v8436_v12, %v1426_v30 }
 0x2a0   : > { %v7256_v51 = vpop.eup %7255  ;;  %7281 = vtanh.f32 %v1537_v24  ;;  %v8572_v62 = vadd.f32 %v8436_v12, %v1427_v18  ;;  %v8575_v46 = vadd.f32 %v8436_v12, %v1408_v7  ;;  %v8578_v13 = vadd.f32 %v8436_v12, %v1409_v42 }
 0x2a1   : > { %v7258_v11 = vpop.eup %7257  ;;  %v1658_v5 = vmul.f32 0.5, %v7256_v51  ;;  %7283 = vtanh.f32 %v1556_v27  ;;  %v1540_v15 = vmul.f32 0.5, %v8563_v20  ;;  %v1541_v0 = vmul.f32 0.5, %v8566_v39 }
 0x2a2   : > { %v7260_v30 = vpop.eup %7259  ;;  %v1659_v60 = vmul.f32 0.5, %v7258_v11  ;;  %7285 = vtanh.f32 %v1557_v4  ;;  %v1560_v24 = vmul.f32 0.5, %v8569_v43  ;;  %v1561_v18 = vmul.f32 0.5, %v8572_v62 }
 0x2a3   : > { %v7262_v26 = vpop.eup %7261  ;;  %v1722_v7 = vadd.f32 0.5, %v1658_v5  ;;  %v1678_v52 = vmul.f32 0.5, %v7260_v30  ;;  %7287 = vtanh.f32 %v1538_v61  ;;  %v1542_v42 = vmul.f32 0.5, %v8575_v46 }
 0x2a4   : > { %v7264_v35 = vpop.eup %7263  ;;  %v1723_v51 = vadd.f32 0.5, %v1659_v60  ;;  %v1679_v27 = vmul.f32 0.5, %v7262_v26  ;;  %7289 = vtanh.f32 %v1539_v10  ;;  %v8586_v50 = vmul.f32 0.5, %v8578_v13 }
 0x2a5   : > { %v7266_v31 = vpop.eup %7265  ;;  %v1786_v4 = vmul.f32 %v1722_v7, %v8453_v41  ;;  %v1742_v11 = vadd.f32 0.5, %v1678_v52  ;;  %v1660_v57 = vmul.f32 0.5, %v7264_v35  ;;  %7291 = vtanh.f32 %v1558_v48 }
 0x2a6   : > { %v7268_v56 = vpop.eup %7267  ;;  %v1787_v5 = vmul.f32 %v1723_v51, %v8456_v16  ;;  %v1743_v30 = vadd.f32 0.5, %v1679_v27  ;;  %v1661_v61 = vmul.f32 0.5, %v7266_v31  ;;  %7293 = vtanh.f32 %v1559_v14 }
 0x2a7   : > { %v7270_v1 = vpop.eup %7269  ;;  %v1806_v60 = vmul.f32 %v1742_v11, %v8459_v22  ;;  %v1724_v26 = vadd.f32 0.5, %v1660_v57  ;;  %v1680_v10 = vmul.f32 0.5, %v7268_v56  ;;  %7295 = vtanh.f32 %v1540_v15 }
 0x2a8   : > { %v7272_v23 = vpop.eup %7271  ;;  %v1850_v8 = vpack.c.bf16 %v1787_v5, %v1786_v4  ;;  %v1807_v44 = vmul.f32 %v1743_v30, %v8462_v49  ;;  %v1725_v41 = vadd.f32 0.5, %v1661_v61  ;;  %v1681_v52 = vmul.f32 0.5, %v7270_v1 }
 0x2a9   : > { %v7274_v35 = vpop.eup %7273  ;;  %v1788_v48 = vmul.f32 %v1724_v26, %v8465_v59  ;;  %v1744_v7 = vadd.f32 0.5, %v1680_v10  ;;  %v1662_v16 = vmul.f32 0.5, %v7272_v23  ;;  %7297 = vtanh.f32 %v1541_v0 }
 0x2aa   : > { %v7276_v31 = vpop.eup %7275  ;;  %6875 = vmatprep.mubr.msk.bf16.mxu0 %vm742_vm1, %v1850_v8  ;;  %v1860_v14 = vpack.c.bf16 %v1807_v44, %v1806_v60  ;;  %v1789_v57 = vmul.f32 %v1725_v41, %v8468_v25  ;;  %v1745_v56 = vadd.f32 0.5, %v1681_v52  ;;  %v1663_v22 = vmul.f32 0.5, %v7274_v35 }
 0x2ab   : > { %v7278_v15 = vpop.eup %7277  ;;  %v1808_v51 = vmul.f32 %v1744_v7, %v8471_v29  ;;  %v1726_v49 = vadd.f32 0.5, %v1662_v16  ;;  %v1682_v27 = vmul.f32 0.5, %v7276_v31  ;;  %7299 = vtanh.f32 %v1560_v24 }
 0x2ac   : > { %v7280_v1 = vpop.eup %7279  ;;  %6895 = vmatprep.mubr.msk.bf16.mxu1 %vm742_vm1, %v1860_v14  ;;  %v1851_v59 = vpack.c.bf16 %v1789_v57, %v1788_v48  ;;  %v1809_v23 = vmul.f32 %v1745_v56, %v8474_v38  ;;  %v1727_v0 = vadd.f32 0.5, %v1663_v22  ;;  %v1683_v4 = vmul.f32 0.5, %v7278_v15 }
 0x2ad   : > { %v7282_v8 = vpop.eup %7281  ;;  %v1790_v44 = vmul.f32 %v1726_v49, %v8487_v53  ;;  %v1746_v25 = vadd.f32 0.5, %v1682_v27  ;;  %v1664_v11 = vmul.f32 0.5, %v7280_v1  ;;  %7301 = vtanh.f32 %v1561_v18 }
 0x2ae   : > { %v7284_v5 = vpop.eup %7283  ;;  %6876 = vmatmul.mubr.msk.bf16.vlgmr.msra.gmra.mxu0 %vm742_vm1, %v1851_v59  ;;  %v1861_v29 = vpack.c.bf16 %v1809_v23, %v1808_v51  ;;  %v1791_v24 = vmul.f32 %v1727_v0, %v8490_v47  ;;  %v1747_v30 = vadd.f32 0.5, %v1683_v4  ;;  %v1665_v61 = vmul.f32 0.5, %v7282_v8  ;;  %v12505_v51 = vld [vmem:[#allocation15_spill] sm:$0xff]  ;;  %v12506_v4 = vld [vmem:[#allocation16_spill] sm:$0xff] }
 0x2af   : > { %v7286_v60 = vpop.eup %7285  ;;  %v1810_v26 = vmul.f32 %v1746_v25, %v8493_v63  ;;  %v1728_v38 = vadd.f32 0.5, %v1664_v11  ;;  %v1684_v10 = vmul.f32 0.5, %v7284_v5  ;;  %7303 = vtanh.f32 %v1542_v42 }
 0x2b0   : > { %v7288_v41 = vpop.eup %7287  ;;  %6896 = vmatmul.mubr.msk.bf16.vlgmr.msra.gmra.mxu1 %vm742_vm1, %v1861_v29  ;;  %v1852_v53 = vpack.c.bf16 %v1791_v24, %v1790_v44  ;;  %v1811_v18 = vmul.f32 %v1747_v30, %v8496_v3  ;;  %v1729_v52 = vadd.f32 0.5, %v1665_v61  ;;  %v1685_v35 = vmul.f32 0.5, %v7286_v60 }
 0x2b1   : > { %v7290_v48 = vpop.eup %7289  ;;  %v1792_v7 = vmul.f32 %v1728_v38, %v8499_v9  ;;  %v1748_v47 = vadd.f32 0.5, %v1684_v10  ;;  %v1666_v16 = vmul.f32 0.5, %v7288_v41  ;;  %7305 = vtanh.f32 %v8586_v50 }
 0x2b2   : > { %v7292_v31 = vpop.eup %7291  ;;  %6879 = vmatprep.mubr.msk.bf16.mxu0 %vm742_vm1, %v1852_v53  ;;  %v1862_v63 = vpack.c.bf16 %v1811_v18, %v1810_v26  ;;  %v1793_v42 = vmul.f32 %v1729_v52, %v8502_v37  ;;  %v1749_v14 = vadd.f32 0.5, %v1685_v35  ;;  %v1667_v57 = vmul.f32 0.5, %v7290_v48  ;;  %v12508_v35 = vld [vmem:[#allocation10_spill] sm:$0xff] }
 0x2b3   : > { %v7294_v56 = vpop.eup %7293  ;;  %v1812_v3 = vmul.f32 %v1748_v47, %v8527_v19  ;;  %v1730_v22 = vadd.f32 0.5, %v1666_v16  ;;  %v1686_v15 = vmul.f32 0.5, %v7292_v31  ;;  %v1428_v9 = vmul.f32 %v8419_v2, %v12505_v51 }
 0x2b4   : > { %v7296_v49 = vpop.eup %7295  ;;  %6899 = vmatprep.mubr.msk.bf16.mxu1 %vm742_vm1, %v1862_v63  ;;  %v1853_v50 = vpack.c.bf16 %v1793_v42, %v1792_v7  ;;  %v1813_v27 = vmul.f32 %v1749_v14, %v8530_v32  ;;  %v1731_v1 = vadd.f32 0.5, %v1667_v57  ;;  %v1687_v59 = vmul.f32 0.5, %v7294_v56  ;;  %v12509_v42 = vld [vmem:[#allocation17_spill] sm:$0xff]  ;;  %v12510_v57 = vld [vmem:[#allocation18_spill] sm:$0xff] }
 0x2b5   : > { %v1794_v37 = vmul.f32 %v1730_v22, %v8533_v33  ;;  %v1750_v23 = vadd.f32 0.5, %v1686_v15  ;;  %v1668_v0 = vmul.f32 0.5, %v7296_v49  ;;  %v1429_v19 = vmul.f32 %v8419_v2, %v12506_v4  ;;  %v12512_v4 = vld [vmem:[#allocation12_spill] sm:$0xff] }
 0x2b6   : > { %v7298_v8 = vpop.eup %7297  ;;  %6880 = vmatmul.mubr.msk.bf16.gmra.mxu0 %vm742_vm1, %v1853_v50  ;;  %v1863_v44 = vpack.c.bf16 %v1813_v27, %v1812_v3  ;;  %v1795_v25 = vmul.f32 %v1731_v1, %v8536_v36  ;;  %v1751_v11 = vadd.f32 0.5, %v1687_v59  ;;  %v8619_v5 = vadd.f32 %v8436_v12, %v1428_v9  ;;  %v12507_v36 = vld [vmem:[#allocation9_spill] sm:$0xff] }
 0x2b7   : > { %v1814_v32 = vmul.f32 %v1750_v23, %v8539_v28  ;;  %v1669_v29 = vmul.f32 0.5, %v7298_v8  ;;  %v1732_v24 = vadd.f32 0.5, %v1668_v0  ;;  %v8623_v33 = vadd.f32 %v8436_v12, %v1429_v19 }
 0x2b8   : > { %v7300_v30 = vpop.eup %7299  ;;  %6900 = vmatmul.mubr.msk.bf16.gmra.mxu1 %vm742_vm1, %v1863_v44  ;;  %v1854_v61 = vpack.c.bf16 %v1795_v25, %v1794_v37  ;;  %v1815_v60 = vmul.f32 %v1751_v11, %v8542_v40  ;;  %v1562_v26 = vmul.f32 0.5, %v8619_v5  ;;  %v1410_v38 = vmul.f32 %v8419_v2, %v12507_v36  ;;  %v12511_v37 = vld [vmem:[#allocation11_spill] sm:$0xff] }
 0x2b9   : > { %v1733_v10 = vadd.f32 0.5, %v1669_v29  ;;  %v1796_v41 = vmul.f32 %v1732_v24, %v8563_v20  ;;  %v1688_v28 = vmul.f32 0.5, %v7300_v30  ;;  %v1563_v53 = vmul.f32 0.5, %v8623_v33  ;;  %v12514_v24 = vld [vmem:[#allocation20_spill] sm:$0xff] }
 0x2ba   : > { %v7302_v18 = vpop.eup %7301  ;;  %6883 = vmatprep.mubr.msk.bf16.mxu0 %vm742_vm1, %v1854_v61  ;;  %v1864_v52 = vpack.c.bf16 %v1815_v60, %v1814_v32  ;;  %7307 = vtanh.f32 %v1562_v26  ;;  %v1411_v48 = vmul.f32 %v8419_v2, %v12508_v35  ;;  %v8636_v40 = vadd.f32 %v8436_v12, %v1410_v38  ;;  %v12513_v32 = vld [vmem:[#allocation19_spill] sm:$0xff]  ;;  %v12515_v60 = vld [vmem:[#allocation13_spill] sm:$0xff] }
 0x2bb   : > { %v1797_v7 = vmul.f32 %v1733_v10, %v8566_v39  ;;  %v1689_v47 = vmul.f32 0.5, %v7302_v18  ;;  %v1752_v16 = vadd.f32 0.5, %v1688_v28  ;;  %7309 = vtanh.f32 %v1563_v53  ;;  %v12517_v18 = vld [vmem:[#allocation21_spill] sm:$0xff] }
 0x2bc   : > { %v7304_v20 = vpop.eup %7303  ;;  %6903 = vmatprep.mubr.msk.bf16.mxu1 %vm742_vm1, %v1864_v52  ;;  %v8641_v31 = vadd.f32 %v8436_v12, %v1411_v48  ;;  %v1544_v63 = vmul.f32 0.5, %v8636_v40  ;;  %v1430_v14 = vmul.f32 %v8419_v2, %v12509_v42  ;;  %v1431_v56 = vmul.f32 %v8419_v2, %v12510_v57 }
 0x2bd   : > { %v1855_v3 = vpack.c.bf16 %v1797_v7, %v1796_v41  ;;  %v1753_v22 = vadd.f32 0.5, %v1689_v47  ;;  %v1816_v39 = vmul.f32 %v1752_v16, %v8569_v43  ;;  %v1670_v15 = vmul.f32 0.5, %v7304_v20  ;;  %v12516_v41 = vld [vmem:[#allocation14_spill] sm:$0xff] }
 0x2be   : > { %v7306_v51 = vpop.eup %7305  ;;  %v1545_v9 = vmul.f32 0.5, %v8641_v31  ;;  %7311 = vtanh.f32 %v1544_v63  ;;  %v8651_v49 = vadd.f32 %v8436_v12, %v1430_v14  ;;  %v8654_v50 = vadd.f32 %v8436_v12, %v1431_v56  ;;  %v12518_v20 = vld [vmem:[#allocation22_spill] sm:$0xff]  ;;  %v12519_v14 = vld [vmem:[#allocation23_spill] sm:$0xff] }
 0x2bf   : > { %6884 = vmatmul.mubr.msk.bf16.gmra.mxu0 %vm742_vm1, %v1855_v3  ;;  %v1817_v27 = vmul.f32 %v1753_v22, %v8572_v62  ;;  %v1671_v1 = vmul.f32 0.5, %v7306_v51  ;;  %v1734_v59 = vadd.f32 0.5, %v1670_v15  ;;  %v1412_v43 = vmul.f32 %v8419_v2, %v12511_v37 }
 0x2c0   : > { %7313 = vtanh.f32 %v1545_v9  ;;  %v1564_v23 = vmul.f32 0.5, %v8651_v49  ;;  %v1565_v0 = vmul.f32 0.5, %v8654_v50  ;;  %v1413_v19 = vmul.f32 %v8419_v2, %v12512_v4  ;;  %v12521_v4 = vld [vmem:[#allocation25_spill] sm:$0xff] }
 0x2c1   : > { %v1865_v8 = vpack.c.bf16 %v1817_v27, %v1816_v39  ;;  %v1735_v44 = vadd.f32 0.5, %v1671_v1  ;;  %v1798_v25 = vmul.f32 %v1734_v59, %v8575_v46  ;;  %v8666_v11 = vadd.f32 %v8436_v12, %v1412_v43  ;;  %v12520_v39 = vld [vmem:[#allocation24_spill] sm:$0xff] }
 0x2c2   : > { %7315 = vtanh.f32 %v1564_v23  ;;  %v8669_v62 = vadd.f32 %v8436_v12, %v1413_v19  ;;  %v1432_v29 = vmul.f32 %v8419_v2, %v12513_v32  ;;  %v1433_v30 = vmul.f32 %v8419_v2, %v12514_v24 }
 0x2c3   : > { %6904 = vmatmul.mubr.msk.bf16.gmra.mxu1 %vm742_vm1, %v1865_v8  ;;  %v1799_v61 = vmul.f32 %v1735_v44, %v8578_v13  ;;  %7317 = vtanh.f32 %v1565_v0  ;;  %v1546_v46 = vmul.f32 0.5, %v8666_v11  ;;  %v1414_v26 = vmul.f32 %v8419_v2, %v12515_v60 }
 0x2c4   : > { %v1547_v36 = vmul.f32 0.5, %v8669_v62  ;;  %v8682_v38 = vadd.f32 %v8436_v12, %v1432_v29  ;;  %v8685_v10 = vadd.f32 %v8436_v12, %v1433_v30  ;;  %v1415_v28 = vmul.f32 %v8419_v2, %v12516_v41 }
 0x2c5   : > { %v1856_v53 = vpack.c.bf16 %v1799_v61, %v1798_v25  ;;  %7319 = vtanh.f32 %v1546_v46  ;;  %v8690_v13 = vadd.f32 %v8436_v12, %v1414_v26  ;;  %v1434_v52 = vmul.f32 %v8419_v2, %v12517_v18 }
 0x2c6   : > { %7321 = vtanh.f32 %v1547_v36  ;;  %v1566_v35 = vmul.f32 0.5, %v8682_v38  ;;  %v1567_v48 = vmul.f32 0.5, %v8685_v10  ;;  %v8697_v7 = vadd.f32 %v8436_v12, %v1415_v28 }
 0x2c7   : > { %v7308_v47 = vpop.eup %7307  ;;  %6887 = vmatprep.mubr.msk.bf16.mxu0 %vm742_vm1, %v1856_v53  ;;  %v1548_v16 = vmul.f32 0.5, %v8690_v13  ;;  %v1435_v63 = vmul.f32 %v8419_v2, %v12518_v20  ;;  %v8704_v42 = vadd.f32 %v8436_v12, %v1434_v52  ;;  %v1436_v57 = vmul.f32 %v8419_v2, %v12519_v14 }
 0x2c8   : > { %v7310_v56 = vpop.eup %7309  ;;  %v1690_v3 = vmul.f32 0.5, %v7308_v47  ;;  %7323 = vtanh.f32 %v1566_v35  ;;  %v1549_v22 = vmul.f32 0.5, %v8697_v7  ;;  %v1437_v15 = vmul.f32 %v8419_v2, %v12520_v39 }
 0x2c9   : > { %v1691_v51 = vmul.f32 0.5, %v7310_v56  ;;  %7325 = vtanh.f32 %v1567_v48  ;;  %v8712_v9 = vadd.f32 %v8436_v12, %v1435_v63  ;;  %v1568_v27 = vmul.f32 0.5, %v8704_v42  ;;  %v12522_v48 = vld [vmem:[#allocation26_spill] sm:$0xff] }
 0x2ca   : > { %v1754_v1 = vadd.f32 0.5, %v1690_v3  ;;  %7327 = vtanh.f32 %v1548_v16  ;;  %v8716_v59 = vadd.f32 %v8436_v12, %v1436_v57  ;;  %v8719_v37 = vadd.f32 %v8436_v12, %v1437_v15 }
 0x2cb   : > { %v7312_v43 = vpop.eup %7311  ;;  %v1755_v23 = vadd.f32 0.5, %v1691_v51  ;;  %7329 = vtanh.f32 %v1549_v22  ;;  %v1569_v0 = vmul.f32 0.5, %v8712_v9  ;;  %v1438_v19 = vmul.f32 %v8419_v2, %v12521_v4 }
 0x2cc   : > { %v1818_v8 = vmul.f32 %v1754_v1, %v8619_v5  ;;  %v1672_v44 = vmul.f32 0.5, %v7312_v43  ;;  %7331 = vtanh.f32 %v1568_v27  ;;  %v1570_v25 = vmul.f32 0.5, %v8716_v59  ;;  %v8755_v27 = vpop.f32.mrf.mxu0 }
 0x2cd   : > { %v7314_v32 = vpop.eup %7313  ;;  %v1819_v29 = vmul.f32 %v1755_v23, %v8623_v33  ;;  %7333 = vtanh.f32 %v1569_v0  ;;  %v1571_v24 = vmul.f32 0.5, %v8719_v37  ;;  %v1439_v30 = vmul.f32 %v8419_v2, %v8109_v55 }
 0x2ce   : > { %v1673_v61 = vmul.f32 0.5, %v7314_v32  ;;  %v1736_v46 = vadd.f32 0.5, %v1672_v44  ;;  %7335 = vtanh.f32 %v1570_v25  ;;  %v8731_v60 = vadd.f32 %v8436_v12, %v1438_v19 }
 0x2cf   : > { %v7316_v5 = vpop.eup %7315  ;;  %v1866_v26 = vpack.c.bf16 %v1819_v29, %v1818_v8  ;;  %7337 = vtanh.f32 %v1571_v24  ;;  %v8734_v36 = vadd.f32 %v8436_v12, %v1439_v30  ;;  %v1440_v33 = vmul.f32 %v8419_v2, %v8116_v17  ;;  %v6866_v8 = vpop.f32.mrf.mxu0 }
 0x2d0   : > { %v7318_v41 = vpop.eup %7317  ;;  %v1737_v28 = vadd.f32 0.5, %v1673_v61  ;;  %v1800_v53 = vmul.f32 %v1736_v46, %v8636_v40  ;;  %v1692_v55 = vmul.f32 0.5, %v7316_v5  ;;  %v1572_v18 = vmul.f32 0.5, %v8731_v60 }
 0x2d1   : > { %6907 = vmatprep.mubr.msk.bf16.mxu1 %vm742_vm1, %v1866_v26  ;;  %v1693_v52 = vmul.f32 0.5, %v7318_v41  ;;  %v1573_v35 = vmul.f32 0.5, %v8734_v36  ;;  %v1441_v47 = vmul.f32 %v8419_v2, %v12522_v48  ;;  %v8745_v16 = vadd.f32 %v8436_v12, %v1440_v33 }
 0x2d2   : > { %v7320_v20 = vpop.eup %7319  ;;  %v1801_v17 = vmul.f32 %v1737_v28, %v8641_v31  ;;  %v1756_v63 = vadd.f32 0.5, %v1692_v55  ;;  %7339 = vtanh.f32 %v1572_v18  ;;  %v1442_v40 = vmul.f32 %v8419_v2, %v8131_v54 }
 0x2d3   : > { %v7322_v14 = vpop.eup %7321  ;;  %v1757_v57 = vadd.f32 0.5, %v1693_v52  ;;  %v1674_v56 = vmul.f32 0.5, %v7320_v20  ;;  %7341 = vtanh.f32 %v1573_v35  ;;  %v8751_v3 = vadd.f32 %v8436_v12, %v1441_v47 }
 0x2d4   : > { %v1857_v22 = vpack.c.bf16 %v1801_v17, %v1800_v53  ;;  %v1820_v39 = vmul.f32 %v1756_v63, %v8651_v49  ;;  %v1675_v15 = vmul.f32 0.5, %v7322_v14  ;;  %v1574_v51 = vmul.f32 0.5, %v8745_v16 }
 0x2d5   : > { %v7324_v31 = vpop.eup %7323  ;;  %v1821_v1 = vmul.f32 %v1757_v57, %v8654_v50  ;;  %v1738_v43 = vadd.f32 0.5, %v1674_v56  ;;  %v1575_v54 = vmul.f32 0.5, %v8751_v3  ;;  %v1443_v23 = vmul.f32 %v8419_v2, %v8139_v21 }
 0x2d6   : > { %v7326_v0 = vpop.eup %7325  ;;  %6888 = vmatmul.mubr.msk.bf16.gmra.mxu0 %vm742_vm1, %v1857_v22  ;;  %v1739_v4 = vadd.f32 0.5, %v1675_v15  ;;  %v1694_v19 = vmul.f32 0.5, %v7324_v31  ;;  %7343 = vtanh.f32 %v1574_v51  ;;  %v8763_v49 = vadd.f32 %v8436_v12, %v1442_v40 }
 0x2d7   : > { %v7328_v44 = vpop.eup %7327  ;;  %v1867_v25 = vpack.c.bf16 %v1821_v1, %v1820_v39  ;;  %v1802_v50 = vmul.f32 %v1738_v43, %v8666_v11  ;;  %v1695_v32 = vmul.f32 0.5, %v7326_v0  ;;  %7345 = vtanh.f32 %v1575_v54 }
 0x2d8   : > { %v7330_v29 = vpop.eup %7329  ;;  %v1803_v24 = vmul.f32 %v1739_v4, %v8669_v62  ;;  %v1758_v21 = vadd.f32 0.5, %v1694_v19  ;;  %v1676_v30 = vmul.f32 0.5, %v7328_v44  ;;  %v8768_v61 = vadd.f32 %v8436_v12, %v1443_v23 }
 0x2d9   : > { %v7332_v46 = vpop.eup %7331  ;;  %6908 = vmatmul.mubr.msk.bf16.gmra.mxu1 %vm742_vm1, %v1867_v25  ;;  %v1759_v5 = vadd.f32 0.5, %v1695_v32  ;;  %v1677_v26 = vmul.f32 0.5, %v7330_v29  ;;  %v1576_v33 = vmul.f32 0.5, %v8763_v49  ;;  %v1444_v11 = vmul.f32 %v8419_v2, %v8146_v34 }
 0x2da   : > { %v7334_v41 = vpop.eup %7333  ;;  %v1858_v28 = vpack.c.bf16 %v1803_v24, %v1802_v50  ;;  %v1822_v53 = vmul.f32 %v1758_v21, %v8682_v38  ;;  %v1740_v62 = vadd.f32 0.5, %v1676_v30  ;;  %v1696_v55 = vmul.f32 0.5, %v7332_v46  ;;  %v12524_v50 = vld [vmem:[#allocation27_spill] sm:$0xff] }
 0x2db   : > { %v7336_v18 = vpop.eup %7335  ;;  %v1823_v52 = vmul.f32 %v1759_v5, %v8685_v10  ;;  %v1741_v35 = vadd.f32 0.5, %v1677_v26  ;;  %v1697_v48 = vmul.f32 0.5, %v7334_v41  ;;  %v1577_v47 = vmul.f32 0.5, %v8768_v61  ;;  %v12525_v26 = vld [vmem:[#allocation28_spill] sm:$0xff] }
 0x2dc   : > { %v7338_v20 = vpop.eup %7337  ;;  %6891 = vmatprep.mubr.msk.bf16.mxu0 %vm742_vm1, %v1858_v28  ;;  %v1804_v17 = vmul.f32 %v1740_v62, %v8690_v13  ;;  %v1760_v63 = vadd.f32 0.5, %v1696_v55  ;;  %v1698_v34 = vmul.f32 0.5, %v7336_v18  ;;  %7347 = vtanh.f32 %v1576_v33  ;;  %v12526_v28 = vld [vmem:[#allocation29_spill] sm:$0xff] }
 0x2dd   : > { %v1868_v40 = vpack.c.bf16 %v1823_v52, %v1822_v53  ;;  %v1805_v38 = vmul.f32 %v1741_v35, %v8697_v7  ;;  %v1761_v14 = vadd.f32 0.5, %v1697_v48  ;;  %v1699_v57 = vmul.f32 0.5, %v7338_v20  ;;  %v12527_v35 = vld [vmem:[#allocation30_spill] sm:$0xff] }
 0x2de   : > { %v1824_v56 = vmul.f32 %v1760_v63, %v8704_v42  ;;  %v1762_v10 = vadd.f32 0.5, %v1698_v34  ;;  %7349 = vtanh.f32 %v1577_v47  ;;  %v1445_v22 = vmul.f32 %v8419_v2, %v8154_v58  ;;  %v12528_v34 = vld [vmem:[#allocation31_spill] sm:$0xff] }
 0x2df   : > { %v7340_v39 = vpop.eup %7339  ;;  %6911 = vmatprep.mubr.msk.bf16.mxu1 %vm742_vm1, %v1868_v40  ;;  %v1859_v15 = vpack.c.bf16 %v1805_v38, %v1804_v17  ;;  %v1825_v13 = vmul.f32 %v1761_v14, %v8712_v9  ;;  %v1763_v51 = vadd.f32 0.5, %v1699_v57  ;;  %v8786_v31 = vadd.f32 %v8436_v12, %v1444_v11  ;;  %v12529_v14 = vld [vmem:[#allocation32_spill] sm:$0xff] }
 0x2e0   : > { %v7342_v7 = vpop.eup %7341  ;;  %v1826_v1 = vmul.f32 %v1762_v10, %v8716_v59  ;;  %v1700_v43 = vmul.f32 0.5, %v7340_v39  ;;  %v8790_v42 = vadd.f32 %v8436_v12, %v1445_v22  ;;  %v1446_v58 = vmul.f32 %v8419_v2, %v8161_v6 }
 0x2e1   : > { %6892 = vmatmul.mubr.msk.bf16.gmra.mxu0 %vm742_vm1, %v1859_v15  ;;  %v1869_v54 = vpack.c.bf16 %v1825_v13, %v1824_v56  ;;  %v1827_v23 = vmul.f32 %v1763_v51, %v8719_v37  ;;  %v1701_v9 = vmul.f32 0.5, %v7342_v7  ;;  %v1578_v0 = vmul.f32 0.5, %v8786_v31 }
 0x2e2   : > { %v1764_v4 = vadd.f32 0.5, %v1700_v43  ;;  %v1579_v19 = vmul.f32 0.5, %v8790_v42  ;;  %v1447_v59 = vmul.f32 %v8419_v2, %v8169_v45  ;;  %v8801_v8 = vadd.f32 %v8436_v12, %v1446_v58  ;;  %v12531_v58 = vld [vmem:[#allocation34_spill] sm:$0xff] }
 0x2e3   : > { %v12523_v44 = vmov 0.0   ;;  %v7344_v6 = vpop.eup %7343  ;;  %6912 = vmatmul.mubr.msk.bf16.gmra.mxu1 %vm742_vm1, %v1869_v54  ;;  %v1870_v25 = vpack.c.bf16 %v1827_v23, %v1826_v1  ;;  %v1765_v37 = vadd.f32 0.5, %v1701_v9  ;;  %7351 = vtanh.f32 %v1578_v0  ;;  %v12530_v1 = vld [vmem:[#allocation33_spill] sm:$0xff] }
 0x2e4   : > { %6947 = vmatprep.mubr.msk.f32.mxu0 %vm7615_vm0, %v12523_v44  ;;  %v1448_v32 = vmul.f32 %v8419_v2, %v12524_v50  ;;  %v7346_v29 = vpop.eup %7345  ;;  %v1828_v24 = vmul.f32 %v1764_v4, %v8731_v60  ;;  %v1702_v21 = vmul.f32 0.5, %v7344_v6  ;;  %7353 = vtanh.f32 %v1579_v19  ;;  %v12533_v50 = vld [vmem:[#allocation36_spill] sm:$0xff] }
 0x2e5   : > { %v8810_v45 = vadd.f32 %v8436_v12, %v1447_v59  ;;  %6915 = vmatprep.mubr.msk.bf16.mxu1 %vm742_vm1, %v1870_v25  ;;  %v1829_v30 = vmul.f32 %v1765_v37, %v8734_v36  ;;  %v1703_v46 = vmul.f32 0.5, %v7346_v29  ;;  %v1580_v5 = vmul.f32 0.5, %v8801_v8  ;;  %v12532_v59 = vld [vmem:[#allocation35_spill] sm:$0xff] }
 0x2e6   : > { %v1449_v33 = vmul.f32 %v8419_v2, %v12525_v26  ;;  %v1766_v11 = vadd.f32 0.5, %v1702_v21  ;;  %v8819_v60 = vadd.f32 %v8436_v12, %v1448_v32  ;;  %v1450_v53 = vmul.f32 %v8419_v2, %v12526_v28  ;;  %v12534_v32 = vld [vmem:[#allocation37_spill] sm:$0xff] }
 0x2e7   : > { %v1581_v41 = vmul.f32 0.5, %v8810_v45  ;;  %v1871_v62 = vpack.c.bf16 %v1829_v30, %v1828_v24  ;;  %v1767_v55 = vadd.f32 0.5, %v1703_v46  ;;  %7355 = vtanh.f32 %v1580_v5 }
 0x2e8   : > { %v8824_v36 = vadd.f32 %v8436_v12, %v1449_v33  ;;  %v1830_v18 = vmul.f32 %v1766_v11, %v8745_v16  ;;  %v1582_v52 = vmul.f32 0.5, %v8819_v60  ;;  %v1451_v48 = vmul.f32 %v8419_v2, %v12527_v35  ;;  %v12535_v11 = vld [vmem:[#allocation38_spill] sm:$0xff] }
 0x2e9   : > { %7357 = vtanh.f32 %v1581_v41  ;;  %v7348_v47 = vpop.eup %7347  ;;  %v1831_v20 = vmul.f32 %v1767_v55, %v8751_v3  ;;  %v8833_v63 = vadd.f32 %v8436_v12, %v1450_v53  ;;  %v1452_v40 = vmul.f32 %v8419_v2, %v12528_v34 }
 0x2ea   : > { %v1583_v17 = vmul.f32 0.5, %v8824_v36  ;;  %v1704_v38 = vmul.f32 0.5, %v7348_v47  ;;  %7359 = vtanh.f32 %v1582_v52  ;;  %v8838_v16 = vadd.f32 %v8436_v12, %v1451_v48 }
 0x2eb   : > { %v1453_v57 = vmul.f32 %v8419_v2, %v12529_v14  ;;  %v7350_v56 = vpop.eup %7349  ;;  %6916 = vmatmul.mubr.msk.bf16.gmra.mxu1 %vm742_vm1, %v1871_v62  ;;  %v1872_v3 = vpack.c.bf16 %v1831_v20, %v1830_v18  ;;  %v1584_v10 = vmul.f32 0.5, %v8833_v63  ;;  %v8845_v22 = vadd.f32 %v8436_v12, %v1452_v40 }
 0x2ec   : > { %7361 = vtanh.f32 %v1583_v17  ;;  %v1705_v39 = vmul.f32 0.5, %v7350_v56  ;;  %v1768_v15 = vadd.f32 0.5, %v1704_v38  ;;  %v1585_v13 = vmul.f32 0.5, %v8838_v16 }
 0x2ed   : > { %v8849_v51 = vadd.f32 %v8436_v12, %v1453_v57  ;;  %6919 = vmatprep.mubr.msk.bf16.mxu1 %vm742_vm1, %v1872_v3  ;;  %7363 = vtanh.f32 %v1584_v10  ;;  %v1586_v7 = vmul.f32 0.5, %v8845_v22  ;;  %v1454_v43 = vmul.f32 %v8419_v2, %v12530_v1 }
 0x2ee   : > { %v1455_v54 = vmul.f32 %v8419_v2, %v12531_v58  ;;  %v1769_v23 = vadd.f32 0.5, %v1705_v39  ;;  %v1832_v9 = vmul.f32 %v1768_v15, %v8763_v49  ;;  %7365 = vtanh.f32 %v1585_v13 }
 0x2ef   : > { %v1587_v0 = vmul.f32 0.5, %v8849_v51  ;;  %7367 = vtanh.f32 %v1586_v7  ;;  %v8860_v4 = vadd.f32 %v8436_v12, %v1454_v43  ;;  %v1456_v6 = vmul.f32 %v8419_v2, %v12532_v59 }
 0x2f0   : > { %v8863_v19 = vadd.f32 %v8436_v12, %v1455_v54  ;;  %v7352_v25 = vpop.eup %7351  ;;  %v1833_v37 = vmul.f32 %v1769_v23, %v8768_v61  ;;  %v1457_v49 = vmul.f32 %v8419_v2, %v12533_v50  ;;  %v1458_v29 = vmul.f32 %v8419_v2, %v12534_v32  ;;  %v12536_v32 = vld [vmem:[#allocation39_spill] sm:$0xff] }
 0x2f1   : > { %7369 = vtanh.f32 %v1587_v0  ;;  %v7354_v24 = vpop.eup %7353  ;;  %v1706_v21 = vmul.f32 0.5, %v7352_v25  ;;  %v1588_v30 = vmul.f32 0.5, %v8860_v4  ;;  %v8875_v5 = vadd.f32 %v8436_v12, %v1456_v6 }
 0x2f2   : > { %v1589_v46 = vmul.f32 0.5, %v8863_v19  ;;  %v1873_v26 = vpack.c.bf16 %v1833_v37, %v1832_v9  ;;  %v1707_v33 = vmul.f32 0.5, %v7354_v24  ;;  %v8878_v61 = vadd.f32 %v8436_v12, %v1457_v49 }
 0x2f3   : > { %v1459_v41 = vmul.f32 %v8419_v2, %v12535_v11  ;;  %v1770_v28 = vadd.f32 0.5, %v1706_v21  ;;  %7371 = vtanh.f32 %v1588_v30  ;;  %v1590_v53 = vmul.f32 0.5, %v8875_v5 }
 0x2f4   : > { %v8884_v62 = vadd.f32 %v8436_v12, %v1458_v29  ;;  %v7356_v55 = vpop.eup %7355  ;;  %6920 = vmatmul.mubr.msk.bf16.gmra.mxu1 %vm742_vm1, %v1873_v26  ;;  %v1771_v18 = vadd.f32 0.5, %v1707_v33  ;;  %7373 = vtanh.f32 %v1589_v46  ;;  %v1591_v52 = vmul.f32 0.5, %v8878_v61 }
 0x2f5   : > { %v8889_v35 = vadd.f32 %v8436_v12, %v1459_v41  ;;  %v1834_v2 = vmul.f32 %v1770_v28, %v8786_v31  ;;  %v1708_v47 = vmul.f32 0.5, %v7356_v55  ;;  %7375 = vtanh.f32 %v1590_v53  ;;  %v6474_v31 = vld [vmem:[%s12254_s9] ss:$0 sm:$0xff] }
 0x2f6   : > { %v7358_v48 = vpop.eup %7357  ;;  %v1592_v20 = vmul.f32 0.5, %v8884_v62  ;;  %v1835_v17 = vmul.f32 %v1771_v18, %v8790_v42  ;;  %7377 = vtanh.f32 %v1591_v52  ;;  %v7617_v42 = vmov 1966171168  }
 0x2f7   : > { %v1709_v34 = vmul.f32 0.5, %v7358_v48  ;;  %v1593_v40 = vmul.f32 0.5, %v8889_v35  ;;  %v7360_v38 = vpop.eup %7359  ;;  %v1772_v14 = vadd.f32 0.5, %v1708_v47  ;;  %v3004_v15 = vunpack.c.l.s4 %v7617_v42 }
 0x2f8   : > { %7379 = vtanh.f32 %v1592_v20  ;;  %v1874_v56 = vpack.c.bf16 %v1835_v17, %v1834_v2  ;;  %v1710_v3 = vmul.f32 0.5, %v7360_v38  ;;  %v1973_v23 = vadd.f32 %v6474_v31, %v8755_v27  ;;  %v12537_v20 = vld [vmem:[#allocation40_spill] sm:$0xff] }
 0x2f9   : > { %v7362_v57 = vpop.eup %7361  ;;  %v1773_v12 = vadd.f32 0.5, %v1709_v34  ;;  %7381 = vtanh.f32 %v1593_v40  ;;  %v1836_v10 = vmul.f32 %v1772_v14, %v8801_v8  ;;  %v3005_v9 = vunpack.c.0.s8 %v3004_v15 }
 0x2fa   : > { %v1711_v39 = vmul.f32 0.5, %v7362_v57  ;;  %v7364_v13 = vpop.eup %7363  ;;  %6923 = vmatprep.mubr.msk.bf16.mxu1 %vm742_vm1, %v1874_v56  ;;  %v1774_v1 = vadd.f32 0.5, %v1710_v3  ;;  %v3002_v21 = vcombine.high %v1973_v23, %v1973_v23 }
 0x2fb   : > { %v1837_v7 = vmul.f32 %v1773_v12, %v8810_v45  ;;  %v7366_v43 = vpop.eup %7365  ;;  %v1712_v54 = vmul.f32 0.5, %v7364_v13  ;;  %v8905_v29 = vsub.s32 %v3005_v9, %v12536_v32 }
 0x2fc   : > { %v1775_v58 = vadd.f32 0.5, %v1711_v39  ;;  %v7368_v0 = vpop.eup %7367  ;;  %v1838_v6 = vmul.f32 %v1774_v1, %v8819_v60  ;;  %v1713_v8 = vmul.f32 0.5, %v7366_v43 }
 0x2fd   : > { %v1875_v59 = vpack.c.bf16 %v1837_v7, %v1836_v10  ;;  %v1776_v50 = vadd.f32 0.5, %v1712_v54  ;;  %v1714_v49 = vmul.f32 0.5, %v7368_v0  ;;  %v3009_v60 = vrot.slane %v1973_v23, %v8905_v29 }
 0x2fe   : > { %v7370_v25 = vpop.eup %7369  ;;  %v1839_v37 = vmul.f32 %v1775_v58, %v8824_v36  ;;  %v1777_v45 = vadd.f32 0.5, %v1713_v8  ;;  %v8916_v48 = vrot.slane %v3002_v21, %v8905_v29 }
 0x2ff   : > { %6924 = vmatmul.mubr.msk.bf16.gmra.mxu1 %vm742_vm1, %v1875_v59  ;;  %v1715_v24 = vmul.f32 0.5, %v7370_v25  ;;  %v1840_v30 = vmul.f32 %v1776_v50, %v8833_v63  ;;  %v1778_v46 = vadd.f32 0.5, %v1714_v49  ;;  %v3017_v53 = vcombine.high %v3009_v60, %v3009_v60 }
 0x300   : > { %v1876_v27 = vpack.c.bf16 %v1839_v37, %v1838_v6  ;;  %v7372_v26 = vpop.eup %7371  ;;  %v1841_v33 = vmul.f32 %v1777_v45, %v8838_v16  ;;  %v3025_v55 = vrot.slane %v3009_v60, %v8905_v29  ;;  %v8928_v39 = vrot.slane %v8916_v48, %v8905_v29 }
 0x301   : > { %v1779_v36 = vadd.f32 0.5, %v1715_v24  ;;  %v7374_v11 = vpop.eup %7373  ;;  %v1842_v41 = vmul.f32 %v1778_v46, %v8845_v22  ;;  %v1716_v28 = vmul.f32 0.5, %v7372_v26  ;;  %v3039_v57 = vrot.slane %v3017_v53, %v8905_v29 }
 0x302   : > { %6927 = vmatprep.mubr.msk.bf16.mxu1 %vm742_vm1, %v1876_v27  ;;  %v7376_v18 = vpop.eup %7375  ;;  %v1717_v63 = vmul.f32 0.5, %v7374_v11  ;;  %v1877_v47 = vpack.c.bf16 %v1841_v33, %v1840_v30  ;;  %v3054_v17 = vrot.slane %v3025_v55, %v12537_v20  ;;  %v3047_v34 = vcombine.high %v3025_v55, %v3025_v55 }
 0x303   : > { %v1843_v52 = vmul.f32 %v1779_v36, %v8849_v51  ;;  %v7378_v2 = vpop.eup %7377  ;;  %v1718_v16 = vmul.f32 0.5, %v7376_v18  ;;  %v1780_v38 = vadd.f32 0.5, %v1716_v28  ;;  %v3058_v10 = vrot.slane %v3039_v57, %v12537_v20 }
 0x304   : > { %v1781_v22 = vadd.f32 0.5, %v1717_v63  ;;  %v1719_v14 = vmul.f32 0.5, %v7378_v2  ;;  %3083 = vrot.lane.b32.xlu0 %v3054_v17, %s7616_s27  ;;  %v3062_v51 = vrot.slane %v3047_v34, %v12537_v20  ;;  %v3049_v42 = vcombine.high %v3039_v57, %v3039_v57  ;;  %v9093_v17 = vpop.permute.xlu0 %2450 }
 0x305   : > { %v7380_v40 = vpop.eup %7379  ;;  %v1878_v12 = vpack.c.bf16 %v1843_v52, %v1842_v41  ;;  %v1782_v3 = vadd.f32 0.5, %v1718_v16  ;;  %v1844_v15 = vmul.f32 %v1780_v38, %v8860_v4  ;;  %v3070_v54 = vrot.slane %v8928_v39, %v12537_v20  ;;  %12548 = vst [vmem:[#allocation20_spill] sm:$0xff] %v9093_v17 }
 0x306   : > { %v7382_v56 = vpop.eup %7381  ;;  %v1783_v31 = vadd.f32 0.5, %v1719_v14  ;;  %3087 = vrot.lane.b32.xlu1 %v3062_v51, %s7616_s27  ;;  %v1845_v13 = vmul.f32 %v1781_v22, %v8863_v19  ;;  %v1720_v7 = vmul.f32 0.5, %v7380_v40  ;;  %v3066_v23 = vrot.slane %v3049_v42, %v12537_v20 }
 0x307   : > { %6928 = vmatmul.mubr.msk.bf16.gmra.mxu1 %vm742_vm1, %v1877_v47  ;;  %v1721_v1 = vmul.f32 0.5, %v7382_v56  ;;  %v1846_v43 = vmul.f32 %v1782_v3, %v8875_v5 }
 0x308   : > { %6931 = vmatprep.mubr.msk.bf16.mxu1 %vm742_vm1, %v1878_v12  ;;  %v1847_v58 = vmul.f32 %v1783_v31, %v8878_v61  ;;  %3085 = vrot.lane.b32.xlu0 %v3058_v10, %s7616_s27  ;;  %v1879_v9 = vpack.c.bf16 %v1845_v13, %v1844_v15  ;;  %v1784_v0 = vadd.f32 0.5, %v1720_v7  ;;  %v9103_v40 = vpop.permute.xlu0 %2934  ;;  %v3018_v13 = vcombine.high %v8916_v48, %v8916_v48 }
 0x309   : > { %v1785_v4 = vadd.f32 0.5, %v1721_v1 }
 0x30a   : > { %3091 = vrot.lane.b32.xlu1 %v3070_v54, %s7616_s27  ;;  %v1880_v59 = vpack.c.bf16 %v1847_v58, %v1846_v43  ;;  %v1848_v19 = vmul.f32 %v1784_v0, %v8884_v62  ;;  %v9166_v54 = vrot.slane %v3018_v13, %v8905_v29 }
 0x30b   : > { %v1849_v5 = vmul.f32 %v1785_v4, %v8889_v35 }
 0x30c   : > { %3089 = vrot.lane.b32.xlu0 %v3066_v23, %s7616_s27  ;;  %v3074_v4 = vrot.slane %v9166_v54, %v12537_v20 }
 0x30d   : > { %v1881_v61 = vpack.c.bf16 %v1849_v5, %v1848_v19 }
 0x30f   : > { %6932 = vmatmul.mubr.msk.bf16.gmra.mxu1 %vm742_vm1, %v1879_v9 }
 0x310   : > { %6935 = vmatprep.mubr.msk.bf16.mxu1 %vm742_vm1, %v1880_v59 }
 0x317   : > { %6936 = vmatmul.mubr.msk.bf16.gmra.mxu1 %vm742_vm1, %v1881_v61 }
 0x36e   : > { %v8945_v6 = vpop.f32.mrf.mxu0 }
 0x36f   : > { %2456 = vrot.lane.b32.xlu0 %v8945_v6, %s7616_s27 }
 0x370   : > { %v8949_v8 = vpop.f32.mrf.mxu1  ;;  %v8955_v62 = vpop.f32.mrf.mxu0 }
 0x371   : > { %12538 = vst [vmem:[#allocation8_spill] sm:$0xff] %v8949_v8  ;;  %2496 = vrot.lane.b32.xlu1 %v8949_v8, %s7616_s27 }
 0x372   : > { %v8957_v35 = vpop.f32.mrf.mxu1  ;;  %v8963_v25 = vpop.f32.mrf.mxu0 }
 0x373   : > { %2721 = vrot.lane.b32.xlu0 %v8949_v8, %s7618_s16  ;;  %12539 = vst [vmem:[#allocation15_spill] sm:$0xff] %v8957_v35 }
 0x374   : > { %v8965_v37 = vpop.f32.mrf.mxu1  ;;  %v8971_v50 = vpop.f32.mrf.mxu0 }
 0x375   : > { %2492 = vrot.lane.b32.xlu1 %v8957_v35, %s7616_s27  ;;  %12540 = vst [vmem:[#allocation16_spill] sm:$0xff] %v8965_v37 }
 0x376   : > { %v8973_v49 = vpop.f32.mrf.mxu1  ;;  %v8979_v32 = vpop.f32.mrf.mxu0 }
 0x377   : > { %2452 = vrot.lane.b32.xlu0 %v8955_v62, %s7616_s27  ;;  %12541 = vst [vmem:[#allocation9_spill] sm:$0xff] %v8973_v49  ;;  %v9113_v22 = vpop.permute.xlu0 %3083 }
 0x378   : > { %v8985_v45 = vpop.f32.mrf.mxu1  ;;  %v8991_v24 = vpop.f32.mrf.mxu0 }
 0x379   : > { %2498 = vrot.lane.b32.xlu1 %v8965_v37, %s7616_s27  ;;  %12542 = vst [vmem:[#allocation10_spill] sm:$0xff] %v8985_v45  ;;  %v9129_v3 = vpop.permute.xlu1 %3087 }
 0x37a   : > { %v8997_v21 = vpop.f32.mrf.mxu1  ;;  %v9003_v27 = vpop.f32.mrf.mxu0  ;;  %12553 = vst [vmem:[#allocation23_spill] sm:$0xff] %v9129_v3 }
 0x37b   : > { %2717 = vrot.lane.b32.xlu0 %v8957_v35, %s7618_s16  ;;  %12543 = vst [vmem:[#allocation17_spill] sm:$0xff] %v8997_v21  ;;  %v9125_v12 = vpop.permute.xlu0 %3085 }
 0x37c   : > { %v9007_v30 = vpop.f32.mrf.mxu1  ;;  %v9013_v46 = vpop.f32.mrf.mxu0 }
 0x37d   : > { %2494 = vrot.lane.b32.xlu1 %v8973_v49, %s7616_s27  ;;  %12544 = vst [vmem:[#allocation18_spill] sm:$0xff] %v9007_v30  ;;  %v9145_v15 = vpop.permute.xlu1 %3091 }
 0x37e   : > { %v9015_v60 = vpop.f32.mrf.mxu1  ;;  %12558 = vst [vmem:[#allocation28_spill] sm:$0xff] %v9145_v15 }
 0x37f   : > { %2458 = vrot.lane.b32.xlu0 %v8963_v25, %s7616_s27  ;;  %12545 = vst [vmem:[#allocation11_spill] sm:$0xff] %v9015_v60  ;;  %v9021_v26 = vpop.f32.mrf.mxu0  ;;  %v9137_v31 = vpop.permute.xlu0 %3089 }
 0x380   : > { %12555 = vst [vmem:[#allocation25_spill] sm:$0xff] %v9137_v31 }
 0x381   : > { %2464 = vrot.lane.b32.xlu1 %v8979_v32, %s7616_s27  ;;  %v9029_v36 = vpop.f32.mrf.mxu0 }
 0x383   : > { %2723 = vrot.lane.b32.xlu0 %v8965_v37, %s7618_s16  ;;  %v9023_v33 = vpop.f32.mrf.mxu1  ;;  %v9041_v41 = vpop.f32.mrf.mxu0 }
 0x385   : > { %2504 = vrot.lane.b32.xlu1 %v8985_v45, %s7616_s27  ;;  %v9035_v11 = vpop.f32.mrf.mxu1  ;;  %v9049_v53 = vpop.f32.mrf.mxu0 }
 0x387   : > { %2454 = vrot.lane.b32.xlu0 %v8971_v50, %s7616_s27  ;;  %v9043_v28 = vpop.f32.mrf.mxu1 }
 0x389   : > { %2460 = vrot.lane.b32.xlu1 %v8991_v24, %s7616_s27  ;;  %v9051_v55 = vpop.f32.mrf.mxu1 }
 0x38b   : > { %2719 = vrot.lane.b32.xlu0 %v8973_v49, %s7618_s16 }
 0x38d   : > { %2500 = vrot.lane.b32.xlu1 %v8997_v21, %s7616_s27 }
 0x38f   : > { %2729 = vrot.lane.b32.xlu0 %v8985_v45, %s7618_s16 }
 0x391   : > { %2466 = vrot.lane.b32.xlu1 %v9003_v27, %s7616_s27 }
 0x393   : > { %2725 = vrot.lane.b32.xlu0 %v8997_v21, %s7618_s16 }
 0x395   : > { %2731 = vrot.lane.b32.xlu1 %v9007_v30, %s7618_s16 }
 0x396   : > { %v9057_v18 = vpop.f32.mrf.mxu0 }
 0x397   : > { %2727 = vrot.lane.b32.xlu0 %v9015_v60, %s7618_s16 }
 0x398   : > { %v9069_v63 = vpop.f32.mrf.mxu0 }
 0x399   : > { %2506 = vrot.lane.b32.xlu1 %v9007_v30, %s7616_s27  ;;  %v9063_v52 = vpop.f32.mrf.mxu1 }
 0x39a   : > { %v9081_v47 = vpop.f32.mrf.mxu0 }
 0x39b   : > { %2512 = vrot.lane.b32.xlu0 %v9023_v33, %s7616_s27  ;;  %v9075_v2 = vpop.f32.mrf.mxu1 }
 0x39c   : > { %12546 = vst [vmem:[#allocation12_spill] sm:$0xff] %v9075_v2  ;;  %v9099_v34 = vpop.f32.mrf.mxu0 }
 0x39d   : > { %2462 = vrot.lane.b32.xlu1 %v9013_v46, %s7616_s27  ;;  %v9087_v16 = vpop.f32.mrf.mxu1 }
 0x39e   : > { %12547 = vst [vmem:[#allocation19_spill] sm:$0xff] %v9087_v16 }
 0x39f   : > { %2693 = vrot.lane.b32.xlu0 %v9029_v36, %s7618_s16  ;;  %v9107_v38 = vpop.f32.mrf.mxu1 }
 0x3a0   : > { %12549 = vst [vmem:[#allocation13_spill] sm:$0xff] %v9107_v38 }
 0x3a1   : > { %2502 = vrot.lane.b32.xlu1 %v9015_v60, %s7616_s27  ;;  %v9121_v57 = vpop.f32.mrf.mxu0 }
 0x3a2   : > { %12551 = vst [vmem:[#allocation21_spill] sm:$0xff] %v9121_v57 }
 0x3a3   : > { %2508 = vrot.lane.b32.xlu0 %v9035_v11, %s7616_s27  ;;  %v9115_v14 = vpop.f32.mrf.mxu1  ;;  %v9141_v10 = vpop.f32.mrf.mxu0 }
 0x3a4   : > { %12550 = vst [vmem:[#allocation14_spill] sm:$0xff] %v9115_v14  ;;  %12556 = vst [vmem:[#allocation26_spill] sm:$0xff] %v9141_v10 }
 0x3a5   : > { %2697 = vrot.lane.b32.xlu1 %v9021_v26, %s7618_s16  ;;  %v9123_v56 = vpop.f32.mrf.mxu1  ;;  %v9168_v48 = vpop.f32.mrf.mxu0 }
 0x3a6   : > { %12552 = vst [vmem:[#allocation22_spill] sm:$0xff] %v9123_v56  ;;  %12560 = vst [vmem:[#allocation30_spill] sm:$0xff] %v9168_v48 }
 0x3a7   : > { %2514 = vrot.lane.b32.xlu0 %v9043_v28, %s7616_s27  ;;  %v9133_v51 = vpop.f32.mrf.mxu1  ;;  %v9197_v13 = vpop.f32.mrf.mxu0 }
 0x3a8   : > { %12554 = vst [vmem:[#allocation24_spill] sm:$0xff] %v9133_v51  ;;  %12564 = vst [vmem:[#allocation34_spill] sm:$0xff] %v9197_v13 }
 0x3a9   : > { %2472 = vrot.lane.b32.xlu1 %v9021_v26, %s7616_s27  ;;  %v9143_v42 = vpop.f32.mrf.mxu1 }
 0x3aa   : > { %12557 = vst [vmem:[#allocation27_spill] sm:$0xff] %v9143_v42 }
 0x3ab   : > { %2510 = vrot.lane.b32.xlu0 %v9051_v55, %s7616_s27  ;;  %v9155_v1 = vpop.f32.mrf.mxu1 }
 0x3ac   : > { %12559 = vst [vmem:[#allocation29_spill] sm:$0xff] %v9155_v1 }
 0x3ad   : > { %2737 = vrot.lane.b32.xlu1 %v9023_v33, %s7618_s16  ;;  %v9170_v23 = vpop.f32.mrf.mxu1 }
 0x3ae   : > { %12561 = vst [vmem:[#allocation31_spill] sm:$0xff] %v9170_v23 }
 0x3af   : > { %2480 = vrot.lane.b32.xlu0 %v9057_v18, %s7616_s27  ;;  %v9182_v59 = vpop.f32.mrf.mxu1 }
 0x3b0   : > { %12562 = vst [vmem:[#allocation32_spill] sm:$0xff] %v9182_v59 }
 0x3b1   : > { %2468 = vrot.lane.b32.xlu1 %v9029_v36, %s7616_s27  ;;  %v9191_v5 = vpop.f32.mrf.mxu1 }
 0x3b2   : > { %12563 = vst [vmem:[#allocation33_spill] sm:$0xff] %v9191_v5 }
 0x3b3   : > { %2520 = vrot.lane.b32.xlu0 %v9063_v52, %s7616_s27 }
 0x3b5   : > { %2733 = vrot.lane.b32.xlu1 %v9035_v11, %s7618_s16 }
 0x3b7   : > { %2476 = vrot.lane.b32.xlu0 %v9069_v63, %s7616_s27 }
 0x3b9   : > { %2699 = vrot.lane.b32.xlu1 %v9041_v41, %s7618_s16 }
 0x3bb   : > { %2516 = vrot.lane.b32.xlu0 %v9075_v2, %s7616_s27 }
 0x3bd   : > { %2474 = vrot.lane.b32.xlu1 %v9041_v41, %s7616_s27 }
 0x3bf   : > { %2482 = vrot.lane.b32.xlu0 %v9081_v47, %s7616_s27 }
 0x3c1   : > { %2739 = vrot.lane.b32.xlu1 %v9043_v28, %s7618_s16 }
 0x3c3   : > { %2747 = vrot.lane.b32.xlu0 %v9087_v16, %s7618_s16 }
 0x3c5   : > { %2695 = vrot.lane.b32.xlu1 %v9049_v53, %s7618_s16 }
 0x3c7   : > { %2522 = vrot.lane.b32.xlu0 %v9087_v16, %s7616_s27 }
 0x3c9   : > { %2470 = vrot.lane.b32.xlu1 %v9049_v53, %s7616_s27 }
 0x3cb   : > { %2703 = vrot.lane.b32.xlu0 %v9099_v34, %s7618_s16 }
 0x3cd   : > { %2735 = vrot.lane.b32.xlu1 %v9051_v55, %s7618_s16 }
 0x3cf   : > { %2478 = vrot.lane.b32.xlu0 %v9099_v34, %s7616_s27 }
 0x3d1   : > { %2705 = vrot.lane.b32.xlu1 %v9057_v18, %s7618_s16 }
 0x3d3   : > { %2518 = vrot.lane.b32.xlu0 %v9107_v38, %s7616_s27 }
 0x3d5   : > { %2745 = vrot.lane.b32.xlu1 %v9063_v52, %s7618_s16 }
 0x3d7   : > { %2488 = vrot.lane.b32.xlu0 %v9121_v57, %s7616_s27 }
 0x3d9   : > { %2701 = vrot.lane.b32.xlu1 %v9069_v63, %s7618_s16 }
 0x3db   : > { %2753 = vrot.lane.b32.xlu0 %v9115_v14, %s7618_s16 }
 0x3dd   : > { %2741 = vrot.lane.b32.xlu1 %v9075_v2, %s7618_s16 }
 0x3df   : > { %2484 = vrot.lane.b32.xlu0 %v9141_v10, %s7616_s27 }
 0x3e1   : > { %2707 = vrot.lane.b32.xlu1 %v9081_v47, %s7618_s16  ;;  %v9153_v7 = vpop.permute.xlu0 %2456 }
 0x3e3   : > { %v9157_v43 = vpop.permute.xlu1 %2496  ;;  %2749 = vrot.lane.b32.xlu0 %v9123_v56, %s7618_s16 }
 0x3e5   : > { %2743 = vrot.lane.b32.xlu1 %v9107_v38, %s7618_s16  ;;  %v9163_v58 = vpop.permute.xlu0 %2721 }
 0x3e7   : > { %v9172_v9 = vpop.permute.xlu1 %2492  ;;  %2715 = vrot.lane.b32.xlu0 %v9168_v48, %s7618_s16 }
 0x3e9   : > { %2713 = vrot.lane.b32.xlu1 %v9121_v57, %s7618_s16  ;;  %v9178_v0 = vpop.permute.xlu0 %2452 }
 0x3eb   : > { %v9184_v29 = vpop.permute.xlu1 %2498  ;;  %3093 = vrot.lane.b32.xlu0 %v3074_v4, %s7616_s27  ;;  %v9203_v4 = vpop.f32.mrf.mxu1 }
 0x3ec   : > { %12565 = vst [vmem:[#allocation35_spill] sm:$0xff] %v9203_v4 }
 0x3ed   : > { %2709 = vrot.lane.b32.xlu1 %v9141_v10, %s7618_s16  ;;  %v9189_v19 = vpop.permute.xlu0 %2717  ;;  %v9213_v60 = vpop.f32.mrf.mxu1 }
 0x3ee   : > { %12566 = vst [vmem:[#allocation36_spill] sm:$0xff] %v9213_v60 }
 0x3ef   : > { %v9193_v61 = vpop.permute.xlu1 %2494  ;;  %2490 = vrot.lane.b32.xlu0 %v9168_v48, %s7616_s27  ;;  %v9223_v49 = vpop.f32.mrf.mxu1 }
 0x3f0   : > { %12567 = vst [vmem:[#allocation37_spill] sm:$0xff] %v9223_v49 }
 0x3f1   : > { %2711 = vrot.lane.b32.xlu1 %v9197_v13, %s7618_s16  ;;  %v9201_v15 = vpop.permute.xlu0 %2458  ;;  %v9233_v35 = vpop.f32.mrf.mxu1 }
 0x3f2   : > { %12568 = vst [vmem:[#allocation38_spill] sm:$0xff] %v9233_v35 }
 0x3f3   : > { %v9205_v31 = vpop.permute.xlu1 %2464  ;;  %2755 = vrot.lane.b32.xlu0 %v9133_v51, %s7618_s16  ;;  %v9243_v10 = vpop.f32.mrf.mxu1 }
 0x3f5   : > { %2524 = vrot.lane.b32.xlu1 %v9123_v56, %s7616_s27  ;;  %v9211_v30 = vpop.permute.xlu0 %2723  ;;  %v9253_v56 = vpop.f32.mrf.mxu1 }
 0x3f6   : > { %12572 = vst [vmem:[#allocation43_spill] sm:$0xff] %v9253_v56 }
 0x3f7   : > { %v9215_v21 = vpop.permute.xlu1 %2504  ;;  %2486 = vrot.lane.b32.xlu0 %v9197_v13, %s7616_s27 }
 0x3f9   : > { %2528 = vrot.lane.b32.xlu1 %v9115_v14, %s7616_s27  ;;  %v9221_v45 = vpop.permute.xlu0 %2454 }
 0x3fb   : > { %v9225_v37 = vpop.permute.xlu1 %2460  ;;  %2751 = vrot.lane.b32.xlu0 %v9143_v42, %s7618_s16 }
 0x3fd   : > { %2530 = vrot.lane.b32.xlu1 %v9133_v51, %s7616_s27  ;;  %v9231_v48 = vpop.permute.xlu0 %2719 }
 0x3ff   : > { %v9235_v13 = vpop.permute.xlu1 %2500  ;;  %2761 = vrot.lane.b32.xlu0 %v9155_v1, %s7618_s16 }
 0x400   : > { %12569 = vst [vmem:[#allocation39_spill] sm:$0xff] %v9235_v13 }
 0x401   : > { %2526 = vrot.lane.b32.xlu1 %v9143_v42, %s7616_s27  ;;  %v9241_v3 = vpop.permute.xlu0 %2729 }
 0x402   : > { %12570 = vst [vmem:[#allocation41_spill] sm:$0xff] %v9241_v3  ;;  %v9263_v3 = vpop.f32.mrf.mxu1 }
 0x403   : > { %v9245_v8 = vpop.permute.xlu1 %2466  ;;  %2757 = vrot.lane.b32.xlu0 %v9170_v23, %s7618_s16  ;;  %12575 = vst [vmem:[#allocation46_spill] sm:$0xff] %v9263_v3 }
 0x405   : > { %2536 = vrot.lane.b32.xlu1 %v9155_v1, %s7616_s27  ;;  %v9251_v51 = vpop.permute.xlu0 %2725 }
 0x406   : > { %12571 = vst [vmem:[#allocation42_spill] sm:$0xff] %v9251_v51 }
 0x407   : > { %v9255_v38 = vpop.permute.xlu1 %2731  ;;  %2759 = vrot.lane.b32.xlu0 %v9191_v5, %s7618_s16 }
 0x408   : > { %12573 = vst [vmem:[#allocation44_spill] sm:$0xff] %v9255_v38 }
 0x409   : > { %2532 = vrot.lane.b32.xlu1 %v9170_v23, %s7616_s27  ;;  %v9261_v42 = vpop.permute.xlu0 %2727 }
 0x40a   : > { %12574 = vst [vmem:[#allocation45_spill] sm:$0xff] %v9261_v42  ;;  %v9281_v42 = vpop.f32.mrf.mxu1 }
 0x40b   : > { %v9265_v14 = vpop.permute.xlu1 %2506  ;;  %2779 = vrot.lane.b32.xlu0 %v9263_v3, %s7618_s16  ;;  %12578 = vst [vmem:[#allocation49_spill] sm:$0xff] %v9281_v42 }
 0x40c   : > { %12576 = vst [vmem:[#allocation47_spill] sm:$0xff] %v9265_v14  ;;  %v9291_v57 = vpop.f32.mrf.mxu1 }
 0x40d   : > { %2763 = vrot.lane.b32.xlu1 %v9182_v59, %s7618_s16  ;;  %v9271_v1 = vpop.permute.xlu0 %2512  ;;  %12581 = vst [vmem:[#allocation52_spill] sm:$0xff] %v9291_v57 }
 0x40e   : > { %12577 = vst [vmem:[#allocation48_spill] sm:$0xff] %v9271_v1 }
 0x40f   : > { %v9273_v38 = vpop.permute.xlu1 %2462  ;;  %2540 = vrot.lane.b32.xlu0 %v9213_v60, %s7616_s27 }
 0x411   : > { %2538 = vrot.lane.b32.xlu1 %v9182_v59, %s7616_s27  ;;  %v9279_v23 = vpop.permute.xlu0 %2693 }
 0x413   : > { %v9283_v51 = vpop.permute.xlu1 %2502  ;;  %2542 = vrot.lane.b32.xlu0 %v9233_v35, %s7616_s27 }
 0x414   : > { %12579 = vst [vmem:[#allocation50_spill] sm:$0xff] %v9283_v51  ;;  %v9301_v51 = vpop.f32.mrf.mxu1 }
 0x415   : > { %2534 = vrot.lane.b32.xlu1 %v9191_v5, %s7616_s27  ;;  %v9289_v1 = vpop.permute.xlu0 %2508  ;;  %12583 = vst [vmem:[#allocation54_spill] sm:$0xff] %v9301_v51 }
 0x416   : > { %12580 = vst [vmem:[#allocation51_spill] sm:$0xff] %v9289_v1  ;;  %v9311_v1 = vpop.f32.mrf.mxu1 }
 0x417   : > { %v9293_v16 = vpop.permute.xlu1 %2697  ;;  %2544 = vrot.lane.b32.xlu0 %v9203_v4, %s7616_s27  ;;  %12586 = vst [vmem:[#allocation57_spill] sm:$0xff] %v9311_v1 }
 0x419   : > { %2769 = vrot.lane.b32.xlu1 %v9203_v4, %s7618_s16  ;;  %v9299_v59 = vpop.permute.xlu0 %2514 }
 0x41a   : > { %12582 = vst [vmem:[#allocation53_spill] sm:$0xff] %v9299_v59  ;;  %v9321_v59 = vpop.f32.mrf.mxu1 }
 0x41b   : > { %v9303_v14 = vpop.permute.xlu1 %2472  ;;  %2785 = vrot.lane.b32.xlu0 %v9291_v57, %s7618_s16  ;;  %12589 = vst [vmem:[#allocation60_spill] sm:$0xff] %v9321_v59 }
 0x41c   : > { %12584 = vst [vmem:[#allocation55_spill] sm:$0xff] %v9303_v14 }
 0x41d   : > { %2765 = vrot.lane.b32.xlu1 %v9213_v60, %s7618_s16  ;;  %v9309_v5 = vpop.permute.xlu0 %2510 }
 0x41e   : > { %12585 = vst [vmem:[#allocation56_spill] sm:$0xff] %v9309_v5  ;;  %v9331_v5 = vpop.f32.mrf.mxu1 }
 0x41f   : > { %v9313_v13 = vpop.permute.xlu1 %2737  ;;  %2781 = vrot.lane.b32.xlu0 %v9301_v51, %s7618_s16  ;;  %12592 = vst [vmem:[#allocation63_spill] sm:$0xff] %v9331_v5 }
 0x420   : > { %12587 = vst [vmem:[#allocation58_spill] sm:$0xff] %v9313_v13 }
 0x421   : > { %2771 = vrot.lane.b32.xlu1 %v9223_v49, %s7618_s16  ;;  %v9319_v4 = vpop.permute.xlu0 %2480 }
 0x422   : > { %12588 = vst [vmem:[#allocation59_spill] sm:$0xff] %v9319_v4 }
 0x423   : > { %v9323_v14 = vpop.permute.xlu1 %2468  ;;  %2787 = vrot.lane.b32.xlu0 %v9311_v1, %s7618_s16 }
 0x424   : > { %12590 = vst [vmem:[#allocation61_spill] sm:$0xff] %v9323_v14  ;;  %v9341_v14 = vpop.f32.mrf.mxu1 }
 0x425   : > { %2767 = vrot.lane.b32.xlu1 %v9233_v35, %s7618_s16  ;;  %v9329_v60 = vpop.permute.xlu0 %2520  ;;  %12595 = vst [vmem:[#allocation66_spill] sm:$0xff] %v9341_v14 }
 0x426   : > { %12591 = vst [vmem:[#allocation62_spill] sm:$0xff] %v9329_v60  ;;  %v9351_v60 = vpop.f32.mrf.mxu1 }
 0x427   : > { %v9333_v13 = vpop.permute.xlu1 %2733  ;;  %2783 = vrot.lane.b32.xlu0 %v9321_v59, %s7618_s16  ;;  %12597 = vst [vmem:[#allocation68_spill] sm:$0xff] %v9351_v60 }
 0x428   : > { %12593 = vst [vmem:[#allocation64_spill] sm:$0xff] %v9333_v13  ;;  %v3048_v13 = vcombine.high %v8928_v39, %v8928_v39 }
 0x429   : > { %2777 = vrot.lane.b32.xlu1 %v9243_v10, %s7618_s16  ;;  %v9339_v4 = vpop.permute.xlu0 %2476 }
 0x42a   : > { %12594 = vst [vmem:[#allocation65_spill] sm:$0xff] %v9339_v4 }
 0x42b   : > { %v9343_v57 = vpop.permute.xlu1 %2699  ;;  %2793 = vrot.lane.b32.xlu0 %v9331_v5, %s7618_s16  ;;  %v9363_v5 = vpop.f32.mrf.mxu1 }
 0x42c   : > { %12600 = vst [vmem:[#allocation71_spill] sm:$0xff] %v9363_v5 }
 0x42d   : > { %2773 = vrot.lane.b32.xlu1 %v9253_v56, %s7618_s16  ;;  %v9349_v35 = vpop.permute.xlu0 %2516 }
 0x42e   : > { %12596 = vst [vmem:[#allocation67_spill] sm:$0xff] %v9349_v35  ;;  %v3078_v35 = vrot.slane %v3048_v13, %v12537_v20 }
 0x42f   : > { %v9355_v2 = vpop.permute.xlu1 %2474  ;;  %2789 = vrot.lane.b32.xlu0 %v9341_v14, %s7618_s16 }
 0x430   : > { %12598 = vst [vmem:[#allocation69_spill] sm:$0xff] %v9355_v2 }
 0x431   : > { %2775 = vrot.lane.b32.xlu1 %v9281_v42, %s7618_s16  ;;  %v9361_v4 = vpop.permute.xlu0 %2482 }
 0x432   : > { %12599 = vst [vmem:[#allocation70_spill] sm:$0xff] %v9361_v4 }
 0x433   : > { %v9365_v51 = vpop.permute.xlu1 %2739  ;;  %2791 = vrot.lane.b32.xlu0 %v9363_v5, %s7618_s16  ;;  %v9383_v5 = vpop.f32.mrf.mxu1 }
 0x434   : > { %12603 = vst [vmem:[#allocation74_spill] sm:$0xff] %v9383_v5 }
 0x435   : > { %3095 = vrot.lane.b32.xlu1 %v3078_v35, %s7616_s27  ;;  %v9371_v39 = vpop.permute.xlu0 %2747 }
 0x436   : > { %12601 = vst [vmem:[#allocation72_spill] sm:$0xff] %v9371_v39  ;;  %v2635_v39 = vadd.f32 %v9057_v18, %v9205_v31  ;;  %v2636_v31 = vadd.f32 %v9081_v47, %v9245_v8  ;;  %v2624_v8 = vadd.f32 %v8963_v25, %v9093_v17  ;;  %v2625_v47 = vadd.f32 %v9093_v17, %v8991_v24 }
 0x437   : > { %v2696_v2 = vpop.permute.xlu1 %2695  ;;  %2546 = vrot.lane.b32.xlu0 %v9223_v49, %s7616_s27  ;;  %v9395_v49 = vpop.f32.mrf.mxu1  ;;  %v2628_v24 = vadd.f32 %v9003_v27, %v9093_v17 }
 0x438   : > { %12605 = vst [vmem:[#allocation76_spill] sm:$0xff] %v9395_v49 }
 0x439   : > { %2795 = vrot.lane.b32.xlu1 %v9351_v60, %s7618_s16  ;;  %v9377_v14 = vpop.permute.xlu0 %2522  ;;  %v2622_v60 = vadd.f32 %v9093_v17, %v8971_v50 }
 0x43a   : > { %12602 = vst [vmem:[#allocation73_spill] sm:$0xff] %v9377_v14  ;;  %v3050_v14 = vcombine.high %v9166_v54, %v9166_v54  ;;  %v2633_v54 = vadd.f32 %v9225_v37, %v9069_v63 }
 0x43b   : > { %v9379_v4 = vpop.permute.xlu1 %2470  ;;  %2548 = vrot.lane.b32.xlu0 %v9253_v56, %s7616_s27  ;;  %v2621_v56 = vadd.f32 %v9093_v17, %v8955_v62  ;;  %v9412_v62 = vpop.f32.mrf.mxu1 }
 0x43c   : > { %12606 = vst [vmem:[#allocation77_spill] sm:$0xff] %v9412_v62  ;;  %v3082_v18 = vrot.slane %v3050_v14, %v12537_v20 }
 0x43d   : > { %2801 = vrot.lane.b32.xlu1 %v9383_v5, %s7618_s16  ;;  %v9387_v35 = vpop.permute.xlu0 %2703  ;;  %v9431_v63 = vpop.f32.mrf.mxu1 }
 0x43e   : > { %12607 = vst [vmem:[#allocation78_spill] sm:$0xff] %v9431_v63 }
 0x43f   : > { %v9389_v13 = vpop.permute.xlu1 %2735  ;;  %2550 = vrot.lane.b32.xlu0 %v9281_v42, %s7616_s27  ;;  %v2865_v42 = vadd.f32 %v2696_v2, %v2622_v60  ;;  %v2623_v60 = vadd.f32 %v8945_v6, %v9093_v17  ;;  %v2878_v2 = vadd.f32 %v9163_v58, %v2635_v39  ;;  %v2876_v6 = vadd.f32 %v9189_v19, %v2633_v54 }
 0x440   : > { %12604 = vst [vmem:[#allocation75_spill] sm:$0xff] %v9389_v13  ;;  %v2864_v13 = vadd.f32 %v9279_v23, %v2621_v56  ;;  %v2879_v19 = vadd.f32 %v9211_v30, %v2636_v31  ;;  %v2626_v30 = vadd.f32 %v9093_v17, %v9013_v46  ;;  %v9482_v46 = vadd.f32 %v9178_v0, %v9029_v36 }
 0x441   : > { %2797 = vrot.lane.b32.xlu1 %v9395_v49, %s7618_s16  ;;  %v9403_v5 = vpop.permute.xlu0 %2478  ;;  %v2938_v56 = vadd.f32 %v9103_v40, %v2865_v42  ;;  %v2866_v14 = vadd.f32 %v9293_v16, %v2623_v60  ;;  %v2951_v58 = vadd.f32 %v9103_v40, %v2878_v2  ;;  %v2627_v16 = vadd.f32 %v8979_v32, %v9093_v17 }
 0x442   : > { %v2937_v23 = vadd.f32 %v9103_v40, %v2864_v13  ;;  %v2634_v13 = vadd.f32 %v9273_v38, %v9099_v34  ;;  %v2867_v60 = vadd.f32 %v9343_v57, %v2624_v8  ;;  %v9465_v34 = vadd.f32 %v9023_v33, %v9157_v43 }
 0x443   : > { %v9408_v50 = vpop.permute.xlu1 %2705  ;;  %2552 = vrot.lane.b32.xlu0 %v9243_v10, %s7616_s27  ;;  %v9445_v39 = vadd.f32 %v9113_v22, %v2938_v56  ;;  %v9469_v38 = vadd.f32 %v9021_v26, %v9153_v7  ;;  %v2949_v2 = vadd.f32 %v9103_v40, %v2876_v6  ;;  %v9478_v57 = vadd.f32 %v9172_v9, %v9035_v11 }
 0x444   : > { %v9453_v54 = vadd.f32 %v9113_v22, %v2937_v23  ;;  %v9485_v33 = vadd.f32 %v9125_v12, %v2951_v58  ;;  %v9491_v7 = vadd.f32 %v9043_v28, %v9184_v29  ;;  %v2952_v43 = vadd.f32 %v9103_v40, %v2879_v19 }
 0x445   : > { %2803 = vrot.lane.b32.xlu1 %v9412_v62, %s7618_s16  ;;  %v9418_v49 = vpop.permute.xlu0 %2518  ;;  %12608 = vst [vmem:[#allocation79_spill] sm:$0xff] %v9445_v39  ;;  %v3306_v26 = vmul.f32 %v9445_v39, %v9445_v39  ;;  %v2877_v56 = vadd.f32 %v9231_v48, %v2634_v13  ;;  %v2940_v0 = vadd.f32 %v9103_v40, %v2867_v60  ;;  %v3173_v28 = vsel %vm3171_vm3, %v9445_v39, 0.0 }
 0x446   : > { %12609 = vst [vmem:[#allocation80_spill] sm:$0xff] %v9453_v54  ;;  %12610 = vst [vmem:[#allocation81_spill] sm:$0xff] %v9485_v33  ;;  %v3305_v11 = vmul.f32 %v9453_v54, %v9453_v54  ;;  %v9510_v48 = vadd.f32 %v9193_v61, %v9051_v55  ;;  %v9514_v31 = vadd.f32 %v9041_v41, %v9201_v15  ;;  %v3172_v61 = vsel %vm3171_vm3, %v9453_v54, 0.0 }
 0x447   : > { %v9428_v37 = vpop.permute.xlu1 %2745  ;;  %3097 = vrot.lane.b32.xlu0 %v3082_v18, %s7616_s27  ;;  %v2939_v18 = vadd.f32 %v9103_v40, %v2866_v14  ;;  %v9518_v23 = vadd.f32 %v9063_v52, %v9215_v21  ;;  %v9521_v14 = vadd.f32 %v9125_v12, %v2949_v2  ;;  %v3319_v55 = vmul.f32 %v9485_v33, %v9485_v33 }
 0x448   : > { %v3370_v41 = vsel %vm3171_vm3, %v3306_v26, 0.0  ;;  %v2869_v15 = vadd.f32 %v9387_v35, %v2626_v30  ;;  %v9535_v21 = vadd.f32 %v9221_v45, %v9049_v53  ;;  %v9538_v52 = vadd.f32 %v9125_v12, %v2952_v43 }
 0x449   : > { %2799 = vrot.lane.b32.xlu1 %v9431_v63, %s7618_s16  ;;  %v9437_v42 = vpop.permute.xlu0 %2488  ;;  %v9502_v36 = vadd.f32 %v9113_v22, %v2939_v18  ;;  %12612 = vst [vmem:[#allocation83_spill] sm:$0xff] %v9521_v14  ;;  %v2950_v8 = vadd.f32 %v9103_v40, %v2877_v56  ;;  %v3369_v19 = vsel %vm3171_vm3, %v3305_v11, 0.0  ;;  %v3317_v45 = vmul.f32 %v9521_v14, %v9521_v14  ;;  %v12634_v63 = vld [vmem:[#allocation51_spill] sm:$0xff] }
 0x44a   : > { %12613 = vst [vmem:[#allocation84_spill] sm:$0xff] %v9538_v52  ;;  %v3371_v53 = vadd.f32 %v3370_v41, %v3369_v19  ;;  %v2870_v18 = vadd.f32 %v9408_v50, %v2627_v16  ;;  %v9559_v2 = vsel %vm3171_vm3, %v9485_v33, 0.0  ;;  %v9562_v26 = vsel %vm3171_vm3, %v3319_v55, 0.0  ;;  %v12617_v16 = vld [vmem:[#allocation12_spill] sm:$0xff]  ;;  %v12625_v33 = vld [vmem:[#allocation21_spill] sm:$0xff] }
 0x44b   : > { %v2702_v25 = vpop.permute.xlu1 %2701  ;;  %2558 = vrot.lane.b32.xlu0 %v9321_v59, %s7616_s27  ;;  %12611 = vst [vmem:[#allocation82_spill] sm:$0xff] %v9502_v36  ;;  %v3307_v13 = vmul.f32 %v9502_v36, %v9502_v36  ;;  %v3175_v43 = vsel %vm3171_vm3, %v9502_v36, 0.0  ;;  %v2942_v56 = vadd.f32 %v9103_v40, %v2869_v15  ;;  %v9569_v50 = vsel %vm3171_vm3, %v9521_v14, 0.0  ;;  %v12624_v14 = vld [vmem:[#allocation55_spill] sm:$0xff]  ;;  %v12626_v36 = vld [vmem:[#allocation48_spill] sm:$0xff] }
 0x44c   : > { %v2868_v32 = vadd.f32 %v2702_v25, %v2625_v47  ;;  %v3174_v47 = vadd.f32 %v3173_v28, %v3172_v61  ;;  %v9545_v25 = vadd.f32 %v9113_v22, %v2940_v0  ;;  %v3320_v0 = vmul.f32 %v9538_v52, %v9538_v52 }
 0x44d   : > { %2805 = vrot.lane.b32.xlu1 %v12523_v44, %s7618_s16  ;;  %v9474_v27 = vpop.permute.xlu0 %2753  ;;  %v9580_v55 = vadd.f32 %v9125_v12, %v2950_v8  ;;  %v3372_v61 = vsel %vm3171_vm3, %v3307_v13, 0.0  ;;  %v9596_v13 = vsel %vm3171_vm3, %v9538_v52, 0.0  ;;  %v9601_v17 = vadd.f32 %v9113_v22, %v2942_v56 }
 0x44e   : > { %v2941_v29 = vadd.f32 %v9103_v40, %v2868_v32  ;;  %12614 = vst [vmem:[#allocation85_spill] sm:$0xff] %v9545_v25  ;;  %v12616_v32 = vld [vmem:[#allocation54_spill] sm:$0xff]  ;;  %v3176_v28 = vadd.f32 %v3175_v43, %v3174_v47  ;;  %v3308_v41 = vmul.f32 %v9545_v25, %v9545_v25  ;;  %v3373_v19 = vadd.f32 %v3372_v61, %v3371_v53  ;;  %v12620_v43 = vld [vmem:[#allocation52_spill] sm:$0xff] }
 0x44f   : > { %v9497_v9 = vpop.permute.xlu1 %2741  ;;  %2562 = vrot.lane.b32.xlu0 %v9311_v1, %s7616_s27  ;;  %12619 = vst [vmem:[#allocation12_spill] sm:$0xff] %v9580_v55  ;;  %v9606_v53 = vsel %vm3171_vm3, %v3320_v0, 0.0  ;;  %v2639_v52 = vadd.f32 %v12625_v33, %v12624_v14  ;;  %v3318_v56 = vmul.f32 %v9580_v55, %v9580_v55 }
 0x450   : > { %v9548_v35 = vadd.f32 %v9113_v22, %v2941_v29 }
 0x451   : > { %2554 = vrot.lane.b32.xlu1 %v9263_v3, %s7616_s27  ;;  %v9525_v6 = vpop.permute.xlu0 %2484 }
 0x452   : > { %12615 = vst [vmem:[#allocation86_spill] sm:$0xff] %v9548_v35  ;;  %v3309_v15 = vmul.f32 %v9548_v35, %v9548_v35 }
 0x453   : > { %v2708_v58 = vpop.permute.xlu1 %2707 }
 0x454   : > { %v2871_v60 = vadd.f32 %v2708_v58, %v2628_v24  ;;  %v12618_v24 = vld [vmem:[#allocation39_spill] sm:$0xff]  ;;  %v9588_v58 = vsel %vm3171_vm3, %v3317_v45, 0.0  ;;  %v3179_v45 = vsel %vm3171_vm3, %v9548_v35, 0.0  ;;  %v3374_v35 = vsel %vm3171_vm3, %v3308_v41, 0.0 }
 0x455   : > { %2556 = vrot.lane.b32.xlu1 %v12616_v32, %s7616_s27  ;;  %v9555_v30 = vpop.permute.xlu0 %2749  ;;  %v9573_v11 = vadd.f32 %v12618_v24, %v12617_v16  ;;  %v2943_v16 = vadd.f32 %v9103_v40, %v2870_v18  ;;  %v3177_v24 = vsel %vm3171_vm3, %v9545_v25, 0.0  ;;  %12621 = vst [vmem:[#allocation39_spill] sm:$0xff] %v9601_v17  ;;  %v12622_v18 = vld [vmem:[#allocation47_spill] sm:$0xff]  ;;  %v12627_v25 = vld [vmem:[#allocation14_spill] sm:$0xff]  ;;  %v3376_v0 = vsel %vm3171_vm3, %v3309_v15, 0.0 }
 0x456   : > { %v2944_v47 = vadd.f32 %v9103_v40, %v2871_v60  ;;  %v12623_v60 = vld [vmem:[#allocation19_spill] sm:$0xff]  ;;  %v3178_v39 = vadd.f32 %v3177_v24, %v3176_v28  ;;  %v9616_v20 = vadd.f32 %v12627_v25, %v12626_v36  ;;  %v12631_v28 = vld [vmem:[#allocation13_spill] sm:$0xff]  ;;  %v12632_v36 = vld [vmem:[#allocation50_spill] sm:$0xff]  ;;  %v3310_v41 = vmul.f32 %v9601_v17, %v9601_v17 }
 0x457   : > { %v9577_v29 = vpop.permute.xlu1 %2743  ;;  %v9610_v61 = vadd.f32 %v12623_v60, %v12622_v18  ;;  %v9623_v62 = vadd.f32 %v9113_v22, %v2943_v16  ;;  %v3375_v18 = vadd.f32 %v3374_v35, %v3373_v19  ;;  %v9632_v25 = vadd.f32 %v12632_v36, %v12631_v28  ;;  %v12633_v24 = vld [vmem:[#allocation22_spill] sm:$0xff]  ;;  %v12636_v19 = vld [vmem:[#allocation59_spill] sm:$0xff]  ;;  %v12637_v16 = vld [vmem:[#allocation8_spill] sm:$0xff] }
 0x458   : > { %v3180_v60 = vadd.f32 %v3179_v45, %v3178_v39  ;;  %v9626_v33 = vadd.f32 %v9113_v22, %v2944_v47  ;;  %v9636_v1 = vadd.f32 %v12634_v63, %v12633_v24  ;;  %v9643_v39 = vsel %vm3171_vm3, %v9580_v55, 0.0  ;;  %v12635_v22 = vld [vmem:[#allocation41_spill] sm:$0xff] }
 0x459   : > { %2560 = vrot.lane.b32.xlu1 %v12620_v43, %s7616_s27  ;;  %v2716_v8 = vpop.permute.xlu0 %2715  ;;  %12628 = vst [vmem:[#allocation47_spill] sm:$0xff] %v9623_v62  ;;  %v2882_v35 = vadd.f32 %v12635_v22, %v2639_v52  ;;  %v2643_v47 = vadd.f32 %v12637_v16, %v12636_v19  ;;  %v3377_v45 = vadd.f32 %v3376_v0, %v3375_v18  ;;  %v9649_v36 = vsel %vm3171_vm3, %v3318_v56, 0.0  ;;  %v12639_v55 = vld [vmem:[#allocation61_spill] sm:$0xff]  ;;  %v12641_v19 = vld [vmem:[#allocation24_spill] sm:$0xff] }
 0x45a   : > { %12629 = vst [vmem:[#allocation19_spill] sm:$0xff] %v9626_v33  ;;  %v3181_v63 = vsel %vm3171_vm3, %v9601_v17, 0.0  ;;  %v2875_v24 = vadd.f32 %v2716_v8, %v9514_v31  ;;  %v3311_v52 = vmul.f32 %v9623_v62, %v9623_v62  ;;  %v3312_v0 = vmul.f32 %v9626_v33, %v9626_v33  ;;  %v12640_v56 = vld [vmem:[#allocation53_spill] sm:$0xff] }
 0x45b   : > { %v2714_v54 = vpop.permute.xlu1 %2713  ;;  %v3182_v22 = vadd.f32 %v3181_v63, %v3180_v60  ;;  %v9665_v16 = vadd.f32 %v12641_v19, %v12640_v56  ;;  %v3378_v31 = vsel %vm3171_vm3, %v3310_v41, 0.0  ;;  %v3183_v60 = vsel %vm3171_vm3, %v9623_v62, 0.0 }
 0x45c   : > { %v2874_v15 = vadd.f32 %v2714_v54, %v9469_v38  ;;  %v12638_v38 = vld [vmem:[#allocation26_spill] sm:$0xff]  ;;  %v3379_v63 = vadd.f32 %v3378_v31, %v3377_v45  ;;  %v3185_v59 = vsel %vm3171_vm3, %v9626_v33, 0.0  ;;  %v2948_v56 = vadd.f32 %v9103_v40, %v2875_v24 }
 0x45d   : > { %v9628_v14 = vpop.permute.xlu0 %3093  ;;  %v2637_v43 = vadd.f32 %v12639_v55, %v12638_v38  ;;  %12642 = vst [vmem:[#allocation21_spill] sm:$0xff] %v9665_v16  ;;  %v2955_v55 = vadd.f32 %v9103_v40, %v2882_v35  ;;  %v3380_v35 = vsel %vm3171_vm3, %v3311_v52, 0.0  ;;  %v12649_v52 = vld [vmem:[#allocation15_spill] sm:$0xff] }
 0x45e   : > { %12630 = vst [vmem:[#allocation55_spill] sm:$0xff] %v9628_v14  ;;  %v9704_v3 = vadd.f32 %v9125_v12, %v2948_v56 }
 0x45f   : > { %v2710_v28 = vpop.permute.xlu1 %2709 }
 0x460   : > { %v2872_v54 = vadd.f32 %v2710_v28, %v9482_v46  ;;  %v2947_v46 = vadd.f32 %v9103_v40, %v2874_v15  ;;  %v12643_v28 = vld [vmem:[#allocation58_spill] sm:$0xff]  ;;  %12652 = vst [vmem:[#allocation50_spill] sm:$0xff] %v9704_v3  ;;  %v3316_v32 = vmul.f32 %v9704_v3, %v9704_v3 }
 0x461   : > { %v9661_v18 = vpop.permute.xlu0 %2490  ;;  %v2886_v38 = vadd.f32 %v12643_v28, %v2643_v47  ;;  %v3184_v47 = vadd.f32 %v3183_v60, %v3182_v22  ;;  %v3382_v28 = vsel %vm3171_vm3, %v3312_v0, 0.0  ;;  %v12650_v22 = vld [vmem:[#allocation65_spill] sm:$0xff]  ;;  %v3381_v60 = vadd.f32 %v3380_v35, %v3379_v63 }
 0x462   : > { %v2945_v8 = vadd.f32 %v9103_v40, %v2872_v54  ;;  %v12645_v54 = vld [vmem:[#allocation42_spill] sm:$0xff]  ;;  %v9687_v45 = vadd.f32 %v9125_v12, %v2947_v46  ;;  %v12654_v35 = vld [vmem:[#allocation69_spill] sm:$0xff] }
 0x463   : > { %v2712_v17 = vpop.permute.xlu1 %2711  ;;  %v2880_v19 = vadd.f32 %v12645_v54, %v2637_v43  ;;  %v3186_v0 = vadd.f32 %v3185_v59, %v3184_v47  ;;  %v12651_v46 = vld [vmem:[#allocation34_spill] sm:$0xff]  ;;  %v2959_v63 = vadd.f32 %v9103_v40, %v2886_v38  ;;  %v3383_v56 = vadd.f32 %v3382_v28, %v3381_v60  ;;  %v9732_v38 = vld [vmem:[%s12255_s10 + $0x8] sm:$0xff] }
 0x464   : > { %v9678_v41 = vadd.f32 %v9125_v12, %v2945_v8  ;;  %v2873_v15 = vadd.f32 %v2712_v17, %v9535_v21  ;;  %12646 = vst [vmem:[#allocation14_spill] sm:$0xff] %v9687_v45  ;;  %v12647_v21 = vld [vmem:[#allocation23_spill] sm:$0xff]  ;;  %v2641_v8 = vadd.f32 %v12650_v22, %v12649_v52  ;;  %v2638_v33 = vadd.f32 %v9379_v4, %v12651_v46  ;;  %v3504_v59 = vld [vmem:[%s12255_s10 + $0x10] sm:$0xff] }
 0x465   : > { %v9684_v62 = vpop.permute.xlu0 %2755  ;;  %v9695_v43 = vadd.f32 %v12647_v21, %v2955_v55  ;;  %v3505_v55 = vld [vmem:[%s12255_s10 + $0x18] sm:$0xff]  ;;  %v12655_v4 = vld [vmem:[#allocation30_spill] sm:$0xff]  ;;  %12656 = vst [vmem:[#allocation51_spill] sm:$0xff] %v9732_v38 }
 0x466   : > { %12644 = vst [vmem:[#allocation48_spill] sm:$0xff] %v9678_v41  ;;  %v3187_v24 = vsel %vm3171_vm3, %v9678_v41, 0.0  ;;  %v3313_v31 = vmul.f32 %v9678_v41, %v9678_v41  ;;  %v2946_v17 = vadd.f32 %v9103_v40, %v2873_v15  ;;  %v2640_v47 = vadd.f32 %v12655_v4, %v12654_v35  ;;  %6940 = vmatpush3.msra.mxu0 %v3505_v55  ;;  %v12658_v35 = vld [vmem:[#allocation45_spill] sm:$0xff] }
 0x467   : > { %12648 = vst [vmem:[#allocation13_spill] sm:$0xff] %v9695_v43  ;;  %v9699_v54 = vpop.permute.xlu1 %2524  ;;  %v3188_v52 = vadd.f32 %v3187_v24, %v3186_v0  ;;  %6941 = vmatprep.subr.mxu0 %v12523_v44  ;;  %v3323_v28 = vmul.f32 %v9695_v43, %v9695_v43  ;;  %v2881_v4 = vadd.f32 %v12658_v35, %v2638_v33 }
 0x468   : > { %v3384_v41 = vsel %vm3171_vm3, %v3313_v31, 0.0  ;;  %v9708_v15 = vadd.f32 %v9125_v12, %v2946_v17  ;;  %v2953_v12 = vadd.f32 %v9103_v40, %v2880_v19  ;;  %v3315_v31 = vmul.f32 %v9687_v45, %v9687_v45  ;;  %v12657_v19 = vld [vmem:[#allocation64_spill] sm:$0xff]  ;;  %6942 = vmatpush3.msra.mxu0 %v3504_v59  ;;  %v12660_v59 = vld [vmem:[#allocation70_spill] sm:$0xff] }
 0x469   : > { %v9719_v22 = vpop.permute.xlu0 %2486  ;;  %v2884_v24 = vadd.f32 %v12657_v19, %v2641_v8  ;;  %v3385_v0 = vadd.f32 %v3384_v41, %v3383_v56  ;;  %6943 = vmatprep.subr.mxu0 %v12523_v44  ;;  %v9749_v41 = vld [vmem:[%s12255_s10] sm:$0xff] }
 0x46a   : > { %12653 = vst [vmem:[#allocation22_spill] sm:$0xff] %v9708_v15  ;;  %v3189_v17 = vsel %vm3171_vm3, %v9708_v15, 0.0  ;;  %v3314_v46 = vmul.f32 %v9708_v15, %v9708_v15  ;;  %v3191_v15 = vsel %vm3171_vm3, %v9687_v45, 0.0  ;;  %v12659_v8 = vld [vmem:[#allocation44_spill] sm:$0xff]  ;;  %6944 = vmatpush3.msra.mxu0 %v9732_v38  ;;  %v9761_v45 = vadd.f32 %v12647_v21, %v2959_v63 }
 0x46b   : > { %v3190_v60 = vadd.f32 %v3189_v17, %v3188_v52  ;;  %v9737_v55 = vpop.permute.xlu1 %2528  ;;  %v2883_v56 = vadd.f32 %v12659_v8, %v2640_v47  ;;  %v12661_v52 = vld [vmem:[#allocation16_spill] sm:$0xff]  ;;  %v3388_v14 = vsel %vm3171_vm3, %v3315_v31, 0.0  ;;  %v3193_v47 = vsel %vm3171_vm3, %v9704_v3, 0.0  ;;  %6945 = vmatprep.subr.mxu0 %v12523_v44  ;;  %v12663_v8 = vld [vmem:[#allocation27_spill] sm:$0xff] }
 0x46c   : > { %v3386_v16 = vsel %vm3171_vm3, %v3314_v46, 0.0  ;;  %v2644_v33 = vadd.f32 %v12661_v52, %v12660_v59  ;;  %v9758_v46 = vadd.f32 %v12647_v21, %v2953_v12  ;;  %12662 = vst [vmem:[#allocation41_spill] sm:$0xff] %v9761_v45  ;;  %6946 = vmatpush3.msra.mxu0 %v9749_v41  ;;  %v3207_v63 = vsel %vm3171_vm3, %v9695_v43, 0.0  ;;  %v12665_v52 = vld [vmem:[#allocation9_spill] sm:$0xff] }
 0x46d   : > { %v3192_v17 = vadd.f32 %v3191_v15, %v3190_v60  ;;  %v3387_v19 = vadd.f32 %v3386_v16, %v3385_v0  ;;  %v9754_v35 = vpop.permute.xlu0 %2751  ;;  %v12664_v15 = vld [vmem:[#allocation56_spill] sm:$0xff]  ;;  %v2957_v0 = vadd.f32 %v9103_v40, %v2884_v24  ;;  %v2954_v31 = vadd.f32 %v9103_v40, %v2881_v4  ;;  %6950 = vmatprep.subr.mxu0 %v12523_v44 }
 0x46e   : > { %v9769_v16 = vadd.f32 %v12664_v15, %v12663_v8  ;;  %v2642_v3 = vadd.f32 %v9403_v5, %v12665_v52  ;;  %v3390_v38 = vsel %vm3171_vm3, %v3316_v32, 0.0  ;;  %v2956_v24 = vadd.f32 %v9103_v40, %v2883_v56  ;;  %v12666_v32 = vld [vmem:[#allocation10_spill] sm:$0xff]  ;;  %v12668_v56 = vld [vmem:[#allocation29_spill] sm:$0xff] }
 0x46f   : > { %v3194_v60 = vadd.f32 %v3193_v47, %v3192_v17  ;;  %v3389_v59 = vadd.f32 %v3388_v14, %v3387_v19  ;;  %v9772_v12 = vpop.permute.xlu1 %2530  ;;  %v2887_v14 = vadd.f32 %v9365_v51, %v2644_v33  ;;  %v3404_v8 = vsel %vm3171_vm3, %v3323_v28, 0.0  ;;  %v12667_v52 = vld [vmem:[#allocation62_spill] sm:$0xff] }
 0x470   : > { %v3321_v4 = vmul.f32 %v9758_v46, %v9758_v46  ;;  %v3327_v5 = vmul.f32 %v9761_v45, %v9761_v45  ;;  %v2647_v15 = vadd.f32 %v12666_v32, %v9437_v42  ;;  %v9796_v43 = vadd.f32 %v12668_v56, %v12667_v52 }
 0x471   : > { %v3196_v17 = vadd.f32 %v9569_v50, %v3194_v60  ;;  %v3391_v19 = vadd.f32 %v3390_v38, %v3389_v59  ;;  %v9785_v47 = vpop.permute.xlu0 %2761  ;;  %v9799_v51 = vadd.f32 %v12647_v21, %v2957_v0  ;;  %v3203_v33 = vsel %vm3171_vm3, %v9758_v46, 0.0  ;;  %v12671_v59 = vld [vmem:[#allocation75_spill] sm:$0xff] }
 0x472   : > { %v9809_v60 = vsel %vm3171_vm3, %v9761_v45, 0.0  ;;  %v9812_v42 = vadd.f32 %v12647_v21, %v2954_v31  ;;  %v2885_v32 = vadd.f32 %v12671_v59, %v2642_v3  ;;  %v9816_v0 = vadd.f32 %v12647_v21, %v2956_v24  ;;  %v12672_v45 = vld [vmem:[#allocation17_spill] sm:$0xff]  ;;  %v12674_v59 = vld [vmem:[#allocation67_spill] sm:$0xff] }
 0x473   : > { %12669 = vst [vmem:[#allocation59_spill] sm:$0xff] %v9799_v51  ;;  %v3198_v50 = vadd.f32 %v9643_v39, %v3196_v17  ;;  %v3393_v38 = vadd.f32 %v9588_v58, %v3391_v19  ;;  %v9803_v28 = vpop.permute.xlu1 %2526  ;;  %v2960_v39 = vadd.f32 %v9103_v40, %v2887_v14  ;;  %v3400_v52 = vsel %vm3171_vm3, %v3321_v4, 0.0  ;;  %v12673_v14 = vld [vmem:[#allocation31_spill] sm:$0xff] }
 0x474   : > { %12670 = vst [vmem:[#allocation8_spill] sm:$0xff] %v9812_v42  ;;  %v9825_v56 = vsel %vm3171_vm3, %v3327_v5, 0.0  ;;  %v2890_v31 = vadd.f32 %v9428_v37, %v2647_v15  ;;  %v2645_v3 = vadd.f32 %v9525_v6, %v12672_v45  ;;  %v3325_v24 = vmul.f32 %v9799_v51, %v9799_v51  ;;  %v12675_v45 = vld [vmem:[#allocation11_spill] sm:$0xff] }
 0x475   : > { %v3200_v58 = vadd.f32 %v9559_v2, %v3198_v50  ;;  %v3395_v17 = vadd.f32 %v9649_v36, %v3393_v38  ;;  %v9821_v19 = vpop.permute.xlu0 %2757  ;;  %v9834_v2 = vadd.f32 %v12674_v59, %v12673_v14  ;;  %v3211_v5 = vsel %vm3171_vm3, %v9799_v51, 0.0 }
 0x476   : > { %v3322_v37 = vmul.f32 %v9812_v42, %v9812_v42  ;;  %v2958_v6 = vadd.f32 %v9103_v40, %v2885_v32  ;;  %v2646_v15 = vadd.f32 %v9719_v22, %v12675_v45  ;;  %v3324_v38 = vmul.f32 %v9816_v0, %v9816_v0 }
 0x477   : > { %v3202_v36 = vadd.f32 %v9596_v13, %v3200_v58  ;;  %v3397_v50 = vadd.f32 %v9562_v26, %v3395_v17  ;;  %v9838_v4 = vpop.permute.xlu1 %2536  ;;  %v9850_v13 = vadd.f32 %v12647_v21, %v2960_v39  ;;  %v3205_v14 = vsel %vm3171_vm3, %v9812_v42, 0.0  ;;  %v12676_v39 = vld [vmem:[#allocation18_spill] sm:$0xff] }
 0x478   : > { %v2963_v59 = vadd.f32 %v9103_v40, %v2890_v31  ;;  %v2894_v32 = vadd.f32 %v9474_v27, %v9465_v34  ;;  %v2888_v22 = vadd.f32 %v9497_v9, %v2645_v3  ;;  %v3408_v45 = vsel %vm3171_vm3, %v3325_v24, 0.0 }
 0x479   : > { %v3204_v26 = vadd.f32 %v3203_v33, %v3202_v36  ;;  %v3399_v58 = vadd.f32 %v9606_v53, %v3397_v50  ;;  %v9853_v17 = vpop.permute.xlu0 %2759  ;;  %v2648_v51 = vadd.f32 %v12676_v39, %v9661_v18  ;;  %v3402_v50 = vsel %vm3171_vm3, %v3322_v37, 0.0  ;;  %v12677_v37 = vld [vmem:[#allocation25_spill] sm:$0xff]  ;;  %v12680_v39 = vld [vmem:[#allocation32_spill] sm:$0xff] }
 0x47a   : > { %v9868_v42 = vadd.f32 %v12647_v21, %v2958_v6  ;;  %v2892_v31 = vadd.f32 %v9555_v30, %v9478_v57  ;;  %v2889_v34 = vadd.f32 %v9577_v29, %v2646_v15  ;;  %v3209_v27 = vsel %vm3171_vm3, %v9816_v0, 0.0  ;;  %v12678_v29 = vld [vmem:[#allocation72_spill] sm:$0xff] }
 0x47b   : > { %v3206_v33 = vadd.f32 %v3205_v14, %v3204_v26  ;;  %v3401_v36 = vadd.f32 %v3400_v52, %v3399_v58  ;;  %v9864_v53 = vpop.permute.xlu1 %2532  ;;  %v3328_v9 = vmul.f32 %v9850_v13, %v9850_v13  ;;  %v3406_v24 = vsel %vm3171_vm3, %v3324_v38, 0.0 }
 0x47c   : > { %v9881_v21 = vadd.f32 %v12677_v37, %v2963_v59  ;;  %v2967_v6 = vadd.f32 %v9103_v40, %v2894_v32  ;;  %v2961_v57 = vadd.f32 %v9103_v40, %v2888_v22  ;;  %v3217_v30 = vsel %vm3171_vm3, %v9850_v13, 0.0 }
 0x47d   : > { %v3403_v18 = vadd.f32 %v3402_v50, %v3401_v36  ;;  %v3208_v52 = vadd.f32 %v3207_v63, %v3206_v33  ;;  %v9877_v3 = vpop.permute.xlu0 %2779  ;;  %v2891_v15 = vadd.f32 %v12678_v29, %v2648_v51  ;;  %v12679_v63 = vld [vmem:[#allocation73_spill] sm:$0xff]  ;;  %v3326_v38 = vmul.f32 %v9868_v42, %v9868_v42 }
 0x47e   : > { %v9892_v33 = vadd.f32 %v12680_v39, %v12679_v63  ;;  %v2965_v59 = vadd.f32 %v9103_v40, %v2892_v31  ;;  %v2962_v32 = vadd.f32 %v9103_v40, %v2889_v34  ;;  %v3414_v22 = vsel %vm3171_vm3, %v3328_v9, 0.0  ;;  %v12681_v34 = vld [vmem:[#allocation33_spill] sm:$0xff] }
 0x47f   : > { %v3210_v26 = vadd.f32 %v3209_v27, %v3208_v52  ;;  %v3405_v58 = vadd.f32 %v3404_v8, %v3403_v18  ;;  %v9888_v14 = vpop.permute.xlu1 %2763  ;;  %v2895_v51 = vadd.f32 %v9684_v62, %v9491_v7  ;;  %v3213_v27 = vsel %vm3171_vm3, %v9868_v42, 0.0 }
 0x480   : > { %v3331_v18 = vmul.f32 %v9881_v21, %v9881_v21  ;;  %v9908_v52 = vadd.f32 %v12677_v37, %v2967_v6  ;;  %v9911_v31 = vadd.f32 %v12677_v37, %v2961_v57  ;;  %v9915_v9 = vadd.f32 %v9418_v49, %v12681_v34 }
 0x481   : > { %v3212_v36 = vadd.f32 %v3211_v5, %v3210_v26  ;;  %v3407_v8 = vadd.f32 %v3406_v24, %v3405_v58  ;;  %v9901_v50 = vpop.permute.xlu0 %2540  ;;  %v2964_v62 = vadd.f32 %v9103_v40, %v2891_v15  ;;  %v3410_v29 = vsel %vm3171_vm3, %v3326_v38, 0.0 }
 0x482   : > { %v9922_v26 = vadd.f32 %v12677_v37, %v2965_v59  ;;  %v9925_v6 = vadd.f32 %v12677_v37, %v2962_v32  ;;  %v2893_v57 = vadd.f32 %v9754_v35, %v9510_v48  ;;  %v3223_v49 = vsel %vm3171_vm3, %v9881_v21, 0.0 }
 0x483   : > { %v3214_v7 = vadd.f32 %v3213_v27, %v3212_v36  ;;  %v3409_v5 = vadd.f32 %v3408_v45, %v3407_v8  ;;  %v9918_v24 = vpop.permute.xlu1 %2538  ;;  %v2968_v15 = vadd.f32 %v9103_v40, %v2895_v51  ;;  %v3420_v39 = vsel %vm3171_vm3, %v3331_v18, 0.0 }
 0x484   : > { %v3335_v38 = vmul.f32 %v9908_v52, %v9908_v52  ;;  %v3329_v59 = vmul.f32 %v9911_v31, %v9911_v31  ;;  %v2898_v48 = vadd.f32 %v9785_v47, %v9518_v23  ;;  %v9944_v35 = vsel %vm3171_vm3, %v9908_v52, 0.0 }
 0x485   : > { %v3216_v45 = vadd.f32 %v9809_v60, %v3214_v7  ;;  %v3411_v58 = vadd.f32 %v3410_v29, %v3409_v5  ;;  %v9933_v63 = vpop.permute.xlu0 %2542  ;;  %v9947_v60 = vadd.f32 %v12677_v37, %v2964_v62  ;;  %v3219_v8 = vsel %vm3171_vm3, %v9911_v31, 0.0 }
 0x486   : > { %v3333_v27 = vmul.f32 %v9922_v26, %v9922_v26  ;;  %v3330_v23 = vmul.f32 %v9925_v6, %v9925_v6  ;;  %v2966_v47 = vadd.f32 %v9103_v40, %v2893_v57  ;;  %v9960_v18 = vadd.f32 %v12677_v37, %v2968_v15 }
 0x487   : > { %v3218_v32 = vadd.f32 %v3217_v30, %v3216_v45  ;;  %v3413_v51 = vadd.f32 %v9825_v56, %v3411_v58  ;;  %v9950_v36 = vpop.permute.xlu1 %2534  ;;  %v2896_v56 = vadd.f32 %v9821_v19, %v9573_v11  ;;  %v3428_v7 = vsel %vm3171_vm3, %v3335_v38, 0.0 }
 0x488   : > { %v3416_v5 = vsel %vm3171_vm3, %v3329_v59, 0.0  ;;  %v3221_v29 = vsel %vm3171_vm3, %v9925_v6, 0.0  ;;  %v2971_v45 = vadd.f32 %v9103_v40, %v2898_v48  ;;  %v3332_v57 = vmul.f32 %v9947_v60, %v9947_v60 }
 0x489   : > { %v3220_v34 = vadd.f32 %v3219_v8, %v3218_v32  ;;  %v3415_v30 = vadd.f32 %v3414_v22, %v3413_v51  ;;  %v9964_v62 = vpop.permute.xlu0 %2544  ;;  %v2897_v22 = vadd.f32 %v9853_v17, %v9632_v25  ;;  %v3227_v19 = vsel %vm3171_vm3, %v9922_v26, 0.0  ;;  %v12683_v17 = vld [vmem:[#allocation36_spill] sm:$0xff] }
 0x48a   : > { %v3424_v38 = vsel %vm3171_vm3, %v3333_v27, 0.0  ;;  %v3418_v59 = vsel %vm3171_vm3, %v3330_v23, 0.0  ;;  %v9980_v32 = vadd.f32 %v12677_v37, %v2966_v47  ;;  %v3336_v48 = vmul.f32 %v9960_v18, %v9960_v18  ;;  %v12684_v23 = vld [vmem:[#allocation28_spill] sm:$0xff] }
 0x48b   : > { %v3222_v15 = vadd.f32 %v3221_v29, %v3220_v34  ;;  %v3417_v58 = vadd.f32 %v3416_v5, %v3415_v30  ;;  %v2770_v11 = vpop.permute.xlu1 %2769  ;;  %v2969_v34 = vadd.f32 %v9103_v40, %v2896_v56  ;;  %v3225_v25 = vsel %vm3171_vm3, %v9947_v60, 0.0 }
 0x48c   : > { %12682 = vst [vmem:[#allocation26_spill] sm:$0xff] %v9980_v32  ;;  %v9991_v27 = vadd.f32 %v9699_v54, %v12683_v17  ;;  %v9994_v5 = vadd.f32 %v12684_v23, %v2971_v45  ;;  %v2899_v37 = vadd.f32 %v9888_v14, %v9610_v61  ;;  %v2970_v56 = vadd.f32 %v9103_v40, %v2897_v22 }
 0x48d   : > { %v3224_v51 = vadd.f32 %v3223_v49, %v3222_v15  ;;  %v3419_v8 = vadd.f32 %v3418_v59, %v3417_v58  ;;  %v9985_v30 = vpop.permute.xlu0 %2785  ;;  %v3422_v49 = vsel %vm3171_vm3, %v3332_v57, 0.0  ;;  %v3233_v58 = vsel %vm3171_vm3, %v9960_v18, 0.0  ;;  %v12685_v59 = vld [vmem:[#allocation35_spill] sm:$0xff] }
 0x48e   : > { %v10004_v54 = vadd.f32 %v12685_v59, %v9737_v55  ;;  %v3334_v45 = vmul.f32 %v9980_v32, %v9980_v32  ;;  %v2907_v61 = vadd.f32 %v9877_v3, %v9892_v33  ;;  %v3430_v14 = vsel %vm3171_vm3, %v3336_v48, 0.0  ;;  %v12689_v59 = vld [vmem:[#allocation38_spill] sm:$0xff] }
 0x48f   : > { %v3421_v47 = vadd.f32 %v3420_v39, %v3419_v8  ;;  %v3226_v29 = vadd.f32 %v3225_v25, %v3224_v51  ;;  %v2766_v15 = vpop.permute.xlu1 %2765  ;;  %v10012_v22 = vadd.f32 %v12684_v23, %v2969_v34  ;;  %v3229_v8 = vsel %vm3171_vm3, %v9980_v32, 0.0 }
 0x490   : > { %v3339_v55 = vmul.f32 %v9994_v5, %v9994_v5  ;;  %v2972_v25 = vadd.f32 %v9103_v40, %v2899_v37  ;;  %v2900_v17 = vadd.f32 %v2766_v15, %v9636_v1  ;;  %v2902_v48 = vadd.f32 %v2770_v11, %v9616_v20 }
 0x491   : > { %v3228_v39 = vadd.f32 %v3227_v19, %v3226_v29  ;;  %v3423_v57 = vadd.f32 %v3422_v49, %v3421_v47  ;;  %12686 = vst [vmem:[#allocation61_spill] sm:$0xff] %v10012_v22  ;;  %v10014_v51 = vpop.permute.xlu0 %2781  ;;  %v10023_v19 = vadd.f32 %v12684_v23, %v2970_v56  ;;  %v3426_v49 = vsel %vm3171_vm3, %v3334_v45, 0.0  ;;  %v12688_v47 = vld [vmem:[#allocation37_spill] sm:$0xff] }
 0x492   : > { %v10029_v29 = vadd.f32 %v12688_v47, %v9772_v12  ;;  %v10033_v32 = vadd.f32 %v9803_v28, %v12689_v59  ;;  %v2980_v1 = vadd.f32 %v9103_v40, %v2907_v61  ;;  %v3337_v56 = vmul.f32 %v10012_v22, %v10012_v22 }
 0x493   : > { %v3230_v3 = vadd.f32 %v3229_v8, %v3228_v39  ;;  %v3425_v33 = vadd.f32 %v3424_v38, %v3423_v57  ;;  %12687 = vst [vmem:[#allocation53_spill] sm:$0xff] %v10023_v19  ;;  %v2772_v34 = vpop.permute.xlu1 %2771  ;;  %v10041_v20 = vadd.f32 %v9243_v10, %v9838_v4  ;;  %v3239_v12 = vsel %vm3171_vm3, %v9994_v5, 0.0  ;;  %v12690_v8 = vld [vmem:[#allocation55_spill] sm:$0xff] }
 0x494   : > { %v3436_v28 = vsel %vm3171_vm3, %v3339_v55, 0.0  ;;  %v10049_v15 = vadd.f32 %v12684_v23, %v2972_v25  ;;  %v3338_v39 = vmul.f32 %v10023_v19, %v10023_v19  ;;  %v2975_v10 = vadd.f32 %v9103_v40, %v2902_v48  ;;  %v12692_v55 = vld [vmem:[#allocation21_spill] sm:$0xff] }
 0x495   : > { %v3232_v38 = vadd.f32 %v9944_v35, %v3230_v3  ;;  %v3427_v37 = vadd.f32 %v3426_v49, %v3425_v33  ;;  %v10043_v11 = vpop.permute.xlu0 %2787  ;;  %v2973_v35 = vadd.f32 %v9103_v40, %v2900_v17  ;;  %v3235_v57 = vsel %vm3171_vm3, %v10012_v22, 0.0 }
 0x496   : > { %v10058_v3 = vadd.f32 %v12690_v8, %v2980_v1  ;;  %v2903_v33 = vadd.f32 %v2772_v34, %v12692_v55  ;;  %v3237_v59 = vsel %vm3171_vm3, %v10023_v19, 0.0  ;;  %v3340_v1 = vmul.f32 %v10049_v15, %v10049_v15 }
 0x497   : > { %v3429_v45 = vadd.f32 %v3428_v7, %v3427_v37  ;;  %v3234_v61 = vadd.f32 %v3233_v58, %v3232_v38  ;;  %v2768_v4 = vpop.permute.xlu1 %2767  ;;  %v3432_v7 = vsel %vm3171_vm3, %v3337_v56, 0.0  ;;  %v12693_v58 = vld [vmem:[#allocation43_spill] sm:$0xff]  ;;  %v10072_v38 = vadd.f32 %v12684_v23, %v2973_v35 }
 0x498   : > { %12691 = vst [vmem:[#allocation24_spill] sm:$0xff] %v10058_v3  ;;  %v2901_v25 = vadd.f32 %v2768_v4, %v9769_v16  ;;  %v10065_v47 = vadd.f32 %v9864_v53, %v12693_v58  ;;  %v3434_v37 = vsel %vm3171_vm3, %v3338_v39, 0.0  ;;  %v10077_v56 = vadd.f32 %v12684_v23, %v2975_v10  ;;  %v12695_v4 = vld [vmem:[#allocation54_spill] sm:$0xff] }
 0x499   : > { %v3236_v49 = vadd.f32 %v3235_v57, %v3234_v61  ;;  %v3431_v17 = vadd.f32 %v3430_v14, %v3429_v45  ;;  %v2784_v48 = vpop.permute.xlu0 %2783  ;;  %12694 = vst [vmem:[#allocation58_spill] sm:$0xff] %v10072_v38  ;;  %v10081_v45 = vsel %vm3171_vm3, %v10058_v3, 0.0  ;;  %v3348_v61 = vmul.f32 %v10058_v3, %v10058_v3  ;;  %v12696_v39 = vld [vmem:[#allocation46_spill] sm:$0xff] }
 0x49a   : > { %v2974_v16 = vadd.f32 %v9103_v40, %v2901_v25  ;;  %v10087_v35 = vadd.f32 %v9901_v50, %v12695_v4  ;;  %v2976_v57 = vadd.f32 %v9103_v40, %v2903_v33  ;;  %v10092_v10 = vadd.f32 %v12696_v39, %v9918_v24 }
 0x49b   : > { %v3433_v34 = vadd.f32 %v3432_v7, %v3431_v17  ;;  %v3238_v14 = vadd.f32 %v3237_v59, %v3236_v49  ;;  %v2778_v53 = vpop.permute.xlu1 %2777  ;;  %v3241_v7 = vsel %vm3171_vm3, %v10049_v15, 0.0  ;;  %v3438_v58 = vsel %vm3171_vm3, %v3340_v1, 0.0 }
 0x49c   : > { %v10095_v49 = vadd.f32 %v12684_v23, %v2974_v16  ;;  %v3341_v50 = vmul.f32 %v10072_v38, %v10072_v38  ;;  %v2906_v33 = vadd.f32 %v2778_v53, %v9796_v43  ;;  %v3343_v24 = vmul.f32 %v10077_v56, %v10077_v56 }
 0x49d   : > { %v3435_v55 = vadd.f32 %v3434_v37, %v3433_v34  ;;  %v3240_v25 = vadd.f32 %v3239_v12, %v3238_v14  ;;  %v10097_v17 = vpop.permute.xlu0 %2793  ;;  %v2910_v16 = vadd.f32 %v9985_v30, %v10004_v54  ;;  %v3243_v14 = vsel %vm3171_vm3, %v10072_v38, 0.0 }
 0x49e   : > { %12697 = vst [vmem:[#allocation42_spill] sm:$0xff] %v10095_v49  ;;  %v10112_v37 = vadd.f32 %v12684_v23, %v2976_v57  ;;  %v3342_v1 = vmul.f32 %v10095_v49, %v10095_v49  ;;  %v2908_v30 = vadd.f32 %v10014_v51, %v9991_v27  ;;  %v3245_v23 = vsel %vm3171_vm3, %v10095_v49, 0.0 }
 0x49f   : > { %v3242_v12 = vadd.f32 %v3241_v7, %v3240_v25  ;;  %v3437_v59 = vadd.f32 %v3436_v28, %v3435_v55  ;;  %v2774_v34 = vpop.permute.xlu1 %2773  ;;  %v10118_v28 = vsel %vm3171_vm3, %v3348_v61, 0.0  ;;  %v3440_v55 = vsel %vm3171_vm3, %v3341_v50, 0.0 }
 0x4a0   : > { %v2904_v43 = vadd.f32 %v2774_v34, %v9834_v2  ;;  %v2979_v57 = vadd.f32 %v9103_v40, %v2906_v33  ;;  %v3247_v2 = vsel %vm3171_vm3, %v10077_v56, 0.0  ;;  %v2983_v61 = vadd.f32 %v9103_v40, %v2910_v16 }
 0x4a1   : > { %v3439_v53 = vadd.f32 %v3438_v58, %v3437_v59  ;;  %v3244_v4 = vadd.f32 %v3243_v14, %v3242_v12  ;;  %v2790_v54 = vpop.permute.xlu0 %2789  ;;  %v3444_v27 = vsel %vm3171_vm3, %v3343_v24, 0.0  ;;  %v3344_v51 = vmul.f32 %v10112_v37, %v10112_v37 }
 0x4a2   : > { %v2977_v25 = vadd.f32 %v9103_v40, %v2904_v43  ;;  %v3442_v50 = vsel %vm3171_vm3, %v3342_v1, 0.0  ;;  %v2909_v34 = vadd.f32 %v2784_v48, %v10033_v32  ;;  %v2981_v43 = vadd.f32 %v9103_v40, %v2908_v30 }
 0x4a3   : > { %v3441_v39 = vadd.f32 %v3440_v55, %v3439_v53  ;;  %v3246_v7 = vadd.f32 %v3245_v23, %v3244_v4  ;;  %v2776_v58 = vpop.permute.xlu1 %2775  ;;  %v3249_v24 = vsel %vm3171_vm3, %v10112_v37, 0.0  ;;  %v10143_v53 = vadd.f32 %v12690_v8, %v2979_v57  ;;  %v12700_v4 = vld [vmem:[#allocation49_spill] sm:$0xff] }
 0x4a4   : > { %v10135_v12 = vadd.f32 %v12690_v8, %v2977_v25  ;;  %v2905_v14 = vadd.f32 %v2776_v58, %v9915_v9  ;;  %v2670_v55 = vadd.f32 %v9950_v36, %v12700_v4  ;;  %v10153_v48 = vadd.f32 %v12690_v8, %v2983_v61 }
 0x4a5   : > { %v3248_v33 = vadd.f32 %v3247_v2, %v3246_v7  ;;  %v3443_v59 = vadd.f32 %v3442_v50, %v3441_v39  ;;  %v2792_v16 = vpop.permute.xlu0 %2791  ;;  %12699 = vst [vmem:[#allocation15_spill] sm:$0xff] %v10143_v53  ;;  %v3446_v30 = vsel %vm3171_vm3, %v3344_v51, 0.0  ;;  %v2911_v57 = vadd.f32 %v10043_v11, %v10029_v29 }
 0x4a6   : > { %12698 = vst [vmem:[#allocation23_spill] sm:$0xff] %v10135_v12  ;;  %v3345_v1 = vmul.f32 %v10135_v12, %v10135_v12  ;;  %v2978_v32 = vadd.f32 %v9103_v40, %v2905_v14  ;;  %12701 = vst [vmem:[#allocation65_spill] sm:$0xff] %v10153_v48  ;;  %v3251_v2 = vsel %vm3171_vm3, %v10135_v12, 0.0  ;;  %v2982_v39 = vadd.f32 %v9103_v40, %v2909_v34 }
 0x4a7   : > { %v3445_v23 = vadd.f32 %v3444_v27, %v3443_v59  ;;  %v3250_v25 = vadd.f32 %v3249_v24, %v3248_v33  ;;  %v10150_v9 = vpop.permute.xlu1 %3095  ;;  %v10165_v50 = vadd.f32 %v12690_v8, %v2981_v43  ;;  %v3347_v61 = vmul.f32 %v10143_v53, %v10143_v53  ;;  %v12704_v24 = vld [vmem:[#allocation60_spill] sm:$0xff] }
 0x4a8   : > { %v10162_v58 = vadd.f32 %v12690_v8, %v2978_v32  ;;  %v3448_v51 = vsel %vm3171_vm3, %v3345_v1, 0.0  ;;  %v2912_v29 = vadd.f32 %v2790_v54, %v10065_v47  ;;  %v2913_v34 = vadd.f32 %v2792_v16, %v2670_v55 }
 0x4a9   : > { %v3252_v36 = vadd.f32 %v3251_v2, %v3250_v25  ;;  %v3447_v7 = vadd.f32 %v3446_v30, %v3445_v23  ;;  %v2547_v27 = vpop.permute.xlu0 %2546  ;;  %12703 = vst [vmem:[#allocation69_spill] sm:$0xff] %v10165_v50  ;;  %v10177_v43 = vadd.f32 %v9933_v63, %v12704_v24  ;;  %v2984_v4 = vadd.f32 %v9103_v40, %v2911_v57  ;;  %v12706_v63 = vld [vmem:[#allocation52_spill] sm:$0xff] }
 0x4aa   : > { %12702 = vst [vmem:[#allocation34_spill] sm:$0xff] %v10162_v58  ;;  %v3253_v33 = vsel %vm3171_vm3, %v10162_v58, 0.0  ;;  %v3346_v59 = vmul.f32 %v10162_v58, %v10162_v58  ;;  %v2914_v1 = vadd.f32 %v10097_v17, %v10041_v20  ;;  %v10183_v47 = vadd.f32 %v12690_v8, %v2982_v39 }
 0x4ab   : > { %v3449_v11 = vadd.f32 %v3448_v51, %v3447_v7  ;;  %v2796_v14 = vpop.permute.xlu1 %2795  ;;  %v3254_v23 = vadd.f32 %v3253_v33, %v3252_v36  ;;  %v3255_v54 = vsel %vm3171_vm3, %v10143_v53, 0.0  ;;  %v2675_v32 = vadd.f32 %v12706_v63, %v9964_v62 }
 0x4ac   : > { %12705 = vst [vmem:[#allocation30_spill] sm:$0xff] %v10183_v47  ;;  %v3450_v25 = vsel %vm3171_vm3, %v3346_v59, 0.0  ;;  %v2915_v16 = vadd.f32 %v2796_v14, %v10092_v10  ;;  %v3349_v30 = vmul.f32 %v10165_v50, %v10165_v50  ;;  %v3263_v57 = vsel %vm3171_vm3, %v10153_v48, 0.0 }
 0x4ad   : > { %v10189_v55 = vpop.permute.xlu0 %2548  ;;  %v3256_v20 = vadd.f32 %v3255_v54, %v3254_v23  ;;  %v3451_v17 = vadd.f32 %v3450_v25, %v3449_v11  ;;  %v3452_v2 = vsel %vm3171_vm3, %v3347_v61, 0.0  ;;  %v2985_v39 = vadd.f32 %v9103_v40, %v2912_v29 }
 0x4ae   : > { %v2986_v36 = vadd.f32 %v9103_v40, %v2913_v34  ;;  %v3351_v7 = vmul.f32 %v10153_v48, %v10153_v48  ;;  %v10203_v62 = vadd.f32 %v12690_v8, %v2984_v4  ;;  %v3259_v11 = vsel %vm3171_vm3, %v10165_v50, 0.0 }
 0x4af   : > { %v2802_v10 = vpop.permute.xlu1 %2801  ;;  %v3258_v51 = vadd.f32 %v10081_v45, %v3256_v20  ;;  %v3453_v33 = vadd.f32 %v3452_v2, %v3451_v17  ;;  %v3350_v61 = vmul.f32 %v10183_v47, %v10183_v47  ;;  %v2987_v29 = vadd.f32 %v9103_v40, %v2914_v1 }
 0x4b0   : > { %12707 = vst [vmem:[#allocation64_spill] sm:$0xff] %v10203_v62  ;;  %v2988_v59 = vadd.f32 %v9103_v40, %v2915_v16  ;;  %v3456_v14 = vsel %vm3171_vm3, %v3349_v30, 0.0  ;;  %v2918_v4 = vadd.f32 %v2802_v10, %v2675_v32  ;;  %v3261_v45 = vsel %vm3171_vm3, %v10183_v47, 0.0  ;;  %v12712_v10 = vld [vmem:[#allocation57_spill] sm:$0xff]  ;;  %v12753_v47 = vld [vmem:[#allocation8_spill] sm:$0xff] }
 0x4b1   : > { %v2551_v34 = vpop.permute.xlu0 %2550  ;;  %v3260_v24 = vadd.f32 %v3259_v11, %v3258_v51  ;;  %v3455_v8 = vadd.f32 %v10118_v28, %v3453_v33  ;;  %v10217_v23 = vadd.f32 %v10150_v9, %v2985_v39  ;;  %v10220_v54 = vadd.f32 %v10150_v9, %v2986_v36 }
 0x4b2   : > { %v10223_v1 = vadd.f32 %v10150_v9, %v2987_v29  ;;  %v3352_v16 = vmul.f32 %v10203_v62, %v10203_v62  ;;  %v3460_v32 = vsel %vm3171_vm3, %v3351_v7, 0.0  ;;  %v3265_v20 = vsel %vm3171_vm3, %v10203_v62, 0.0 }
 0x4b3   : > { %12708 = vst [vmem:[#allocation45_spill] sm:$0xff] %v10217_v23  ;;  %12709 = vst [vmem:[#allocation44_spill] sm:$0xff] %v10220_v54  ;;  %v2798_v25 = vpop.permute.xlu1 %2797  ;;  %v3262_v63 = vadd.f32 %v3261_v45, %v3260_v24  ;;  %v3457_v30 = vadd.f32 %v3456_v14, %v3455_v8  ;;  %v3458_v17 = vsel %vm3171_vm3, %v3350_v61, 0.0  ;;  %v10233_v2 = vadd.f32 %v10150_v9, %v2988_v59 }
 0x4b4   : > { %12710 = vst [vmem:[#allocation70_spill] sm:$0xff] %v10223_v1  ;;  %v2916_v28 = vadd.f32 %v2798_v25, %v10087_v35  ;;  %v2676_v51 = vadd.f32 %v12712_v10, %v2547_v27  ;;  %v2991_v11 = vadd.f32 %v9103_v40, %v2918_v4  ;;  %v3353_v35 = vmul.f32 %v10217_v23, %v10217_v23 }
 0x4b5   : > { %12711 = vst [vmem:[#allocation16_spill] sm:$0xff] %v10233_v2  ;;  %v2553_v39 = vpop.permute.xlu0 %2552  ;;  %v3459_v36 = vadd.f32 %v3458_v17, %v3457_v30  ;;  %v3264_v33 = vadd.f32 %v3263_v57, %v3262_v63  ;;  %v3354_v7 = vmul.f32 %v10220_v54, %v10220_v54  ;;  %v3355_v29 = vmul.f32 %v10223_v1, %v10223_v1 }
 0x4b6   : > { %v2989_v61 = vadd.f32 %v9103_v40, %v2916_v28  ;;  %v3462_v14 = vsel %vm3171_vm3, %v3352_v16, 0.0  ;;  %v3267_v57 = vsel %vm3171_vm3, %v10217_v23, 0.0  ;;  %v3271_v4 = vsel %vm3171_vm3, %v10223_v1, 0.0  ;;  %v12722_v23 = vld [vmem:[#allocation77_spill] sm:$0xff] }
 0x4b7   : > { %v2804_v59 = vpop.permute.xlu1 %2803  ;;  %v3266_v24 = vadd.f32 %v3265_v20, %v3264_v33  ;;  %v3461_v8 = vadd.f32 %v3460_v32, %v3459_v36  ;;  %v3356_v45 = vmul.f32 %v10233_v2, %v10233_v2  ;;  %v3269_v16 = vsel %vm3171_vm3, %v10220_v54, 0.0 }
 0x4b8   : > { %v2919_v27 = vadd.f32 %v2804_v59, %v2676_v51  ;;  %v10252_v25 = vadd.f32 %v10150_v9, %v2989_v61  ;;  %v10259_v32 = vadd.f32 %v10150_v9, %v2991_v11  ;;  %v3464_v20 = vsel %vm3171_vm3, %v3353_v35, 0.0  ;;  %v12715_v35 = vld [vmem:[#allocation66_spill] sm:$0xff] }
 0x4b9   : > { %v10254_v63 = vpop.permute.xlu0 %3097  ;;  %v3268_v30 = vadd.f32 %v3267_v57, %v3266_v24  ;;  %v3463_v28 = vadd.f32 %v3462_v14, %v3461_v8  ;;  %v3466_v17 = vsel %vm3171_vm3, %v3354_v7, 0.0  ;;  %v3468_v36 = vsel %vm3171_vm3, %v3355_v29, 0.0  ;;  %v12716_v8 = vld [vmem:[#allocation71_spill] sm:$0xff] }
 0x4ba   : > { %12713 = vst [vmem:[#allocation27_spill] sm:$0xff] %v10252_v25  ;;  %12714 = vst [vmem:[#allocation56_spill] sm:$0xff] %v10259_v32  ;;  %v2992_v10 = vadd.f32 %v9103_v40, %v2919_v27  ;;  %v3357_v59 = vmul.f32 %v10252_v25, %v10252_v25  ;;  %v3273_v11 = vsel %vm3171_vm3, %v10233_v2, 0.0  ;;  %v3470_v14 = vsel %vm3171_vm3, %v3356_v45, 0.0 }
 0x4bb   : > { %v2800_v51 = vpop.permute.xlu1 %2799  ;;  %v3270_v33 = vadd.f32 %v3269_v16, %v3268_v30  ;;  %v3465_v61 = vadd.f32 %v3464_v20, %v3463_v28  ;;  %v2677_v7 = vadd.f32 %v10189_v55, %v12715_v35  ;;  %v2678_v29 = vadd.f32 %v2551_v34, %v12716_v8  ;;  %v12717_v28 = vld [vmem:[#allocation63_spill] sm:$0xff]  ;;  %v12721_v35 = vld [vmem:[#allocation78_spill] sm:$0xff] }
 0x4bc   : > { %v2917_v24 = vadd.f32 %v2800_v51, %v10177_v43  ;;  %v3279_v16 = vsel %vm3171_vm3, %v10259_v32, 0.0  ;;  %v3359_v30 = vmul.f32 %v10259_v32, %v10259_v32  ;;  %v3275_v43 = vsel %vm3171_vm3, %v10252_v25, 0.0 }
 0x4bd   : > { %v2559_v57 = vpop.permute.xlu0 %2558  ;;  %v3272_v27 = vadd.f32 %v3271_v4, %v3270_v33  ;;  %v3467_v54 = vadd.f32 %v3466_v17, %v3465_v61  ;;  %v2679_v20 = vadd.f32 %v12717_v28, %v2553_v39  ;;  %v10282_v45 = vadd.f32 %v10150_v9, %v2992_v10 }
 0x4be   : > { %v2990_v55 = vadd.f32 %v9103_v40, %v2917_v24  ;;  %v3472_v51 = vsel %vm3171_vm3, %v3357_v59, 0.0  ;;  %v2682_v8 = vadd.f32 %v2559_v57, %v12721_v35 }
 0x4bf   : > { %12718 = vst [vmem:[#allocation9_spill] sm:$0xff] %v10282_v45  ;;  %v10285_v34 = vpop.permute.xlu1 %2805  ;;  %v3274_v4 = vadd.f32 %v3273_v11, %v3272_v27  ;;  %v3469_v17 = vadd.f32 %v3468_v36, %v3467_v54  ;;  %v3281_v35 = vsel %vm3171_vm3, %v10282_v45, 0.0 }
 0x4c0   : > { %12719 = vst [vmem:[#allocation10_spill] sm:$0xff] %v10285_v34  ;;  %v2920_v33 = vadd.f32 %v10285_v34, %v2677_v7  ;;  %v10290_v61 = vadd.f32 %v10150_v9, %v2990_v55  ;;  %v2921_v39 = vadd.f32 %v10285_v34, %v2678_v29  ;;  %v2922_v10 = vadd.f32 %v10285_v34, %v2679_v20  ;;  %v12725_v20 = vld [vmem:[#allocation68_spill] sm:$0xff] }
 0x4c1   : > { %v2563_v25 = vpop.permute.xlu0 %2562  ;;  %v3471_v28 = vadd.f32 %v3470_v14, %v3469_v17  ;;  %v3276_v24 = vadd.f32 %v3275_v43, %v3274_v4  ;;  %v3360_v14 = vmul.f32 %v10282_v45, %v10282_v45 }
 0x4c2   : > { %12720 = vst [vmem:[#allocation62_spill] sm:$0xff] %v10290_v61  ;;  %v2684_v32 = vadd.f32 %v12722_v23, %v2563_v25  ;;  %v2993_v54 = vadd.f32 %v9103_v40, %v2920_v33  ;;  %v3277_v36 = vsel %vm3171_vm3, %v10290_v61, 0.0  ;;  %v3358_v9 = vmul.f32 %v10290_v61, %v10290_v61 }
 0x4c3   : > { %v2994_v59 = vadd.f32 %v9103_v40, %v2921_v39  ;;  %v2995_v11 = vadd.f32 %v9103_v40, %v2922_v10  ;;  %v2555_v7 = vpop.permute.xlu1 %2554  ;;  %v3473_v29 = vadd.f32 %v3472_v51, %v3471_v28  ;;  %v3278_v57 = vadd.f32 %v3277_v36, %v3276_v24 }
 0x4c4   : > { %v10306_v23 = vadd.f32 %v10254_v63, %v2993_v54  ;;  %v3474_v25 = vsel %vm3171_vm3, %v3358_v9, 0.0  ;;  %v2927_v27 = vadd.f32 %v10285_v34, %v2684_v32  ;;  %v2680_v55 = vadd.f32 %v12725_v20, %v2555_v7  ;;  %v12727_v9 = vld [vmem:[#allocation76_spill] sm:$0xff] }
 0x4c5   : > { %v10311_v43 = vadd.f32 %v10254_v63, %v2994_v59  ;;  %v3280_v4 = vadd.f32 %v3279_v16, %v3278_v57  ;;  %v3475_v17 = vadd.f32 %v3474_v25, %v3473_v29  ;;  %v10315_v51 = vadd.f32 %v10254_v63, %v2995_v11 }
 0x4c6   : > { %12723 = vst [vmem:[#allocation29_spill] sm:$0xff] %v10306_v23  ;;  %v3476_v33 = vsel %vm3171_vm3, %v3359_v30, 0.0  ;;  %v3361_v39 = vmul.f32 %v10306_v23, %v10306_v23  ;;  %v2925_v32 = vadd.f32 %v10285_v34, %v2682_v8  ;;  %v3478_v54 = vsel %vm3171_vm3, %v3360_v14, 0.0 }
 0x4c7   : > { %12724 = vst [vmem:[#allocation75_spill] sm:$0xff] %v10311_v43  ;;  %12726 = vst [vmem:[#allocation17_spill] sm:$0xff] %v10315_v51  ;;  %v2557_v10 = vpop.permute.xlu1 %2556  ;;  %v3282_v28 = vadd.f32 %v3281_v35, %v3280_v4  ;;  %v3477_v24 = vadd.f32 %v3476_v33, %v3475_v17  ;;  %v3362_v16 = vmul.f32 %v10311_v43, %v10311_v43  ;;  %v3283_v7 = vsel %vm3171_vm3, %v10306_v23, 0.0  ;;  %v12728_v33 = vld [vmem:[#allocation74_spill] sm:$0xff] }
 0x4c8   : > { %v3000_v36 = vadd.f32 %v9103_v40, %v2927_v27  ;;  %v2923_v30 = vadd.f32 %v10285_v34, %v2680_v55  ;;  %v2681_v59 = vadd.f32 %v2557_v10, %v12727_v9  ;;  %v3363_v8 = vmul.f32 %v10315_v51, %v10315_v51 }
 0x4c9   : > { %v3479_v11 = vadd.f32 %v3478_v54, %v3477_v24  ;;  %v3480_v29 = vsel %vm3171_vm3, %v3361_v39, 0.0  ;;  %v3284_v25 = vadd.f32 %v3283_v7, %v3282_v28  ;;  %v2998_v27 = vadd.f32 %v9103_v40, %v2925_v32 }
 0x4ca   : > { %v2996_v57 = vadd.f32 %v9103_v40, %v2923_v30  ;;  %v2924_v14 = vadd.f32 %v10285_v34, %v2681_v59  ;;  %v3285_v55 = vsel %vm3171_vm3, %v10311_v43, 0.0  ;;  %v3482_v4 = vsel %vm3171_vm3, %v3362_v16, 0.0 }
 0x4cb   : > { %v2561_v20 = vpop.permute.xlu1 %2560  ;;  %v3481_v17 = vadd.f32 %v3480_v29, %v3479_v11  ;;  %v3286_v39 = vadd.f32 %v3285_v55, %v3284_v25  ;;  %v10346_v28 = vadd.f32 %v10254_v63, %v2998_v27  ;;  %v10349_v32 = vadd.f32 %v10254_v63, %v3000_v36 }
 0x4cc   : > { %v2683_v35 = vadd.f32 %v12728_v33, %v2561_v20  ;;  %v10342_v10 = vadd.f32 %v10254_v63, %v2996_v57  ;;  %v2997_v24 = vadd.f32 %v9103_v40, %v2924_v14  ;;  %v3287_v54 = vsel %vm3171_vm3, %v10315_v51, 0.0 }
 0x4cd   : > { %12730 = vst [vmem:[#allocation67_spill] sm:$0xff] %v10346_v28  ;;  %12731 = vst [vmem:[#allocation11_spill] sm:$0xff] %v10349_v32  ;;  %v3483_v30 = vadd.f32 %v3482_v4, %v3481_v17  ;;  %v3484_v9 = vsel %vm3171_vm3, %v3363_v8, 0.0  ;;  %v3288_v59 = vadd.f32 %v3287_v54, %v3286_v39  ;;  %v3366_v57 = vmul.f32 %v10346_v28, %v10346_v28 }
 0x4ce   : > { %12729 = vst [vmem:[#allocation31_spill] sm:$0xff] %v10342_v10  ;;  %v2926_v16 = vadd.f32 %v10285_v34, %v2683_v35  ;;  %v3364_v11 = vmul.f32 %v10342_v10, %v10342_v10  ;;  %v10358_v7 = vadd.f32 %v10254_v63, %v2997_v24  ;;  %v3289_v29 = vsel %vm3171_vm3, %v10342_v10, 0.0 }
 0x4cf   : > { %v3485_v36 = vadd.f32 %v3484_v9, %v3483_v30  ;;  %v3290_v14 = vadd.f32 %v3289_v29, %v3288_v59  ;;  %v3368_v54 = vmul.f32 %v10349_v32, %v10349_v32  ;;  %v3490_v30 = vsel %vm3171_vm3, %v3366_v57, 0.0 }
 0x4d0   : > { %12732 = vst [vmem:[#allocation18_spill] sm:$0xff] %v10358_v7  ;;  %v2999_v25 = vadd.f32 %v9103_v40, %v2926_v16  ;;  %v3486_v27 = vsel %vm3171_vm3, %v3364_v11, 0.0  ;;  %v3291_v8 = vsel %vm3171_vm3, %v10358_v7, 0.0  ;;  %v3365_v20 = vmul.f32 %v10358_v7, %v10358_v7 }
 0x4d1   : > { %v3487_v55 = vadd.f32 %v3486_v27, %v3485_v36  ;;  %v3292_v17 = vadd.f32 %v3291_v8, %v3290_v14  ;;  %v3293_v40 = vsel %vm3171_vm3, %v10346_v28, 0.0  ;;  %v3297_v11 = vsel %vm3171_vm3, %v10349_v32, 0.0 }
 0x4d2   : > { %v10371_v4 = vadd.f32 %v10254_v63, %v2999_v25  ;;  %v3488_v33 = vsel %vm3171_vm3, %v3365_v20, 0.0  ;;  %v3494_v36 = vsel %vm3171_vm3, %v3368_v54, 0.0  ;;  %v7513_v54 = vld [vmem:[%s12255_s10 + $0x18] sm:$0xff] }
 0x4d3   : > { %v3489_v35 = vadd.f32 %v3488_v33, %v3487_v55  ;;  %v3294_v63 = vadd.f32 %v3293_v40, %v3292_v17 }
 0x4d4   : > { %12733 = vst [vmem:[#allocation25_spill] sm:$0xff] %v10371_v4  ;;  %v3295_v39 = vsel %vm3171_vm3, %v10371_v4, 0.0  ;;  %v3367_v24 = vmul.f32 %v10371_v4, %v10371_v4 }
 0x4d5   : > { %v3491_v16 = vadd.f32 %v3490_v30, %v3489_v35  ;;  %v3296_v59 = vadd.f32 %v3295_v39, %v3294_v63  ;;  %v12734_v63 = vld [vmem:[#allocation51_spill] sm:$0xff] }
 0x4d6   : > { %v3492_v9 = vsel %vm3171_vm3, %v3367_v24, 0.0 }
 0x4d7   : > { %v3493_v29 = vadd.f32 %v3492_v9, %v3491_v16  ;;  %v3298_v25 = vadd.f32 %v3297_v11, %v3296_v59  ;;  %v3666_v16 = vld [vmem:[%s12256_s11 + $0x18] sm:$0xff]  ;;  %v3665_v59 = vld [vmem:[%s12256_s11 + $0x10] sm:$0xff]  ;;  %v3663_v11 = vld [vmem:[%s12256_s11] sm:$0xff] }
 0x4d9   : > { %v3495_v14 = vadd.f32 %v3494_v36, %v3493_v29  ;;  %v3299_v27 = vrot.slane %v3298_v25, 4 }
 0x4db   : > { %v3496_v8 = vrot.slane %v3495_v14, 4  ;;  %v3300_v20 = vadd.f32 %v3299_v27, %v3298_v25 }
 0x4dd   : > { %v3497_v55 = vadd.f32 %v3496_v8, %v3495_v14  ;;  %v3301_v33 = vrot.slane %v3300_v20, 2 }
 0x4df   : > { %v3498_v34 = vrot.slane %v3497_v55, 2  ;;  %v3302_v57 = vadd.f32 %v3301_v33, %v3300_v20 }
 0x4e1   : > { %v3499_v17 = vadd.f32 %v3498_v34, %v3497_v55  ;;  %v3303_v35 = vrot.slane %v3302_v57, 1  ;;  %v7514_v34 = vld [vmem:[%s12255_s10 + $0x10] sm:$0xff] }
 0x4e3   : > { %v3500_v40 = vrot.slane %v3499_v17, 1  ;;  %v3304_v24 = vadd.f32 %v3303_v35, %v3302_v57 }
 0x4e5   : > { %v3501_v39 = vadd.f32 %v3500_v40, %v3499_v17  ;;  %3507 = vrot.lane.b32.xlu1 %v3304_v24, %s7618_s16  ;;  %v3813_v24 = vld [vmem:[%s12257_s12] sm:$0x1] }
 0x4e7   : > { %3582 = vrot.lane.b32.xlu0 %v3501_v39, %s7618_s16 }
 0x557   : > { %v3508_v30 = vpop.permute.xlu1 %3507 }
 0x558   : > { %6948 = vmatmul.mubr.msk.f32.vlgmr.msra.gmra.mxu0 %vm1238_vm2, %v3508_v30 }
 0x559   : > { %6951 = vmatpush3.msra.mxu0 %v7513_v54  ;;  %6958 = vmatprep.mubr.msk.f32.mxu0 %vm7615_vm0, %v12523_v44  ;;  %v3583_v9 = vpop.permute.xlu0 %3582 }
 0x55a   : > { %6952 = vmatprep.subr.mxu0 %v12523_v44 }
 0x55b   : > { %6953 = vmatpush3.msra.mxu0 %v7514_v34 }
 0x55c   : > { %6954 = vmatprep.subr.mxu0 %v12523_v44 }
 0x55d   : > { %6955 = vmatpush3.msra.mxu0 %v12734_v63  ;;  %v12735_v63 = vld [vmem:[#allocation40_spill] sm:$0xff] }
 0x55e   : > { %6956 = vmatprep.subr.mxu0 %v12523_v44 }
 0x55f   : > { %6957 = vmatpush3.msra.mxu0 %v9749_v41  ;;  %v3664_v41 = vld [vmem:[%s12256_s11 + $0x8] sm:$0xff] }
 0x560   : > { %6959 = vmatmul.mubr.msk.f32.vlgmr.msra.gmra.mxu0 %vm1238_vm2, %v3583_v9  ;;  %6961 = vmatprep.subr.mxu0 %v12523_v44 }
 0x561   : > { %6962 = vmatpush3.msra.mxu0 %v3666_v16  ;;  %6969 = vmatprep.mubr.msk.f32.mxu0 %vm7615_vm0, %v12523_v44 }
 0x562   : > { %6963 = vmatprep.subr.mxu0 %v12523_v44 }
 0x563   : > { %6964 = vmatpush3.msra.mxu0 %v3665_v59 }
 0x564   : > { %6965 = vmatprep.subr.mxu0 %v12523_v44 }
 0x565   : > { %6966 = vmatpush3.msra.mxu0 %v3664_v41 }
 0x566   : > { %6967 = vmatprep.subr.mxu0 %v12523_v44 }
 0x567   : > { %6968 = vmatpush3.msra.mxu0 %v3663_v11 }
 0x568   : > { %6972 = vmatprep.subr.mxu0 %v12523_v44 }
 0x618   : > { %v3577_v29 = vpop.f32.mrf.mxu0 }
 0x619   : > { %v3656_v36 = vmul.f32 0.001953125, %v3577_v29 }
 0x61a   : > { %v6949_v25 = vpop.f32.mrf.mxu0 }
 0x61b   : > { %6970 = vmatmul.mubr.msk.f32.vlgmr.msra.gmra.mxu0 %vm1238_vm2, %v3656_v36  ;;  %v3658_v27 = vmul.f32 %v3656_v36, %v3656_v36  ;;  %v12737_v36 = vld [vmem:[#allocation85_spill] sm:$0xff] }
 0x61c   : > { %6973 = vmatpush3.msra.mxu0 %v3666_v16  ;;  %6980 = vmatprep.mubr.msk.f32.mxu0 %vm7615_vm0, %v12523_v44 }
 0x61d   : > { %6974 = vmatprep.subr.mxu0 %v12523_v44 }
 0x61e   : > { %6975 = vmatpush3.msra.mxu0 %v3665_v59 }
 0x61f   : > { %6976 = vmatprep.subr.mxu0 %v12523_v44 }
 0x620   : > { %v3652_v14 = vpop.f32.mrf.mxu0  ;;  %6977 = vmatpush3.msra.mxu0 %v3664_v41 }
 0x621   : > { %v3657_v8 = vmul.f32 0.001953125, %v3652_v14  ;;  %6978 = vmatprep.subr.mxu0 %v12523_v44  ;;  %v3815_v44 = vld [vmem:[%s12258_s13] sm:$0x1] }
 0x622   : > { %v6960_v20 = vpop.f32.mrf.mxu0  ;;  %6979 = vmatpush3.msra.mxu0 %v3663_v11  ;;  %v12736_v11 = vld [vmem:[#allocation82_spill] sm:$0xff]  ;;  %v12738_v14 = vld [vmem:[#allocation80_spill] sm:$0xff] }
 0x623   : > { %v3659_v55 = vsub.f32 %v3657_v8, %v3658_v27  ;;  %v12739_v8 = vld [vmem:[#allocation79_spill] sm:$0xff] }
 0x625   : > { %v3660_v33 = vmax.f32 %v3659_v55, 0.0  ;;  %v12740_v55 = vld [vmem:[#allocation47_spill] sm:$0xff] }
 0x627   : > { %v3661_v57 = vadd.f32 1e-06, %v3660_v33 }
 0x629   : > { %7383 = vrsqrt.f32 %v3661_v57  ;;  %v12741_v57 = vld [vmem:[#allocation19_spill] sm:$0xff] }
 0x636   : > { %v7384_v17 = vpop.eup %7383 }
 0x637   : > { %6981 = vmatmul.mubr.msk.f32.vlgmr.msra.gmra.mxu0 %vm1238_vm2, %v7384_v17 }
 0x6db   : > { %v3736_v35 = vpop.f32.mrf.mxu0 }
 0x6dd   : > { %v6971_v40 = vpop.f32.mrf.mxu0 }
 0x6f7   : > { %v3809_v39 = vpop.f32.mrf.mxu0 }
 0x6f8   : > { %v3814_v30 = vmul.f32 %v3813_v24, %v3809_v39  ;;  %v12743_v24 = vld [vmem:[#allocation39_spill] sm:$0xff] }
 0x6f9   : > { %v6982_v54 = vpop.f32.mrf.mxu0 }
 0x6fa   : > { %v3816_v34 = vmul.f32 %v3814_v30, %v3736_v35  ;;  %v3822_v16 = vrot.slane %v3814_v30, %v12735_v63  ;;  %v12742_v35 = vld [vmem:[#allocation86_spill] sm:$0xff] }
 0x6fb   : > { %v12744_v30 = vld [vmem:[#allocation14_spill] sm:$0xff] }
 0x6fc   : > { %v3817_v9 = vsub.f32 %v3815_v44, %v3816_v34  ;;  %3823 = vrot.lane.b32.xlu1 %v3822_v16, %s7616_s27  ;;  %v12745_v54 = vld [vmem:[#allocation50_spill] sm:$0xff] }
 0x6fe   : > { %v3894_v59 = vrot.slane %v3817_v9, %v12735_v63  ;;  %v12746_v63 = vld [vmem:[#allocation48_spill] sm:$0xff]  ;;  %v12747_v9 = vld [vmem:[#allocation22_spill] sm:$0xff] }
 0x700   : > { %3895 = vrot.lane.b32.xlu0 %v3894_v59, %s7616_s27 }
 0x76e   : > { %v10440_v41 = vpop.permute.xlu1 %3823 }
 0x76f   : > { %v3828_v29 = vmul.f32 %v10440_v41, %v12736_v11  ;;  %v3829_v25 = vmul.f32 %v10440_v41, %v12737_v36  ;;  %v3826_v27 = vmul.f32 %v10440_v41, %v12738_v14  ;;  %v3827_v20 = vmul.f32 %v10440_v41, %v12739_v8  ;;  %v12748_v36 = vld [vmem:[#allocation81_spill] sm:$0xff]  ;;  %v12749_v8 = vld [vmem:[#allocation84_spill] sm:$0xff] }
 0x770   : > { %v3832_v33 = vmul.f32 %v10440_v41, %v12740_v55  ;;  %v3833_v17 = vmul.f32 %v10440_v41, %v12741_v57  ;;  %v3830_v40 = vmul.f32 %v10440_v41, %v12742_v35  ;;  %v3831_v39 = vmul.f32 %v10440_v41, %v12743_v24  ;;  %v12750_v57 = vld [vmem:[#allocation83_spill] sm:$0xff]  ;;  %v12751_v24 = vld [vmem:[#allocation12_spill] sm:$0xff] }
 0x771   : > { %v3836_v44 = vmul.f32 %v10440_v41, %v12744_v30  ;;  %v3837_v34 = vmul.f32 %v10440_v41, %v12745_v54  ;;  %v3834_v16 = vmul.f32 %v10440_v41, %v12746_v63  ;;  %v3835_v59 = vmul.f32 %v10440_v41, %v12747_v9 }
 0x772   : > { %v10466_v11 = vpop.permute.xlu0 %3895  ;;  %v3840_v14 = vmul.f32 %v10440_v41, %v12748_v36  ;;  %v3841_v55 = vmul.f32 %v10440_v41, %v12749_v8  ;;  %v3838_v35 = vmul.f32 %v10440_v41, %v12750_v57  ;;  %v3839_v30 = vmul.f32 %v10440_v41, %v12751_v24 }
 0x773   : > { %v10477_v54 = vadd.f32 %v10466_v11, %v3828_v29  ;;  %v10480_v63 = vadd.f32 %v10466_v11, %v3829_v25  ;;  %v10483_v9 = vadd.f32 %v10466_v11, %v3826_v27  ;;  %v10486_v36 = vadd.f32 %v10466_v11, %v3827_v20 }
 0x774   : > { %v10489_v8 = vadd.f32 %v10466_v11, %v3832_v33  ;;  %v10492_v57 = vadd.f32 %v10466_v11, %v3833_v17  ;;  %v10495_v24 = vadd.f32 %v10466_v11, %v3830_v40  ;;  %v10498_v29 = vadd.f32 %v10466_v11, %v3831_v39  ;;  %v7181_v33 = vld [vmem:[%s12259_s14 + $0x8] sm:$0xff]   ;;  %v7182_v17 = vld [vmem:[%s12259_s14] sm:$0xff]  }
 0x775   : > { %v3964_v25 = vmul.f32 0.5, %v10477_v54  ;;  %v3965_v27 = vmul.f32 0.5, %v10480_v63  ;;  %v3962_v28 = vmul.f32 0.5, %v10483_v9  ;;  %v3963_v20 = vmul.f32 0.5, %v10486_v36  ;;  %6983 = vmatprep.subr.bf16.mxu0 %v7181_v33 }
 0x776   : > { %v3968_v40 = vmul.f32 0.5, %v10489_v8  ;;  %v3969_v39 = vmul.f32 0.5, %v10492_v57  ;;  %v3966_v7 = vmul.f32 0.5, %v10495_v24  ;;  %v3967_v43 = vmul.f32 0.5, %v10498_v29  ;;  %6984 = vmatpush3.bf16.msra.mxu0 %v7181_v33 }
 0x777   : > { %7385 = vtanh.f32 %v3964_v25  ;;  %v10515_v23 = vadd.f32 %v10466_v11, %v3836_v44  ;;  %v10518_v32 = vadd.f32 %v10466_v11, %v3837_v34  ;;  %v10521_v4 = vadd.f32 %v10466_v11, %v3834_v16  ;;  %6985 = vmatprep.subr.bf16.mxu0 %v7182_v17 }
 0x778   : > { %7387 = vtanh.f32 %v3965_v27  ;;  %v10524_v61 = vadd.f32 %v10466_v11, %v3835_v59  ;;  %v10527_v10 = vadd.f32 %v10466_v11, %v3840_v14  ;;  %v10530_v51 = vadd.f32 %v10466_v11, %v3841_v55  ;;  %v12752_v27 = vld [vmem:[#allocation13_spill] sm:$0xff] }
 0x779   : > { %7389 = vtanh.f32 %v3962_v28  ;;  %v3972_v44 = vmul.f32 0.5, %v10515_v23  ;;  %v3973_v34 = vmul.f32 0.5, %v10518_v32  ;;  %v3970_v16 = vmul.f32 0.5, %v10521_v4 }
 0x77a   : > { %7391 = vtanh.f32 %v3963_v20  ;;  %v3971_v25 = vmul.f32 0.5, %v10524_v61  ;;  %v3976_v59 = vmul.f32 0.5, %v10527_v10  ;;  %v3977_v14 = vmul.f32 0.5, %v10530_v51  ;;  %6986 = vmatpush3.bf16.msra.mxu0 %v7182_v17 }
 0x77b   : > { %7393 = vtanh.f32 %v3968_v40  ;;  %v10539_v55 = vadd.f32 %v10466_v11, %v3838_v35  ;;  %v10542_v28 = vadd.f32 %v10466_v11, %v3839_v30  ;;  %v3844_v33 = vmul.f32 %v10440_v41, %v12752_v27 }
 0x77c   : > { %7395 = vtanh.f32 %v3969_v39  ;;  %v3845_v20 = vmul.f32 %v10440_v41, %v9816_v0  ;;  %v3842_v45 = vmul.f32 %v10440_v41, %v9758_v46  ;;  %v3843_v50 = vmul.f32 %v10440_v41, %v12753_v47 }
 0x77d   : > { %7397 = vtanh.f32 %v3966_v7  ;;  %v3974_v35 = vmul.f32 0.5, %v10539_v55  ;;  %v3975_v30 = vmul.f32 0.5, %v10542_v28  ;;  %v10555_v40 = vadd.f32 %v10466_v11, %v3844_v33  ;;  %v12754_v7 = vld [vmem:[#allocation41_spill] sm:$0xff] }
 0x77e   : > { %7399 = vtanh.f32 %v3967_v43  ;;  %v10558_v39 = vadd.f32 %v10466_v11, %v3845_v20  ;;  %v10561_v0 = vadd.f32 %v10466_v11, %v3842_v45  ;;  %v10564_v46 = vadd.f32 %v10466_v11, %v3843_v50  ;;  %v12755_v20 = vld [vmem:[#allocation59_spill] sm:$0xff] }
 0x77f   : > { %7401 = vtanh.f32 %v3972_v44  ;;  %v3980_v47 = vmul.f32 0.5, %v10555_v40  ;;  %v3848_v17 = vmul.f32 %v10440_v41, %v12754_v7  ;;  %v3849_v27 = vmul.f32 %v10440_v41, %v9850_v13 }
 0x780   : > { %7403 = vtanh.f32 %v3973_v34  ;;  %v3981_v43 = vmul.f32 0.5, %v10558_v39  ;;  %v3978_v33 = vmul.f32 0.5, %v10561_v0  ;;  %v3979_v45 = vmul.f32 0.5, %v10564_v46 }
 0x781   : > { %7405 = vtanh.f32 %v3970_v16  ;;  %v10575_v50 = vadd.f32 %v10466_v11, %v3848_v17  ;;  %v10578_v44 = vadd.f32 %v10466_v11, %v3849_v27  ;;  %v3846_v7 = vmul.f32 %v10440_v41, %v12755_v20 }
 0x782   : > { %7407 = vtanh.f32 %v3971_v25  ;;  %v3847_v13 = vmul.f32 %v10440_v41, %v9868_v42  ;;  %v3852_v34 = vmul.f32 %v10440_v41, %v9881_v21  ;;  %v3853_v2 = vmul.f32 %v10440_v41, %v9947_v60 }
 0x783   : > { %7409 = vtanh.f32 %v3976_v59  ;;  %v3984_v16 = vmul.f32 0.5, %v10575_v50  ;;  %v3985_v17 = vmul.f32 0.5, %v10578_v44  ;;  %v10591_v27 = vadd.f32 %v10466_v11, %v3846_v7 }
 0x784   : > { %v7386_v1 = vpop.eup %7385  ;;  %7411 = vtanh.f32 %v3977_v14  ;;  %v10594_v25 = vadd.f32 %v10466_v11, %v3847_v13  ;;  %v10597_v42 = vadd.f32 %v10466_v11, %v3852_v34  ;;  %v10600_v21 = vadd.f32 %v10466_v11, %v3853_v2 }
 0x785   : > { %v7388_v60 = vpop.eup %7387  ;;  %v4092_v59 = vmul.f32 0.5, %v7386_v1  ;;  %7413 = vtanh.f32 %v3974_v35  ;;  %v3982_v20 = vmul.f32 0.5, %v10591_v27  ;;  %v10605_v7 = vmul.f32 %v10440_v41, %v9911_v31 }
 0x786   : > { %12756 = vst [vmem:[#allocation72_spill] sm:$0xff] %v10600_v21  ;;  %v7390_v58 = vpop.eup %7389  ;;  %v4093_v14 = vmul.f32 0.5, %v7388_v60  ;;  %7415 = vtanh.f32 %v3975_v30  ;;  %v3983_v13 = vmul.f32 0.5, %v10594_v25  ;;  %v10609_v34 = vmul.f32 0.5, %v10597_v42 }
 0x787   : > { %v7392_v12 = vpop.eup %7391  ;;  %v4156_v2 = vadd.f32 0.5, %v4092_v59  ;;  %v4090_v62 = vmul.f32 0.5, %v7390_v58  ;;  %7417 = vtanh.f32 %v3980_v47  ;;  %v10612_v1 = vmul.f32 0.5, %v10600_v21 }
 0x788   : > { %v7394_v35 = vpop.eup %7393  ;;  %v4157_v48 = vadd.f32 0.5, %v4093_v14  ;;  %v4091_v49 = vmul.f32 0.5, %v7392_v12  ;;  %7419 = vtanh.f32 %v3981_v43  ;;  %v10616_v31 = vmul.f32 %v10440_v41, %v9925_v6 }
 0x789   : > { %v7396_v30 = vpop.eup %7395  ;;  %v4220_v60 = vmul.f32 %v4156_v2, %v10477_v54  ;;  %v4154_v38 = vadd.f32 0.5, %v4090_v62  ;;  %v4096_v3 = vmul.f32 0.5, %v7394_v35  ;;  %7421 = vtanh.f32 %v3978_v33 }
 0x78a   : > { %v7398_v59 = vpop.eup %7397  ;;  %v4221_v58 = vmul.f32 %v4157_v48, %v10480_v63  ;;  %v4155_v47 = vadd.f32 0.5, %v4091_v49  ;;  %v4097_v53 = vmul.f32 0.5, %v7396_v30  ;;  %7423 = vtanh.f32 %v3979_v45 }
 0x78b   : > { %v7400_v19 = vpop.eup %7399  ;;  %v4218_v12 = vmul.f32 %v4154_v38, %v10483_v9  ;;  %v4160_v43 = vadd.f32 0.5, %v4096_v3  ;;  %v4094_v14 = vmul.f32 0.5, %v7398_v59  ;;  %7425 = vtanh.f32 %v3984_v16 }
 0x78c   : > { %v7402_v6 = vpop.eup %7401  ;;  %v4283_v22 = vpack.c.bf16 %v4221_v58, %v4220_v60  ;;  %v4219_v21 = vmul.f32 %v4155_v47, %v10486_v36  ;;  %v4161_v54 = vadd.f32 0.5, %v4097_v53  ;;  %v4095_v62 = vmul.f32 0.5, %v7400_v19 }
 0x78d   : > { %v7404_v2 = vpop.eup %7403  ;;  %v4224_v33 = vmul.f32 %v4160_v43, %v10489_v8  ;;  %v4158_v35 = vadd.f32 0.5, %v4094_v14  ;;  %v4100_v48 = vmul.f32 0.5, %v7402_v6  ;;  %7427 = vtanh.f32 %v3985_v17 }
 0x78e   : > { %v7406_v49 = vpop.eup %7405  ;;  %4352 = vrot.lane.b32.xlu0 %v4283_v22, %s7618_s16  ;;  %v4282_v63 = vpack.c.bf16 %v4219_v21, %v4218_v12  ;;  %v4225_v3 = vmul.f32 %v4161_v54, %v10492_v57  ;;  %v4159_v38 = vadd.f32 0.5, %v4095_v62  ;;  %v4101_v9 = vmul.f32 0.5, %v7404_v2 }
 0x78f   : > { %v7408_v45 = vpop.eup %7407  ;;  %v4222_v16 = vmul.f32 %v4158_v35, %v10495_v24  ;;  %v4164_v36 = vadd.f32 0.5, %v4100_v48  ;;  %v4098_v53 = vmul.f32 0.5, %v7406_v49  ;;  %7429 = vtanh.f32 %v3982_v20 }
 0x790   : > { %v7410_v19 = vpop.eup %7409  ;;  %4350 = vrot.lane.b32.xlu1 %v4282_v63, %s7618_s16  ;;  %v4285_v8 = vpack.c.bf16 %v4225_v3, %v4224_v33  ;;  %v4223_v17 = vmul.f32 %v4159_v38, %v10498_v29  ;;  %v4165_v30 = vadd.f32 0.5, %v4101_v9  ;;  %v4099_v60 = vmul.f32 0.5, %v7408_v45 }
 0x791   : > { %v7412_v22 = vpop.eup %7411  ;;  %v4228_v21 = vmul.f32 %v4164_v36, %v10515_v23  ;;  %v4162_v57 = vadd.f32 0.5, %v4098_v53  ;;  %v4104_v59 = vmul.f32 0.5, %v7410_v19  ;;  %7431 = vtanh.f32 %v3983_v13 }
 0x792   : > { %v7414_v58 = vpop.eup %7413  ;;  %4356 = vrot.lane.b32.xlu0 %v4285_v8, %s7618_s16  ;;  %v4284_v24 = vpack.c.bf16 %v4223_v17, %v4222_v16  ;;  %v4229_v20 = vmul.f32 %v4165_v30, %v10518_v32  ;;  %v4163_v47 = vadd.f32 0.5, %v4099_v60  ;;  %v4105_v12 = vmul.f32 0.5, %v7412_v22 }
 0x793   : > { %v7416_v43 = vpop.eup %7415  ;;  %v4226_v14 = vmul.f32 %v4162_v57, %v10521_v4  ;;  %v4168_v29 = vadd.f32 0.5, %v4104_v59  ;;  %v4102_v6 = vmul.f32 0.5, %v7414_v58  ;;  %7433 = vtanh.f32 %v10609_v34 }
 0x794   : > { %v7418_v54 = vpop.eup %7417  ;;  %4354 = vrot.lane.b32.xlu1 %v4284_v24, %s7618_s16  ;;  %v4287_v23 = vpack.c.bf16 %v4229_v20, %v4228_v21  ;;  %v4227_v13 = vmul.f32 %v4163_v47, %v10524_v61  ;;  %v4169_v62 = vadd.f32 0.5, %v4105_v12  ;;  %v4103_v2 = vmul.f32 0.5, %v7416_v43 }
 0x795   : > { %v7420_v33 = vpop.eup %7419  ;;  %v4232_v32 = vmul.f32 %v4168_v29, %v10527_v10  ;;  %v4166_v35 = vadd.f32 0.5, %v4102_v6  ;;  %v4108_v48 = vmul.f32 0.5, %v7418_v54  ;;  %7435 = vtanh.f32 %v10612_v1 }
 0x796   : > { %v7422_v4 = vpop.eup %7421  ;;  %4360 = vrot.lane.b32.xlu0 %v4287_v23, %s7618_s16  ;;  %v4286_v49 = vpack.c.bf16 %v4227_v13, %v4226_v14  ;;  %v4233_v34 = vmul.f32 %v4169_v62, %v10530_v51  ;;  %v4167_v63 = vadd.f32 0.5, %v4103_v2  ;;  %v4109_v3 = vmul.f32 0.5, %v7420_v33 }
 0x797   : > { %v7424_v38 = vpop.eup %7423  ;;  %v4230_v61 = vmul.f32 %v4166_v35, %v10539_v55  ;;  %v4172_v9 = vadd.f32 0.5, %v4108_v48  ;;  %v4106_v45 = vmul.f32 0.5, %v7422_v4  ;;  %v10642_v10 = vadd.f32 %v10466_v11, %v10605_v7 }
 0x798   : > { %v7426_v16 = vpop.eup %7425  ;;  %4358 = vrot.lane.b32.xlu1 %v4286_v49, %s7618_s16  ;;  %v4289_v1 = vpack.c.bf16 %v4233_v34, %v4232_v32  ;;  %v4231_v36 = vmul.f32 %v4167_v63, %v10542_v28  ;;  %v4173_v53 = vadd.f32 0.5, %v4109_v3  ;;  %v4107_v19 = vmul.f32 0.5, %v7424_v38  ;;  %v12757_v63 = vld [vmem:[#allocation26_spill] sm:$0xff] }
 0x799   : > { %v4236_v51 = vmul.f32 %v4172_v9, %v10555_v40  ;;  %v4170_v8 = vadd.f32 0.5, %v4106_v45  ;;  %v4112_v17 = vmul.f32 0.5, %v7426_v16  ;;  %v10649_v55 = vadd.f32 %v10466_v11, %v10616_v31 }
 0x79a   : > { %v7428_v30 = vpop.eup %7427  ;;  %4364 = vrot.lane.b32.xlu0 %v4289_v1, %s7618_s16  ;;  %v4288_v7 = vpack.c.bf16 %v4231_v36, %v4230_v61  ;;  %v4237_v60 = vmul.f32 %v4173_v53, %v10558_v39  ;;  %v4171_v22 = vadd.f32 0.5, %v4107_v19  ;;  %v3986_v21 = vmul.f32 0.5, %v10642_v10  ;;  %v12758_v53 = vld [vmem:[#allocation72_spill] sm:$0xff] }
 0x79b   : > { %v4234_v28 = vmul.f32 %v4170_v8, %v10561_v0  ;;  %v4113_v57 = vmul.f32 0.5, %v7428_v30  ;;  %v4176_v59 = vadd.f32 0.5, %v4112_v17  ;;  %v3987_v40 = vmul.f32 0.5, %v10649_v55  ;;  %v12760_v8 = vld [vmem:[#allocation53_spill] sm:$0xff] }
 0x79c   : > { %v7430_v58 = vpop.eup %7429  ;;  %4362 = vrot.lane.b32.xlu1 %v4288_v7, %s7618_s16  ;;  %v4291_v31 = vpack.c.bf16 %v4237_v60, %v4236_v51  ;;  %v4235_v24 = vmul.f32 %v4171_v22, %v10564_v46  ;;  %7437 = vtanh.f32 %v3986_v21  ;;  %v3856_v20 = vmul.f32 %v10440_v41, %v9908_v52  ;;  %v12759_v51 = vld [vmem:[#allocation61_spill] sm:$0xff] }
 0x79d   : > { %v4177_v39 = vadd.f32 0.5, %v4113_v57  ;;  %v4240_v47 = vmul.f32 %v4176_v59, %v10575_v50  ;;  %v4110_v12 = vmul.f32 0.5, %v7430_v58  ;;  %7439 = vtanh.f32 %v3987_v40 }
 0x79e   : > { %v7432_v0 = vpop.eup %7431  ;;  %4368 = vrot.lane.b32.xlu0 %v4291_v31, %s7618_s16  ;;  %v4290_v43 = vpack.c.bf16 %v4235_v24, %v4234_v28  ;;  %v3857_v14 = vmul.f32 %v10440_v41, %v9960_v18  ;;  %v10665_v29 = vadd.f32 %v10466_v11, %v3856_v20  ;;  %v3860_v46 = vmul.f32 %v10440_v41, %v9994_v5  ;;  %v12762_v24 = vld [vmem:[#allocation24_spill] sm:$0xff] }
 0x79f   : > { %v4241_v52 = vmul.f32 %v4177_v39, %v10578_v44  ;;  %v4111_v6 = vmul.f32 0.5, %v7432_v0  ;;  %v4174_v54 = vadd.f32 0.5, %v4110_v12  ;;  %v3861_v50 = vmul.f32 %v10440_v41, %v10049_v15 }
 0x7a0   : > { %v7434_v23 = vpop.eup %7433  ;;  %4366 = vrot.lane.b32.xlu1 %v4290_v43, %s7618_s16  ;;  %v10674_v13 = vadd.f32 %v10466_v11, %v3857_v14  ;;  %v3992_v18 = vmul.f32 0.5, %v10665_v29  ;;  %v10678_v62 = vadd.f32 %v10466_v11, %v3860_v46  ;;  %v3854_v5 = vmul.f32 %v10440_v41, %v9922_v26 }
 0x7a1   : > { %v4293_v44 = vpack.c.bf16 %v4241_v52, %v4240_v47  ;;  %v4175_v2 = vadd.f32 0.5, %v4111_v6  ;;  %v4238_v33 = vmul.f32 %v4174_v54, %v10591_v27  ;;  %v4116_v32 = vmul.f32 0.5, %v7434_v23  ;;  %v12763_v52 = vld [vmem:[#allocation58_spill] sm:$0xff] }
 0x7a2   : > { %v7436_v15 = vpop.eup %7435  ;;  %v3993_v35 = vmul.f32 0.5, %v10674_v13  ;;  %7441 = vtanh.f32 %v3992_v18  ;;  %v10685_v48 = vadd.f32 %v10466_v11, %v3861_v50  ;;  %v3996_v4 = vmul.f32 0.5, %v10678_v62  ;;  %v12764_v54 = vld [vmem:[#allocation42_spill] sm:$0xff] }
 0x7a3   : > { %4372 = vrot.lane.b32.xlu0 %v4293_v44, %s7618_s16  ;;  %v4239_v49 = vmul.f32 %v4175_v2, %v10594_v25  ;;  %v4117_v34 = vmul.f32 0.5, %v7436_v15  ;;  %v4180_v26 = vadd.f32 0.5, %v4116_v32  ;;  %v3855_v3 = vmul.f32 %v10440_v41, %v12757_v63  ;;  %v12765_v15 = vld [vmem:[#allocation65_spill] sm:$0xff] }
 0x7a4   : > { %7443 = vtanh.f32 %v3993_v35  ;;  %v3997_v27 = vmul.f32 0.5, %v10685_v48  ;;  %v10694_v38 = vadd.f32 %v10466_v11, %v3854_v5  ;;  %v3864_v61 = vmul.f32 %v10440_v41, %v10077_v56 }
 0x7a5   : > { %v4292_v9 = vpack.c.bf16 %v4239_v49, %v4238_v33  ;;  %v4181_v45 = vadd.f32 0.5, %v4117_v34  ;;  %v4244_v16 = vmul.f32 %v4180_v26, %v10597_v42  ;;  %7445 = vtanh.f32 %v3996_v4  ;;  %v12767_v34 = vld [vmem:[#allocation23_spill] sm:$0xff] }
 0x7a6   : > { %7447 = vtanh.f32 %v3997_v27  ;;  %v10700_v25 = vadd.f32 %v10466_v11, %v3855_v3  ;;  %v3990_v1 = vmul.f32 0.5, %v10694_v38  ;;  %v3865_v36 = vmul.f32 %v10440_v41, %v10112_v37  ;;  %v12761_v37 = vld [vmem:[#allocation15_spill] sm:$0xff] }
 0x7a7   : > { %4370 = vrot.lane.b32.xlu1 %v4292_v9, %s7618_s16  ;;  %v4245_v19 = vmul.f32 %v4181_v45, %v12758_v53  ;;  %v10708_v56 = vadd.f32 %v10466_v11, %v3864_v61  ;;  %v3858_v42 = vmul.f32 %v10440_v41, %v12759_v51  ;;  %v3859_v17 = vmul.f32 %v10440_v41, %v12760_v8 }
 0x7a8   : > { %v3991_v30 = vmul.f32 0.5, %v10700_v25  ;;  %7449 = vtanh.f32 %v3990_v1  ;;  %v10716_v7 = vadd.f32 %v10466_v11, %v3865_v36  ;;  %v3868_v60 = vmul.f32 %v10440_v41, %v12761_v37 }
 0x7a9   : > { %v7438_v22 = vpop.eup %7437  ;;  %v4295_v21 = vpack.c.bf16 %v4245_v19, %v4244_v16  ;;  %v4000_v28 = vmul.f32 0.5, %v10708_v56  ;;  %v10722_v57 = vadd.f32 %v10466_v11, %v3858_v42  ;;  %v10725_v59 = vadd.f32 %v10466_v11, %v3859_v17  ;;  %v12768_v19 = vld [vmem:[#allocation34_spill] sm:$0xff] }
 0x7aa   : > { %v7440_v40 = vpop.eup %7439  ;;  %v4114_v58 = vmul.f32 0.5, %v7438_v22  ;;  %7451 = vtanh.f32 %v3991_v30  ;;  %v4001_v31 = vmul.f32 0.5, %v10716_v7  ;;  %v3869_v20 = vmul.f32 %v10440_v41, %v12762_v24  ;;  %v6551_v30 = vld [vmem:[%s12260_s15] ss:$0 sm:$0xff] }
 0x7ab   : > { %4376 = vrot.lane.b32.xlu0 %v4295_v21, %s7618_s16  ;;  %v4115_v39 = vmul.f32 0.5, %v7440_v40  ;;  %7453 = vtanh.f32 %v4000_v28  ;;  %v3994_v47 = vmul.f32 0.5, %v10722_v57  ;;  %v3995_v12 = vmul.f32 0.5, %v10725_v59 }
 0x7ac   : > { %v4178_v0 = vadd.f32 0.5, %v4114_v58  ;;  %7455 = vtanh.f32 %v4001_v31  ;;  %v10734_v43 = vadd.f32 %v10466_v11, %v3868_v60  ;;  %v10737_v14 = vadd.f32 %v10466_v11, %v3869_v20 }
 0x7ad   : > { %v4179_v46 = vadd.f32 0.5, %v4115_v39  ;;  %7457 = vtanh.f32 %v3994_v47  ;;  %v3862_v6 = vmul.f32 %v10440_v41, %v12763_v52  ;;  %v3863_v50 = vmul.f32 %v10440_v41, %v12764_v54 }
 0x7ae   : > { %v4242_v23 = vmul.f32 %v4178_v0, %v10642_v10  ;;  %7459 = vtanh.f32 %v3995_v12  ;;  %v4004_v18 = vmul.f32 0.5, %v10734_v43  ;;  %v4005_v5 = vmul.f32 0.5, %v10737_v14  ;;  %v12766_v10 = vld [vmem:[#allocation64_spill] sm:$0xff]  ;;  %v12769_v12 = vld [vmem:[#allocation70_spill] sm:$0xff] }
 0x7af   : > { %v7442_v44 = vpop.eup %7441  ;;  %v4243_v2 = vmul.f32 %v4179_v46, %v10649_v55  ;;  %v10748_v33 = vadd.f32 %v10466_v11, %v3862_v6  ;;  %v10751_v32 = vadd.f32 %v10466_v11, %v3863_v50  ;;  %v3872_v35 = vmul.f32 %v10440_v41, %v12765_v15 }
 0x7b0   : > { %v4120_v4 = vmul.f32 0.5, %v7442_v44  ;;  %7461 = vtanh.f32 %v4004_v18  ;;  %v3873_v49 = vmul.f32 %v10440_v41, %v12766_v10  ;;  %v3866_v26 = vmul.f32 %v10440_v41, %v12767_v34  ;;  %v12770_v18 = vld [vmem:[#allocation16_spill] sm:$0xff] }
 0x7b1   : > { %v7444_v63 = vpop.eup %7443  ;;  %v4294_v3 = vpack.c.bf16 %v4243_v2, %v4242_v23  ;;  %7463 = vtanh.f32 %v4005_v5  ;;  %v3998_v55 = vmul.f32 0.5, %v10748_v33  ;;  %v3999_v27 = vmul.f32 0.5, %v10751_v32 }
 0x7b2   : > { %v7446_v61 = vpop.eup %7445  ;;  %v4121_v9 = vmul.f32 0.5, %v7444_v63  ;;  %v4184_v45 = vadd.f32 0.5, %v4120_v4  ;;  %v10762_v16 = vadd.f32 %v10466_v11, %v3872_v35  ;;  %v10765_v1 = vadd.f32 %v10466_v11, %v3873_v49 }
 0x7b3   : > { %v7448_v36 = vpop.eup %7447  ;;  %4374 = vrot.lane.b32.xlu1 %v4294_v3, %s7618_s16  ;;  %v4124_v53 = vmul.f32 0.5, %v7446_v61  ;;  %7465 = vtanh.f32 %v3998_v55  ;;  %v3867_v51 = vmul.f32 %v10440_v41, %v12768_v19  ;;  %v10771_v42 = vadd.f32 %v10466_v11, %v3866_v26 }
 0x7b4   : > { %v4185_v8 = vadd.f32 0.5, %v4121_v9  ;;  %v4248_v17 = vmul.f32 %v4184_v45, %v10665_v29  ;;  %v4125_v37 = vmul.f32 0.5, %v7448_v36  ;;  %7467 = vtanh.f32 %v3999_v27 }
 0x7b5   : > { %v7450_v60 = vpop.eup %7449  ;;  %v4188_v22 = vadd.f32 0.5, %v4124_v53  ;;  %v4008_v21 = vmul.f32 0.5, %v10762_v16  ;;  %v4009_v28 = vmul.f32 0.5, %v10765_v1  ;;  %v10780_v40 = vadd.f32 %v10466_v11, %v3867_v51 }
 0x7b6   : > { %v4249_v58 = vmul.f32 %v4185_v8, %v10674_v13  ;;  %v4189_v31 = vadd.f32 0.5, %v4125_v37  ;;  %v4118_v24 = vmul.f32 0.5, %v7450_v60  ;;  %v4002_v29 = vmul.f32 0.5, %v10771_v42 }
 0x7b7   : > { %v7452_v20 = vpop.eup %7451  ;;  %5345 = vrot.lane.b32.xlu1 %v6551_v30, %s7616_s27  ;;  %v4252_v39 = vmul.f32 %v4188_v22, %v10678_v62  ;;  %7469 = vtanh.f32 %v4008_v21  ;;  %v4003_v47 = vmul.f32 0.5, %v10780_v40  ;;  %v3876_v0 = vmul.f32 %v10440_v41, %v12769_v12 }
 0x7b8   : > { %v7454_v46 = vpop.eup %7453  ;;  %v4297_v52 = vpack.c.bf16 %v4249_v58, %v4248_v17  ;;  %v4253_v6 = vmul.f32 %v4189_v31, %v10685_v48  ;;  %v4119_v13 = vmul.f32 0.5, %v7452_v20  ;;  %v4182_v54 = vadd.f32 0.5, %v4118_v24  ;;  %v12771_v17 = vld [vmem:[#allocation69_spill] sm:$0xff]  ;;  %v12772_v58 = vld [vmem:[#allocation30_spill] sm:$0xff] }
 0x7b9   : > { %v7456_v50 = vpop.eup %7455  ;;  %v4128_v23 = vmul.f32 0.5, %v7454_v46  ;;  %7471 = vtanh.f32 %v4009_v28  ;;  %v3877_v5 = vmul.f32 %v10440_v41, %v12770_v18  ;;  %v10793_v62 = vadd.f32 %v10466_v11, %v3876_v0 }
 0x7ba   : > { %v7458_v44 = vpop.eup %7457  ;;  %4380 = vrot.lane.b32.xlu0 %v4297_v52, %s7618_s16  ;;  %v4299_v2 = vpack.c.bf16 %v4253_v6, %v4252_v39  ;;  %v4183_v15 = vadd.f32 0.5, %v4119_v13  ;;  %v4246_v35 = vmul.f32 %v4182_v54, %v10694_v38  ;;  %v4129_v4 = vmul.f32 0.5, %v7456_v50  ;;  %v12773_v39 = vld [vmem:[#allocation56_spill] sm:$0xff]  ;;  %v12774_v13 = vld [vmem:[#allocation9_spill] sm:$0xff] }
 0x7bb   : > { %v7460_v48 = vpop.eup %7459  ;;  %v4192_v10 = vadd.f32 0.5, %v4128_v23  ;;  %v4122_v49 = vmul.f32 0.5, %v7458_v44  ;;  %7473 = vtanh.f32 %v4002_v29  ;;  %v10798_v34 = vadd.f32 %v10466_v11, %v3877_v5  ;;  %v12775_v50 = vld [vmem:[#allocation45_spill] sm:$0xff] }
 0x7bc   : > { %v4247_v26 = vmul.f32 %v4183_v15, %v10700_v25  ;;  %v4193_v63 = vadd.f32 0.5, %v4129_v4  ;;  %v4123_v3 = vmul.f32 0.5, %v7460_v48  ;;  %7475 = vtanh.f32 %v4003_v47 }
 0x7bd   : > { %v7462_v55 = vpop.eup %7461  ;;  %v4256_v27 = vmul.f32 %v4192_v10, %v10708_v56  ;;  %v4186_v61 = vadd.f32 0.5, %v4122_v49  ;;  %v4012_v9 = vmul.f32 0.5, %v10793_v62  ;;  %v4013_v38 = vmul.f32 0.5, %v10798_v34  ;;  %v12776_v49 = vld [vmem:[#allocation44_spill] sm:$0xff] }
 0x7be   : > { %v7464_v45 = vpop.eup %7463  ;;  %4384 = vrot.lane.b32.xlu0 %v4299_v2, %s7618_s16  ;;  %v4296_v36 = vpack.c.bf16 %v4247_v26, %v4246_v35  ;;  %v4257_v53 = vmul.f32 %v4193_v63, %v10716_v7  ;;  %v4187_v19 = vadd.f32 0.5, %v4123_v3  ;;  %v4132_v51 = vmul.f32 0.5, %v7462_v55 }
 0x7bf   : > { %v4250_v25 = vmul.f32 %v4186_v61, %v10722_v57  ;;  %v4133_v8 = vmul.f32 0.5, %v7464_v45  ;;  %7477 = vtanh.f32 %v4012_v9  ;;  %v3870_v56 = vmul.f32 %v10440_v41, %v12771_v17  ;;  %v12778_v17 = vld [vmem:[#allocation31_spill] sm:$0xff] }
 0x7c0   : > { %v7466_v30 = vpop.eup %7465  ;;  %4378 = vrot.lane.b32.xlu1 %v4296_v36, %s7618_s16  ;;  %v4301_v37 = vpack.c.bf16 %v4257_v53, %v4256_v27  ;;  %v4251_v60 = vmul.f32 %v4187_v19, %v10725_v59  ;;  %v4196_v22 = vadd.f32 0.5, %v4132_v51  ;;  %7479 = vtanh.f32 %v4013_v38  ;;  %v12777_v53 = vld [vmem:[#allocation17_spill] sm:$0xff] }
 0x7c1   : > { %v7468_v21 = vpop.eup %7467  ;;  %v4197_v28 = vadd.f32 0.5, %v4133_v8  ;;  %v4126_v7 = vmul.f32 0.5, %v7466_v30  ;;  %v3871_v31 = vmul.f32 %v10440_v41, %v12772_v58  ;;  %v10814_v57 = vadd.f32 %v10466_v11, %v3870_v56 }
 0x7c2   : > { %4388 = vrot.lane.b32.xlu0 %v4301_v37, %s7618_s16  ;;  %v4298_v24 = vpack.c.bf16 %v4251_v60, %v4250_v25  ;;  %v4260_v29 = vmul.f32 %v4196_v22, %v10734_v43  ;;  %v4127_v20 = vmul.f32 0.5, %v7468_v21  ;;  %v3880_v59 = vmul.f32 %v10440_v41, %v12773_v39  ;;  %v12779_v60 = vld [vmem:[#allocation27_spill] sm:$0xff]  ;;  %v12780_v39 = vld [vmem:[#allocation62_spill] sm:$0xff] }
 0x7c3   : > { %v4261_v47 = vmul.f32 %v4197_v28, %v10737_v14  ;;  %v4190_v12 = vadd.f32 0.5, %v4126_v7  ;;  %v10822_v0 = vadd.f32 %v10466_v11, %v3871_v31  ;;  %v4006_v46 = vmul.f32 0.5, %v10814_v57 }
 0x7c4   : > { %v7470_v52 = vpop.eup %7469  ;;  %4382 = vrot.lane.b32.xlu1 %v4298_v24, %s7618_s16  ;;  %v4191_v6 = vadd.f32 0.5, %v4127_v20  ;;  %v3881_v54 = vmul.f32 %v10440_v41, %v12774_v13  ;;  %v10829_v43 = vadd.f32 %v10466_v11, %v3880_v59  ;;  %v3874_v23 = vmul.f32 %v10440_v41, %v12775_v50  ;;  %v12782_v50 = vld [vmem:[#allocation11_spill] sm:$0xff] }
 0x7c5   : > { %v4303_v14 = vpack.c.bf16 %v4261_v47, %v4260_v29  ;;  %v4254_v18 = vmul.f32 %v4190_v12, %v10748_v33  ;;  %v4136_v5 = vmul.f32 0.5, %v7470_v52  ;;  %v4007_v44 = vmul.f32 0.5, %v10822_v0 }
 0x7c6   : > { %v7472_v2 = vpop.eup %7471  ;;  %v4255_v15 = vmul.f32 %v4191_v6, %v10751_v32  ;;  %7481 = vtanh.f32 %v4006_v46  ;;  %v10837_v35 = vadd.f32 %v10466_v11, %v3881_v54  ;;  %v4016_v4 = vmul.f32 0.5, %v10829_v43 }
 0x7c7   : > { %4392 = vrot.lane.b32.xlu0 %v4303_v14, %s7618_s16  ;;  %v4137_v48 = vmul.f32 0.5, %v7472_v2  ;;  %v4200_v10 = vadd.f32 0.5, %v4136_v5  ;;  %7483 = vtanh.f32 %v4007_v44  ;;  %v3875_v33 = vmul.f32 %v10440_v41, %v12776_v49  ;;  %v12783_v5 = vld [vmem:[#allocation29_spill] sm:$0xff] }
 0x7c8   : > { %v7474_v26 = vpop.eup %7473  ;;  %v4300_v63 = vpack.c.bf16 %v4255_v15, %v4254_v18  ;;  %v4017_v3 = vmul.f32 0.5, %v10837_v35  ;;  %7485 = vtanh.f32 %v4016_v4  ;;  %v10845_v32 = vadd.f32 %v10466_v11, %v3874_v23  ;;  %v12784_v4 = vld [vmem:[#allocation75_spill] sm:$0xff] }
 0x7c9   : > { %v7476_v55 = vpop.eup %7475  ;;  %v4201_v27 = vadd.f32 0.5, %v4137_v48  ;;  %v4264_v61 = vmul.f32 %v4200_v10, %v10762_v16  ;;  %v4130_v9 = vmul.f32 0.5, %v7474_v26  ;;  %v10849_v38 = vadd.f32 %v10466_v11, %v3875_v33 }
 0x7ca   : > { %4386 = vrot.lane.b32.xlu1 %v4300_v63, %s7618_s16  ;;  %v4131_v45 = vmul.f32 0.5, %v7476_v55  ;;  %7487 = vtanh.f32 %v4017_v3  ;;  %v4010_v36 = vmul.f32 0.5, %v10845_v32  ;;  %v3884_v19 = vmul.f32 %v10440_v41, %v12777_v53 }
 0x7cb   : > { %v4265_v51 = vmul.f32 %v4201_v27, %v10765_v1  ;;  %v4194_v25 = vadd.f32 0.5, %v4130_v9  ;;  %v4011_v8 = vmul.f32 0.5, %v10849_v38  ;;  %v3885_v16 = vmul.f32 %v10440_v41, %v12778_v17 }
 0x7cc   : > { %v7478_v56 = vpop.eup %7477  ;;  %v4195_v30 = vadd.f32 0.5, %v4131_v45  ;;  %7489 = vtanh.f32 %v4010_v36  ;;  %v10860_v37 = vadd.f32 %v10466_v11, %v3884_v19  ;;  %v3878_v22 = vmul.f32 %v10440_v41, %v12779_v60  ;;  %v12786_v60 = vld [vmem:[#allocation67_spill] sm:$0xff] }
 0x7cd   : > { %v7480_v21 = vpop.eup %7479  ;;  %v4305_v28 = vpack.c.bf16 %v4265_v51, %v4264_v61  ;;  %v4258_v7 = vmul.f32 %v4194_v25, %v10771_v42  ;;  %v4140_v1 = vmul.f32 0.5, %v7478_v56  ;;  %7491 = vtanh.f32 %v4011_v8  ;;  %v12781_v42 = vld [vmem:[#allocation25_spill] sm:$0xff]  ;;  %v12785_v51 = vld [vmem:[#allocation18_spill] sm:$0xff] }
 0x7ce   : > { %v4259_v58 = vmul.f32 %v4195_v30, %v10780_v40  ;;  %v4141_v31 = vmul.f32 0.5, %v7480_v21  ;;  %v10867_v24 = vadd.f32 %v10466_v11, %v3885_v16  ;;  %v4020_v29 = vmul.f32 0.5, %v10860_v37 }
 0x7cf   : > { %4396 = vrot.lane.b32.xlu0 %v4305_v28, %s7618_s16  ;;  %v4204_v20 = vadd.f32 0.5, %v4140_v1  ;;  %v3879_v59 = vmul.f32 %v10440_v41, %v12780_v39  ;;  %v10874_v47 = vadd.f32 %v10466_v11, %v3878_v22  ;;  %v3888_v12 = vmul.f32 %v10440_v41, %v12781_v42 }
 0x7d0   : > { %v4302_v46 = vpack.c.bf16 %v4259_v58, %v4258_v7  ;;  %v4205_v40 = vadd.f32 0.5, %v4141_v31  ;;  %v4021_v52 = vmul.f32 0.5, %v10867_v24  ;;  %7493 = vtanh.f32 %v4020_v29 }
 0x7d1   : > { %v4268_v6 = vmul.f32 %v4204_v20, %v10793_v62  ;;  %v10881_v13 = vadd.f32 %v10466_v11, %v3879_v59  ;;  %v4014_v54 = vmul.f32 0.5, %v10874_v47  ;;  %v3889_v23 = vmul.f32 %v10440_v41, %v12782_v50 }
 0x7d2   : > { %4390 = vrot.lane.b32.xlu1 %v4302_v46, %s7618_s16  ;;  %v4269_v14 = vmul.f32 %v4205_v40, %v10798_v34  ;;  %7495 = vtanh.f32 %v4021_v52  ;;  %v10889_v18 = vadd.f32 %v10466_v11, %v3888_v12  ;;  %v3882_v44 = vmul.f32 %v10440_v41, %v12783_v5 }
 0x7d3   : > { %v7482_v62 = vpop.eup %7481  ;;  %v4015_v2 = vmul.f32 0.5, %v10881_v13  ;;  %7497 = vtanh.f32 %v4014_v54  ;;  %v10895_v15 = vadd.f32 %v10466_v11, %v3889_v23  ;;  %v3883_v48 = vmul.f32 %v10440_v41, %v12784_v4 }
 0x7d4   : > { %v7484_v10 = vpop.eup %7483  ;;  %v4307_v49 = vpack.c.bf16 %v4269_v14, %v4268_v6  ;;  %v4134_v34 = vmul.f32 0.5, %v7482_v62  ;;  %v4024_v33 = vmul.f32 0.5, %v10889_v18  ;;  %v10901_v26 = vadd.f32 %v10466_v11, %v3882_v44 }
 0x7d5   : > { %v7486_v63 = vpop.eup %7485  ;;  %v4135_v3 = vmul.f32 0.5, %v7484_v10  ;;  %7499 = vtanh.f32 %v4015_v2  ;;  %v4025_v55 = vmul.f32 0.5, %v10895_v15  ;;  %v10905_v27 = vadd.f32 %v10466_v11, %v3883_v48 }
 0x7d6   : > { %4400 = vrot.lane.b32.xlu0 %v4307_v49, %s7618_s16  ;;  %v4198_v61 = vadd.f32 0.5, %v4134_v34  ;;  %v4144_v9 = vmul.f32 0.5, %v7486_v63  ;;  %7501 = vtanh.f32 %v4024_v33  ;;  %v4018_v45 = vmul.f32 0.5, %v10901_v26 }
 0x7d7   : > { %v7488_v36 = vpop.eup %7487  ;;  %v4199_v53 = vadd.f32 0.5, %v4135_v3  ;;  %7503 = vtanh.f32 %v4025_v55  ;;  %v4019_v19 = vmul.f32 0.5, %v10905_v27  ;;  %v3886_v25 = vmul.f32 %v10440_v41, %v12785_v51 }
 0x7d8   : > { %v4262_v8 = vmul.f32 %v4198_v61, %v10814_v57  ;;  %v4145_v17 = vmul.f32 0.5, %v7488_v36  ;;  %v4208_v16 = vadd.f32 0.5, %v4144_v9  ;;  %7505 = vtanh.f32 %v4018_v45 }
 0x7d9   : > { %v7490_v56 = vpop.eup %7489  ;;  %v4263_v30 = vmul.f32 %v4199_v53, %v10822_v0  ;;  %7507 = vtanh.f32 %v4019_v19  ;;  %v3887_v22 = vmul.f32 %v10440_v41, %v12786_v60  ;;  %v10917_v21 = vadd.f32 %v10466_v11, %v3886_v25 }
 0x7da   : > { %v7492_v28 = vpop.eup %7491  ;;  %v4209_v7 = vadd.f32 0.5, %v4145_v17  ;;  %v4272_v1 = vmul.f32 %v4208_v16, %v10829_v43  ;;  %v4138_v58 = vmul.f32 0.5, %v7490_v56 }
 0x7db   : > { %v4304_v31 = vpack.c.bf16 %v4263_v30, %v4262_v8  ;;  %v4139_v57 = vmul.f32 0.5, %v7492_v28  ;;  %v3959_v29 = vadd.f32 %v10466_v11, %v3887_v22  ;;  %v4022_v20 = vmul.f32 0.5, %v10917_v21 }
 0x7dc   : > { %v4273_v0 = vmul.f32 %v4209_v7, %v10837_v35  ;;  %v4202_v39 = vadd.f32 0.5, %v4138_v58 }
 0x7dd   : > { %v7494_v59 = vpop.eup %7493  ;;  %4394 = vrot.lane.b32.xlu1 %v4304_v31, %s7618_s16  ;;  %v4203_v41 = vadd.f32 0.5, %v4139_v57  ;;  %v4023_v42 = vmul.f32 0.5, %v3959_v29  ;;  %7509 = vtanh.f32 %v4022_v20 }
 0x7de   : > { %v4309_v12 = vpack.c.bf16 %v4273_v0, %v4272_v1  ;;  %v4266_v46 = vmul.f32 %v4202_v39, %v10845_v32  ;;  %v4148_v43 = vmul.f32 0.5, %v7494_v59 }
 0x7df   : > { %v7496_v40 = vpop.eup %7495  ;;  %v4267_v52 = vmul.f32 %v4203_v41, %v10849_v38  ;;  %7511 = vtanh.f32 %v4023_v42 }
 0x7e0   : > { %v7498_v11 = vpop.eup %7497  ;;  %4404 = vrot.lane.b32.xlu0 %v4309_v12, %s7618_s16  ;;  %v4149_v6 = vmul.f32 0.5, %v7496_v40  ;;  %v4212_v35 = vadd.f32 0.5, %v4148_v43 }
 0x7e1   : > { %v4306_v54 = vpack.c.bf16 %v4267_v52, %v4266_v46  ;;  %v4142_v50 = vmul.f32 0.5, %v7498_v11 }
 0x7e2   : > { %v7500_v23 = vpop.eup %7499  ;;  %v4213_v14 = vadd.f32 0.5, %v4149_v6  ;;  %v4276_v5 = vmul.f32 %v4212_v35, %v10860_v37 }
 0x7e3   : > { %v7502_v44 = vpop.eup %7501  ;;  %4398 = vrot.lane.b32.xlu1 %v4306_v54, %s7618_s16  ;;  %v4143_v32 = vmul.f32 0.5, %v7500_v23  ;;  %v4206_v62 = vadd.f32 0.5, %v4142_v50 }
 0x7e4   : > { %v7504_v2 = vpop.eup %7503  ;;  %v4277_v38 = vmul.f32 %v4213_v14, %v10867_v24  ;;  %v4152_v4 = vmul.f32 0.5, %v7502_v44 }
 0x7e5   : > { %v7506_v48 = vpop.eup %7505  ;;  %v4207_v10 = vadd.f32 0.5, %v4143_v32  ;;  %v4270_v49 = vmul.f32 %v4206_v62, %v10874_v47  ;;  %v4153_v34 = vmul.f32 0.5, %v7504_v2 }
 0x7e6   : > { %v7508_v33 = vpop.eup %7507  ;;  %v4311_v63 = vpack.c.bf16 %v4277_v38, %v4276_v5  ;;  %v4216_v3 = vadd.f32 0.5, %v4152_v4  ;;  %v4146_v55 = vmul.f32 0.5, %v7506_v48  ;;  %v7183_v38 = vld [vmem:[%s12787_s25 + $0x18] sm:$0xff]   ;;  %v7184_v4 = vld [vmem:[%s12787_s25 + $0x10] sm:$0xff]   ;;  %v7185_v48 = vld [vmem:[%s12787_s25 + $0x8] sm:$0xff]  }
 0x7e7   : > { %v4271_v37 = vmul.f32 %v4207_v10, %v10881_v13  ;;  %v4217_v61 = vadd.f32 0.5, %v4153_v34  ;;  %v4147_v9 = vmul.f32 0.5, %v7508_v33  ;;  %7051 = vmatprep.subr.bf16.mxu1 %v7183_v38  ;;  %v7186_v10 = vld [vmem:[%s12787_s25] sm:$0xff]   ;;  %v7516_v34 = vld [vmem:[%s7793_s26 + $0x8] sm:$0xff]   ;;  %v7517_v33 = vld [vmem:[%s7793_s26 + $0x10] sm:$0xff]  }
 0x7e8   : > { %4408 = vrot.lane.b32.xlu0 %v4311_v63, %s7618_s16  ;;  %v4280_v45 = vmul.f32 %v4216_v3, %v10889_v18  ;;  %v4210_v36 = vadd.f32 0.5, %v4146_v55  ;;  %7052 = vmatpush3.bf16.msra.mxu1 %v7183_v38  ;;  %v7518_v3 = vld [vmem:[%s7793_s26 + $0x18] sm:$0xff]  }
 0x7e9   : > { %v4308_v24 = vpack.c.bf16 %v4271_v37, %v4270_v49  ;;  %v4281_v53 = vmul.f32 %v4217_v61, %v10895_v15  ;;  %v4211_v19 = vadd.f32 0.5, %v4147_v9  ;;  %7053 = vmatprep.subr.bf16.mxu1 %v7184_v4  ;;  %v7515_v49 = vld [vmem:[%s7793_s26] sm:$0xff]   ;;  %v7542_v38 = vld [vmem:[%s7793_s26 + $0xd8] sm:$0xff]  }
 0x7ea   : > { %v7510_v51 = vpop.eup %7509  ;;  %v4274_v47 = vmul.f32 %v4210_v36, %v10901_v26  ;;  %7059 = vmatprep.mubr.msk.bf16.mxu1 %vm742_vm1, %v7515_v49  ;;  %v7519_v61 = vld [vmem:[%s7793_s26 + $0x20] sm:$0xff]   ;;  %v7544_v49 = vld [vmem:[%s7793_s26 + $0xe8] sm:$0xff]  }
 0x7eb   : > { %4402 = vrot.lane.b32.xlu1 %v4308_v24, %s7618_s16  ;;  %v4313_v25 = vpack.c.bf16 %v4281_v53, %v4280_v45  ;;  %v4275_v8 = vmul.f32 %v4211_v19, %v10905_v27  ;;  %v4150_v13 = vmul.f32 0.5, %v7510_v51  ;;  %v7520_v24 = vld [vmem:[%s7793_s26 + $0x28] sm:$0xff]   ;;  %v7521_v51 = vld [vmem:[%s7793_s26 + $0x30] sm:$0xff]  }
 0x7ec   : > { %v7512_v17 = vpop.eup %7511  ;;  %7054 = vmatpush3.bf16.msra.mxu1 %v7184_v4 }
 0x7ed   : > { %4412 = vrot.lane.b32.xlu0 %v4313_v25, %s7618_s16  ;;  %v4310_v16 = vpack.c.bf16 %v4275_v8, %v4274_v47  ;;  %v4151_v56 = vmul.f32 0.5, %v7512_v17  ;;  %v4214_v18 = vadd.f32 0.5, %v4150_v13  ;;  %7055 = vmatprep.subr.bf16.mxu1 %v7185_v48  ;;  %v7522_v8 = vld [vmem:[%s7793_s26 + $0x38] sm:$0xff]  }
 0x7ef   : > { %4406 = vrot.lane.b32.xlu1 %v4310_v16, %s7618_s16  ;;  %v4215_v30 = vadd.f32 0.5, %v4151_v56  ;;  %v4278_v15 = vmul.f32 %v4214_v18, %v10917_v21  ;;  %v7523_v16 = vld [vmem:[%s7793_s26 + $0x40] sm:$0xff]  }
 0x7f0   : > { %7056 = vmatpush3.bf16.msra.mxu1 %v7185_v48  ;;  %v7543_v48 = vld [vmem:[%s7793_s26 + $0xe0] sm:$0xff]  }
 0x7f1   : > { %v4279_v60 = vmul.f32 %v4215_v30, %v3959_v29  ;;  %7057 = vmatprep.subr.bf16.mxu1 %v7186_v10  ;;  %v7524_v30 = vld [vmem:[%s7793_s26 + $0x48] sm:$0xff]  }
 0x7f3   : > { %v4312_v22 = vpack.c.bf16 %v4279_v60, %v4278_v15  ;;  %v7525_v60 = vld [vmem:[%s7793_s26 + $0x50] sm:$0xff]  }
 0x7f4   : > { %7058 = vmatpush3.bf16.msra.mxu1 %v7186_v10 }
 0x7f5   : > { %4410 = vrot.lane.b32.xlu1 %v4312_v22, %s7618_s16 }
 0x7f7   : > { %7060 = vmatmul.mubr.msk.bf16.vlgmr.msra.gmra.mxu1 %vm742_vm1, %v7516_v34 }
 0x7f8   : > { %7063 = vmatprep.mubr.msk.bf16.mxu1 %vm742_vm1, %v7517_v33 }
 0x7ff   : > { %7064 = vmatmul.mubr.msk.bf16.gmra.mxu1 %vm742_vm1, %v7518_v3 }
 0x800   : > { %v4353_v26 = vpop.permute.xlu0 %4352  ;;  %7067 = vmatprep.mubr.msk.bf16.mxu1 %vm742_vm1, %v7519_v61 }
 0x802   : > { %v4351_v28 = vpop.permute.xlu1 %4350 }
 0x803   : > { %6987 = vmatprep.mubr.msk.bf16.mxu0 %vm1238_vm2, %v4351_v28 }
 0x804   : > { %6988 = vmatmul.mubr.msk.bf16.vlgmr.msra.gmra.mxu0 %vm1238_vm2, %v4353_v26  ;;  %v4357_v7 = vpop.permute.xlu0 %4356  ;;  %v7526_v26 = vld [vmem:[%s7793_s26 + $0x58] sm:$0xff]  }
 0x806   : > { %v4355_v27 = vpop.permute.xlu1 %4354 }
 0x807   : > { %6991 = vmatprep.mubr.msk.bf16.mxu0 %vm1238_vm2, %v4355_v27  ;;  %7068 = vmatmul.mubr.msk.bf16.gmra.mxu1 %vm742_vm1, %v7520_v24  ;;  %v7527_v27 = vld [vmem:[%s7793_s26 + $0x60] sm:$0xff]   ;;  %v7545_v24 = vld [vmem:[%s7793_s26 + $0xf0] sm:$0xff]  }
 0x808   : > { %v4361_v21 = vpop.permute.xlu0 %4360  ;;  %7071 = vmatprep.mubr.msk.bf16.mxu1 %vm742_vm1, %v7521_v51  ;;  %v7546_v51 = vld [vmem:[%s7793_s26 + $0xf8] sm:$0xff]  }
 0x80a   : > { %v4359_v1 = vpop.permute.xlu1 %4358 }
 0x80c   : > { %6992 = vmatmul.mubr.msk.bf16.gmra.mxu0 %vm1238_vm2, %v4357_v7  ;;  %v4365_v31 = vpop.permute.xlu0 %4364 }
 0x80d   : > { %6995 = vmatprep.mubr.msk.bf16.mxu0 %vm1238_vm2, %v4359_v1  ;;  %v7528_v1 = vld [vmem:[%s7793_s26 + $0x68] sm:$0xff]  }
 0x80e   : > { %v4363_v58 = vpop.permute.xlu1 %4362 }
 0x80f   : > { %7072 = vmatmul.mubr.msk.bf16.gmra.mxu1 %vm742_vm1, %v7522_v8 }
 0x810   : > { %v4369_v20 = vpop.permute.xlu0 %4368  ;;  %7075 = vmatprep.mubr.msk.bf16.mxu1 %vm742_vm1, %v7523_v16 }
 0x812   : > { %v4367_v57 = vpop.permute.xlu1 %4366 }
 0x814   : > { %6996 = vmatmul.mubr.msk.bf16.gmra.mxu0 %vm1238_vm2, %v4361_v21 }
 0x815   : > { %6999 = vmatprep.mubr.msk.bf16.mxu0 %vm1238_vm2, %v4363_v58  ;;  %v4373_v39 = vpop.permute.xlu0 %4372  ;;  %v7529_v58 = vld [vmem:[%s7793_s26 + $0x70] sm:$0xff]  }
 0x817   : > { %7076 = vmatmul.mubr.msk.bf16.gmra.mxu1 %vm742_vm1, %v7524_v30 }
 0x818   : > { %7079 = vmatprep.mubr.msk.bf16.mxu1 %vm742_vm1, %v7525_v60 }
 0x819   : > { %v4371_v29 = vpop.permute.xlu1 %4370 }
 0x81c   : > { %7000 = vmatmul.mubr.msk.bf16.gmra.mxu0 %vm1238_vm2, %v4365_v31 }
 0x81d   : > { %7003 = vmatprep.mubr.msk.bf16.mxu0 %vm1238_vm2, %v4367_v57  ;;  %v4377_v41 = vpop.permute.xlu0 %4376  ;;  %v7530_v57 = vld [vmem:[%s7793_s26 + $0x78] sm:$0xff]  }
 0x81f   : > { %7080 = vmatmul.mubr.msk.bf16.gmra.mxu1 %vm742_vm1, %v7526_v26 }
 0x820   : > { %7083 = vmatprep.mubr.msk.bf16.mxu1 %vm742_vm1, %v7527_v27 }
 0x824   : > { %7004 = vmatmul.mubr.msk.bf16.gmra.mxu0 %vm1238_vm2, %v4369_v20  ;;  %v7531_v20 = vld [vmem:[%s7793_s26 + $0x80] sm:$0xff]  }
 0x825   : > { %7007 = vmatprep.mubr.msk.bf16.mxu0 %vm1238_vm2, %v4371_v29  ;;  %v4375_v0 = vpop.permute.xlu1 %4374 }
 0x827   : > { %7084 = vmatmul.mubr.msk.bf16.gmra.mxu1 %vm742_vm1, %v7528_v1 }
 0x828   : > { %7087 = vmatprep.mubr.msk.bf16.mxu1 %vm742_vm1, %v7529_v58 }
 0x829   : > { %v10955_v59 = vpop.permute.xlu1 %5345 }
 0x82c   : > { %7008 = vmatmul.mubr.msk.bf16.gmra.mxu0 %vm1238_vm2, %v4373_v39  ;;  %v4381_v12 = vpop.permute.xlu0 %4380  ;;  %v7532_v39 = vld [vmem:[%s7793_s26 + $0x88] sm:$0xff]  }
 0x82d   : > { %7011 = vmatprep.mubr.msk.bf16.mxu0 %vm1238_vm2, %v4375_v0 }
 0x82f   : > { %7088 = vmatmul.mubr.msk.bf16.gmra.mxu1 %vm742_vm1, %v7530_v57 }
 0x830   : > { %v4385_v43 = vpop.permute.xlu0 %4384  ;;  %7091 = vmatprep.mubr.msk.bf16.mxu1 %vm742_vm1, %v7531_v20 }
 0x832   : > { %v4379_v42 = vpop.permute.xlu1 %4378 }
 0x834   : > { %7012 = vmatmul.mubr.msk.bf16.gmra.mxu0 %vm1238_vm2, %v4377_v41  ;;  %v4389_v52 = vpop.permute.xlu0 %4388 }
 0x835   : > { %7015 = vmatprep.mubr.msk.bf16.mxu0 %vm1238_vm2, %v4379_v42  ;;  %v7533_v42 = vld [vmem:[%s7793_s26 + $0x90] sm:$0xff]  }
 0x836   : > { %v4383_v46 = vpop.permute.xlu1 %4382 }
 0x837   : > { %7092 = vmatmul.mubr.msk.bf16.gmra.mxu1 %vm742_vm1, %v7532_v39 }
 0x838   : > { %7095 = vmatprep.mubr.msk.bf16.mxu1 %vm742_vm1, %v7533_v42 }
 0x839   : > { %v4393_v6 = vpop.permute.xlu0 %4392 }
 0x83c   : > { %7016 = vmatmul.mubr.msk.bf16.gmra.mxu0 %vm1238_vm2, %v4381_v12  ;;  %v4387_v40 = vpop.permute.xlu1 %4386 }
 0x83d   : > { %7019 = vmatprep.mubr.msk.bf16.mxu0 %vm1238_vm2, %v4383_v46  ;;  %v7534_v46 = vld [vmem:[%s7793_s26 + $0x98] sm:$0xff]  }
 0x83f   : > { %7096 = vmatmul.mubr.msk.bf16.gmra.mxu1 %vm742_vm1, %v7534_v46 }
 0x841   : > { %v4397_v54 = vpop.permute.xlu0 %4396 }
 0x844   : > { %7020 = vmatmul.mubr.msk.bf16.gmra.mxu0 %vm1238_vm2, %v4385_v43  ;;  %v4391_v11 = vpop.permute.xlu1 %4390 }
 0x845   : > { %7023 = vmatprep.mubr.msk.bf16.mxu0 %vm1238_vm2, %v4387_v40  ;;  %v7535_v40 = vld [vmem:[%s7793_s26 + $0xa0] sm:$0xff]  }
 0x846   : > { %7099 = vmatprep.mubr.msk.bf16.mxu1 %vm742_vm1, %v7535_v40 }
 0x848   : > { %v4401_v23 = vpop.permute.xlu0 %4400 }
 0x84c   : > { %7024 = vmatmul.mubr.msk.bf16.gmra.mxu0 %vm1238_vm2, %v4389_v52 }
 0x84d   : > { %7027 = vmatprep.mubr.msk.bf16.mxu0 %vm1238_vm2, %v4391_v11  ;;  %v7536_v11 = vld [vmem:[%s7793_s26 + $0xa8] sm:$0xff]  }
 0x84e   : > { %7100 = vmatmul.mubr.msk.bf16.gmra.mxu1 %vm742_vm1, %v7536_v11 }
 0x84f   : > { %v4395_v35 = vpop.permute.xlu1 %4394 }
 0x852   : > { %v4405_v5 = vpop.permute.xlu0 %4404 }
 0x854   : > { %7028 = vmatmul.mubr.msk.bf16.gmra.mxu0 %vm1238_vm2, %v4393_v6 }
 0x855   : > { %7031 = vmatprep.mubr.msk.bf16.mxu0 %vm1238_vm2, %v4395_v35  ;;  %v4399_v50 = vpop.permute.xlu1 %4398  ;;  %v7537_v35 = vld [vmem:[%s7793_s26 + $0xb0] sm:$0xff]  }
 0x856   : > { %7103 = vmatprep.mubr.msk.bf16.mxu1 %vm742_vm1, %v7537_v35 }
 0x85a   : > { %v4409_v32 = vpop.permute.xlu0 %4408 }
 0x85c   : > { %7032 = vmatmul.mubr.msk.bf16.gmra.mxu0 %vm1238_vm2, %v4397_v54 }
 0x85d   : > { %7035 = vmatprep.mubr.msk.bf16.mxu0 %vm1238_vm2, %v4399_v50  ;;  %v4403_v14 = vpop.permute.xlu1 %4402  ;;  %v7538_v50 = vld [vmem:[%s7793_s26 + $0xb8] sm:$0xff]  }
 0x85e   : > { %7104 = vmatmul.mubr.msk.bf16.gmra.mxu1 %vm742_vm1, %v7538_v50 }
 0x85f   : > { %v4413_v2 = vpop.permute.xlu0 %4412 }
 0x861   : > { %v4407_v44 = vpop.permute.xlu1 %4406 }
 0x864   : > { %7036 = vmatmul.mubr.msk.bf16.gmra.mxu0 %vm1238_vm2, %v4401_v23 }
 0x865   : > { %7039 = vmatprep.mubr.msk.bf16.mxu0 %vm1238_vm2, %v4403_v14  ;;  %v7539_v14 = vld [vmem:[%s7793_s26 + $0xc0] sm:$0xff]  }
 0x866   : > { %7107 = vmatprep.mubr.msk.bf16.mxu1 %vm742_vm1, %v7539_v14 }
 0x867   : > { %v4411_v62 = vpop.permute.xlu1 %4410 }
 0x86c   : > { %7040 = vmatmul.mubr.msk.bf16.gmra.mxu0 %vm1238_vm2, %v4405_v5 }
 0x86d   : > { %7043 = vmatprep.mubr.msk.bf16.mxu0 %vm1238_vm2, %v4407_v44  ;;  %v7540_v44 = vld [vmem:[%s7793_s26 + $0xc8] sm:$0xff]  }
 0x86e   : > { %7108 = vmatmul.mubr.msk.bf16.gmra.mxu1 %vm742_vm1, %v7540_v44 }
 0x874   : > { %7044 = vmatmul.mubr.msk.bf16.gmra.mxu0 %vm1238_vm2, %v4409_v32 }
 0x875   : > { %7047 = vmatprep.mubr.msk.bf16.mxu0 %vm1238_vm2, %v4411_v62  ;;  %v7541_v62 = vld [vmem:[%s7793_s26 + $0xd0] sm:$0xff]  }
 0x876   : > { %7111 = vmatprep.mubr.msk.bf16.mxu1 %vm742_vm1, %v7541_v62 }
 0x877   : > { %7112 = vmatmul.mubr.msk.bf16.gmra.mxu1 %vm742_vm1, %v7542_v38 }
 0x878   : > { %7115 = vmatprep.mubr.msk.bf16.mxu1 %vm742_vm1, %v7543_v48 }
 0x87c   : > { %7048 = vmatmul.mubr.msk.bf16.gmra.mxu0 %vm1238_vm2, %v4413_v2 }
 0x87f   : > { %7116 = vmatmul.mubr.msk.bf16.gmra.mxu1 %vm742_vm1, %v7544_v49 }
 0x880   : > { %7119 = vmatprep.mubr.msk.bf16.mxu1 %vm742_vm1, %v7545_v24 }
 0x887   : > { %7120 = vmatmul.mubr.msk.bf16.gmra.mxu1 %vm742_vm1, %v7546_v51 }
 0x8c4   : > { %v10993_v63 = vpop.f32.mrf.mxu0 }
 0x8c5   : > { %4871 = vrot.lane.b32.xlu1 %v10993_v63, %s7616_s27 }
 0x8c6   : > { %v10999_v55 = vpop.f32.mrf.mxu0 }
 0x8c8   : > { %v11002_v37 = vpop.f32.mrf.mxu0 }
 0x8c9   : > { %4867 = vrot.lane.b32.xlu1 %v10999_v55, %s7616_s27  ;;  %4873 = vrot.lane.b32.xlu0 %v11002_v37, %s7616_s27 }
 0x8ca   : > { %v11009_v9 = vpop.f32.mrf.mxu0 }
 0x8cc   : > { %v11012_v45 = vpop.f32.mrf.mxu0 }
 0x8cd   : > { %4869 = vrot.lane.b32.xlu0 %v11009_v9, %s7616_s27  ;;  %4879 = vrot.lane.b32.xlu1 %v11012_v45, %s7616_s27 }
 0x8ce   : > { %v11018_v36 = vpop.f32.mrf.mxu0 }
 0x8d0   : > { %v11021_v53 = vpop.f32.mrf.mxu0 }
 0x8d1   : > { %4875 = vrot.lane.b32.xlu1 %v11018_v36, %s7616_s27  ;;  %4881 = vrot.lane.b32.xlu0 %v11021_v53, %s7616_s27 }
 0x8d2   : > { %v11028_v19 = vpop.f32.mrf.mxu0 }
 0x8d4   : > { %v11031_v47 = vpop.f32.mrf.mxu0 }
 0x8d5   : > { %4877 = vrot.lane.b32.xlu0 %v11028_v19, %s7616_s27  ;;  %4887 = vrot.lane.b32.xlu1 %v11031_v47, %s7616_s27 }
 0x8d6   : > { %v11038_v25 = vpop.f32.mrf.mxu0 }
 0x8d8   : > { %v11041_v13 = vpop.f32.mrf.mxu0 }
 0x8d9   : > { %5111 = vrot.lane.b32.xlu1 %v11031_v47, %s7618_s16  ;;  %4889 = vrot.lane.b32.xlu0 %v11041_v13, %s7616_s27 }
 0x8da   : > { %v11048_v17 = vpop.f32.mrf.mxu0 }
 0x8dc   : > { %v11051_v56 = vpop.f32.mrf.mxu0 }
 0x8dd   : > { %4883 = vrot.lane.b32.xlu1 %v11038_v25, %s7616_s27  ;;  %5113 = vrot.lane.b32.xlu0 %v11041_v13, %s7618_s16 }
 0x8de   : > { %v11058_v18 = vpop.f32.mrf.mxu0 }
 0x8e0   : > { %v11061_v15 = vpop.f32.mrf.mxu0 }
 0x8e1   : > { %5107 = vrot.lane.b32.xlu1 %v11038_v25, %s7618_s16  ;;  %4885 = vrot.lane.b32.xlu0 %v11048_v17, %s7616_s27 }
 0x8e2   : > { %v11069_v22 = vpop.f32.mrf.mxu0 }
 0x8e4   : > { %v11077_v28 = vpop.f32.mrf.mxu0 }
 0x8e5   : > { %5109 = vrot.lane.b32.xlu0 %v11048_v17, %s7618_s16  ;;  %4895 = vrot.lane.b32.xlu1 %v11051_v56, %s7616_s27 }
 0x8e6   : > { %v11085_v7 = vpop.f32.mrf.mxu0 }
 0x8e8   : > { %v11093_v21 = vpop.f32.mrf.mxu0 }
 0x8e9   : > { %5119 = vrot.lane.b32.xlu1 %v11051_v56, %s7618_s16  ;;  %4897 = vrot.lane.b32.xlu0 %v11061_v15, %s7616_s27 }
 0x8ea   : > { %v11101_v31 = vpop.f32.mrf.mxu0 }
 0x8ec   : > { %v11109_v29 = vpop.f32.mrf.mxu0 }
 0x8ed   : > { %4891 = vrot.lane.b32.xlu1 %v11058_v18, %s7616_s27  ;;  %5121 = vrot.lane.b32.xlu0 %v11061_v15, %s7618_s16  ;;  %12788 = vst [vmem:[#allocation73_spill] sm:$0xff] %v11109_v29 }
 0x8ee   : > { %v11117_v0 = vpop.f32.mrf.mxu0 }
 0x8ef   : > { %12789 = vst [vmem:[#allocation32_spill] sm:$0xff] %v11117_v0 }
 0x8f0   : > { %v11125_v41 = vpop.f32.mrf.mxu0 }
 0x8f1   : > { %5115 = vrot.lane.b32.xlu1 %v11058_v18, %s7618_s16  ;;  %4893 = vrot.lane.b32.xlu0 %v11069_v22, %s7616_s27  ;;  %12790 = vst [vmem:[#allocation33_spill] sm:$0xff] %v11125_v41 }
 0x8f2   : > { %v11133_v12 = vpop.f32.mrf.mxu0 }
 0x8f3   : > { %12791 = vst [vmem:[#allocation36_spill] sm:$0xff] %v11133_v12 }
 0x8f4   : > { %v11141_v43 = vpop.f32.mrf.mxu0 }
 0x8f5   : > { %5117 = vrot.lane.b32.xlu0 %v11069_v22, %s7618_s16  ;;  %4903 = vrot.lane.b32.xlu1 %v11077_v28, %s7616_s27  ;;  %12792 = vst [vmem:[#allocation28_spill] sm:$0xff] %v11141_v43 }
 0x8f6   : > { %v11149_v52 = vpop.f32.mrf.mxu0 }
 0x8f7   : > { %12793 = vst [vmem:[#allocation35_spill] sm:$0xff] %v11149_v52 }
 0x8f8   : > { %v11157_v6 = vpop.f32.mrf.mxu0 }
 0x8f9   : > { %5127 = vrot.lane.b32.xlu1 %v11077_v28, %s7618_s16  ;;  %4905 = vrot.lane.b32.xlu0 %v11093_v21, %s7616_s27  ;;  %12794 = vst [vmem:[#allocation37_spill] sm:$0xff] %v11157_v6 }
 0x8fa   : > { %v11165_v54 = vpop.f32.mrf.mxu0 }
 0x8fb   : > { %12795 = vst [vmem:[#allocation38_spill] sm:$0xff] %v11165_v54 }
 0x8fc   : > { %v11173_v23 = vpop.f32.mrf.mxu0 }
 0x8fd   : > { %4899 = vrot.lane.b32.xlu1 %v11085_v7, %s7616_s27  ;;  %5129 = vrot.lane.b32.xlu0 %v11093_v21, %s7618_s16  ;;  %12796 = vst [vmem:[#allocation55_spill] sm:$0xff] %v11173_v23 }
 0x8fe   : > { %v11181_v5 = vpop.f32.mrf.mxu0 }
 0x8ff   : > { %12797 = vst [vmem:[#allocation21_spill] sm:$0xff] %v11181_v5 }
 0x900   : > { %v11189_v32 = vpop.f32.mrf.mxu0 }
 0x901   : > { %5123 = vrot.lane.b32.xlu1 %v11085_v7, %s7618_s16  ;;  %4901 = vrot.lane.b32.xlu0 %v11101_v31, %s7616_s27  ;;  %12798 = vst [vmem:[#allocation43_spill] sm:$0xff] %v11189_v32 }
 0x902   : > { %v11197_v2 = vpop.f32.mrf.mxu0 }
 0x903   : > { %12799 = vst [vmem:[#allocation54_spill] sm:$0xff] %v11197_v2 }
 0x904   : > { %v11205_v4 = vpop.f32.mrf.mxu0 }
 0x905   : > { %5125 = vrot.lane.b32.xlu0 %v11101_v31, %s7618_s16  ;;  %4911 = vrot.lane.b32.xlu1 %v11109_v29, %s7616_s27  ;;  %12800 = vst [vmem:[#allocation46_spill] sm:$0xff] %v11205_v4 }
 0x906   : > { %v11213_v10 = vpop.f32.mrf.mxu0 }
 0x907   : > { %12801 = vst [vmem:[#allocation49_spill] sm:$0xff] %v11213_v10 }
 0x908   : > { %v11221_v34 = vpop.f32.mrf.mxu0 }
 0x909   : > { %5135 = vrot.lane.b32.xlu1 %v11109_v29, %s7618_s16  ;;  %4913 = vrot.lane.b32.xlu0 %v11125_v41, %s7616_s27  ;;  %12802 = vst [vmem:[#allocation60_spill] sm:$0xff] %v11221_v34 }
 0x90a   : > { %v11228_v33 = vpop.f32.mrf.mxu0 }
 0x90b   : > { %12803 = vst [vmem:[#allocation52_spill] sm:$0xff] %v11228_v33 }
 0x90c   : > { %v11236_v61 = vpop.f32.mrf.mxu0 }
 0x90d   : > { %4907 = vrot.lane.b32.xlu1 %v11117_v0, %s7616_s27  ;;  %5137 = vrot.lane.b32.xlu0 %v11125_v41, %s7618_s16  ;;  %12804 = vst [vmem:[#allocation57_spill] sm:$0xff] %v11236_v61 }
 0x90e   : > { %v11248_v30 = vpop.f32.mrf.mxu0 }
 0x90f   : > { %12805 = vst [vmem:[#allocation66_spill] sm:$0xff] %v11248_v30 }
 0x910   : > { %v11260_v27 = vpop.f32.mrf.mxu0 }
 0x911   : > { %5131 = vrot.lane.b32.xlu1 %v11117_v0, %s7618_s16  ;;  %4909 = vrot.lane.b32.xlu0 %v11133_v12, %s7616_s27  ;;  %12806 = vst [vmem:[#allocation71_spill] sm:$0xff] %v11260_v27  ;;  %v11432_v0 = vpop.f32.mrf.mxu1 }
 0x912   : > { %v11270_v57 = vpop.f32.mrf.mxu0  ;;  %12835 = vst [vmem:[#allocation26_spill] sm:$0xff] %v11432_v0 }
 0x913   : > { %12807 = vst [vmem:[#allocation63_spill] sm:$0xff] %v11270_v57 }
 0x914   : > { %v11280_v42 = vpop.f32.mrf.mxu0 }
 0x915   : > { %5133 = vrot.lane.b32.xlu0 %v11133_v12, %s7618_s16  ;;  %4919 = vrot.lane.b32.xlu1 %v11141_v43, %s7616_s27  ;;  %12808 = vst [vmem:[#allocation78_spill] sm:$0xff] %v11280_v42 }
 0x916   : > { %v11290_v11 = vpop.f32.mrf.mxu0 }
 0x917   : > { %12809 = vst [vmem:[#allocation77_spill] sm:$0xff] %v11290_v11 }
 0x918   : > { %v11300_v14 = vpop.f32.mrf.mxu0 }
 0x919   : > { %5143 = vrot.lane.b32.xlu1 %v11141_v43, %s7618_s16  ;;  %4921 = vrot.lane.b32.xlu0 %v11157_v6, %s7616_s27  ;;  %12810 = vst [vmem:[#allocation68_spill] sm:$0xff] %v11300_v14 }
 0x91a   : > { %v11310_v38 = vpop.f32.mrf.mxu0 }
 0x91b   : > { %12811 = vst [vmem:[#allocation76_spill] sm:$0xff] %v11310_v38 }
 0x91c   : > { %v11320_v24 = vpop.f32.mrf.mxu0 }
 0x91d   : > { %4915 = vrot.lane.b32.xlu1 %v11149_v52, %s7616_s27  ;;  %5145 = vrot.lane.b32.xlu0 %v11157_v6, %s7618_s16  ;;  %12813 = vst [vmem:[#allocation51_spill] sm:$0xff] %v11320_v24 }
 0x921   : > { %5139 = vrot.lane.b32.xlu1 %v11149_v52, %s7618_s16  ;;  %4917 = vrot.lane.b32.xlu0 %v11165_v54, %s7616_s27 }
 0x925   : > { %5141 = vrot.lane.b32.xlu0 %v11165_v54, %s7618_s16  ;;  %4927 = vrot.lane.b32.xlu1 %v11173_v23, %s7616_s27 }
 0x929   : > { %5151 = vrot.lane.b32.xlu1 %v11173_v23, %s7618_s16  ;;  %4929 = vrot.lane.b32.xlu0 %v11189_v32, %s7616_s27 }
 0x92d   : > { %4923 = vrot.lane.b32.xlu1 %v11181_v5, %s7616_s27  ;;  %5153 = vrot.lane.b32.xlu0 %v11189_v32, %s7618_s16 }
 0x931   : > { %5147 = vrot.lane.b32.xlu1 %v11181_v5, %s7618_s16  ;;  %4925 = vrot.lane.b32.xlu0 %v11197_v2, %s7616_s27 }
 0x935   : > { %5149 = vrot.lane.b32.xlu0 %v11197_v2, %s7618_s16  ;;  %4935 = vrot.lane.b32.xlu1 %v11205_v4, %s7616_s27 }
 0x937   : > { %v11234_v3 = vpop.permute.xlu1 %4871 }
 0x939   : > { %5159 = vrot.lane.b32.xlu1 %v11205_v4, %s7618_s16  ;;  %4937 = vrot.lane.b32.xlu0 %v11221_v34, %s7616_s27 }
 0x93b   : > { %v11244_v8 = vpop.permute.xlu1 %4867  ;;  %v11246_v16 = vpop.permute.xlu0 %4873 }
 0x93d   : > { %4931 = vrot.lane.b32.xlu1 %v11213_v10, %s7616_s27  ;;  %5161 = vrot.lane.b32.xlu0 %v11221_v34, %s7618_s16 }
 0x93f   : > { %v11256_v60 = vpop.permute.xlu0 %4869  ;;  %v11258_v26 = vpop.permute.xlu1 %4879 }
 0x941   : > { %5155 = vrot.lane.b32.xlu1 %v11213_v10, %s7618_s16  ;;  %4933 = vrot.lane.b32.xlu0 %v11228_v33, %s7616_s27 }
 0x943   : > { %v11266_v1 = vpop.permute.xlu1 %4875  ;;  %v11268_v58 = vpop.permute.xlu0 %4881 }
 0x945   : > { %5157 = vrot.lane.b32.xlu0 %v11228_v33, %s7618_s16  ;;  %4943 = vrot.lane.b32.xlu1 %v11236_v61, %s7616_s27 }
 0x947   : > { %v11276_v20 = vpop.permute.xlu0 %4877  ;;  %v11278_v39 = vpop.permute.xlu1 %4887 }
 0x949   : > { %5167 = vrot.lane.b32.xlu1 %v11236_v61, %s7618_s16  ;;  %4945 = vrot.lane.b32.xlu0 %v11260_v27, %s7616_s27 }
 0x94b   : > { %v11286_v46 = vpop.permute.xlu1 %5111  ;;  %v11288_v40 = vpop.permute.xlu0 %4889 }
 0x94d   : > { %4939 = vrot.lane.b32.xlu1 %v11248_v30, %s7616_s27  ;;  %5169 = vrot.lane.b32.xlu0 %v11260_v27, %s7618_s16 }
 0x94f   : > { %v11296_v35 = vpop.permute.xlu1 %4883  ;;  %v11298_v50 = vpop.permute.xlu0 %5113 }
 0x951   : > { %5163 = vrot.lane.b32.xlu1 %v11248_v30, %s7618_s16  ;;  %4941 = vrot.lane.b32.xlu0 %v11270_v57, %s7616_s27 }
 0x953   : > { %v11306_v44 = vpop.permute.xlu1 %5107  ;;  %v11308_v62 = vpop.permute.xlu0 %4885 }
 0x955   : > { %5165 = vrot.lane.b32.xlu0 %v11270_v57, %s7618_s16  ;;  %4951 = vrot.lane.b32.xlu1 %v11280_v42, %s7616_s27  ;;  %v11330_v57 = vpop.f32.mrf.mxu0 }
 0x956   : > { %12814 = vst [vmem:[#allocation40_spill] sm:$0xff] %v11330_v57 }
 0x957   : > { %v11316_v48 = vpop.permute.xlu0 %5109  ;;  %v11318_v49 = vpop.permute.xlu1 %4895 }
 0x958   : > { %12812 = vst [vmem:[#allocation74_spill] sm:$0xff] %v11318_v49 }
 0x959   : > { %5175 = vrot.lane.b32.xlu1 %v11280_v42, %s7618_s16  ;;  %4953 = vrot.lane.b32.xlu0 %v11300_v14, %s7616_s27  ;;  %v11340_v42 = vpop.f32.mrf.mxu0 }
 0x95a   : > { %12816 = vst [vmem:[#allocation85_spill] sm:$0xff] %v11340_v42 }
 0x95b   : > { %v11326_v51 = vpop.permute.xlu1 %5119  ;;  %v11328_v30 = vpop.permute.xlu0 %4897 }
 0x95c   : > { %v11350_v4 = vpop.f32.mrf.mxu0 }
 0x95d   : > { %4947 = vrot.lane.b32.xlu1 %v11290_v11, %s7616_s27  ;;  %5177 = vrot.lane.b32.xlu0 %v11300_v14, %s7618_s16  ;;  %12818 = vst [vmem:[#allocation79_spill] sm:$0xff] %v11350_v4 }
 0x95f   : > { %v11336_v61 = vpop.permute.xlu1 %4891  ;;  %v11338_v27 = vpop.permute.xlu0 %5121 }
 0x960   : > { %12815 = vst [vmem:[#allocation82_spill] sm:$0xff] %v11336_v61 }
 0x961   : > { %5171 = vrot.lane.b32.xlu1 %v11290_v11, %s7618_s16  ;;  %4949 = vrot.lane.b32.xlu0 %v11310_v38, %s7616_s27  ;;  %v11360_v11 = vpop.f32.mrf.mxu0 }
 0x962   : > { %12820 = vst [vmem:[#allocation19_spill] sm:$0xff] %v11360_v11 }
 0x963   : > { %v11346_v10 = vpop.permute.xlu1 %5115  ;;  %v11348_v33 = vpop.permute.xlu0 %4893 }
 0x964   : > { %12817 = vst [vmem:[#allocation80_spill] sm:$0xff] %v11348_v33  ;;  %v11444_v33 = vpop.f32.mrf.mxu1 }
 0x965   : > { %5173 = vrot.lane.b32.xlu0 %v11310_v38, %s7618_s16  ;;  %4959 = vrot.lane.b32.xlu1 %v11320_v24, %s7616_s27  ;;  %v11370_v38 = vpop.f32.mrf.mxu0  ;;  %12838 = vst [vmem:[#allocation53_spill] sm:$0xff] %v11444_v33 }
 0x966   : > { %12822 = vst [vmem:[#allocation39_spill] sm:$0xff] %v11370_v38  ;;  %v11456_v12 = vpop.f32.mrf.mxu1 }
 0x967   : > { %v11356_v14 = vpop.permute.xlu0 %5117  ;;  %v11358_v34 = vpop.permute.xlu1 %4903  ;;  %12841 = vst [vmem:[#allocation58_spill] sm:$0xff] %v11456_v12 }
 0x968   : > { %12819 = vst [vmem:[#allocation47_spill] sm:$0xff] %v11358_v34  ;;  %v11468_v29 = vpop.f32.mrf.mxu1 }
 0x969   : > { %5183 = vrot.lane.b32.xlu1 %v11320_v24, %s7618_s16  ;;  %4961 = vrot.lane.b32.xlu0 %v11340_v42, %s7616_s27  ;;  %v11380_v24 = vpop.f32.mrf.mxu0  ;;  %12844 = vst [vmem:[#allocation64_spill] sm:$0xff] %v11468_v29 }
 0x96a   : > { %12824 = vst [vmem:[#allocation50_spill] sm:$0xff] %v11380_v24 }
 0x96b   : > { %v11366_v5 = vpop.permute.xlu1 %5127  ;;  %v11368_v2 = vpop.permute.xlu0 %4905 }
 0x96c   : > { %12821 = vst [vmem:[#allocation86_spill] sm:$0xff] %v11368_v2  ;;  %v11390_v43 = vpop.f32.mrf.mxu0 }
 0x96d   : > { %4955 = vrot.lane.b32.xlu1 %v11330_v57, %s7616_s27  ;;  %5185 = vrot.lane.b32.xlu0 %v11340_v42, %s7618_s16  ;;  %12826 = vst [vmem:[#allocation22_spill] sm:$0xff] %v11390_v43 }
 0x96f   : > { %v11376_v23 = vpop.permute.xlu1 %4899  ;;  %v11378_v32 = vpop.permute.xlu0 %5129 }
 0x970   : > { %12823 = vst [vmem:[#allocation14_spill] sm:$0xff] %v11376_v23 }
 0x971   : > { %5179 = vrot.lane.b32.xlu1 %v11330_v57, %s7618_s16  ;;  %4957 = vrot.lane.b32.xlu0 %v11350_v4, %s7616_s27  ;;  %v11400_v57 = vpop.f32.mrf.mxu0 }
 0x972   : > { %12828 = vst [vmem:[#allocation84_spill] sm:$0xff] %v11400_v57 }
 0x973   : > { %v11386_v52 = vpop.permute.xlu1 %5123  ;;  %v11388_v54 = vpop.permute.xlu0 %4901 }
 0x974   : > { %12825 = vst [vmem:[#allocation48_spill] sm:$0xff] %v11388_v54 }
 0x975   : > { %5181 = vrot.lane.b32.xlu0 %v11350_v4, %s7618_s16  ;;  %4967 = vrot.lane.b32.xlu1 %v11360_v11, %s7616_s27  ;;  %v11410_v4 = vpop.f32.mrf.mxu0 }
 0x976   : > { %12830 = vst [vmem:[#allocation12_spill] sm:$0xff] %v11410_v4 }
 0x977   : > { %v11396_v42 = vpop.permute.xlu0 %5125  ;;  %v11398_v23 = vpop.permute.xlu1 %4911 }
 0x978   : > { %12827 = vst [vmem:[#allocation81_spill] sm:$0xff] %v11398_v23 }
 0x979   : > { %5191 = vrot.lane.b32.xlu1 %v11360_v11, %s7618_s16  ;;  %4969 = vrot.lane.b32.xlu0 %v11380_v24, %s7616_s27  ;;  %v11420_v11 = vpop.f32.mrf.mxu0 }
 0x97a   : > { %12832 = vst [vmem:[#allocation8_spill] sm:$0xff] %v11420_v11 }
 0x97b   : > { %v11406_v54 = vpop.permute.xlu1 %5135  ;;  %v11408_v34 = vpop.permute.xlu0 %4913 }
 0x97c   : > { %12829 = vst [vmem:[#allocation83_spill] sm:$0xff] %v11408_v34  ;;  %v11430_v61 = vpop.f32.mrf.mxu0 }
 0x97d   : > { %4963 = vrot.lane.b32.xlu1 %v11370_v38, %s7616_s27  ;;  %5193 = vrot.lane.b32.xlu0 %v11380_v24, %s7618_s16  ;;  %12834 = vst [vmem:[#allocation59_spill] sm:$0xff] %v11430_v61 }
 0x97f   : > { %v11416_v23 = vpop.permute.xlu1 %4907  ;;  %v11418_v6 = vpop.permute.xlu0 %5137 }
 0x980   : > { %12831 = vst [vmem:[#allocation13_spill] sm:$0xff] %v11416_v23  ;;  %v11442_v23 = vpop.f32.mrf.mxu0 }
 0x981   : > { %5187 = vrot.lane.b32.xlu1 %v11370_v38, %s7618_s16  ;;  %4965 = vrot.lane.b32.xlu0 %v11390_v43, %s7616_s27  ;;  %12837 = vst [vmem:[#allocation61_spill] sm:$0xff] %v11442_v23 }
 0x983   : > { %v11426_v34 = vpop.permute.xlu1 %5131  ;;  %v11428_v2 = vpop.permute.xlu0 %4909 }
 0x984   : > { %12833 = vst [vmem:[#allocation41_spill] sm:$0xff] %v11428_v2  ;;  %v11454_v2 = vpop.f32.mrf.mxu0 }
 0x985   : > { %5189 = vrot.lane.b32.xlu0 %v11390_v43, %s7618_s16  ;;  %4975 = vrot.lane.b32.xlu1 %v11400_v57, %s7616_s27  ;;  %12840 = vst [vmem:[#allocation24_spill] sm:$0xff] %v11454_v2 }
 0x987   : > { %v11438_v24 = vpop.permute.xlu0 %5133  ;;  %v11440_v38 = vpop.permute.xlu1 %4919 }
 0x988   : > { %12836 = vst [vmem:[#allocation72_spill] sm:$0xff] %v11440_v38  ;;  %v11466_v38 = vpop.f32.mrf.mxu0 }
 0x989   : > { %5199 = vrot.lane.b32.xlu1 %v11400_v57, %s7618_s16  ;;  %4977 = vrot.lane.b32.xlu0 %v11420_v11, %s7616_s27  ;;  %12843 = vst [vmem:[#allocation65_spill] sm:$0xff] %v11466_v38 }
 0x98a   : > { %v11478_v49 = vpop.f32.mrf.mxu0 }
 0x98b   : > { %v11450_v0 = vpop.permute.xlu1 %5143  ;;  %v11452_v43 = vpop.permute.xlu0 %4921  ;;  %12847 = vst [vmem:[#allocation70_spill] sm:$0xff] %v11478_v49 }
 0x98c   : > { %12839 = vst [vmem:[#allocation15_spill] sm:$0xff] %v11452_v43 }
 0x98d   : > { %4971 = vrot.lane.b32.xlu1 %v11410_v4, %s7616_s27  ;;  %5201 = vrot.lane.b32.xlu0 %v11420_v11, %s7618_s16  ;;  %v11480_v11 = vpop.f32.mrf.mxu1 }
 0x98e   : > { %12848 = vst [vmem:[#allocation16_spill] sm:$0xff] %v11480_v11 }
 0x98f   : > { %v11462_v33 = vpop.permute.xlu1 %4915  ;;  %v11464_v57 = vpop.permute.xlu0 %5145 }
 0x990   : > { %12842 = vst [vmem:[#allocation42_spill] sm:$0xff] %v11462_v33  ;;  %v11490_v33 = vpop.f32.mrf.mxu0  ;;  %v11492_v41 = vpop.f32.mrf.mxu1 }
 0x991   : > { %5195 = vrot.lane.b32.xlu1 %v11410_v4, %s7618_s16  ;;  %4973 = vrot.lane.b32.xlu0 %v11430_v61, %s7616_s27  ;;  %12850 = vst [vmem:[#allocation30_spill] sm:$0xff] %v11490_v33  ;;  %12851 = vst [vmem:[#allocation56_spill] sm:$0xff] %v11492_v41 }
 0x993   : > { %v11474_v12 = vpop.permute.xlu1 %5139  ;;  %v11476_v43 = vpop.permute.xlu0 %4917 }
 0x994   : > { %12845 = vst [vmem:[#allocation23_spill] sm:$0xff] %v11474_v12  ;;  %12846 = vst [vmem:[#allocation34_spill] sm:$0xff] %v11476_v43  ;;  %v11502_v43 = vpop.f32.mrf.mxu0  ;;  %v12855_v12 = vld [vmem:[#allocation20_spill] sm:$0xff] }
 0x995   : > { %5197 = vrot.lane.b32.xlu0 %v11430_v61, %s7618_s16  ;;  %5207 = vrot.lane.b32.xlu1 %v11442_v23, %s7618_s16  ;;  %v11504_v23 = vpop.f32.mrf.mxu1 }
 0x996   : > { %12854 = vst [vmem:[#allocation44_spill] sm:$0xff] %v11504_v23  ;;  %v5037_v23 = vadd.f32 %v10993_v63, %v12855_v12 }
 0x997   : > { %v11486_v29 = vpop.permute.xlu0 %5141  ;;  %v11488_v4 = vpop.permute.xlu1 %4927 }
 0x998   : > { %12849 = vst [vmem:[#allocation69_spill] sm:$0xff] %v11488_v4  ;;  %v5038_v4 = vadd.f32 %v11002_v37, %v12855_v12  ;;  %v5036_v37 = vadd.f32 %v11009_v9, %v12855_v12  ;;  %v5035_v9 = vadd.f32 %v10999_v55, %v12855_v12 }
 0x999   : > { %5203 = vrot.lane.b32.xlu1 %v11454_v2, %s7618_s16  ;;  %5209 = vrot.lane.b32.xlu0 %v11466_v38, %s7618_s16 }
 0x99a   : > { %v5278_v41 = vadd.f32 %v11298_v50, %v5038_v4  ;;  %v5277_v4 = vadd.f32 %v11286_v46, %v5037_v23  ;;  %v5275_v23 = vadd.f32 %v11306_v44, %v5035_v9 }
 0x99b   : > { %v11498_v11 = vpop.permute.xlu1 %5151  ;;  %v11500_v61 = vpop.permute.xlu0 %4929 }
 0x99c   : > { %12852 = vst [vmem:[#allocation9_spill] sm:$0xff] %v11498_v11  ;;  %12853 = vst [vmem:[#allocation45_spill] sm:$0xff] %v11500_v61  ;;  %v11517_v61 = vpop.f32.mrf.mxu0  ;;  %v11519_v11 = vpop.f32.mrf.mxu1  ;;  %v5351_v50 = vadd.f32 %v10955_v59, %v5278_v41  ;;  %v5350_v41 = vadd.f32 %v10955_v59, %v5277_v4 }
 0x99d   : > { %5205 = vrot.lane.b32.xlu0 %v11478_v49, %s7618_s16  ;;  %5215 = vrot.lane.b32.xlu1 %v11490_v33, %s7618_s16  ;;  %12857 = vst [vmem:[#allocation31_spill] sm:$0xff] %v11517_v61  ;;  %12858 = vst [vmem:[#allocation27_spill] sm:$0xff] %v11519_v11  ;;  %v5276_v33 = vadd.f32 %v11316_v48, %v5036_v37 }
 0x99e   : > { %v11536_v63 = vpop.f32.mrf.mxu0 }
 0x99f   : > { %v11513_v2 = vpop.permute.xlu1 %4923  ;;  %v11515_v38 = vpop.permute.xlu0 %5153  ;;  %v5349_v46 = vadd.f32 %v10955_v59, %v5276_v33  ;;  %v5348_v33 = vadd.f32 %v10955_v59, %v5275_v23 }
 0x9a0   : > { %12856 = vst [vmem:[#allocation17_spill] sm:$0xff] %v11513_v2  ;;  %v11538_v2 = vpop.f32.mrf.mxu1 }
 0x9a1   : > { %5211 = vrot.lane.b32.xlu1 %v11502_v43, %s7618_s16  ;;  %5217 = vrot.lane.b32.xlu0 %v11517_v61, %s7618_s16  ;;  %12859 = vst [vmem:[#allocation62_spill] sm:$0xff] %v11538_v2  ;;  %v5042_v61 = vadd.f32 %v11021_v53, %v12855_v12  ;;  %v5041_v53 = vadd.f32 %v11012_v45, %v12855_v12 }
 0x9a2   : > { %v11555_v55 = vpop.f32.mrf.mxu1 }
 0x9a3   : > { %v11532_v49 = vpop.permute.xlu1 %5147  ;;  %v11534_v11 = vpop.permute.xlu0 %4925  ;;  %v5282_v48 = vadd.f32 %v11338_v27, %v5042_v61  ;;  %v5281_v61 = vadd.f32 %v11326_v51, %v5041_v53 }
 0x9a4   : > { %v11571_v45 = vpop.f32.mrf.mxu1 }
 0x9a5   : > { %6066 = vrot.lane.b32.xlu1 %v5351_v50, %s7618_s16  ;;  %5213 = vrot.lane.b32.xlu0 %v11536_v63, %s7618_s16  ;;  %v5040_v50 = vadd.f32 %v11028_v19, %v12855_v12  ;;  %v5355_v27 = vadd.f32 %v10955_v59, %v5282_v48  ;;  %v5039_v19 = vadd.f32 %v11018_v36, %v12855_v12 }
 0x9a6   : > { %v5354_v51 = vadd.f32 %v10955_v59, %v5281_v61  ;;  %v11587_v36 = vpop.f32.mrf.mxu1  ;;  %v5044_v12 = vadd.f32 %v11256_v60, %v11048_v17  ;;  %v5043_v17 = vadd.f32 %v11244_v8, %v11038_v25  ;;  %v5048_v8 = vadd.f32 %v11276_v20, %v11069_v22 }
 0x9a7   : > { %v11551_v37 = vpop.permute.xlu0 %5149  ;;  %v11553_v2 = vpop.permute.xlu1 %4935  ;;  %v5280_v44 = vadd.f32 %v11356_v14, %v5040_v50  ;;  %v5279_v14 = vadd.f32 %v11346_v10, %v5039_v19  ;;  %v5047_v22 = vadd.f32 %v11266_v1, %v11058_v18  ;;  %v5052_v1 = vadd.f32 %v11308_v62, %v11101_v31 }
 0x9a8   : > { %v5284_v50 = vadd.f32 %v11396_v42, %v5044_v12  ;;  %v5283_v60 = vadd.f32 %v11386_v52, %v5043_v17  ;;  %v5051_v31 = vadd.f32 %v11296_v35, %v11085_v7  ;;  %v12862_v7 = vld [vmem:[#allocation74_spill] sm:$0xff]  ;;  %v12863_v35 = vld [vmem:[#allocation73_spill] sm:$0xff] }
 0x9a9   : > { %6062 = vrot.lane.b32.xlu1 %v5349_v46, %s7618_s16  ;;  %6064 = vrot.lane.b32.xlu0 %v5350_v41, %s7618_s16  ;;  %v5046_v41 = vadd.f32 %v11041_v13, %v11246_v16  ;;  %v5353_v23 = vadd.f32 %v10955_v59, %v5280_v44  ;;  %v5045_v13 = vadd.f32 %v11031_v47, %v11234_v3  ;;  %v11603_v47 = vpop.f32.mrf.mxu1 }
 0x9aa   : > { %v5352_v10 = vadd.f32 %v10955_v59, %v5279_v14  ;;  %v5050_v3 = vadd.f32 %v11061_v15, %v11268_v58  ;;  %v5357_v42 = vadd.f32 %v10955_v59, %v5284_v50  ;;  %v5049_v15 = vadd.f32 %v11051_v56, %v11258_v26 }
 0x9ab   : > { %v11567_v4 = vpop.permute.xlu1 %5159  ;;  %v11569_v9 = vpop.permute.xlu0 %4937  ;;  %v5286_v46 = vadd.f32 %v11378_v32, %v5046_v41  ;;  %v5285_v32 = vadd.f32 %v11366_v5, %v5045_v13  ;;  %v5356_v52 = vadd.f32 %v10955_v59, %v5283_v60  ;;  %v5288_v41 = vadd.f32 %v11438_v24, %v5048_v8 }
 0x9ac   : > { %v11619_v25 = vpop.f32.mrf.mxu1  ;;  %v5054_v26 = vadd.f32 %v11093_v21, %v11288_v40  ;;  %v5287_v20 = vadd.f32 %v11426_v34, %v5047_v22  ;;  %v5053_v21 = vadd.f32 %v11077_v28, %v11278_v39  ;;  %v5292_v12 = vadd.f32 %v11486_v29, %v5052_v1  ;;  %v12860_v39 = vld [vmem:[#allocation33_spill] sm:$0xff] }
 0x9ad   : > { %6074 = vrot.lane.b32.xlu1 %v5355_v27, %s7618_s16  ;;  %6060 = vrot.lane.b32.xlu0 %v5348_v33, %s7618_s16  ;;  %v5359_v16 = vadd.f32 %v10955_v59, %v5286_v46  ;;  %v5358_v5 = vadd.f32 %v10955_v59, %v5285_v32  ;;  %v5290_v27 = vadd.f32 %v11418_v6, %v5050_v3 }
 0x9ae   : > { %v5289_v6 = vadd.f32 %v11406_v54, %v5049_v15  ;;  %v11635_v56 = vpop.f32.mrf.mxu1  ;;  %v5361_v24 = vadd.f32 %v10955_v59, %v5288_v41  ;;  %v5360_v34 = vadd.f32 %v10955_v59, %v5287_v20  ;;  %v5058_v62 = vadd.f32 %v12860_v39, %v11328_v30  ;;  %v12868_v20 = vld [vmem:[#allocation82_spill] sm:$0xff] }
 0x9af   : > { %v11583_v48 = vpop.permute.xlu1 %4931  ;;  %v11585_v53 = vpop.permute.xlu0 %5161  ;;  %v5363_v58 = vadd.f32 %v10955_v59, %v5290_v27  ;;  %v5365_v50 = vadd.f32 %v10955_v59, %v5292_v12  ;;  %v5057_v30 = vadd.f32 %v12863_v35, %v12862_v7  ;;  %v12865_v27 = vld [vmem:[#allocation80_spill] sm:$0xff] }
 0x9b0   : > { %v5362_v54 = vadd.f32 %v10955_v59, %v5289_v6  ;;  %v11651_v18 = vpop.f32.mrf.mxu1  ;;  %v5298_v17 = vadd.f32 %v11515_v38, %v5058_v62  ;;  %v12871_v62 = vld [vmem:[#allocation47_spill] sm:$0xff] }
 0x9b1   : > { %6070 = vrot.lane.b32.xlu1 %v5353_v23, %s7618_s16  ;;  %6072 = vrot.lane.b32.xlu0 %v5354_v51, %s7618_s16  ;;  %v5294_v23 = vadd.f32 %v11464_v57, %v5054_v26  ;;  %v5293_v57 = vadd.f32 %v11450_v0, %v5053_v21  ;;  %v12870_v21 = vld [vmem:[#allocation37_spill] sm:$0xff] }
 0x9b2   : > { %v11667_v28 = vpop.f32.mrf.mxu1  ;;  %v5371_v38 = vadd.f32 %v10955_v59, %v5298_v17 }
 0x9b3   : > { %v11599_v33 = vpop.permute.xlu1 %5155  ;;  %v11601_v61 = vpop.permute.xlu0 %4933  ;;  %v5367_v40 = vadd.f32 %v10955_v59, %v5294_v23  ;;  %v5366_v0 = vadd.f32 %v10955_v59, %v5293_v57  ;;  %v12869_v23 = vld [vmem:[#allocation86_spill] sm:$0xff] }
 0x9b4   : > { %v11681_v60 = vpop.f32.mrf.mxu1  ;;  %v5062_v1 = vadd.f32 %v12870_v21, %v12869_v23 }
 0x9b5   : > { %6082 = vrot.lane.b32.xlu1 %v5359_v16, %s7618_s16  ;;  %6068 = vrot.lane.b32.xlu0 %v5352_v10, %s7618_s16  ;;  %v12861_v16 = vld [vmem:[#allocation23_spill] sm:$0xff] }
 0x9b6   : > { %v5291_v29 = vadd.f32 %v12861_v16, %v5051_v31  ;;  %v11697_v26 = vpop.f32.mrf.mxu1 }
 0x9b7   : > { %v11615_v44 = vpop.permute.xlu0 %5157  ;;  %v11617_v19 = vpop.permute.xlu1 %4943 }
 0x9b8   : > { %v5364_v8 = vadd.f32 %v10955_v59, %v5291_v29  ;;  %v11711_v39 = vpop.f32.mrf.mxu1  ;;  %v12873_v29 = vld [vmem:[#allocation38_spill] sm:$0xff] }
 0x9b9   : > { %6078 = vrot.lane.b32.xlu1 %v5357_v42, %s7618_s16  ;;  %6080 = vrot.lane.b32.xlu0 %v5358_v5, %s7618_s16  ;;  %v12864_v42 = vld [vmem:[#allocation36_spill] sm:$0xff] }
 0x9ba   : > { %v5056_v15 = vadd.f32 %v12865_v27, %v12864_v42  ;;  %v11725_v27 = vpop.f32.mrf.mxu1 }
 0x9bb   : > { %v11631_v51 = vpop.permute.xlu1 %5167  ;;  %v11633_v14 = vpop.permute.xlu0 %4945 }
 0x9bc   : > { %v11739_v21 = vpop.f32.mrf.mxu1 }
 0x9bd   : > { %6090 = vrot.lane.b32.xlu1 %v5363_v58, %s7618_s16  ;;  %6076 = vrot.lane.b32.xlu0 %v5356_v52, %s7618_s16  ;;  %v12866_v52 = vld [vmem:[#allocation9_spill] sm:$0xff]  ;;  %v5296_v58 = vadd.f32 %v11551_v37, %v5056_v15  ;;  %v12875_v15 = vld [vmem:[#allocation35_spill] sm:$0xff] }
 0x9be   : > { %v5297_v6 = vadd.f32 %v12866_v52, %v5057_v30 }
 0x9bf   : > { %v11647_v46 = vpop.permute.xlu1 %4939  ;;  %v11649_v13 = vpop.permute.xlu0 %5169  ;;  %v5369_v57 = vadd.f32 %v10955_v59, %v5296_v58 }
 0x9c1   : > { %6086 = vrot.lane.b32.xlu1 %v5361_v24, %s7618_s16  ;;  %6088 = vrot.lane.b32.xlu0 %v5362_v54, %s7618_s16  ;;  %v12867_v54 = vld [vmem:[#allocation32_spill] sm:$0xff] }
 0x9c2   : > { %v5055_v24 = vadd.f32 %v12868_v20, %v12867_v54 }
 0x9c3   : > { %v11663_v10 = vpop.permute.xlu1 %5163  ;;  %v11665_v32 = vpop.permute.xlu0 %4941 }
 0x9c4   : > { %v5295_v37 = vadd.f32 %v11532_v49, %v5055_v24 }
 0x9c5   : > { %6098 = vrot.lane.b32.xlu1 %v5367_v40, %s7618_s16  ;;  %6084 = vrot.lane.b32.xlu0 %v5360_v34, %s7618_s16  ;;  %v5370_v34 = vadd.f32 %v10955_v59, %v5297_v6  ;;  %v5302_v40 = vadd.f32 %v11585_v53, %v5062_v1  ;;  %v12877_v6 = vld [vmem:[#allocation83_spill] sm:$0xff]  ;;  %v12879_v1 = vld [vmem:[#allocation81_spill] sm:$0xff] }
 0x9c6   : > { %v5368_v49 = vadd.f32 %v10955_v59, %v5295_v37 }
 0x9c7   : > { %v5166_v3 = vpop.permute.xlu0 %5165  ;;  %v11679_v5 = vpop.permute.xlu1 %4951  ;;  %v5375_v53 = vadd.f32 %v10955_v59, %v5302_v40  ;;  %v12882_v40 = vld [vmem:[#allocation41_spill] sm:$0xff] }
 0x9c9   : > { %6094 = vrot.lane.b32.xlu1 %v5365_v50, %s7618_s16  ;;  %6096 = vrot.lane.b32.xlu0 %v5366_v0, %s7618_s16  ;;  %v12872_v0 = vld [vmem:[#allocation28_spill] sm:$0xff] }
 0x9ca   : > { %v5061_v16 = vadd.f32 %v12872_v0, %v12871_v62  ;;  %v12874_v50 = vld [vmem:[#allocation48_spill] sm:$0xff] }
 0x9cb   : > { %v11693_v41 = vpop.permute.xlu1 %5175  ;;  %v11695_v22 = vpop.permute.xlu0 %4953  ;;  %v5060_v17 = vadd.f32 %v12874_v50, %v12873_v29 }
 0x9cc   : > { %v5301_v7 = vadd.f32 %v11567_v4, %v5061_v16 }
 0x9cd   : > { %6106 = vrot.lane.b32.xlu1 %v5371_v38, %s7618_s16  ;;  %6092 = vrot.lane.b32.xlu0 %v5364_v8, %s7618_s16  ;;  %v5300_v35 = vadd.f32 %v11615_v44, %v5060_v17  ;;  %v12876_v8 = vld [vmem:[#allocation14_spill] sm:$0xff]  ;;  %v12878_v38 = vld [vmem:[#allocation43_spill] sm:$0xff]  ;;  %v11752_v17 = vpop.f32.mrf.mxu1 }
 0x9ce   : > { %v5059_v52 = vadd.f32 %v12876_v8, %v12875_v15  ;;  %v5066_v58 = vadd.f32 %v12878_v38, %v12877_v6  ;;  %v5374_v4 = vadd.f32 %v10955_v59, %v5301_v7  ;;  %v12884_v7 = vld [vmem:[#allocation13_spill] sm:$0xff]  ;;  %v12886_v15 = vld [vmem:[#allocation60_spill] sm:$0xff] }
 0x9cf   : > { %v11709_v12 = vpop.permute.xlu1 %4947  ;;  %v5178_v31 = vpop.permute.xlu0 %5177  ;;  %v5373_v44 = vadd.f32 %v10955_v59, %v5300_v35  ;;  %v12885_v35 = vld [vmem:[#allocation15_spill] sm:$0xff] }
 0x9d0   : > { %v5299_v54 = vadd.f32 %v11599_v33, %v5059_v52  ;;  %v5306_v20 = vadd.f32 %v11649_v13, %v5066_v58  ;;  %v5070_v8 = vadd.f32 %v12886_v15, %v12885_v35 }
 0x9d1   : > { %6102 = vrot.lane.b32.xlu1 %v5369_v57, %s7618_s16  ;;  %6104 = vrot.lane.b32.xlu0 %v5370_v34, %s7618_s16  ;;  %v12880_v34 = vld [vmem:[#allocation55_spill] sm:$0xff]  ;;  %v12881_v57 = vld [vmem:[#allocation54_spill] sm:$0xff] }
 0x9d2   : > { %v5065_v37 = vadd.f32 %v12880_v34, %v12879_v1  ;;  %v5064_v62 = vadd.f32 %v12882_v40, %v12881_v57  ;;  %v5372_v33 = vadd.f32 %v10955_v59, %v5299_v54  ;;  %v5379_v13 = vadd.f32 %v10955_v59, %v5306_v20  ;;  %v12887_v54 = vld [vmem:[#allocation72_spill] sm:$0xff]  ;;  %v12890_v34 = vld [vmem:[#allocation34_spill] sm:$0xff] }
 0x9d3   : > { %v5172_v30 = vpop.permute.xlu1 %5171  ;;  %v11723_v42 = vpop.permute.xlu0 %4949  ;;  %v5310_v6 = vadd.f32 %v5178_v31, %v5070_v8  ;;  %v12889_v1 = vld [vmem:[#allocation52_spill] sm:$0xff] }
 0x9d4   : > { %v5305_v0 = vadd.f32 %v11631_v51, %v5065_v37  ;;  %v5304_v16 = vadd.f32 %v5166_v3, %v5064_v62  ;;  %v5068_v37 = vadd.f32 %v12890_v34, %v12889_v1 }
 0x9d5   : > { %6114 = vrot.lane.b32.xlu1 %v5375_v53, %s7618_s16  ;;  %6100 = vrot.lane.b32.xlu0 %v5368_v49, %s7618_s16  ;;  %v12883_v49 = vld [vmem:[#allocation21_spill] sm:$0xff]  ;;  %v5383_v31 = vadd.f32 %v10955_v59, %v5310_v6 }
 0x9d6   : > { %v5063_v53 = vadd.f32 %v12884_v7, %v12883_v49  ;;  %v5378_v51 = vadd.f32 %v10955_v59, %v5305_v0  ;;  %v5377_v3 = vadd.f32 %v10955_v59, %v5304_v16  ;;  %v12892_v16 = vld [vmem:[#allocation42_spill] sm:$0xff]  ;;  %v12893_v7 = vld [vmem:[#allocation45_spill] sm:$0xff] }
 0x9d7   : > { %v5174_v24 = vpop.permute.xlu0 %5173  ;;  %v11737_v23 = vpop.permute.xlu1 %4959  ;;  %v12895_v6 = vld [vmem:[#allocation69_spill] sm:$0xff] }
 0x9d8   : > { %v5303_v52 = vadd.f32 %v11663_v10, %v5063_v53  ;;  %v5308_v40 = vadd.f32 %v5174_v24, %v5068_v37  ;;  %v12894_v53 = vld [vmem:[#allocation71_spill] sm:$0xff] }
 0x9d9   : > { %6110 = vrot.lane.b32.xlu1 %v5373_v44, %s7618_s16  ;;  %6112 = vrot.lane.b32.xlu0 %v5374_v4, %s7618_s16  ;;  %v11765_v4 = vpop.f32.mrf.mxu1  ;;  %v12888_v44 = vld [vmem:[#allocation46_spill] sm:$0xff]  ;;  %v5074_v35 = vadd.f32 %v12894_v53, %v12893_v7 }
 0x9da   : > { %v5069_v20 = vadd.f32 %v12888_v44, %v12887_v54  ;;  %v5376_v10 = vadd.f32 %v10955_v59, %v5303_v52  ;;  %v5381_v24 = vadd.f32 %v10955_v59, %v5308_v40  ;;  %v12896_v54 = vld [vmem:[#allocation57_spill] sm:$0xff]  ;;  %v12898_v40 = vld [vmem:[#allocation66_spill] sm:$0xff] }
 0x9db   : > { %v5184_v29 = vpop.permute.xlu1 %5183  ;;  %v11750_v50 = vpop.permute.xlu0 %4961  ;;  %v5073_v44 = vadd.f32 %v12896_v54, %v12895_v6 }
 0x9dc   : > { %v5309_v57 = vadd.f32 %v11693_v41, %v5069_v20  ;;  %v11778_v0 = vpop.f32.mrf.mxu1  ;;  %v12897_v20 = vld [vmem:[#allocation63_spill] sm:$0xff] }
 0x9dd   : > { %6122 = vrot.lane.b32.xlu1 %v5379_v13, %s7618_s16  ;;  %6108 = vrot.lane.b32.xlu0 %v5372_v33, %s7618_s16  ;;  %v12891_v13 = vld [vmem:[#allocation49_spill] sm:$0xff]  ;;  %v5072_v1 = vadd.f32 %v11534_v11, %v12897_v20  ;;  %v12900_v11 = vld [vmem:[#allocation68_spill] sm:$0xff] }
 0x9de   : > { %v5067_v49 = vadd.f32 %v12892_v16, %v12891_v13  ;;  %v5382_v41 = vadd.f32 %v10955_v59, %v5309_v57  ;;  %v12899_v13 = vld [vmem:[#allocation17_spill] sm:$0xff] }
 0x9df   : > { %v11763_v38 = vpop.permute.xlu1 %4955  ;;  %v5186_v58 = vpop.permute.xlu0 %5185  ;;  %v5071_v16 = vadd.f32 %v12899_v13, %v12898_v40  ;;  %v12905_v40 = vld [vmem:[#allocation61_spill] sm:$0xff] }
 0x9e0   : > { %v5307_v15 = vadd.f32 %v5172_v30, %v5067_v49  ;;  %v5314_v8 = vadd.f32 %v5186_v58, %v5074_v35  ;;  %v5313_v30 = vadd.f32 %v5184_v29, %v5073_v44  ;;  %v5078_v49 = vadd.f32 %v12900_v11, %v11569_v9 }
 0x9e1   : > { %6118 = vrot.lane.b32.xlu1 %v5377_v3, %s7618_s16  ;;  %6120 = vrot.lane.b32.xlu0 %v5378_v51, %s7618_s16  ;;  %v11788_v3 = vpop.f32.mrf.mxu1 }
 0x9e2   : > { %v5380_v34 = vadd.f32 %v10955_v59, %v5307_v15  ;;  %v5387_v37 = vadd.f32 %v10955_v59, %v5314_v8  ;;  %v5386_v7 = vadd.f32 %v10955_v59, %v5313_v30  ;;  %v12901_v8 = vld [vmem:[#allocation78_spill] sm:$0xff] }
 0x9e3   : > { %v5180_v62 = vpop.permute.xlu1 %5179  ;;  %v11776_v33 = vpop.permute.xlu0 %4957 }
 0x9e4   : > { %v5311_v29 = vadd.f32 %v5180_v62, %v5071_v16 }
 0x9e5   : > { %6130 = vrot.lane.b32.xlu1 %v5383_v31, %s7618_s16  ;;  %6116 = vrot.lane.b32.xlu0 %v5376_v10, %s7618_s16  ;;  %v11798_v31 = vpop.f32.mrf.mxu1 }
 0x9e6   : > { %v5384_v9 = vadd.f32 %v10955_v59, %v5311_v29 }
 0x9e7   : > { %v5182_v51 = vpop.permute.xlu0 %5181  ;;  %v4968_v52 = vpop.permute.xlu1 %4967 }
 0x9e8   : > { %v5312_v58 = vadd.f32 %v5182_v51, %v5072_v1  ;;  %v5077_v51 = vadd.f32 %v12901_v8, %v11553_v2  ;;  %v12902_v1 = vld [vmem:[#allocation77_spill] sm:$0xff]  ;;  %v12903_v2 = vld [vmem:[#allocation76_spill] sm:$0xff]  ;;  %v5093_v13 = vadd.f32 %v12905_v40, %v4968_v52  ;;  %v12910_v40 = vld [vmem:[#allocation51_spill] sm:$0xff] }
 0x9e9   : > { %6126 = vrot.lane.b32.xlu1 %v5381_v24, %s7618_s16  ;;  %6128 = vrot.lane.b32.xlu0 %v5382_v41, %s7618_s16  ;;  %v11808_v24 = vpop.f32.mrf.mxu1  ;;  %v5076_v30 = vadd.f32 %v11601_v61, %v12903_v2  ;;  %v12908_v52 = vld [vmem:[#allocation24_spill] sm:$0xff] }
 0x9ea   : > { %v5385_v53 = vadd.f32 %v10955_v59, %v5312_v58 }
 0x9eb   : > { %v5192_v10 = vpop.permute.xlu1 %5191  ;;  %v4970_v57 = vpop.permute.xlu0 %4969 }
 0x9ec   : > { %v5317_v54 = vadd.f32 %v5192_v10, %v5077_v51  ;;  %v11816_v20 = vpop.f32.mrf.mxu1 }
 0x9ed   : > { %6138 = vrot.lane.b32.xlu1 %v5387_v37, %s7618_s16  ;;  %6124 = vrot.lane.b32.xlu0 %v5380_v34, %s7618_s16  ;;  %v5075_v34 = vadd.f32 %v11583_v48, %v12902_v1  ;;  %v12904_v37 = vld [vmem:[#allocation65_spill] sm:$0xff]  ;;  %v12906_v48 = vld [vmem:[#allocation10_spill] sm:$0xff] }
 0x9ee   : > { %v5094_v58 = vadd.f32 %v12904_v37, %v4970_v57  ;;  %v5390_v10 = vadd.f32 %v10955_v59, %v5317_v54  ;;  %v11829_v29 = vpop.f32.mrf.mxu1  ;;  %v5333_v57 = vadd.f32 %v5093_v13, %v12906_v48  ;;  %v5081_v13 = vadd.f32 %v12910_v40, %v11617_v19  ;;  %v12912_v19 = vld [vmem:[#allocation79_spill] sm:$0xff] }
 0x9ef   : > { %v4964_v35 = vpop.permute.xlu1 %4963  ;;  %v5194_v41 = vpop.permute.xlu0 %5193 }
 0x9f0   : > { %v5318_v15 = vadd.f32 %v5194_v41, %v5078_v49  ;;  %v12907_v41 = vld [vmem:[#allocation70_spill] sm:$0xff]  ;;  %v5091_v8 = vadd.f32 %v4964_v35, %v12908_v52  ;;  %v11841_v54 = vpop.f32.mrf.mxu1  ;;  %v5406_v1 = vadd.f32 %v10955_v59, %v5333_v57  ;;  %v5080_v57 = vadd.f32 %v11665_v32, %v12912_v19 }
 0x9f1   : > { %6134 = vrot.lane.b32.xlu1 %v5385_v53, %s7618_s16  ;;  %6136 = vrot.lane.b32.xlu0 %v5386_v7, %s7618_s16  ;;  %v5334_v53 = vadd.f32 %v5094_v58, %v12906_v48  ;;  %v12915_v19 = vld [vmem:[#allocation22_spill] sm:$0xff] }
 0x9f2   : > { %v5391_v6 = vadd.f32 %v10955_v59, %v5318_v15  ;;  %v11851_v58 = vpop.f32.mrf.mxu1 }
 0x9f3   : > { %v5188_v62 = vpop.permute.xlu1 %5187  ;;  %v4966_v44 = vpop.permute.xlu0 %4965 }
 0x9f4   : > { %v5315_v16 = vadd.f32 %v5188_v62, %v5075_v34  ;;  %v5092_v15 = vadd.f32 %v4966_v44, %v12907_v41  ;;  %v5407_v62 = vadd.f32 %v10955_v59, %v5334_v53  ;;  %v5331_v34 = vadd.f32 %v5091_v8, %v12906_v48 }
 0x9f5   : > { %6146 = vrot.lane.b32.xlu1 %v5391_v6, %s7618_s16  ;;  %6132 = vrot.lane.b32.xlu0 %v5384_v9, %s7618_s16 }
 0x9f6   : > { %v5388_v51 = vadd.f32 %v10955_v59, %v5315_v16  ;;  %v5332_v44 = vadd.f32 %v5092_v15, %v12906_v48  ;;  %v12911_v15 = vld [vmem:[#allocation40_spill] sm:$0xff] }
 0x9f7   : > { %v5190_v11 = vpop.permute.xlu0 %5189  ;;  %v11827_v49 = vpop.permute.xlu1 %4975 }
 0x9f8   : > { %v5316_v7 = vadd.f32 %v5190_v11, %v5076_v30  ;;  %v12909_v30 = vld [vmem:[#allocation85_spill] sm:$0xff]  ;;  %v5404_v11 = vadd.f32 %v10955_v59, %v5331_v34 }
 0x9f9   : > { %6144 = vrot.lane.b32.xlu0 %v5390_v10, %s7618_s16  ;;  %v5082_v37 = vadd.f32 %v12909_v30, %v11633_v14  ;;  %v5405_v10 = vadd.f32 %v10955_v59, %v5332_v44  ;;  %v11859_v14 = vpop.f32.mrf.mxu1 }
 0x9fa   : > { %v5389_v61 = vadd.f32 %v10955_v59, %v5316_v7 }
 0x9fb   : > { %v5200_v6 = vpop.permute.xlu1 %5199  ;;  %v11838_v9 = vpop.permute.xlu0 %4977 }
 0x9fc   : > { %6142 = vrot.lane.b32.xlu1 %v5389_v61, %s7618_s16  ;;  %v5321_v7 = vadd.f32 %v5200_v6, %v5081_v13  ;;  %v5079_v61 = vadd.f32 %v11647_v46, %v12911_v15  ;;  %v11871_v46 = vpop.f32.mrf.mxu1 }
 0x9fd   : > { %6140 = vrot.lane.b32.xlu0 %v5388_v51, %s7618_s16 }
 0x9fe   : > { %v5394_v51 = vadd.f32 %v10955_v59, %v5321_v7  ;;  %v11881_v13 = vpop.f32.mrf.mxu1 }
 0x9ff   : > { %v4972_v35 = vpop.permute.xlu1 %4971  ;;  %v5202_v2 = vpop.permute.xlu0 %5201 }
 0xa00   : > { %6178 = vrot.lane.b32.xlu1 %v5407_v62, %s7618_s16  ;;  %v5322_v16 = vadd.f32 %v5202_v2, %v5082_v37  ;;  %v5095_v6 = vadd.f32 %v4972_v35, %v11502_v43  ;;  %v12913_v35 = vld [vmem:[#allocation50_spill] sm:$0xff] }
 0xa01   : > { %6176 = vrot.lane.b32.xlu0 %v5406_v1, %s7618_s16  ;;  %v5086_v40 = vadd.f32 %v12913_v35, %v11695_v22  ;;  %v5084_v22 = vadd.f32 %v11723_v42, %v12915_v19  ;;  %v12924_v19 = vld [vmem:[#allocation26_spill] sm:$0xff] }
 0xa02   : > { %v5395_v52 = vadd.f32 %v10955_v59, %v5322_v16 }
 0xa03   : > { %v5196_v53 = vpop.permute.xlu1 %5195  ;;  %v4974_v41 = vpop.permute.xlu0 %4973 }
 0xa04   : > { %6174 = vrot.lane.b32.xlu1 %v5405_v10, %s7618_s16  ;;  %v5096_v8 = vadd.f32 %v4974_v41, %v11536_v63  ;;  %v5319_v62 = vadd.f32 %v5196_v53, %v5079_v61  ;;  %v5335_v63 = vadd.f32 %v5095_v6, %v12906_v48  ;;  %v12914_v10 = vld [vmem:[#allocation19_spill] sm:$0xff] }
 0xa05   : > { %6172 = vrot.lane.b32.xlu0 %v5404_v11, %s7618_s16  ;;  %v5085_v16 = vadd.f32 %v12914_v10, %v11679_v5 }
 0xa06   : > { %v5336_v32 = vadd.f32 %v5096_v8, %v12906_v48  ;;  %v5392_v30 = vadd.f32 %v10955_v59, %v5319_v62  ;;  %v5408_v53 = vadd.f32 %v10955_v59, %v5335_v63  ;;  %v11898_v8 = vld [vmem:[%s12917_s22] ss:$0 sm:$0xff] }
 0xa07   : > { %v5198_v44 = vpop.permute.xlu0 %5197  ;;  %v5208_v1 = vpop.permute.xlu1 %5207 }
 0xa08   : > { %v5320_v34 = vadd.f32 %v5198_v44, %v5080_v57  ;;  %6154 = vrot.lane.b32.xlu1 %v5395_v52, %s7618_s16  ;;  %v5409_v11 = vadd.f32 %v10955_v59, %v5336_v32  ;;  %v5325_v41 = vadd.f32 %v5208_v1, %v5085_v16  ;;  %v11891_v57 = vpop.f32.mrf.mxu1  ;;  %v12916_v52 = vld [vmem:[#allocation39_spill] sm:$0xff] }
 0xa09   : > { %6152 = vrot.lane.b32.xlu0 %v5394_v51, %s7618_s16  ;;  %v5083_v5 = vadd.f32 %v11709_v12, %v12916_v52  ;;  %v12919_v12 = vld [vmem:[#allocation58_spill] sm:$0xff] }
 0xa0a   : > { %v5393_v2 = vadd.f32 %v10955_v59, %v5320_v34  ;;  %v5398_v62 = vadd.f32 %v10955_v59, %v5325_v41  ;;  %v12918_v34 = vld [vmem:[#allocation8_spill] sm:$0xff]  ;;  %v11909_v63 = vpop.f32.mrf.mxu1 }
 0xa0b   : > { %v5204_v37 = vpop.permute.xlu1 %5203  ;;  %v5210_v43 = vpop.permute.xlu0 %5209  ;;  %v5090_v32 = vadd.f32 %v12918_v34, %v11750_v50  ;;  %v12923_v41 = vld [vmem:[#allocation12_spill] sm:$0xff] }
 0xa0c   : > { %6150 = vrot.lane.b32.xlu1 %v5393_v2, %s7618_s16  ;;  %v5326_v7 = vadd.f32 %v5210_v43, %v5086_v40  ;;  %v5323_v42 = vadd.f32 %v5204_v37, %v5083_v5  ;;  %v5753_v2 = vadd.f32 %v12919_v12, %v11898_v8  ;;  %v12926_v5 = vld [vmem:[#allocation64_spill] sm:$0xff] }
 0xa0d   : > { %6148 = vrot.lane.b32.xlu0 %v5392_v30, %s7618_s16  ;;  %v12920_v30 = vld [vmem:[#allocation84_spill] sm:$0xff] }
 0xa0e   : > { %v5399_v51 = vadd.f32 %v10955_v59, %v5326_v7  ;;  %v5089_v43 = vadd.f32 %v12920_v30, %v11737_v23  ;;  %v5396_v50 = vadd.f32 %v10955_v59, %v5323_v42 }
 0xa0f   : > { %v5206_v15 = vpop.permute.xlu0 %5205  ;;  %v5216_v61 = vpop.permute.xlu1 %5215 }
 0xa10   : > { %6182 = vrot.lane.b32.xlu1 %v5409_v11, %s7618_s16  ;;  %v5324_v6 = vadd.f32 %v5206_v15, %v5084_v22  ;;  %v5329_v40 = vadd.f32 %v5216_v61, %v5089_v43  ;;  %v12922_v11 = vld [vmem:[#allocation59_spill] sm:$0xff]  ;;  %v5087_v15 = vadd.f32 %v11763_v38, %v12923_v41  ;;  %v5750_v22 = vadd.f32 %v12924_v19, %v11898_v8 }
 0xa11   : > { %6180 = vrot.lane.b32.xlu0 %v5408_v53, %s7618_s16  ;;  %v5088_v7 = vadd.f32 %v11776_v33, %v12922_v11  ;;  %v11924_v53 = vpop.f32.mrf.mxu1  ;;  %v12925_v61 = vld [vmem:[#allocation31_spill] sm:$0xff] }
 0xa12   : > { %v5397_v37 = vadd.f32 %v10955_v59, %v5324_v6  ;;  %v5098_v52 = vadd.f32 %v12925_v61, %v11838_v9  ;;  %v5402_v42 = vadd.f32 %v10955_v59, %v5329_v40  ;;  %v12928_v9 = vld [vmem:[#allocation44_spill] sm:$0xff] }
 0xa13   : > { %v5212_v44 = vpop.permute.xlu1 %5211  ;;  %v5218_v1 = vpop.permute.xlu0 %5217  ;;  %v5769_v12 = vadd.f32 %v12928_v9, %v11898_v8  ;;  %v12933_v9 = vld [vmem:[#allocation62_spill] sm:$0xff] }
 0xa14   : > { %6162 = vrot.lane.b32.xlu1 %v5399_v51, %s7618_s16  ;;  %v5330_v35 = vadd.f32 %v5218_v1, %v5090_v32  ;;  %v5745_v51 = vadd.f32 %v11898_v8, %v12926_v5  ;;  %v5327_v1 = vadd.f32 %v5212_v44, %v5087_v15  ;;  %v11944_v43 = vpop.f32.mrf.mxu1  ;;  %v12930_v15 = vld [vmem:[#allocation16_spill] sm:$0xff] }
 0xa15   : > { %6160 = vrot.lane.b32.xlu0 %v5398_v62, %s7618_s16  ;;  %v12927_v62 = vld [vmem:[#allocation30_spill] sm:$0xff]  ;;  %v5766_v19 = vadd.f32 %v12930_v15, %v11898_v8 }
 0xa16   : > { %v5403_v33 = vadd.f32 %v10955_v59, %v5330_v35  ;;  %v5097_v38 = vadd.f32 %v12927_v62, %v11827_v49  ;;  %v12929_v35 = vld [vmem:[#allocation53_spill] sm:$0xff]  ;;  %v5400_v40 = vadd.f32 %v10955_v59, %v5327_v1 }
 0xa17   : > { %v6067_v10 = vpop.permute.xlu1 %6066  ;;  %v5214_v16 = vpop.permute.xlu0 %5213  ;;  %v5742_v49 = vadd.f32 %v11898_v8, %v12929_v35  ;;  %v5801_v35 = vadd.f32 %v11635_v56, %v11898_v8  ;;  %v5798_v56 = vadd.f32 %v11603_v47, %v11898_v8  ;;  %v5790_v47 = vadd.f32 %v11898_v8, %v11619_v25 }
 0xa18   : > { %v6255_v23 = vadd.f32 %v6067_v10, %v5753_v2  ;;  %6158 = vrot.lane.b32.xlu1 %v5397_v37, %s7618_s16  ;;  %v5328_v6 = vadd.f32 %v5214_v16, %v5088_v7  ;;  %v5338_v37 = vadd.f32 %v5098_v52, %v12906_v48 }
 0xa19   : > { %6156 = vrot.lane.b32.xlu0 %v5396_v50, %s7618_s16  ;;  %v5337_v50 = vadd.f32 %v5097_v38, %v12906_v48  ;;  %v12931_v48 = vld [vmem:[#allocation27_spill] sm:$0xff]  ;;  %v12932_v38 = vld [vmem:[#allocation56_spill] sm:$0xff] }
 0xa1a   : > { %6319 = vst.msk [vmem:[%s11918_s17 + $0x18] sm:$0xff] %vm1238_vm2, %v6255_v23  ;;  %v5401_v44 = vadd.f32 %v10955_v59, %v5328_v6  ;;  %v11958_v23 = vpop.f32.mrf.mxu1  ;;  %v5411_v41 = vadd.f32 %v10955_v59, %v5338_v37 }
 0xa1b   : > { %v6063_v34 = vpop.permute.xlu1 %6062  ;;  %v6065_v32 = vpop.permute.xlu0 %6064  ;;  %v5410_v61 = vadd.f32 %v10955_v59, %v5337_v50 }
 0xa1c   : > { %v6253_v2 = vadd.f32 %v6063_v34, %v5745_v51  ;;  %v6254_v30 = vadd.f32 %v6065_v32, %v5750_v22  ;;  %6170 = vrot.lane.b32.xlu1 %v5403_v33, %s7618_s16  ;;  %v5761_v22 = vadd.f32 %v11898_v8, %v12931_v48  ;;  %v5785_v51 = vadd.f32 %v11571_v45, %v11898_v8  ;;  %v11974_v62 = vpop.f32.mrf.mxu1 }
 0xa1d   : > { %6168 = vrot.lane.b32.xlu0 %v5402_v42, %s7618_s16  ;;  %v5758_v42 = vadd.f32 %v11898_v8, %v12932_v38 }
 0xa1e   : > { %6317 = vst.msk [vmem:[%s11918_s17 + $0x8] sm:$0xff] %vm1238_vm2, %v6253_v2  ;;  %6318 = vst.msk [vmem:[%s11918_s17 + $0x10] sm:$0xff] %vm1238_vm2, %v6254_v30  ;;  %v11983_v32 = vpop.f32.mrf.mxu1  ;;  %v5777_v2 = vadd.f32 %v11898_v8, %v11587_v36 }
 0xa1f   : > { %v6075_v10 = vpop.permute.xlu1 %6074  ;;  %v6061_v16 = vpop.permute.xlu0 %6060 }
 0xa20   : > { %v6259_v11 = vadd.f32 %v6075_v10, %v5769_v12  ;;  %v6252_v7 = vadd.f32 %v6061_v16, %v5742_v49  ;;  %6166 = vrot.lane.b32.xlu1 %v5401_v44, %s7618_s16  ;;  %v5782_v12 = vadd.f32 %v12933_v9, %v11898_v8  ;;  %v11995_v50 = vpop.f32.mrf.mxu1 }
 0xa21   : > { %6164 = vrot.lane.b32.xlu0 %v5400_v40, %s7618_s16  ;;  %v5774_v40 = vadd.f32 %v11898_v8, %v11555_v55 }
 0xa22   : > { %6323 = vst.msk [vmem:[%s11918_s17 + $0x38] sm:$0xff] %vm1238_vm2, %v6259_v11  ;;  %6316 = vst.msk [vmem:[%s11918_s17] sm:$0xff] %vm1238_vm2, %v6252_v7  ;;  %v12003_v7 = vpop.f32.mrf.mxu1 }
 0xa23   : > { %v6071_v52 = vpop.permute.xlu1 %6070  ;;  %v6073_v5 = vpop.permute.xlu0 %6072 }
 0xa24   : > { %v6257_v33 = vadd.f32 %v6071_v52, %v5761_v22  ;;  %v6258_v6 = vadd.f32 %v6073_v5, %v5766_v19  ;;  %6186 = vrot.lane.b32.xlu1 %v5411_v41, %s7618_s16  ;;  %v5793_v41 = vadd.f32 %v11898_v8, %v11651_v18  ;;  %v5817_v19 = vadd.f32 %v11697_v26, %v11898_v8 }
 0xa25   : > { %6184 = vrot.lane.b32.xlu0 %v5410_v61, %s7618_s16  ;;  %v12015_v61 = vpop.f32.mrf.mxu1  ;;  %v5814_v26 = vadd.f32 %v11667_v28, %v11898_v8  ;;  %v5806_v28 = vadd.f32 %v11898_v8, %v11681_v60 }
 0xa26   : > { %6321 = vst.msk [vmem:[%s11918_s17 + $0x28] sm:$0xff] %vm1238_vm2, %v6257_v33  ;;  %6322 = vst.msk [vmem:[%s11918_s17 + $0x30] sm:$0xff] %vm1238_vm2, %v6258_v6  ;;  %v5809_v6 = vadd.f32 %v11898_v8, %v11711_v39 }
 0xa27   : > { %v6083_v59 = vpop.permute.xlu1 %6082  ;;  %v6069_v45 = vpop.permute.xlu0 %6068 }
 0xa28   : > { %v6263_v1 = vadd.f32 %v6083_v59, %v5785_v51  ;;  %v6256_v34 = vadd.f32 %v6069_v45, %v5758_v42  ;;  %v12023_v33 = vpop.f32.mrf.mxu1  ;;  %v5833_v42 = vadd.f32 %v11752_v17, %v11898_v8  ;;  %v5830_v17 = vadd.f32 %v11725_v27, %v11898_v8 }
 0xa29   : > { %v5822_v27 = vadd.f32 %v11898_v8, %v11739_v21 }
 0xa2a   : > { %6327 = vst.msk [vmem:[%s11918_s17 + $0x58] sm:$0xff] %vm1238_vm2, %v6263_v1  ;;  %6320 = vst.msk [vmem:[%s11918_s17 + $0x20] sm:$0xff] %vm1238_vm2, %v6256_v34  ;;  %v12035_v1 = vpop.f32.mrf.mxu1 }
 0xa2b   : > { %v6079_v30 = vpop.permute.xlu1 %6078  ;;  %v6081_v37 = vpop.permute.xlu0 %6080 }
 0xa2c   : > { %v6261_v49 = vadd.f32 %v6079_v30, %v5777_v2  ;;  %v6262_v44 = vadd.f32 %v6081_v37, %v5782_v12  ;;  %v12043_v2 = vpop.f32.mrf.mxu1  ;;  %v5825_v30 = vadd.f32 %v11898_v8, %v11765_v4 }
 0xa2e   : > { %6325 = vst.msk [vmem:[%s11918_s17 + $0x48] sm:$0xff] %vm1238_vm2, %v6261_v49  ;;  %6326 = vst.msk [vmem:[%s11918_s17 + $0x50] sm:$0xff] %vm1238_vm2, %v6262_v44 }
 0xa2f   : > { %v6091_v36 = vpop.permute.xlu1 %6090  ;;  %v6077_v10 = vpop.permute.xlu0 %6076 }
 0xa30   : > { %v6267_v16 = vadd.f32 %v6091_v36, %v5801_v35  ;;  %v6260_v11 = vadd.f32 %v6077_v10, %v5774_v40  ;;  %v5849_v35 = vadd.f32 %v11798_v31, %v11898_v8  ;;  %v12055_v40 = vpop.f32.mrf.mxu1  ;;  %v5846_v31 = vadd.f32 %v11778_v0, %v11898_v8 }
 0xa31   : > { %v5838_v0 = vadd.f32 %v11898_v8, %v11788_v3 }
 0xa32   : > { %6331 = vst.msk [vmem:[%s11918_s17 + $0x78] sm:$0xff] %vm1238_vm2, %v6267_v16  ;;  %6324 = vst.msk [vmem:[%s11918_s17 + $0x40] sm:$0xff] %vm1238_vm2, %v6260_v11  ;;  %v12063_v11 = vpop.f32.mrf.mxu1 }
 0xa33   : > { %v6087_v55 = vpop.permute.xlu1 %6086  ;;  %v6089_v15 = vpop.permute.xlu0 %6088 }
 0xa34   : > { %v6265_v48 = vadd.f32 %v6087_v55, %v5793_v41  ;;  %v6266_v22 = vadd.f32 %v6089_v15, %v5798_v56  ;;  %v5841_v56 = vadd.f32 %v11898_v8, %v11808_v24  ;;  %v5865_v55 = vadd.f32 %v11841_v54, %v11898_v8 }
 0xa35   : > { %v5862_v54 = vadd.f32 %v11816_v20, %v11898_v8  ;;  %v5854_v20 = vadd.f32 %v11898_v8, %v11829_v29 }
 0xa36   : > { %6329 = vst.msk [vmem:[%s11918_s17 + $0x68] sm:$0xff] %vm1238_vm2, %v6265_v48  ;;  %6330 = vst.msk [vmem:[%s11918_s17 + $0x70] sm:$0xff] %vm1238_vm2, %v6266_v22  ;;  %v12075_v48 = vpop.f32.mrf.mxu1 }
 0xa37   : > { %v6099_v18 = vpop.permute.xlu1 %6098  ;;  %v6085_v52 = vpop.permute.xlu0 %6084 }
 0xa38   : > { %v6271_v5 = vadd.f32 %v6099_v18, %v5817_v19  ;;  %v6264_v51 = vadd.f32 %v6085_v52, %v5790_v47  ;;  %v12083_v52 = vpop.f32.mrf.mxu1 }
 0xa3a   : > { %6335 = vst.msk [vmem:[%s11918_s17 + $0x98] sm:$0xff] %vm1238_vm2, %v6271_v5  ;;  %6328 = vst.msk [vmem:[%s11918_s17 + $0x60] sm:$0xff] %vm1238_vm2, %v6264_v51  ;;  %v5857_v5 = vadd.f32 %v11898_v8, %v11851_v58 }
 0xa3b   : > { %v6095_v25 = vpop.permute.xlu1 %6094  ;;  %v6097_v38 = vpop.permute.xlu0 %6096 }
 0xa3c   : > { %v6269_v59 = vadd.f32 %v6095_v25, %v5809_v6  ;;  %v6270_v45 = vadd.f32 %v6097_v38, %v5814_v26  ;;  %v5881_v26 = vadd.f32 %v11881_v13, %v11898_v8  ;;  %v12095_v38 = vpop.f32.mrf.mxu1  ;;  %v5878_v13 = vadd.f32 %v11859_v14, %v11898_v8 }
 0xa3d   : > { %v5870_v14 = vadd.f32 %v11898_v8, %v11871_v46 }
 0xa3e   : > { %6333 = vst.msk [vmem:[%s11918_s17 + $0x88] sm:$0xff] %vm1238_vm2, %v6269_v59  ;;  %6334 = vst.msk [vmem:[%s11918_s17 + $0x90] sm:$0xff] %vm1238_vm2, %v6270_v45 }
 0xa3f   : > { %v6107_v39 = vpop.permute.xlu1 %6106  ;;  %v6093_v34 = vpop.permute.xlu0 %6092 }
 0xa40   : > { %v6275_v9 = vadd.f32 %v6107_v39, %v5833_v42  ;;  %v6268_v12 = vadd.f32 %v6093_v34, %v5806_v28  ;;  %v12103_v28 = vpop.f32.mrf.mxu1  ;;  %v5873_v39 = vadd.f32 %v11898_v8, %v11891_v57 }
 0xa42   : > { %6339 = vst.msk [vmem:[%s11918_s17 + $0xb8] sm:$0xff] %vm1238_vm2, %v6275_v9  ;;  %6332 = vst.msk [vmem:[%s11918_s17 + $0x80] sm:$0xff] %vm1238_vm2, %v6268_v12  ;;  %v5897_v9 = vadd.f32 %v11944_v43, %v11898_v8  ;;  %v5894_v43 = vadd.f32 %v11909_v63, %v11898_v8  ;;  %v5886_v63 = vadd.f32 %v11898_v8, %v11924_v53 }
 0xa43   : > { %v6103_v60 = vpop.permute.xlu1 %6102  ;;  %v6105_v37 = vpop.permute.xlu0 %6104 }
 0xa44   : > { %v6273_v49 = vadd.f32 %v6103_v60, %v5825_v30  ;;  %v6274_v44 = vadd.f32 %v6105_v37, %v5830_v17  ;;  %v12115_v30 = vpop.f32.mrf.mxu1 }
 0xa46   : > { %6337 = vst.msk [vmem:[%s11918_s17 + $0xa8] sm:$0xff] %vm1238_vm2, %v6273_v49  ;;  %6338 = vst.msk [vmem:[%s11918_s17 + $0xb0] sm:$0xff] %vm1238_vm2, %v6274_v44  ;;  %v12123_v49 = vpop.f32.mrf.mxu1  ;;  %v5889_v44 = vadd.f32 %v11898_v8, %v11958_v23 }
 0xa47   : > { %v6115_v4 = vpop.permute.xlu1 %6114  ;;  %v6101_v36 = vpop.permute.xlu0 %6100 }
 0xa48   : > { %v6279_v10 = vadd.f32 %v6115_v4, %v5849_v35  ;;  %v6272_v16 = vadd.f32 %v6101_v36, %v5822_v27  ;;  %v5913_v4 = vadd.f32 %v11995_v50, %v11898_v8 }
 0xa4a   : > { %6343 = vst.msk [vmem:[%s11918_s17 + $0xd8] sm:$0xff] %vm1238_vm2, %v6279_v10  ;;  %6336 = vst.msk [vmem:[%s11918_s17 + $0xa0] sm:$0xff] %vm1238_vm2, %v6272_v16  ;;  %v7117_v16 = vpop.f32.mrf.mxu1 }
 0xa4b   : > { %v6111_v21 = vpop.permute.xlu1 %6110  ;;  %v6113_v41 = vpop.permute.xlu0 %6112 }
 0xa4c   : > { %v6277_v15 = vadd.f32 %v6111_v21, %v5841_v56  ;;  %v6278_v19 = vadd.f32 %v6113_v41, %v5846_v31  ;;  %v5965_v41 = vpop.f32.mrf.mxu1 }
 0xa4e   : > { %6341 = vst.msk [vmem:[%s11918_s17 + $0xc8] sm:$0xff] %vm1238_vm2, %v6277_v15  ;;  %6342 = vst.msk [vmem:[%s11918_s17 + $0xd0] sm:$0xff] %vm1238_vm2, %v6278_v19  ;;  %v7118_v15 = vpop.f32.mrf.mxu1  ;;  %v5905_v19 = vadd.f32 %v11898_v8, %v12003_v7 }
 0xa4f   : > { %v6123_v24 = vpop.permute.xlu1 %6122  ;;  %v6109_v22 = vpop.permute.xlu0 %6108 }
 0xa50   : > { %v6283_v47 = vadd.f32 %v6123_v24, %v5865_v55  ;;  %v6276_v18 = vadd.f32 %v6109_v22, %v5838_v0  ;;  %v5910_v55 = vadd.f32 %v11974_v62, %v11898_v8  ;;  %v5902_v0 = vadd.f32 %v11898_v8, %v11983_v32  ;;  %v5968_v22 = vpop.f32.mrf.mxu1 }
 0xa52   : > { %6347 = vst.msk [vmem:[%s11918_s17 + $0xf8] sm:$0xff] %vm1238_vm2, %v6283_v47  ;;  %6340 = vst.msk [vmem:[%s11918_s17 + $0xc0] sm:$0xff] %vm1238_vm2, %v6276_v18  ;;  %v5977_v18 = vadd.f32 %v7118_v15, %v11898_v8 }
 0xa53   : > { %v6119_v3 = vpop.permute.xlu1 %6118  ;;  %v6121_v51 = vpop.permute.xlu0 %6120 }
 0xa54   : > { %v6281_v6 = vadd.f32 %v6119_v3, %v5857_v5  ;;  %v6282_v25 = vadd.f32 %v6121_v51, %v5862_v54  ;;  %v5974_v54 = vadd.f32 %v7117_v16, %v11898_v8  ;;  %v12155_v3 = vpop.f32.mrf.mxu1 }
 0xa56   : > { %6345 = vst.msk [vmem:[%s11918_s17 + $0xe8] sm:$0xff] %vm1238_vm2, %v6281_v6  ;;  %6346 = vst.msk [vmem:[%s11918_s17 + $0xf0] sm:$0xff] %vm1238_vm2, %v6282_v25  ;;  %v5966_v6 = vadd.f32 %v11898_v8, %v5965_v41 }
 0xa57   : > { %v6131_v58 = vpop.permute.xlu1 %6130  ;;  %v6117_v42 = vpop.permute.xlu0 %6116 }
 0xa58   : > { %v6287_v59 = vadd.f32 %v6131_v58, %v5881_v26  ;;  %v6280_v45 = vadd.f32 %v6117_v42, %v5854_v20  ;;  %v5969_v26 = vadd.f32 %v11898_v8, %v5968_v22  ;;  %v5981_v20 = vpop.f32.mrf.mxu1 }
 0xa5a   : > { %6351 = vst.msk [vmem:[%s11918_s17 + $0x118] sm:$0xff] %vm1238_vm2, %v6287_v59  ;;  %6344 = vst.msk [vmem:[%s11918_s17 + $0xe0] sm:$0xff] %vm1238_vm2, %v6280_v45 }
 0xa5b   : > { %v6127_v29 = vpop.permute.xlu1 %6126  ;;  %v6129_v34 = vpop.permute.xlu0 %6128 }
 0xa5c   : > { %v6285_v12 = vadd.f32 %v6127_v29, %v5873_v39  ;;  %v6286_v17 = vadd.f32 %v6129_v34, %v5878_v13  ;;  %v7122_v13 = vpop.f32.mrf.mxu1  ;;  %v5929_v39 = vadd.f32 %v12035_v1, %v11898_v8  ;;  %v5926_v29 = vadd.f32 %v12015_v61, %v11898_v8 }
 0xa5d   : > { %v5918_v1 = vadd.f32 %v11898_v8, %v12023_v33 }
 0xa5e   : > { %6349 = vst.msk [vmem:[%s11918_s17 + $0x108] sm:$0xff] %vm1238_vm2, %v6285_v12  ;;  %6350 = vst.msk [vmem:[%s11918_s17 + $0x110] sm:$0xff] %vm1238_vm2, %v6286_v17 }
 0xa5f   : > { %v6139_v57 = vpop.permute.xlu1 %6138  ;;  %v6125_v60 = vpop.permute.xlu0 %6124 }
 0xa60   : > { %v6291_v37 = vadd.f32 %v6139_v57, %v5897_v9  ;;  %v6284_v35 = vadd.f32 %v6125_v60, %v5870_v14  ;;  %v5984_v14 = vpop.f32.mrf.mxu1  ;;  %v5921_v57 = vadd.f32 %v11898_v8, %v12043_v2 }
 0xa62   : > { %6355 = vst.msk [vmem:[%s11918_s17 + $0x138] sm:$0xff] %vm1238_vm2, %v6291_v37  ;;  %6348 = vst.msk [vmem:[%s11918_s17 + $0x100] sm:$0xff] %vm1238_vm2, %v6284_v35  ;;  %v5985_v35 = vadd.f32 %v11898_v8, %v5984_v14 }
 0xa63   : > { %v6135_v46 = vpop.permute.xlu1 %6134  ;;  %v6137_v27 = vpop.permute.xlu0 %6136 }
 0xa64   : > { %v6289_v36 = vadd.f32 %v6135_v46, %v5889_v44  ;;  %v6290_v10 = vadd.f32 %v6137_v27, %v5894_v43  ;;  %v5982_v43 = vadd.f32 %v11898_v8, %v5981_v20 }
 0xa66   : > { %6353 = vst.msk [vmem:[%s11918_s17 + $0x128] sm:$0xff] %vm1238_vm2, %v6289_v36  ;;  %6354 = vst.msk [vmem:[%s11918_s17 + $0x130] sm:$0xff] %vm1238_vm2, %v6290_v10  ;;  %v5942_v36 = vadd.f32 %v12055_v40, %v11898_v8 }
 0xa67   : > { %v6147_v23 = vpop.permute.xlu1 %6146  ;;  %v6133_v31 = vpop.permute.xlu0 %6132 }
 0xa68   : > { %v6295_v56 = vadd.f32 %v6147_v23, %v5913_v4  ;;  %v6288_v21 = vadd.f32 %v6133_v31, %v5886_v63  ;;  %v5945_v4 = vadd.f32 %v12075_v48, %v11898_v8  ;;  %v5937_v31 = vadd.f32 %v11898_v8, %v12083_v52 }
 0xa69   : > { %v5934_v48 = vadd.f32 %v11898_v8, %v12063_v11  ;;  %v5958_v52 = vadd.f32 %v12095_v38, %v11898_v8 }
 0xa6a   : > { %6359 = vst.msk [vmem:[%s11918_s17 + $0x158] sm:$0xff] %vm1238_vm2, %v6295_v56  ;;  %6352 = vst.msk [vmem:[%s11918_s17 + $0x120] sm:$0xff] %vm1238_vm2, %v6288_v21 }
 0xa6b   : > { %v6145_v53 = vpop.permute.xlu0 %6144 }
 0xa6c   : > { %v6294_v50 = vadd.f32 %v6145_v53, %v5910_v55  ;;  %v5961_v55 = vadd.f32 %v12115_v30, %v11898_v8  ;;  %v5950_v30 = vadd.f32 %v11898_v8, %v12103_v28 }
 0xa6e   : > { %6358 = vst.msk [vmem:[%s11918_s17 + $0x150] sm:$0xff] %vm1238_vm2, %v6294_v50  ;;  %v6143_v24 = vpop.permute.xlu1 %6142 }
 0xa6f   : > { %v6293_v62 = vadd.f32 %v6143_v24, %v5905_v19  ;;  %v6141_v47 = vpop.permute.xlu0 %6140  ;;  %v5953_v19 = vadd.f32 %v11898_v8, %v12123_v49  ;;  %v5990_v49 = vadd.f32 %v12155_v3, %v11898_v8 }
 0xa70   : > { %v6292_v5 = vadd.f32 %v6141_v47, %v5902_v0 }
 0xa71   : > { %6357 = vst.msk [vmem:[%s11918_s17 + $0x148] sm:$0xff] %vm1238_vm2, %v6293_v62  ;;  %v5993_v62 = vadd.f32 %v7122_v13, %v11898_v8 }
 0xa72   : > { %6356 = vst.msk [vmem:[%s11918_s17 + $0x140] sm:$0xff] %vm1238_vm2, %v6292_v5  ;;  %v6179_v32 = vpop.permute.xlu1 %6178 }
 0xa73   : > { %v6311_v7 = vadd.f32 %v6179_v32, %v5977_v18  ;;  %v6177_v51 = vpop.permute.xlu0 %6176 }
 0xa74   : > { %v6310_v25 = vadd.f32 %v6177_v51, %v5974_v54 }
 0xa75   : > { %6375 = vst.msk [vmem:[%s11918_s17 + $0x1d8] sm:$0xff] %vm1238_vm2, %v6311_v7 }
 0xa76   : > { %6374 = vst.msk [vmem:[%s11918_s17 + $0x1d0] sm:$0xff] %vm1238_vm2, %v6310_v25  ;;  %v6175_v58 = vpop.permute.xlu1 %6174 }
 0xa77   : > { %v6309_v42 = vadd.f32 %v6175_v58, %v5969_v26  ;;  %v6173_v59 = vpop.permute.xlu0 %6172 }
 0xa78   : > { %v6308_v45 = vadd.f32 %v6173_v59, %v5966_v6 }
 0xa79   : > { %6373 = vst.msk [vmem:[%s11918_s17 + $0x1c8] sm:$0xff] %vm1238_vm2, %v6309_v42 }
 0xa7a   : > { %6372 = vst.msk [vmem:[%s11918_s17 + $0x1c0] sm:$0xff] %vm1238_vm2, %v6308_v45  ;;  %v6155_v34 = vpop.permute.xlu1 %6154 }
 0xa7b   : > { %v6299_v9 = vadd.f32 %v6155_v34, %v5929_v39  ;;  %v6153_v12 = vpop.permute.xlu0 %6152 }
 0xa7c   : > { %v6298_v17 = vadd.f32 %v6153_v12, %v5926_v29 }
 0xa7d   : > { %6363 = vst.msk [vmem:[%s11918_s17 + $0x178] sm:$0xff] %vm1238_vm2, %v6299_v9 }
 0xa7e   : > { %6362 = vst.msk [vmem:[%s11918_s17 + $0x170] sm:$0xff] %vm1238_vm2, %v6298_v17  ;;  %v6151_v61 = vpop.permute.xlu1 %6150 }
 0xa7f   : > { %v6297_v60 = vadd.f32 %v6151_v61, %v5921_v57  ;;  %v6149_v37 = vpop.permute.xlu0 %6148 }
 0xa80   : > { %v6296_v44 = vadd.f32 %v6149_v37, %v5918_v1 }
 0xa81   : > { %6361 = vst.msk [vmem:[%s11918_s17 + $0x168] sm:$0xff] %vm1238_vm2, %v6297_v60 }
 0xa82   : > { %6360 = vst.msk [vmem:[%s11918_s17 + $0x160] sm:$0xff] %vm1238_vm2, %v6296_v44  ;;  %v6183_v2 = vpop.permute.xlu1 %6182 }
 0xa83   : > { %v6313_v46 = vadd.f32 %v6183_v2, %v5985_v35  ;;  %v6181_v33 = vpop.permute.xlu0 %6180 }
 0xa84   : > { %v6312_v27 = vadd.f32 %v6181_v33, %v5982_v43 }
 0xa85   : > { %6377 = vst.msk [vmem:[%s11918_s17 + $0x1e8] sm:$0xff] %vm1238_vm2, %v6313_v46 }
 0xa86   : > { %6376 = vst.msk [vmem:[%s11918_s17 + $0x1e0] sm:$0xff] %vm1238_vm2, %v6312_v27  ;;  %v6163_v10 = vpop.permute.xlu1 %6162 }
 0xa87   : > { %v6303_v16 = vadd.f32 %v6163_v10, %v5945_v4  ;;  %v6161_v63 = vpop.permute.xlu0 %6160 }
 0xa88   : > { %v6302_v23 = vadd.f32 %v6161_v63, %v5942_v36 }
 0xa89   : > { %6367 = vst.msk [vmem:[%s11918_s17 + $0x198] sm:$0xff] %vm1238_vm2, %v6303_v16 }
 0xa8a   : > { %6366 = vst.msk [vmem:[%s11918_s17 + $0x190] sm:$0xff] %vm1238_vm2, %v6302_v23  ;;  %v6159_v40 = vpop.permute.xlu1 %6158 }
 0xa8b   : > { %v6301_v56 = vadd.f32 %v6159_v40, %v5937_v31  ;;  %v6157_v21 = vpop.permute.xlu0 %6156 }
 0xa8c   : > { %v6300_v41 = vadd.f32 %v6157_v21, %v5934_v48 }
 0xa8d   : > { %6365 = vst.msk [vmem:[%s11918_s17 + $0x188] sm:$0xff] %vm1238_vm2, %v6301_v56 }
 0xa8e   : > { %6364 = vst.msk [vmem:[%s11918_s17 + $0x180] sm:$0xff] %vm1238_vm2, %v6300_v41  ;;  %v6171_v11 = vpop.permute.xlu1 %6170 }
 0xa8f   : > { %v6307_v53 = vadd.f32 %v6171_v11, %v5961_v55  ;;  %v6169_v50 = vpop.permute.xlu0 %6168 }
 0xa90   : > { %v6306_v15 = vadd.f32 %v6169_v50, %v5958_v52 }
 0xa91   : > { %6371 = vst.msk [vmem:[%s11918_s17 + $0x1b8] sm:$0xff] %vm1238_vm2, %v6307_v53 }
 0xa92   : > { %6370 = vst.msk [vmem:[%s11918_s17 + $0x1b0] sm:$0xff] %vm1238_vm2, %v6306_v15  ;;  %v6167_v38 = vpop.permute.xlu1 %6166 }
 0xa93   : > { %v6305_v0 = vadd.f32 %v6167_v38, %v5953_v19  ;;  %v6165_v24 = vpop.permute.xlu0 %6164 }
 0xa94   : > { %v6304_v22 = vadd.f32 %v6165_v24, %v5950_v30 }
 0xa95   : > { %6369 = vst.msk [vmem:[%s11918_s17 + $0x1a8] sm:$0xff] %vm1238_vm2, %v6305_v0 }
 0xa96   : > { %6368 = vst.msk [vmem:[%s11918_s17 + $0x1a0] sm:$0xff] %vm1238_vm2, %v6304_v22  ;;  %v6187_v47 = vpop.permute.xlu1 %6186 }
 0xa97   : > { %v6315_v18 = vadd.f32 %v6187_v47, %v5993_v62  ;;  %v6185_v54 = vpop.permute.xlu0 %6184 }
 0xa98   : > { %v6314_v5 = vadd.f32 %v6185_v54, %v5990_v49 }
 0xa99   : > { %6379 = vst.msk [vmem:[%s11918_s17 + $0x1f8] sm:$0xff] %vm1238_vm2, %v6315_v18 }
 0xa9a   : > { %6378 = vst.msk [vmem:[%s11918_s17 + $0x1f0] sm:$0xff] %vm1238_vm2, %v6314_v5 }
 0xa9b PF: > { %s12934_s30 = sld [smem:[#allocation6_spill]]  ;;  %s12937_s27 = smov %s7601_s28 }
 0xa9c   : > { %s12935_s16 = sld [smem:[#allocation5_spill]] }
 0xa9d   : > { %s12936_s29 = sld [smem:[#allocation7_spill]] }
 0xaa1   : > { %p28_p9 = scmp.ge.s32.totalorder %s12934_s30, 4  }
 0xaa2   : > { %s12938_s28 = smov %s12935_s16 }
 0xaa3   :  { %30 = sbr.rel (!%p28_p9) target bundleno = 10 (0xa), region = 135 }
 0xaa8   :  { %6401 = vsyncpa [#allocation3], 1 }
 0xaa9   :  { %6403 = vsyncpa [#allocation3 + $0x1], 1 }

</bundles_post_ra>
